<compile_context>
chip_gen: v6e
topology: v6e:2x2x1
jax: 0.10.0
libtpu: 0.0.40
codegen_flags: <defaults>
</compile_context>

<pallas_src>
import jax
import jax.numpy as jnp
from jax.experimental import pallas as pl
from jax.experimental.pallas import tpu as pltpu


CP = 128          # lane-dense channel-slab width (one 128-lane vreg row)
_BN_EPS = 1e-3    # YOLOv8 BatchNorm eps


def _pick_tile(n, cap=512):
    """Largest multiple-of-8 tile <= cap that exactly divides n."""
    for t in (512, 256, 128, 64, 32, 16, 8):
        if t <= cap and n % t == 0:
            return t
    return None


# ---------------------------------------------------------------------------
# Kernel 1: K-tiled matmul + fused BN-bias + SiLU  (all 1x1 convs)
#   bf16 x bf16 on the MXU, f32 VMEM accumulator, lane-dense Cout (k*128).
# ---------------------------------------------------------------------------
def _mm_bias_silu_kernel(x_ref, w_ref, b_ref, o_ref, acc_ref):
    @pl.when(pl.program_id(1) == 0)
    def _init():
        acc_ref[...] = jnp.zeros_like(acc_ref)

    acc_ref[...] += jnp.dot(x_ref[...], w_ref[...],
                            preferred_element_type=jnp.float32)

    @pl.when(pl.program_id(1) == pl.num_programs(1) - 1)
    def _finalize():
        a = acc_ref[...] + b_ref[...]
        o_ref[...] = (a * jax.nn.sigmoid(a)).astype(o_ref.dtype)   # SiLU


def _matmul_bias_silu(x, w, b):
    """x: (M, K) bf16, w: (K, Cout) bf16, b: (1, Cout) f32 -> (M, Cout) bf16."""
    M0, K = x.shape
    Cout = w.shape[1]
    M = M0
    TM = _pick_tile(M)
    if TM is None:                 # ragged M: minimal (<8 rows) pad, not tile-size pad
        M = ((M0 + 7) // 8) * 8
        x = jnp.pad(x, ((0, M - M0), (0, 0)))
        TM = _pick_tile(M)
    TK = _pick_tile(K)
    assert TK is not None and K % 128 == 0 and Cout % 128 == 0

    out = pl.pallas_call(
        _mm_bias_silu_kernel,
        out_shape=jax.ShapeDtypeStruct((M, Cout), jnp.bfloat16),
        grid_spec=pltpu.PrefetchScalarGridSpec(
            num_scalar_prefetch=0,
            grid=(M // TM, K // TK),                     # reduction axis last
            in_specs=[
                pl.BlockSpec((TM, TK), lambda i, k: (i, k)),
                pl.BlockSpec((TK, Cout), lambda i, k: (k, 0)),
                pl.BlockSpec((1, Cout), lambda i, k: (0, 0)),
            ],
            out_specs=pl.BlockSpec((TM, Cout), lambda i, k: (i, 0)),
            scratch_shapes=[pltpu.VMEM((TM, Cout), jnp.float32)],
        ),
        compiler_params=pltpu.CompilerParams(
            dimension_semantics=("parallel", "arbitrary"),
            vmem_limit_bytes=32 * 1024 * 1024,
        ),
    )(x, w, b)
    return out[:M0] if M != M0 else out


# ---------------------------------------------------------------------------
# Kernel 2: 3x3 Conv-BN-SiLU (+ optional fused residual add) by in-kernel
# tap accumulation.  One grid step = one image; the input is read once and
# all 9 taps are accumulated in f32 inside the kernel (no host im2col).
# Stride-2 is handled by a host-side phase (space-to-depth) split so every
# in-kernel tap read is a plain contiguous row slice of a flattened grid.
# ---------------------------------------------------------------------------
def _make_tap_conv_kernel(taps, s, nw, rows, cout, with_res):
    def kernel(x_ref, w_ref, b_ref, *rest):
        if with_res:
            res_ref, o_ref = rest
        else:
            (o_ref,) = rest
        acc = jnp.zeros((rows, cout), jnp.float32)
        for t, (ki, kj) in enumerate(taps):
            ph = (ki % s) * s + (kj % s)          # stride-phase holding this tap
            shift = (ki // s) * nw + (kj // s)    # constant row shift in that phase
            xs = x_ref[ph, shift:shift + rows, :]  # (rows, Cin) bf16, contiguous
            acc = acc + jnp.dot(xs, w_ref[t], preferred_element_type=jnp.float32)
        acc = acc + b_ref[...]                     # fused BN bias
        y = acc * jax.nn.sigmoid(acc)              # SiLU
        if with_res:
            y = y + res_ref[0].astype(jnp.float32)  # fused bottleneck residual
        o_ref[0] = y.astype(o_ref.dtype)
    return kernel


def _conv3x3_bn_silu(x, w_taps, bias, stride, residual=None):
    """x: (N, H, W, Cin) bf16 slab; w_taps: (9, Cin, Cout) bf16; bias: (1, Cout) f32.
    Returns (N, HO, WO, Cout) bf16.  `residual` (optional): (N, HO, WO, Cout) bf16."""
    N, H, W, CIN = x.shape
    KH = KW = 3
    s = stride
    p = 1
    HO = (H + 2 * p - KH) // s + 1
    WO = (W + 2 * p - KW) // s + 1
    nh = (KH - 1) // s + HO            # per-phase height
    nw = (KW - 1) // s + WO            # per-phase width (output computed at this width)
    Hp, Wp = s * nh, s * nw
    # One spatial zero-pad of the *un-inflated* input (top/left = conv pad).
    xp = jnp.pad(x, ((0, 0), (p, Hp - H - p), (p, Wp - W - p), (0, 0)))
    # Phase / space-to-depth split: stride-s conv -> 9 constant-shift reads.
    phases = [xp[:, a::s, b::s, :] for a in range(s) for b in range(s)]
    xph = jnp.stack(phases, axis=1)                     # (N, s*s, nh, nw, Cin)
    slack = (KH - 1) // s                               # keeps tap reads in-bounds
    xflat = jnp.pad(xph.reshape(N * s * s, nh * nw, CIN),
                    ((0, 0), (0, slack), (0, 0)))
    F = nh * nw + slack
    R = HO * nw                                          # extended output rows
    COUT = w_taps.shape[-1]
    taps = [(ki, kj) for ki in range(KH) for kj in range(KW)]
    kernel = _make_tap_conv_kernel(taps, s, nw, R, COUT, residual is not None)

    in_specs = [
        pl.BlockSpec((s * s, F, CIN), lambda n: (n, 0, 0)),
        pl.BlockSpec((KH * KW, CIN, COUT), lambda n: (0, 0, 0)),
        pl.BlockSpec((1, COUT), lambda n: (0, 0)),
    ]
    args = [xflat, w_taps, bias]
    if residual is not None:
        res_ext = jnp.pad(residual, ((0, 0), (0, 0), (0, nw - WO), (0, 0)))
        args.append(res_ext.reshape(N, R, COUT))
        in_specs.append(pl.BlockSpec((1, R, COUT), lambda n: (n, 0, 0)))

    out = pl.pallas_call(
        kernel,
        out_shape=jax.ShapeDtypeStruct((N, R, COUT), jnp.bfloat16),
        grid_spec=pltpu.PrefetchScalarGridSpec(
            num_scalar_prefetch=0,
            grid=(N,),
            in_specs=in_specs,
            out_specs=pl.BlockSpec((1, R, COUT), lambda n: (n, 0, 0)),
        ),
        compiler_params=pltpu.CompilerParams(
            dimension_semantics=("parallel",),
            vmem_limit_bytes=32 * 1024 * 1024,
        ),
    )(*args)
    # Drop the (nw - WO) wrap columns of the extended output grid.
    return out.reshape(N, HO, nw, COUT)[:, :, :WO, :]


# ---------------------------------------------------------------------------
# Deterministic synthetic parameters (stand-ins for the checkpoint)
# ---------------------------------------------------------------------------
def _init_conv(key, cin, cout, k):
    kw, kg, kb, km, kv = jax.random.split(key, 5)
    fan_in = float(k * k * cin)
    return dict(
        w=jax.random.normal(kw, (k, k, cin, cout), jnp.float32) / jnp.sqrt(fan_in),
        gamma=1.0 + 0.1 * jax.random.normal(kg, (cout,), jnp.float32),
        beta=0.05 * jax.random.normal(kb, (cout,), jnp.float32),
        mean=0.05 * jax.random.normal(km, (cout,), jnp.float32),
        var=jnp.abs(1.0 + 0.1 * jax.random.normal(kv, (cout,), jnp.float32)),
    )


def _init_c2f(key, c1, c2, n=1):
    ch = c2 // 2
    keys = jax.random.split(key, 2 + 2 * n)
    bottlenecks = []
    for i in range(n):
        bottlenecks.append(dict(
            cv1=_init_conv(keys[2 + 2 * i], ch, ch, 3),
            cv2=_init_conv(keys[3 + 2 * i], ch, ch, 3),
        ))
    return dict(
        cv1=_init_conv(keys[0], c1, 2 * ch, 1),
        cv2=_init_conv(keys[1], (2 + n) * ch, c2, 1),
        bottlenecks=bottlenecks,
    )


# ---------------------------------------------------------------------------
# BN folding + lane-dense channel-slab packing (done once, eagerly)
# ---------------------------------------------------------------------------
def _fold_bn(p):
    scale = p["gamma"] / jnp.sqrt(p["var"] + _BN_EPS)
    w = p["w"] * scale[None, None, None, :]
    b = p["beta"] - p["mean"] * scale
    return w, b


def _prep_conv(p, in_map=None, out_map=None, cin_p=CP, cout_p=CP):
    """Fold BN into the conv, scatter channels into zero-padded lane-dense
    slabs and cast the weight to bf16 (bias stays f32)."""
    w, b = _fold_bn(p)
    KH, KW, Cin, Cout = p["w"].shape
    if in_map is None:
        in_map = jnp.arange(Cin)
    if out_map is None:
        out_map = jnp.arange(Cout)
    wt = jnp.zeros((KH * KW, cin_p, cout_p), jnp.float32)
    wt = wt.at[:, in_map[:, None], out_map[None, :]].set(w.reshape(KH * KW, Cin, Cout))
    bt = jnp.zeros((cout_p,), jnp.float32).at[out_map].set(b)
    return dict(w=wt.astype(jnp.bfloat16), b=bt.reshape(1, cout_p))


def _prep_c2f(raw, c_out):
    ch = c_out // 2
    n = len(raw["bottlenecks"])
    # cv1 writes two lane-dense slabs: y1 -> lanes [0, ch), y2 -> [CP, CP + ch).
    out_map_cv1 = jnp.concatenate([jnp.arange(ch), CP + jnp.arange(ch)])
    cv1 = _prep_conv(raw["cv1"], out_map=out_map_cv1, cout_p=2 * CP)
    bots = [dict(cv1=_prep_conv(b["cv1"]), cv2=_prep_conv(b["cv2"]))
            for b in raw["bottlenecks"]]
    # cv2 reads the lane-aligned slab concat [y1 | y2 | cur_1 | ...].
    in_map_cv2 = jnp.concatenate([c * CP + jnp.arange(ch) for c in range(2 + n)])
    cv2 = _prep_conv(raw["cv2"], in_map=in_map_cv2, cin_p=(2 + n) * CP)
    return dict(cv1=cv1, bots=bots, cv2=cv2)


def _c2f_forward(x, p):
    """YOLOv8 C2f block on lane-dense slabs (shortcut=True)."""
    N, H, W, _ = x.shape
    M = N * H * W
    y = _matmul_bias_silu(x.reshape(M, CP), p["cv1"]["w"][0], p["cv1"]["b"])  # (M, 2*CP)
    y2 = y.reshape(N, H, W, 2 * CP)[..., CP:]
    slabs = [y]
    cur = y2
    for b in p["bots"]:
        h = _conv3x3_bn_silu(cur, b["cv1"]["w"], b["cv1"]["b"], stride=1)
        # second 3x3 conv with the residual add fused into its epilogue
        cur = _conv3x3_bn_silu(h, b["cv2"]["w"], b["cv2"]["b"], stride=1,
                               residual=cur)
        slabs.append(cur.reshape(M, CP))
    cat = jnp.concatenate(slabs, axis=-1)              # lane-aligned 128-slabs
    out = _matmul_bias_silu(cat, p["cv2"]["w"][0], p["cv2"]["b"])
    return out.reshape(N, H, W, CP)


# ---------------------------------------------------------------------------
# Model
# ---------------------------------------------------------------------------
class FastSAMPallas:
    """Pallas stand-in for `fastsam` (mmdet3d backbone wrapping FastSAM)."""

    def __init__(self, key, is_optimize=False, width=(8, 16, 32)):
        self.is_optimize = is_optimize
        c1, c2, c3 = width
        self.out_channels = c3
        k = jax.random.split(key, 5)
        raw = dict(
            stem=_init_conv(k[0], 3, c1, 3),      # stride 2
            down1=_init_conv(k[1], c1, c2, 3),    # stride 2
            c2f1=_init_c2f(k[2], c2, c2, n=1),
            down2=_init_conv(k[3], c2, c3, 3),    # stride 2
            c2f2=_init_c2f(k[4], c3, c3, n=1),
        )
        # BN folding + slab packing hoisted out of the per-call path.
        self.params = dict(
            stem=_prep_conv(raw["stem"]),
            down1=_prep_conv(raw["down1"]),
            c2f1=_prep_c2f(raw["c2f1"], c2),
            down2=_prep_conv(raw["down2"]),
            c2f2=_prep_c2f(raw["c2f2"], c3),
        )

    def __call__(self, x_rgb_nchw):
        p = self.params
        x = jnp.transpose(x_rgb_nchw, (0, 2, 3, 1))                  # NCHW -> NHWC
        x = jnp.pad(x, ((0, 0), (0, 0), (0, 0), (0, CP - x.shape[-1])))
        x = x.astype(jnp.bfloat16)                                   # bf16 slab
        x = _conv3x3_bn_silu(x, p["stem"]["w"], p["stem"]["b"], stride=2)
        x = _conv3x3_bn_silu(x, p["down1"]["w"], p["down1"]["b"], stride=2)
        x = _c2f_forward(x, p["c2f1"])
        x = _conv3x3_bn_silu(x, p["down2"]["w"], p["down2"]["b"], stride=2)
        x = _c2f_forward(x, p["c2f2"])
        x = x[..., :self.out_channels].astype(jnp.float32)
        x = jnp.transpose(x, (0, 3, 1, 2))                           # NHWC -> NCHW
        if not self.is_optimize:
            x = jax.lax.stop_gradient(x)                             # mimics x_rgb.detach_()
        return x


if __name__ == "__main__":
    key = jax.random.PRNGKey(0)
    k_in, k_model = jax.random.split(key)
    x = jax.random.normal(k_in, (2, 3, 16, 16), jnp.float32)  # small NCHW input

    model = FastSAMPallas(k_model, is_optimize=False)
    out = jax.jit(model.__call__)(x)
    out = jax.block_until_ready(out)

    assert out.shape == (2, 32, 2, 2), out.shape
    assert out.dtype == jnp.float32
    assert bool(jnp.all(jnp.isfinite(out)))
    print("KERNEL_OK")
</pallas_src>

<mosaic_0001>
module attributes {stable_mosaic.version = 11 : i64} {
  func.func @kernel(%arg0: i32, %arg1: memref<4x82x128xbf16, #tpu.memory_space<vmem>>, %arg2: memref<9x128x128xbf16, #tpu.memory_space<vmem>>, %arg3: memref<1x128xf32, #tpu.memory_space<vmem>>, %arg4: memref<1x72x128xbf16, #tpu.memory_space<vmem>>) attributes {dimension_semantics = [#tpu.dimension_semantics<parallel>], iteration_bounds = array<i64: 2>, scalar_prefetch = 0 : i64, scratch_operands = 0 : i64, tpu.core_type = #tpu.core_type<tc>, window_params = [{transform_indices = @transform_0, window_bounds = array<i64: 4, 82, 128>}, {pipeline_mode = #tpu.pipeline_mode<synchronous>, transform_indices = @transform_1, window_bounds = array<i64: 9, 128, 128>}, {pipeline_mode = #tpu.pipeline_mode<synchronous>, transform_indices = @transform_2, window_bounds = array<i64: 1, 128>}, {transform_indices = @transform_3, window_bounds = array<i64: 1, 72, 128>}]} {
    %cst = arith.constant 0.000000e+00 : f32
    %0 = vector.broadcast %cst : f32 to vector<72x128xf32>
    %c0 = arith.constant 0 : index
    %c0_0 = arith.constant 0 : index
    %c0_1 = arith.constant 0 : index
    %1 = vector.load %arg1[%c0, %c0_0, %c0_1] : memref<4x82x128xbf16, #tpu.memory_space<vmem>>, vector<1x72x128xbf16>
    %2 = vector.shape_cast %1 : vector<1x72x128xbf16> to vector<72x128xbf16>
    %c0_2 = arith.constant 0 : index
    %c0_3 = arith.constant 0 : index
    %c0_4 = arith.constant 0 : index
    %3 = vector.load %arg2[%c0_2, %c0_3, %c0_4] : memref<9x128x128xbf16, #tpu.memory_space<vmem>>, vector<1x128x128xbf16>
    %4 = vector.shape_cast %3 : vector<1x128x128xbf16> to vector<128x128xbf16>
    %cst_5 = arith.constant dense<0.000000e+00> : vector<72x128xf32>
    %5 = tpu.matmul %2, %4, %cst_5 {dimension_numbers = #tpu.dot_dimension_numbers<[1], [0], [0], [1], [0, 0, 1, 1], [], []>} : vector<72x128xbf16>, vector<128x128xbf16>, vector<72x128xf32> -> vector<72x128xf32>
    %6 = arith.addf %0, %5 : vector<72x128xf32>
    %c1 = arith.constant 1 : index
    %c0_6 = arith.constant 0 : index
    %c0_7 = arith.constant 0 : index
    %7 = vector.load %arg1[%c1, %c0_6, %c0_7] : memref<4x82x128xbf16, #tpu.memory_space<vmem>>, vector<1x72x128xbf16>
    %8 = vector.shape_cast %7 : vector<1x72x128xbf16> to vector<72x128xbf16>
    %c1_8 = arith.constant 1 : index
    %c0_9 = arith.constant 0 : index
    %c0_10 = arith.constant 0 : index
    %9 = vector.load %arg2[%c1_8, %c0_9, %c0_10] : memref<9x128x128xbf16, #tpu.memory_space<vmem>>, vector<1x128x128xbf16>
    %10 = vector.shape_cast %9 : vector<1x128x128xbf16> to vector<128x128xbf16>
    %cst_11 = arith.constant dense<0.000000e+00> : vector<72x128xf32>
    %11 = tpu.matmul %8, %10, %cst_11 {dimension_numbers = #tpu.dot_dimension_numbers<[1], [0], [0], [1], [0, 0, 1, 1], [], []>} : vector<72x128xbf16>, vector<128x128xbf16>, vector<72x128xf32> -> vector<72x128xf32>
    %12 = arith.addf %6, %11 : vector<72x128xf32>
    %c0_12 = arith.constant 0 : index
    %c1_13 = arith.constant 1 : index
    %c0_14 = arith.constant 0 : index
    %13 = vector.load %arg1[%c0_12, %c1_13, %c0_14] : memref<4x82x128xbf16, #tpu.memory_space<vmem>>, vector<1x72x128xbf16>
    %14 = vector.shape_cast %13 : vector<1x72x128xbf16> to vector<72x128xbf16>
    %c2 = arith.constant 2 : index
    %c0_15 = arith.constant 0 : index
    %c0_16 = arith.constant 0 : index
    %15 = vector.load %arg2[%c2, %c0_15, %c0_16] : memref<9x128x128xbf16, #tpu.memory_space<vmem>>, vector<1x128x128xbf16>
    %16 = vector.shape_cast %15 : vector<1x128x128xbf16> to vector<128x128xbf16>
    %cst_17 = arith.constant dense<0.000000e+00> : vector<72x128xf32>
    %17 = tpu.matmul %14, %16, %cst_17 {dimension_numbers = #tpu.dot_dimension_numbers<[1], [0], [0], [1], [0, 0, 1, 1], [], []>} : vector<72x128xbf16>, vector<128x128xbf16>, vector<72x128xf32> -> vector<72x128xf32>
    %18 = arith.addf %12, %17 : vector<72x128xf32>
    %c2_18 = arith.constant 2 : index
    %c0_19 = arith.constant 0 : index
    %c0_20 = arith.constant 0 : index
    %19 = vector.load %arg1[%c2_18, %c0_19, %c0_20] : memref<4x82x128xbf16, #tpu.memory_space<vmem>>, vector<1x72x128xbf16>
    %20 = vector.shape_cast %19 : vector<1x72x128xbf16> to vector<72x128xbf16>
    %c3 = arith.constant 3 : index
    %c0_21 = arith.constant 0 : index
    %c0_22 = arith.constant 0 : index
    %21 = vector.load %arg2[%c3, %c0_21, %c0_22] : memref<9x128x128xbf16, #tpu.memory_space<vmem>>, vector<1x128x128xbf16>
    %22 = vector.shape_cast %21 : vector<1x128x128xbf16> to vector<128x128xbf16>
    %cst_23 = arith.constant dense<0.000000e+00> : vector<72x128xf32>
    %23 = tpu.matmul %20, %22, %cst_23 {dimension_numbers = #tpu.dot_dimension_numbers<[1], [0], [0], [1], [0, 0, 1, 1], [], []>} : vector<72x128xbf16>, vector<128x128xbf16>, vector<72x128xf32> -> vector<72x128xf32>
    %24 = arith.addf %18, %23 : vector<72x128xf32>
    %c3_24 = arith.constant 3 : index
    %c0_25 = arith.constant 0 : index
    %c0_26 = arith.constant 0 : index
    %25 = vector.load %arg1[%c3_24, %c0_25, %c0_26] : memref<4x82x128xbf16, #tpu.memory_space<vmem>>, vector<1x72x128xbf16>
    %26 = vector.shape_cast %25 : vector<1x72x128xbf16> to vector<72x128xbf16>
    %c4 = arith.constant 4 : index
    %c0_27 = arith.constant 0 : index
    %c0_28 = arith.constant 0 : index
    %27 = vector.load %arg2[%c4, %c0_27, %c0_28] : memref<9x128x128xbf16, #tpu.memory_space<vmem>>, vector<1x128x128xbf16>
    %28 = vector.shape_cast %27 : vector<1x128x128xbf16> to vector<128x128xbf16>
    %cst_29 = arith.constant dense<0.000000e+00> : vector<72x128xf32>
    %29 = tpu.matmul %26, %28, %cst_29 {dimension_numbers = #tpu.dot_dimension_numbers<[1], [0], [0], [1], [0, 0, 1, 1], [], []>} : vector<72x128xbf16>, vector<128x128xbf16>, vector<72x128xf32> -> vector<72x128xf32>
    %30 = arith.addf %24, %29 : vector<72x128xf32>
    %c2_30 = arith.constant 2 : index
    %c1_31 = arith.constant 1 : index
    %c0_32 = arith.constant 0 : index
    %31 = vector.load %arg1[%c2_30, %c1_31, %c0_32] : memref<4x82x128xbf16, #tpu.memory_space<vmem>>, vector<1x72x128xbf16>
    %32 = vector.shape_cast %31 : vector<1x72x128xbf16> to vector<72x128xbf16>
    %c5 = arith.constant 5 : index
    %c0_33 = arith.constant 0 : index
    %c0_34 = arith.constant 0 : index
    %33 = vector.load %arg2[%c5, %c0_33, %c0_34] : memref<9x128x128xbf16, #tpu.memory_space<vmem>>, vector<1x128x128xbf16>
    %34 = vector.shape_cast %33 : vector<1x128x128xbf16> to vector<128x128xbf16>
    %cst_35 = arith.constant dense<0.000000e+00> : vector<72x128xf32>
    %35 = tpu.matmul %32, %34, %cst_35 {dimension_numbers = #tpu.dot_dimension_numbers<[1], [0], [0], [1], [0, 0, 1, 1], [], []>} : vector<72x128xbf16>, vector<128x128xbf16>, vector<72x128xf32> -> vector<72x128xf32>
    %36 = arith.addf %30, %35 : vector<72x128xf32>
    %c0_36 = arith.constant 0 : index
    %c9 = arith.constant 9 : index
    %c0_37 = arith.constant 0 : index
    %37 = vector.load %arg1[%c0_36, %c9, %c0_37] : memref<4x82x128xbf16, #tpu.memory_space<vmem>>, vector<1x72x128xbf16>
    %38 = vector.shape_cast %37 : vector<1x72x128xbf16> to vector<72x128xbf16>
    %c6 = arith.constant 6 : index
    %c0_38 = arith.constant 0 : index
    %c0_39 = arith.constant 0 : index
    %39 = vector.load %arg2[%c6, %c0_38, %c0_39] : memref<9x128x128xbf16, #tpu.memory_space<vmem>>, vector<1x128x128xbf16>
    %40 = vector.shape_cast %39 : vector<1x128x128xbf16> to vector<128x128xbf16>
    %cst_40 = arith.constant dense<0.000000e+00> : vector<72x128xf32>
    %41 = tpu.matmul %38, %40, %cst_40 {dimension_numbers = #tpu.dot_dimension_numbers<[1], [0], [0], [1], [0, 0, 1, 1], [], []>} : vector<72x128xbf16>, vector<128x128xbf16>, vector<72x128xf32> -> vector<72x128xf32>
    %42 = arith.addf %36, %41 : vector<72x128xf32>
    %c1_41 = arith.constant 1 : index
    %c9_42 = arith.constant 9 : index
    %c0_43 = arith.constant 0 : index
    %43 = vector.load %arg1[%c1_41, %c9_42, %c0_43] : memref<4x82x128xbf16, #tpu.memory_space<vmem>>, vector<1x72x128xbf16>
    %44 = vector.shape_cast %43 : vector<1x72x128xbf16> to vector<72x128xbf16>
    %c7 = arith.constant 7 : index
    %c0_44 = arith.constant 0 : index
    %c0_45 = arith.constant 0 : index
    %45 = vector.load %arg2[%c7, %c0_44, %c0_45] : memref<9x128x128xbf16, #tpu.memory_space<vmem>>, vector<1x128x128xbf16>
    %46 = vector.shape_cast %45 : vector<1x128x128xbf16> to vector<128x128xbf16>
    %cst_46 = arith.constant dense<0.000000e+00> : vector<72x128xf32>
    %47 = tpu.matmul %44, %46, %cst_46 {dimension_numbers = #tpu.dot_dimension_numbers<[1], [0], [0], [1], [0, 0, 1, 1], [], []>} : vector<72x128xbf16>, vector<128x128xbf16>, vector<72x128xf32> -> vector<72x128xf32>
    %48 = arith.addf %42, %47 : vector<72x128xf32>
    %c0_47 = arith.constant 0 : index
    %c10 = arith.constant 10 : index
    %c0_48 = arith.constant 0 : index
    %49 = vector.load %arg1[%c0_47, %c10, %c0_48] : memref<4x82x128xbf16, #tpu.memory_space<vmem>>, vector<1x72x128xbf16>
    %50 = vector.shape_cast %49 : vector<1x72x128xbf16> to vector<72x128xbf16>
    %c8 = arith.constant 8 : index
    %c0_49 = arith.constant 0 : index
    %c0_50 = arith.constant 0 : index
    %51 = vector.load %arg2[%c8, %c0_49, %c0_50] : memref<9x128x128xbf16, #tpu.memory_space<vmem>>, vector<1x128x128xbf16>
    %52 = vector.shape_cast %51 : vector<1x128x128xbf16> to vector<128x128xbf16>
    %cst_51 = arith.constant dense<0.000000e+00> : vector<72x128xf32>
    %53 = tpu.matmul %50, %52, %cst_51 {dimension_numbers = #tpu.dot_dimension_numbers<[1], [0], [0], [1], [0, 0, 1, 1], [], []>} : vector<72x128xbf16>, vector<128x128xbf16>, vector<72x128xf32> -> vector<72x128xf32>
    %54 = arith.addf %48, %53 : vector<72x128xf32>
    %c0_52 = arith.constant 0 : index
    %c0_53 = arith.constant 0 : index
    %55 = vector.load %arg3[%c0_52, %c0_53] : memref<1x128xf32, #tpu.memory_space<vmem>>, vector<1x128xf32>
    %56 = vector.broadcast %55 : vector<1x128xf32> to vector<72x128xf32>
    %57 = arith.addf %54, %56 : vector<72x128xf32>
    %58 = arith.negf %57 : vector<72x128xf32>
    %59 = math.exp %58 : vector<72x128xf32>
    %cst_54 = arith.constant 1.000000e+00 : f32
    %60 = vector.broadcast %cst_54 : f32 to vector<72x128xf32>
    %61 = arith.addf %60, %59 : vector<72x128xf32>
    %62 = arith.divf %60, %61 : vector<72x128xf32>
    %63 = arith.mulf %57, %62 : vector<72x128xf32>
    %64 = arith.truncf %63 : vector<72x128xf32> to vector<72x128xbf16>
    %c0_55 = arith.constant 0 : index
    %c0_56 = arith.constant 0 : index
    %c0_57 = arith.constant 0 : index
    %65 = vector.load %arg4[%c0_55, %c0_56, %c0_57] : memref<1x72x128xbf16, #tpu.memory_space<vmem>>, vector<1x72x128xbf16>
    %66 = vector.shape_cast %65 : vector<1x72x128xbf16> to vector<72x128xbf16>
    %67 = vector.shape_cast %64 : vector<72x128xbf16> to vector<1x72x128xbf16>
    tpu.vector_store %arg4[%c0_55, %c0_56, %c0_57], %67 {strides = array<i32>} : memref<1x72x128xbf16, #tpu.memory_space<vmem>>, vector<1x72x128xbf16>,
    return
  }
  func.func @transform_0(%arg0: i32) -> (i32, i32, i32) {
    %c0_i32 = arith.constant 0 : i32
    %c0_i32_0 = arith.constant 0 : i32
    %c0_i32_1 = arith.constant 0 : i32
    return %arg0, %c0_i32, %c0_i32_0 : i32, i32, i32
  }
  func.func @transform_1(%arg0: i32) -> (i32, i32, i32) {
    %c0_i32 = arith.constant 0 : i32
    %c0_i32_0 = arith.constant 0 : i32
    %c0_i32_1 = arith.constant 0 : i32
    %c0_i32_2 = arith.constant 0 : i32
    return %c0_i32, %c0_i32_0, %c0_i32_1 : i32, i32, i32
  }
  func.func @transform_2(%arg0: i32) -> (i32, i32) {
    %c0_i32 = arith.constant 0 : i32
    %c0_i32_0 = arith.constant 0 : i32
    %c0_i32_1 = arith.constant 0 : i32
    return %c0_i32, %c0_i32_0 : i32, i32
  }
  func.func @transform_3(%arg0: i32) -> (i32, i32, i32) {
    %c0_i32 = arith.constant 0 : i32
    %c0_i32_0 = arith.constant 0 : i32
    %c0_i32_1 = arith.constant 0 : i32
    return %arg0, %c0_i32, %c0_i32_0 : i32, i32, i32
  }
}

module attributes {stable_mosaic.version = 11 : i64} {
  func.func @kernel(%arg0: i32, %arg1: memref<4x26x128xbf16, #tpu.memory_space<vmem>>, %arg2: memref<9x128x128xbf16, #tpu.memory_space<vmem>>, %arg3: memref<1x128xf32, #tpu.memory_space<vmem>>, %arg4: memref<1x20x128xbf16, #tpu.memory_space<vmem>>) attributes {dimension_semantics = [#tpu.dimension_semantics<parallel>], iteration_bounds = array<i64: 2>, scalar_prefetch = 0 : i64, scratch_operands = 0 : i64, tpu.core_type = #tpu.core_type<tc>, window_params = [{transform_indices = @transform_0, window_bounds = array<i64: 4, 26, 128>}, {pipeline_mode = #tpu.pipeline_mode<synchronous>, transform_indices = @transform_1, window_bounds = array<i64: 9, 128, 128>}, {pipeline_mode = #tpu.pipeline_mode<synchronous>, transform_indices = @transform_2, window_bounds = array<i64: 1, 128>}, {transform_indices = @transform_3, window_bounds = array<i64: 1, 20, 128>}]} {
    %cst = arith.constant 0.000000e+00 : f32
    %0 = vector.broadcast %cst : f32 to vector<20x128xf32>
    %c0 = arith.constant 0 : index
    %c0_0 = arith.constant 0 : index
    %c0_1 = arith.constant 0 : index
    %1 = vector.load %arg1[%c0, %c0_0, %c0_1] : memref<4x26x128xbf16, #tpu.memory_space<vmem>>, vector<1x20x128xbf16>
    %2 = vector.shape_cast %1 : vector<1x20x128xbf16> to vector<20x128xbf16>
    %c0_2 = arith.constant 0 : index
    %c0_3 = arith.constant 0 : index
    %c0_4 = arith.constant 0 : index
    %3 = vector.load %arg2[%c0_2, %c0_3, %c0_4] : memref<9x128x128xbf16, #tpu.memory_space<vmem>>, vector<1x128x128xbf16>
    %4 = vector.shape_cast %3 : vector<1x128x128xbf16> to vector<128x128xbf16>
    %cst_5 = arith.constant dense<0.000000e+00> : vector<20x128xf32>
    %5 = tpu.matmul %2, %4, %cst_5 {dimension_numbers = #tpu.dot_dimension_numbers<[1], [0], [0], [1], [0, 0, 1, 1], [], []>} : vector<20x128xbf16>, vector<128x128xbf16>, vector<20x128xf32> -> vector<20x128xf32>
    %6 = arith.addf %0, %5 : vector<20x128xf32>
    %c1 = arith.constant 1 : index
    %c0_6 = arith.constant 0 : index
    %c0_7 = arith.constant 0 : index
    %7 = vector.load %arg1[%c1, %c0_6, %c0_7] : memref<4x26x128xbf16, #tpu.memory_space<vmem>>, vector<1x20x128xbf16>
    %8 = vector.shape_cast %7 : vector<1x20x128xbf16> to vector<20x128xbf16>
    %c1_8 = arith.constant 1 : index
    %c0_9 = arith.constant 0 : index
    %c0_10 = arith.constant 0 : index
    %9 = vector.load %arg2[%c1_8, %c0_9, %c0_10] : memref<9x128x128xbf16, #tpu.memory_space<vmem>>, vector<1x128x128xbf16>
    %10 = vector.shape_cast %9 : vector<1x128x128xbf16> to vector<128x128xbf16>
    %cst_11 = arith.constant dense<0.000000e+00> : vector<20x128xf32>
    %11 = tpu.matmul %8, %10, %cst_11 {dimension_numbers = #tpu.dot_dimension_numbers<[1], [0], [0], [1], [0, 0, 1, 1], [], []>} : vector<20x128xbf16>, vector<128x128xbf16>, vector<20x128xf32> -> vector<20x128xf32>
    %12 = arith.addf %6, %11 : vector<20x128xf32>
    %c0_12 = arith.constant 0 : index
    %c1_13 = arith.constant 1 : index
    %c0_14 = arith.constant 0 : index
    %13 = vector.load %arg1[%c0_12, %c1_13, %c0_14] : memref<4x26x128xbf16, #tpu.memory_space<vmem>>, vector<1x20x128xbf16>
    %14 = vector.shape_cast %13 : vector<1x20x128xbf16> to vector<20x128xbf16>
    %c2 = arith.constant 2 : index
    %c0_15 = arith.constant 0 : index
    %c0_16 = arith.constant 0 : index
    %15 = vector.load %arg2[%c2, %c0_15, %c0_16] : memref<9x128x128xbf16, #tpu.memory_space<vmem>>, vector<1x128x128xbf16>
    %16 = vector.shape_cast %15 : vector<1x128x128xbf16> to vector<128x128xbf16>
    %cst_17 = arith.constant dense<0.000000e+00> : vector<20x128xf32>
    %17 = tpu.matmul %14, %16, %cst_17 {dimension_numbers = #tpu.dot_dimension_numbers<[1], [0], [0], [1], [0, 0, 1, 1], [], []>} : vector<20x128xbf16>, vector<128x128xbf16>, vector<20x128xf32> -> vector<20x128xf32>
    %18 = arith.addf %12, %17 : vector<20x128xf32>
    %c2_18 = arith.constant 2 : index
    %c0_19 = arith.constant 0 : index
    %c0_20 = arith.constant 0 : index
    %19 = vector.load %arg1[%c2_18, %c0_19, %c0_20] : memref<4x26x128xbf16, #tpu.memory_space<vmem>>, vector<1x20x128xbf16>
    %20 = vector.shape_cast %19 : vector<1x20x128xbf16> to vector<20x128xbf16>
    %c3 = arith.constant 3 : index
    %c0_21 = arith.constant 0 : index
    %c0_22 = arith.constant 0 : index
    %21 = vector.load %arg2[%c3, %c0_21, %c0_22] : memref<9x128x128xbf16, #tpu.memory_space<vmem>>, vector<1x128x128xbf16>
    %22 = vector.shape_cast %21 : vector<1x128x128xbf16> to vector<128x128xbf16>
    %cst_23 = arith.constant dense<0.000000e+00> : vector<20x128xf32>
    %23 = tpu.matmul %20, %22, %cst_23 {dimension_numbers = #tpu.dot_dimension_numbers<[1], [0], [0], [1], [0, 0, 1, 1], [], []>} : vector<20x128xbf16>, vector<128x128xbf16>, vector<20x128xf32> -> vector<20x128xf32>
    %24 = arith.addf %18, %23 : vector<20x128xf32>
    %c3_24 = arith.constant 3 : index
    %c0_25 = arith.constant 0 : index
    %c0_26 = arith.constant 0 : index
    %25 = vector.load %arg1[%c3_24, %c0_25, %c0_26] : memref<4x26x128xbf16, #tpu.memory_space<vmem>>, vector<1x20x128xbf16>
    %26 = vector.shape_cast %25 : vector<1x20x128xbf16> to vector<20x128xbf16>
    %c4 = arith.constant 4 : index
    %c0_27 = arith.constant 0 : index
    %c0_28 = arith.constant 0 : index
    %27 = vector.load %arg2[%c4, %c0_27, %c0_28] : memref<9x128x128xbf16, #tpu.memory_space<vmem>>, vector<1x128x128xbf16>
    %28 = vector.shape_cast %27 : vector<1x128x128xbf16> to vector<128x128xbf16>
    %cst_29 = arith.constant dense<0.000000e+00> : vector<20x128xf32>
    %29 = tpu.matmul %26, %28, %cst_29 {dimension_numbers = #tpu.dot_dimension_numbers<[1], [0], [0], [1], [0, 0, 1, 1], [], []>} : vector<20x128xbf16>, vector<128x128xbf16>, vector<20x128xf32> -> vector<20x128xf32>
    %30 = arith.addf %24, %29 : vector<20x128xf32>
    %c2_30 = arith.constant 2 : index
    %c1_31 = arith.constant 1 : index
    %c0_32 = arith.constant 0 : index
    %31 = vector.load %arg1[%c2_30, %c1_31, %c0_32] : memref<4x26x128xbf16, #tpu.memory_space<vmem>>, vector<1x20x128xbf16>
    %32 = vector.shape_cast %31 : vector<1x20x128xbf16> to vector<20x128xbf16>
    %c5 = arith.constant 5 : index
    %c0_33 = arith.constant 0 : index
    %c0_34 = arith.constant 0 : index
    %33 = vector.load %arg2[%c5, %c0_33, %c0_34] : memref<9x128x128xbf16, #tpu.memory_space<vmem>>, vector<1x128x128xbf16>
    %34 = vector.shape_cast %33 : vector<1x128x128xbf16> to vector<128x128xbf16>
    %cst_35 = arith.constant dense<0.000000e+00> : vector<20x128xf32>
    %35 = tpu.matmul %32, %34, %cst_35 {dimension_numbers = #tpu.dot_dimension_numbers<[1], [0], [0], [1], [0, 0, 1, 1], [], []>} : vector<20x128xbf16>, vector<128x128xbf16>, vector<20x128xf32> -> vector<20x128xf32>
    %36 = arith.addf %30, %35 : vector<20x128xf32>
    %c0_36 = arith.constant 0 : index
    %c5_37 = arith.constant 5 : index
    %c0_38 = arith.constant 0 : index
    %37 = vector.load %arg1[%c0_36, %c5_37, %c0_38] : memref<4x26x128xbf16, #tpu.memory_space<vmem>>, vector<1x20x128xbf16>
    %38 = vector.shape_cast %37 : vector<1x20x128xbf16> to vector<20x128xbf16>
    %c6 = arith.constant 6 : index
    %c0_39 = arith.constant 0 : index
    %c0_40 = arith.constant 0 : index
    %39 = vector.load %arg2[%c6, %c0_39, %c0_40] : memref<9x128x128xbf16, #tpu.memory_space<vmem>>, vector<1x128x128xbf16>
    %40 = vector.shape_cast %39 : vector<1x128x128xbf16> to vector<128x128xbf16>
    %cst_41 = arith.constant dense<0.000000e+00> : vector<20x128xf32>
    %41 = tpu.matmul %38, %40, %cst_41 {dimension_numbers = #tpu.dot_dimension_numbers<[1], [0], [0], [1], [0, 0, 1, 1], [], []>} : vector<20x128xbf16>, vector<128x128xbf16>, vector<20x128xf32> -> vector<20x128xf32>
    %42 = arith.addf %36, %41 : vector<20x128xf32>
    %c1_42 = arith.constant 1 : index
    %c5_43 = arith.constant 5 : index
    %c0_44 = arith.constant 0 : index
    %43 = vector.load %arg1[%c1_42, %c5_43, %c0_44] : memref<4x26x128xbf16, #tpu.memory_space<vmem>>, vector<1x20x128xbf16>
    %44 = vector.shape_cast %43 : vector<1x20x128xbf16> to vector<20x128xbf16>
    %c7 = arith.constant 7 : index
    %c0_45 = arith.constant 0 : index
    %c0_46 = arith.constant 0 : index
    %45 = vector.load %arg2[%c7, %c0_45, %c0_46] : memref<9x128x128xbf16, #tpu.memory_space<vmem>>, vector<1x128x128xbf16>
    %46 = vector.shape_cast %45 : vector<1x128x128xbf16> to vector<128x128xbf16>
    %cst_47 = arith.constant dense<0.000000e+00> : vector<20x128xf32>
    %47 = tpu.matmul %44, %46, %cst_47 {dimension_numbers = #tpu.dot_dimension_numbers<[1], [0], [0], [1], [0, 0, 1, 1], [], []>} : vector<20x128xbf16>, vector<128x128xbf16>, vector<20x128xf32> -> vector<20x128xf32>
    %48 = arith.addf %42, %47 : vector<20x128xf32>
    %c0_48 = arith.constant 0 : index
    %c6_49 = arith.constant 6 : index
    %c0_50 = arith.constant 0 : index
    %49 = vector.load %arg1[%c0_48, %c6_49, %c0_50] : memref<4x26x128xbf16, #tpu.memory_space<vmem>>, vector<1x20x128xbf16>
    %50 = vector.shape_cast %49 : vector<1x20x128xbf16> to vector<20x128xbf16>
    %c8 = arith.constant 8 : index
    %c0_51 = arith.constant 0 : index
    %c0_52 = arith.constant 0 : index
    %51 = vector.load %arg2[%c8, %c0_51, %c0_52] : memref<9x128x128xbf16, #tpu.memory_space<vmem>>, vector<1x128x128xbf16>
    %52 = vector.shape_cast %51 : vector<1x128x128xbf16> to vector<128x128xbf16>
    %cst_53 = arith.constant dense<0.000000e+00> : vector<20x128xf32>
    %53 = tpu.matmul %50, %52, %cst_53 {dimension_numbers = #tpu.dot_dimension_numbers<[1], [0], [0], [1], [0, 0, 1, 1], [], []>} : vector<20x128xbf16>, vector<128x128xbf16>, vector<20x128xf32> -> vector<20x128xf32>
    %54 = arith.addf %48, %53 : vector<20x128xf32>
    %c0_54 = arith.constant 0 : index
    %c0_55 = arith.constant 0 : index
    %55 = vector.load %arg3[%c0_54, %c0_55] : memref<1x128xf32, #tpu.memory_space<vmem>>, vector<1x128xf32>
    %56 = vector.broadcast %55 : vector<1x128xf32> to vector<20x128xf32>
    %57 = arith.addf %54, %56 : vector<20x128xf32>
    %58 = arith.negf %57 : vector<20x128xf32>
    %59 = math.exp %58 : vector<20x128xf32>
    %cst_56 = arith.constant 1.000000e+00 : f32
    %60 = vector.broadcast %cst_56 : f32 to vector<20x128xf32>
    %61 = arith.addf %60, %59 : vector<20x128xf32>
    %62 = arith.divf %60, %61 : vector<20x128xf32>
    %63 = arith.mulf %57, %62 : vector<20x128xf32>
    %64 = arith.truncf %63 : vector<20x128xf32> to vector<20x128xbf16>
    %c0_57 = arith.constant 0 : index
    %c0_58 = arith.constant 0 : index
    %c0_59 = arith.constant 0 : index
    %65 = vector.load %arg4[%c0_57, %c0_58, %c0_59] : memref<1x20x128xbf16, #tpu.memory_space<vmem>>, vector<1x20x128xbf16>
    %66 = vector.shape_cast %65 : vector<1x20x128xbf16> to vector<20x128xbf16>
    %67 = vector.shape_cast %64 : vector<20x128xbf16> to vector<1x20x128xbf16>
    tpu.vector_store %arg4[%c0_57, %c0_58, %c0_59], %67 {strides = array<i32>} : memref<1x20x128xbf16, #tpu.memory_space<vmem>>, vector<1x20x128xbf16>,
    return
  }
  func.func @transform_0(%arg0: i32) -> (i32, i32, i32) {
    %c0_i32 = arith.constant 0 : i32
    %c0_i32_0 = arith.constant 0 : i32
    %c0_i32_1 = arith.constant 0 : i32
    return %arg0, %c0_i32, %c0_i32_0 : i32, i32, i32
  }
  func.func @transform_1(%arg0: i32) -> (i32, i32, i32) {
    %c0_i32 = arith.constant 0 : i32
    %c0_i32_0 = arith.constant 0 : i32
    %c0_i32_1 = arith.constant 0 : i32
    %c0_i32_2 = arith.constant 0 : i32
    return %c0_i32, %c0_i32_0, %c0_i32_1 : i32, i32, i32
  }
  func.func @transform_2(%arg0: i32) -> (i32, i32) {
    %c0_i32 = arith.constant 0 : i32
    %c0_i32_0 = arith.constant 0 : i32
    %c0_i32_1 = arith.constant 0 : i32
    return %c0_i32, %c0_i32_0 : i32, i32
  }
  func.func @transform_3(%arg0: i32) -> (i32, i32, i32) {
    %c0_i32 = arith.constant 0 : i32
    %c0_i32_0 = arith.constant 0 : i32
    %c0_i32_1 = arith.constant 0 : i32
    return %arg0, %c0_i32, %c0_i32_0 : i32, i32, i32
  }
}

module attributes {stable_mosaic.version = 11 : i64} {
  func.func @_mm_bias_silu_kernel(%arg0: i32, %arg1: i32, %arg2: memref<32x128xbf16, #tpu.memory_space<vmem>>, %arg3: memref<128x256xbf16, #tpu.memory_space<vmem>>, %arg4: memref<1x256xf32, #tpu.memory_space<vmem>>, %arg5: memref<32x256xbf16, #tpu.memory_space<vmem>>, %arg6: memref<32x256xf32, #tpu.memory_space<vmem>>) attributes {dimension_semantics = [#tpu.dimension_semantics<parallel>, #tpu.dimension_semantics<arbitrary>], iteration_bounds = array<i64: 1, 1>, scalar_prefetch = 0 : i64, scratch_operands = 1 : i64, tpu.core_type = #tpu.core_type<tc>, window_params = [{transform_indices = @transform_0, window_bounds = array<i64: 32, 128>}, {transform_indices = @transform_1, window_bounds = array<i64: 128, 256>}, {pipeline_mode = #tpu.pipeline_mode<synchronous>, transform_indices = @transform_2, window_bounds = array<i64: 1, 256>}, {transform_indices = @transform_3, window_bounds = array<i64: 32, 256>}]} {
    %c0_i32 = arith.constant 0 : i32
    %0 = arith.cmpi eq, %arg1, %c0_i32 : i32
    %1 = arith.extui %0 : i1 to i32
    %c0_i32_0 = arith.constant 0 : i32
    %2 = arith.cmpi ne, %1, %c0_i32_0 : i32
    scf.if %2 {
      %cst_10 = arith.constant 0.000000e+00 : f32
      %12 = vector.broadcast %cst_10 : f32 to vector<32x256xf32>
      %c0_11 = arith.constant 0 : index
      %c0_12 = arith.constant 0 : index
      %13 = vector.load %arg6[%c0_11, %c0_12] : memref<32x256xf32, #tpu.memory_space<vmem>>, vector<32x256xf32>
      tpu.vector_store %arg6[%c0_11, %c0_12], %12 {strides = array<i32>} : memref<32x256xf32, #tpu.memory_space<vmem>>, vector<32x256xf32>,
    } else {
    }
    %c0 = arith.constant 0 : index
    %c0_1 = arith.constant 0 : index
    %3 = vector.load %arg6[%c0, %c0_1] : memref<32x256xf32, #tpu.memory_space<vmem>>, vector<32x256xf32>
    %c0_2 = arith.constant 0 : index
    %c0_3 = arith.constant 0 : index
    %4 = vector.load %arg2[%c0_2, %c0_3] : memref<32x128xbf16, #tpu.memory_space<vmem>>, vector<32x128xbf16>
    %c0_4 = arith.constant 0 : index
    %c0_5 = arith.constant 0 : index
    %5 = vector.load %arg3[%c0_4, %c0_5] : memref<128x256xbf16, #tpu.memory_space<vmem>>, vector<128x256xbf16>
    %cst = arith.constant dense<0.000000e+00> : vector<32x256xf32>
    %6 = tpu.matmul %4, %5, %cst {dimension_numbers = #tpu.dot_dimension_numbers<[1], [0], [0], [1], [0, 0, 1, 1], [], []>} : vector<32x128xbf16>, vector<128x256xbf16>, vector<32x256xf32> -> vector<32x256xf32>
    %7 = arith.addf %3, %6 : vector<32x256xf32>
    %c0_6 = arith.constant 0 : index
    %c0_7 = arith.constant 0 : index
    %8 = vector.load %arg6[%c0_6, %c0_7] : memref<32x256xf32, #tpu.memory_space<vmem>>, vector<32x256xf32>
    tpu.vector_store %arg6[%c0_6, %c0_7], %7 {strides = array<i32>} : memref<32x256xf32, #tpu.memory_space<vmem>>, vector<32x256xf32>,
    %c0_i32_8 = arith.constant 0 : i32
    %9 = arith.cmpi eq, %arg1, %c0_i32_8 : i32
    %10 = arith.extui %9 : i1 to i32
    %c0_i32_9 = arith.constant 0 : i32
    %11 = arith.cmpi ne, %10, %c0_i32_9 : i32
    scf.if %11 {
      %c0_10 = arith.constant 0 : index
      %c0_11 = arith.constant 0 : index
      %12 = vector.load %arg6[%c0_10, %c0_11] : memref<32x256xf32, #tpu.memory_space<vmem>>, vector<32x256xf32>
      %c0_12 = arith.constant 0 : index
      %c0_13 = arith.constant 0 : index
      %13 = vector.load %arg4[%c0_12, %c0_13] : memref<1x256xf32, #tpu.memory_space<vmem>>, vector<1x256xf32>
      %14 = vector.broadcast %13 : vector<1x256xf32> to vector<32x256xf32>
      %15 = arith.addf %12, %14 : vector<32x256xf32>
      %16 = arith.negf %15 : vector<32x256xf32>
      %17 = math.exp %16 : vector<32x256xf32>
      %cst_14 = arith.constant 1.000000e+00 : f32
      %18 = vector.broadcast %cst_14 : f32 to vector<32x256xf32>
      %19 = arith.addf %18, %17 : vector<32x256xf32>
      %20 = arith.divf %18, %19 : vector<32x256xf32>
      %21 = arith.mulf %15, %20 : vector<32x256xf32>
      %22 = arith.truncf %21 : vector<32x256xf32> to vector<32x256xbf16>
      %c0_15 = arith.constant 0 : index
      %c0_16 = arith.constant 0 : index
      %23 = vector.load %arg5[%c0_15, %c0_16] : memref<32x256xbf16, #tpu.memory_space<vmem>>, vector<32x256xbf16>
      tpu.vector_store %arg5[%c0_15, %c0_16], %22 {strides = array<i32>} : memref<32x256xbf16, #tpu.memory_space<vmem>>, vector<32x256xbf16>,
    } else {
    }
    return
  }
  func.func @transform_0(%arg0: i32, %arg1: i32) -> (i32, i32) {
    %c0_i32 = arith.constant 0 : i32
    return %arg0, %arg1 : i32, i32
  }
  func.func @transform_1(%arg0: i32, %arg1: i32) -> (i32, i32) {
    %c0_i32 = arith.constant 0 : i32
    %c0_i32_0 = arith.constant 0 : i32
    return %arg1, %c0_i32 : i32, i32
  }
  func.func @transform_2(%arg0: i32, %arg1: i32) -> (i32, i32) {
    %c0_i32 = arith.constant 0 : i32
    %c0_i32_0 = arith.constant 0 : i32
    %c0_i32_1 = arith.constant 0 : i32
    return %c0_i32, %c0_i32_0 : i32, i32
  }
  func.func @transform_3(%arg0: i32, %arg1: i32) -> (i32, i32) {
    %c0_i32 = arith.constant 0 : i32
    %c0_i32_0 = arith.constant 0 : i32
    return %arg0, %c0_i32 : i32, i32
  }
}

module attributes {stable_mosaic.version = 11 : i64} {
  func.func @_mm_bias_silu_kernel(%arg0: i32, %arg1: i32, %arg2: memref<32x128xbf16, #tpu.memory_space<vmem>>, %arg3: memref<128x128xbf16, #tpu.memory_space<vmem>>, %arg4: memref<1x128xf32, #tpu.memory_space<vmem>>, %arg5: memref<32x128xbf16, #tpu.memory_space<vmem>>, %arg6: memref<32x128xf32, #tpu.memory_space<vmem>>) attributes {dimension_semantics = [#tpu.dimension_semantics<parallel>, #tpu.dimension_semantics<arbitrary>], iteration_bounds = array<i64: 1, 3>, scalar_prefetch = 0 : i64, scratch_operands = 1 : i64, tpu.core_type = #tpu.core_type<tc>, window_params = [{transform_indices = @transform_0, window_bounds = array<i64: 32, 128>}, {transform_indices = @transform_1, window_bounds = array<i64: 128, 128>}, {pipeline_mode = #tpu.pipeline_mode<synchronous>, transform_indices = @transform_2, window_bounds = array<i64: 1, 128>}, {transform_indices = @transform_3, window_bounds = array<i64: 32, 128>}]} {
    %c0_i32 = arith.constant 0 : i32
    %0 = arith.cmpi eq, %arg1, %c0_i32 : i32
    %1 = arith.extui %0 : i1 to i32
    %c0_i32_0 = arith.constant 0 : i32
    %2 = arith.cmpi ne, %1, %c0_i32_0 : i32
    scf.if %2 {
      %cst_9 = arith.constant 0.000000e+00 : f32
      %12 = vector.broadcast %cst_9 : f32 to vector<32x128xf32>
      %c0_10 = arith.constant 0 : index
      %c0_11 = arith.constant 0 : index
      %13 = vector.load %arg6[%c0_10, %c0_11] : memref<32x128xf32, #tpu.memory_space<vmem>>, vector<32x128xf32>
      tpu.vector_store %arg6[%c0_10, %c0_11], %12 {strides = array<i32>} : memref<32x128xf32, #tpu.memory_space<vmem>>, vector<32x128xf32>,
    } else {
    }
    %c0 = arith.constant 0 : index
    %c0_1 = arith.constant 0 : index
    %3 = vector.load %arg6[%c0, %c0_1] : memref<32x128xf32, #tpu.memory_space<vmem>>, vector<32x128xf32>
    %c0_2 = arith.constant 0 : index
    %c0_3 = arith.constant 0 : index
    %4 = vector.load %arg2[%c0_2, %c0_3] : memref<32x128xbf16, #tpu.memory_space<vmem>>, vector<32x128xbf16>
    %c0_4 = arith.constant 0 : index
    %c0_5 = arith.constant 0 : index
    %5 = vector.load %arg3[%c0_4, %c0_5] : memref<128x128xbf16, #tpu.memory_space<vmem>>, vector<128x128xbf16>
    %cst = arith.constant dense<0.000000e+00> : vector<32x128xf32>
    %6 = tpu.matmul %4, %5, %cst {dimension_numbers = #tpu.dot_dimension_numbers<[1], [0], [0], [1], [0, 0, 1, 1], [], []>} : vector<32x128xbf16>, vector<128x128xbf16>, vector<32x128xf32> -> vector<32x128xf32>
    %7 = arith.addf %3, %6 : vector<32x128xf32>
    %c0_6 = arith.constant 0 : index
    %c0_7 = arith.constant 0 : index
    %8 = vector.load %arg6[%c0_6, %c0_7] : memref<32x128xf32, #tpu.memory_space<vmem>>, vector<32x128xf32>
    tpu.vector_store %arg6[%c0_6, %c0_7], %7 {strides = array<i32>} : memref<32x128xf32, #tpu.memory_space<vmem>>, vector<32x128xf32>,
    %c2_i32 = arith.constant 2 : i32
    %9 = arith.cmpi eq, %arg1, %c2_i32 : i32
    %10 = arith.extui %9 : i1 to i32
    %c0_i32_8 = arith.constant 0 : i32
    %11 = arith.cmpi ne, %10, %c0_i32_8 : i32
    scf.if %11 {
      %c0_9 = arith.constant 0 : index
      %c0_10 = arith.constant 0 : index
      %12 = vector.load %arg6[%c0_9, %c0_10] : memref<32x128xf32, #tpu.memory_space<vmem>>, vector<32x128xf32>
      %c0_11 = arith.constant 0 : index
      %c0_12 = arith.constant 0 : index
      %13 = vector.load %arg4[%c0_11, %c0_12] : memref<1x128xf32, #tpu.memory_space<vmem>>, vector<1x128xf32>
      %14 = vector.broadcast %13 : vector<1x128xf32> to vector<32x128xf32>
      %15 = arith.addf %12, %14 : vector<32x128xf32>
      %16 = arith.negf %15 : vector<32x128xf32>
      %17 = math.exp %16 : vector<32x128xf32>
      %cst_13 = arith.constant 1.000000e+00 : f32
      %18 = vector.broadcast %cst_13 : f32 to vector<32x128xf32>
      %19 = arith.addf %18, %17 : vector<32x128xf32>
      %20 = arith.divf %18, %19 : vector<32x128xf32>
      %21 = arith.mulf %15, %20 : vector<32x128xf32>
      %22 = arith.truncf %21 : vector<32x128xf32> to vector<32x128xbf16>
      %c0_14 = arith.constant 0 : index
      %c0_15 = arith.constant 0 : index
      %23 = vector.load %arg5[%c0_14, %c0_15] : memref<32x128xbf16, #tpu.memory_space<vmem>>, vector<32x128xbf16>
      tpu.vector_store %arg5[%c0_14, %c0_15], %22 {strides = array<i32>} : memref<32x128xbf16, #tpu.memory_space<vmem>>, vector<32x128xbf16>,
    } else {
    }
    return
  }
  func.func @transform_0(%arg0: i32, %arg1: i32) -> (i32, i32) {
    %c0_i32 = arith.constant 0 : i32
    return %arg0, %arg1 : i32, i32
  }
  func.func @transform_1(%arg0: i32, %arg1: i32) -> (i32, i32) {
    %c0_i32 = arith.constant 0 : i32
    %c0_i32_0 = arith.constant 0 : i32
    return %arg1, %c0_i32 : i32, i32
  }
  func.func @transform_2(%arg0: i32, %arg1: i32) -> (i32, i32) {
    %c0_i32 = arith.constant 0 : i32
    %c0_i32_0 = arith.constant 0 : i32
    %c0_i32_1 = arith.constant 0 : i32
    return %c0_i32, %c0_i32_0 : i32, i32
  }
  func.func @transform_3(%arg0: i32, %arg1: i32) -> (i32, i32) {
    %c0_i32 = arith.constant 0 : i32
    %c0_i32_0 = arith.constant 0 : i32
    return %arg0, %c0_i32 : i32, i32
  }
}

module attributes {stable_mosaic.version = 11 : i64} {
  func.func @kernel(%arg0: i32, %arg1: memref<1x38x128xbf16, #tpu.memory_space<vmem>>, %arg2: memref<9x128x128xbf16, #tpu.memory_space<vmem>>, %arg3: memref<1x128xf32, #tpu.memory_space<vmem>>, %arg4: memref<1x24x128xbf16, #tpu.memory_space<vmem>>, %arg5: memref<1x24x128xbf16, #tpu.memory_space<vmem>>) attributes {dimension_semantics = [#tpu.dimension_semantics<parallel>], iteration_bounds = array<i64: 2>, scalar_prefetch = 0 : i64, scratch_operands = 0 : i64, tpu.core_type = #tpu.core_type<tc>, window_params = [{transform_indices = @transform_0, window_bounds = array<i64: 1, 38, 128>}, {pipeline_mode = #tpu.pipeline_mode<synchronous>, transform_indices = @transform_1, window_bounds = array<i64: 9, 128, 128>}, {pipeline_mode = #tpu.pipeline_mode<synchronous>, transform_indices = @transform_2, window_bounds = array<i64: 1, 128>}, {transform_indices = @transform_3, window_bounds = array<i64: 1, 24, 128>}, {transform_indices = @transform_4, window_bounds = array<i64: 1, 24, 128>}]} {
    %cst = arith.constant 0.000000e+00 : f32
    %0 = vector.broadcast %cst : f32 to vector<24x128xf32>
    %c0 = arith.constant 0 : index
    %c0_0 = arith.constant 0 : index
    %c0_1 = arith.constant 0 : index
    %1 = vector.load %arg1[%c0, %c0_0, %c0_1] : memref<1x38x128xbf16, #tpu.memory_space<vmem>>, vector<1x24x128xbf16>
    %2 = vector.shape_cast %1 : vector<1x24x128xbf16> to vector<24x128xbf16>
    %c0_2 = arith.constant 0 : index
    %c0_3 = arith.constant 0 : index
    %c0_4 = arith.constant 0 : index
    %3 = vector.load %arg2[%c0_2, %c0_3, %c0_4] : memref<9x128x128xbf16, #tpu.memory_space<vmem>>, vector<1x128x128xbf16>
    %4 = vector.shape_cast %3 : vector<1x128x128xbf16> to vector<128x128xbf16>
    %cst_5 = arith.constant dense<0.000000e+00> : vector<24x128xf32>
    %5 = tpu.matmul %2, %4, %cst_5 {dimension_numbers = #tpu.dot_dimension_numbers<[1], [0], [0], [1], [0, 0, 1, 1], [], []>} : vector<24x128xbf16>, vector<128x128xbf16>, vector<24x128xf32> -> vector<24x128xf32>
    %6 = arith.addf %0, %5 : vector<24x128xf32>
    %c0_6 = arith.constant 0 : index
    %c1 = arith.constant 1 : index
    %c0_7 = arith.constant 0 : index
    %7 = vector.load %arg1[%c0_6, %c1, %c0_7] : memref<1x38x128xbf16, #tpu.memory_space<vmem>>, vector<1x24x128xbf16>
    %8 = vector.shape_cast %7 : vector<1x24x128xbf16> to vector<24x128xbf16>
    %c1_8 = arith.constant 1 : index
    %c0_9 = arith.constant 0 : index
    %c0_10 = arith.constant 0 : index
    %9 = vector.load %arg2[%c1_8, %c0_9, %c0_10] : memref<9x128x128xbf16, #tpu.memory_space<vmem>>, vector<1x128x128xbf16>
    %10 = vector.shape_cast %9 : vector<1x128x128xbf16> to vector<128x128xbf16>
    %cst_11 = arith.constant dense<0.000000e+00> : vector<24x128xf32>
    %11 = tpu.matmul %8, %10, %cst_11 {dimension_numbers = #tpu.dot_dimension_numbers<[1], [0], [0], [1], [0, 0, 1, 1], [], []>} : vector<24x128xbf16>, vector<128x128xbf16>, vector<24x128xf32> -> vector<24x128xf32>
    %12 = arith.addf %6, %11 : vector<24x128xf32>
    %c0_12 = arith.constant 0 : index
    %c2 = arith.constant 2 : index
    %c0_13 = arith.constant 0 : index
    %13 = vector.load %arg1[%c0_12, %c2, %c0_13] : memref<1x38x128xbf16, #tpu.memory_space<vmem>>, vector<1x24x128xbf16>
    %14 = vector.shape_cast %13 : vector<1x24x128xbf16> to vector<24x128xbf16>
    %c2_14 = arith.constant 2 : index
    %c0_15 = arith.constant 0 : index
    %c0_16 = arith.constant 0 : index
    %15 = vector.load %arg2[%c2_14, %c0_15, %c0_16] : memref<9x128x128xbf16, #tpu.memory_space<vmem>>, vector<1x128x128xbf16>
    %16 = vector.shape_cast %15 : vector<1x128x128xbf16> to vector<128x128xbf16>
    %cst_17 = arith.constant dense<0.000000e+00> : vector<24x128xf32>
    %17 = tpu.matmul %14, %16, %cst_17 {dimension_numbers = #tpu.dot_dimension_numbers<[1], [0], [0], [1], [0, 0, 1, 1], [], []>} : vector<24x128xbf16>, vector<128x128xbf16>, vector<24x128xf32> -> vector<24x128xf32>
    %18 = arith.addf %12, %17 : vector<24x128xf32>
    %c0_18 = arith.constant 0 : index
    %c6 = arith.constant 6 : index
    %c0_19 = arith.constant 0 : index
    %19 = vector.load %arg1[%c0_18, %c6, %c0_19] : memref<1x38x128xbf16, #tpu.memory_space<vmem>>, vector<1x24x128xbf16>
    %20 = vector.shape_cast %19 : vector<1x24x128xbf16> to vector<24x128xbf16>
    %c3 = arith.constant 3 : index
    %c0_20 = arith.constant 0 : index
    %c0_21 = arith.constant 0 : index
    %21 = vector.load %arg2[%c3, %c0_20, %c0_21] : memref<9x128x128xbf16, #tpu.memory_space<vmem>>, vector<1x128x128xbf16>
    %22 = vector.shape_cast %21 : vector<1x128x128xbf16> to vector<128x128xbf16>
    %cst_22 = arith.constant dense<0.000000e+00> : vector<24x128xf32>
    %23 = tpu.matmul %20, %22, %cst_22 {dimension_numbers = #tpu.dot_dimension_numbers<[1], [0], [0], [1], [0, 0, 1, 1], [], []>} : vector<24x128xbf16>, vector<128x128xbf16>, vector<24x128xf32> -> vector<24x128xf32>
    %24 = arith.addf %18, %23 : vector<24x128xf32>
    %c0_23 = arith.constant 0 : index
    %c7 = arith.constant 7 : index
    %c0_24 = arith.constant 0 : index
    %25 = vector.load %arg1[%c0_23, %c7, %c0_24] : memref<1x38x128xbf16, #tpu.memory_space<vmem>>, vector<1x24x128xbf16>
    %26 = vector.shape_cast %25 : vector<1x24x128xbf16> to vector<24x128xbf16>
    %c4 = arith.constant 4 : index
    %c0_25 = arith.constant 0 : index
    %c0_26 = arith.constant 0 : index
    %27 = vector.load %arg2[%c4, %c0_25, %c0_26] : memref<9x128x128xbf16, #tpu.memory_space<vmem>>, vector<1x128x128xbf16>
    %28 = vector.shape_cast %27 : vector<1x128x128xbf16> to vector<128x128xbf16>
    %cst_27 = arith.constant dense<0.000000e+00> : vector<24x128xf32>
    %29 = tpu.matmul %26, %28, %cst_27 {dimension_numbers = #tpu.dot_dimension_numbers<[1], [0], [0], [1], [0, 0, 1, 1], [], []>} : vector<24x128xbf16>, vector<128x128xbf16>, vector<24x128xf32> -> vector<24x128xf32>
    %30 = arith.addf %24, %29 : vector<24x128xf32>
    %c0_28 = arith.constant 0 : index
    %c8 = arith.constant 8 : index
    %c0_29 = arith.constant 0 : index
    %31 = vector.load %arg1[%c0_28, %c8, %c0_29] : memref<1x38x128xbf16, #tpu.memory_space<vmem>>, vector<1x24x128xbf16>
    %32 = vector.shape_cast %31 : vector<1x24x128xbf16> to vector<24x128xbf16>
    %c5 = arith.constant 5 : index
    %c0_30 = arith.constant 0 : index
    %c0_31 = arith.constant 0 : index
    %33 = vector.load %arg2[%c5, %c0_30, %c0_31] : memref<9x128x128xbf16, #tpu.memory_space<vmem>>, vector<1x128x128xbf16>
    %34 = vector.shape_cast %33 : vector<1x128x128xbf16> to vector<128x128xbf16>
    %cst_32 = arith.constant dense<0.000000e+00> : vector<24x128xf32>
    %35 = tpu.matmul %32, %34, %cst_32 {dimension_numbers = #tpu.dot_dimension_numbers<[1], [0], [0], [1], [0, 0, 1, 1], [], []>} : vector<24x128xbf16>, vector<128x128xbf16>, vector<24x128xf32> -> vector<24x128xf32>
    %36 = arith.addf %30, %35 : vector<24x128xf32>
    %c0_33 = arith.constant 0 : index
    %c12 = arith.constant 12 : index
    %c0_34 = arith.constant 0 : index
    %37 = vector.load %arg1[%c0_33, %c12, %c0_34] : memref<1x38x128xbf16, #tpu.memory_space<vmem>>, vector<1x24x128xbf16>
    %38 = vector.shape_cast %37 : vector<1x24x128xbf16> to vector<24x128xbf16>
    %c6_35 = arith.constant 6 : index
    %c0_36 = arith.constant 0 : index
    %c0_37 = arith.constant 0 : index
    %39 = vector.load %arg2[%c6_35, %c0_36, %c0_37] : memref<9x128x128xbf16, #tpu.memory_space<vmem>>, vector<1x128x128xbf16>
    %40 = vector.shape_cast %39 : vector<1x128x128xbf16> to vector<128x128xbf16>
    %cst_38 = arith.constant dense<0.000000e+00> : vector<24x128xf32>
    %41 = tpu.matmul %38, %40, %cst_38 {dimension_numbers = #tpu.dot_dimension_numbers<[1], [0], [0], [1], [0, 0, 1, 1], [], []>} : vector<24x128xbf16>, vector<128x128xbf16>, vector<24x128xf32> -> vector<24x128xf32>
    %42 = arith.addf %36, %41 : vector<24x128xf32>
    %c0_39 = arith.constant 0 : index
    %c13 = arith.constant 13 : index
    %c0_40 = arith.constant 0 : index
    %43 = vector.load %arg1[%c0_39, %c13, %c0_40] : memref<1x38x128xbf16, #tpu.memory_space<vmem>>, vector<1x24x128xbf16>
    %44 = vector.shape_cast %43 : vector<1x24x128xbf16> to vector<24x128xbf16>
    %c7_41 = arith.constant 7 : index
    %c0_42 = arith.constant 0 : index
    %c0_43 = arith.constant 0 : index
    %45 = vector.load %arg2[%c7_41, %c0_42, %c0_43] : memref<9x128x128xbf16, #tpu.memory_space<vmem>>, vector<1x128x128xbf16>
    %46 = vector.shape_cast %45 : vector<1x128x128xbf16> to vector<128x128xbf16>
    %cst_44 = arith.constant dense<0.000000e+00> : vector<24x128xf32>
    %47 = tpu.matmul %44, %46, %cst_44 {dimension_numbers = #tpu.dot_dimension_numbers<[1], [0], [0], [1], [0, 0, 1, 1], [], []>} : vector<24x128xbf16>, vector<128x128xbf16>, vector<24x128xf32> -> vector<24x128xf32>
    %48 = arith.addf %42, %47 : vector<24x128xf32>
    %c0_45 = arith.constant 0 : index
    %c14 = arith.constant 14 : index
    %c0_46 = arith.constant 0 : index
    %49 = vector.load %arg1[%c0_45, %c14, %c0_46] : memref<1x38x128xbf16, #tpu.memory_space<vmem>>, vector<1x24x128xbf16>
    %50 = vector.shape_cast %49 : vector<1x24x128xbf16> to vector<24x128xbf16>
    %c8_47 = arith.constant 8 : index
    %c0_48 = arith.constant 0 : index
    %c0_49 = arith.constant 0 : index
    %51 = vector.load %arg2[%c8_47, %c0_48, %c0_49] : memref<9x128x128xbf16, #tpu.memory_space<vmem>>, vector<1x128x128xbf16>
    %52 = vector.shape_cast %51 : vector<1x128x128xbf16> to vector<128x128xbf16>
    %cst_50 = arith.constant dense<0.000000e+00> : vector<24x128xf32>
    %53 = tpu.matmul %50, %52, %cst_50 {dimension_numbers = #tpu.dot_dimension_numbers<[1], [0], [0], [1], [0, 0, 1, 1], [], []>} : vector<24x128xbf16>, vector<128x128xbf16>, vector<24x128xf32> -> vector<24x128xf32>
    %54 = arith.addf %48, %53 : vector<24x128xf32>
    %c0_51 = arith.constant 0 : index
    %c0_52 = arith.constant 0 : index
    %55 = vector.load %arg3[%c0_51, %c0_52] : memref<1x128xf32, #tpu.memory_space<vmem>>, vector<1x128xf32>
    %56 = vector.broadcast %55 : vector<1x128xf32> to vector<24x128xf32>
    %57 = arith.addf %54, %56 : vector<24x128xf32>
    %58 = arith.negf %57 : vector<24x128xf32>
    %59 = math.exp %58 : vector<24x128xf32>
    %cst_53 = arith.constant 1.000000e+00 : f32
    %60 = vector.broadcast %cst_53 : f32 to vector<24x128xf32>
    %61 = arith.addf %60, %59 : vector<24x128xf32>
    %62 = arith.divf %60, %61 : vector<24x128xf32>
    %63 = arith.mulf %57, %62 : vector<24x128xf32>
    %c0_54 = arith.constant 0 : index
    %c0_55 = arith.constant 0 : index
    %c0_56 = arith.constant 0 : index
    %64 = vector.load %arg4[%c0_54, %c0_55, %c0_56] : memref<1x24x128xbf16, #tpu.memory_space<vmem>>, vector<1x24x128xbf16>
    %65 = vector.shape_cast %64 : vector<1x24x128xbf16> to vector<24x128xbf16>
    %66 = arith.extf %65 : vector<24x128xbf16> to vector<24x128xf32>
    %67 = arith.addf %63, %66 : vector<24x128xf32>
    %68 = arith.truncf %67 : vector<24x128xf32> to vector<24x128xbf16>
    %c0_57 = arith.constant 0 : index
    %c0_58 = arith.constant 0 : index
    %c0_59 = arith.constant 0 : index
    %69 = vector.load %arg5[%c0_57, %c0_58, %c0_59] : memref<1x24x128xbf16, #tpu.memory_space<vmem>>, vector<1x24x128xbf16>
    %70 = vector.shape_cast %69 : vector<1x24x128xbf16> to vector<24x128xbf16>
    %71 = vector.shape_cast %68 : vector<24x128xbf16> to vector<1x24x128xbf16>
    tpu.vector_store %arg5[%c0_57, %c0_58, %c0_59], %71 {strides = array<i32>} : memref<1x24x128xbf16, #tpu.memory_space<vmem>>, vector<1x24x128xbf16>,
    return
  }
  func.func @transform_0(%arg0: i32) -> (i32, i32, i32) {
    %c0_i32 = arith.constant 0 : i32
    %c0_i32_0 = arith.constant 0 : i32
    %c0_i32_1 = arith.constant 0 : i32
    return %arg0, %c0_i32, %c0_i32_0 : i32, i32, i32
  }
  func.func @transform_1(%arg0: i32) -> (i32, i32, i32) {
    %c0_i32 = arith.constant 0 : i32
    %c0_i32_0 = arith.constant 0 : i32
    %c0_i32_1 = arith.constant 0 : i32
    %c0_i32_2 = arith.constant 0 : i32
    return %c0_i32, %c0_i32_0, %c0_i32_1 : i32, i32, i32
  }
  func.func @transform_2(%arg0: i32) -> (i32, i32) {
    %c0_i32 = arith.constant 0 : i32
    %c0_i32_0 = arith.constant 0 : i32
    %c0_i32_1 = arith.constant 0 : i32
    return %c0_i32, %c0_i32_0 : i32, i32
  }
  func.func @transform_3(%arg0: i32) -> (i32, i32, i32) {
    %c0_i32 = arith.constant 0 : i32
    %c0_i32_0 = arith.constant 0 : i32
    %c0_i32_1 = arith.constant 0 : i32
    return %arg0, %c0_i32, %c0_i32_0 : i32, i32, i32
  }
  func.func @transform_4(%arg0: i32) -> (i32, i32, i32) {
    %c0_i32 = arith.constant 0 : i32
    %c0_i32_0 = arith.constant 0 : i32
    %c0_i32_1 = arith.constant 0 : i32
    return %arg0, %c0_i32, %c0_i32_0 : i32, i32, i32
  }
}

module attributes {stable_mosaic.version = 11 : i64} {
  func.func @kernel(%arg0: i32, %arg1: memref<1x38x128xbf16, #tpu.memory_space<vmem>>, %arg2: memref<9x128x128xbf16, #tpu.memory_space<vmem>>, %arg3: memref<1x128xf32, #tpu.memory_space<vmem>>, %arg4: memref<1x24x128xbf16, #tpu.memory_space<vmem>>) attributes {dimension_semantics = [#tpu.dimension_semantics<parallel>], iteration_bounds = array<i64: 2>, scalar_prefetch = 0 : i64, scratch_operands = 0 : i64, tpu.core_type = #tpu.core_type<tc>, window_params = [{transform_indices = @transform_0, window_bounds = array<i64: 1, 38, 128>}, {pipeline_mode = #tpu.pipeline_mode<synchronous>, transform_indices = @transform_1, window_bounds = array<i64: 9, 128, 128>}, {pipeline_mode = #tpu.pipeline_mode<synchronous>, transform_indices = @transform_2, window_bounds = array<i64: 1, 128>}, {transform_indices = @transform_3, window_bounds = array<i64: 1, 24, 128>}]} {
    %cst = arith.constant 0.000000e+00 : f32
    %0 = vector.broadcast %cst : f32 to vector<24x128xf32>
    %c0 = arith.constant 0 : index
    %c0_0 = arith.constant 0 : index
    %c0_1 = arith.constant 0 : index
    %1 = vector.load %arg1[%c0, %c0_0, %c0_1] : memref<1x38x128xbf16, #tpu.memory_space<vmem>>, vector<1x24x128xbf16>
    %2 = vector.shape_cast %1 : vector<1x24x128xbf16> to vector<24x128xbf16>
    %c0_2 = arith.constant 0 : index
    %c0_3 = arith.constant 0 : index
    %c0_4 = arith.constant 0 : index
    %3 = vector.load %arg2[%c0_2, %c0_3, %c0_4] : memref<9x128x128xbf16, #tpu.memory_space<vmem>>, vector<1x128x128xbf16>
    %4 = vector.shape_cast %3 : vector<1x128x128xbf16> to vector<128x128xbf16>
    %cst_5 = arith.constant dense<0.000000e+00> : vector<24x128xf32>
    %5 = tpu.matmul %2, %4, %cst_5 {dimension_numbers = #tpu.dot_dimension_numbers<[1], [0], [0], [1], [0, 0, 1, 1], [], []>} : vector<24x128xbf16>, vector<128x128xbf16>, vector<24x128xf32> -> vector<24x128xf32>
    %6 = arith.addf %0, %5 : vector<24x128xf32>
    %c0_6 = arith.constant 0 : index
    %c1 = arith.constant 1 : index
    %c0_7 = arith.constant 0 : index
    %7 = vector.load %arg1[%c0_6, %c1, %c0_7] : memref<1x38x128xbf16, #tpu.memory_space<vmem>>, vector<1x24x128xbf16>
    %8 = vector.shape_cast %7 : vector<1x24x128xbf16> to vector<24x128xbf16>
    %c1_8 = arith.constant 1 : index
    %c0_9 = arith.constant 0 : index
    %c0_10 = arith.constant 0 : index
    %9 = vector.load %arg2[%c1_8, %c0_9, %c0_10] : memref<9x128x128xbf16, #tpu.memory_space<vmem>>, vector<1x128x128xbf16>
    %10 = vector.shape_cast %9 : vector<1x128x128xbf16> to vector<128x128xbf16>
    %cst_11 = arith.constant dense<0.000000e+00> : vector<24x128xf32>
    %11 = tpu.matmul %8, %10, %cst_11 {dimension_numbers = #tpu.dot_dimension_numbers<[1], [0], [0], [1], [0, 0, 1, 1], [], []>} : vector<24x128xbf16>, vector<128x128xbf16>, vector<24x128xf32> -> vector<24x128xf32>
    %12 = arith.addf %6, %11 : vector<24x128xf32>
    %c0_12 = arith.constant 0 : index
    %c2 = arith.constant 2 : index
    %c0_13 = arith.constant 0 : index
    %13 = vector.load %arg1[%c0_12, %c2, %c0_13] : memref<1x38x128xbf16, #tpu.memory_space<vmem>>, vector<1x24x128xbf16>
    %14 = vector.shape_cast %13 : vector<1x24x128xbf16> to vector<24x128xbf16>
    %c2_14 = arith.constant 2 : index
    %c0_15 = arith.constant 0 : index
    %c0_16 = arith.constant 0 : index
    %15 = vector.load %arg2[%c2_14, %c0_15, %c0_16] : memref<9x128x128xbf16, #tpu.memory_space<vmem>>, vector<1x128x128xbf16>
    %16 = vector.shape_cast %15 : vector<1x128x128xbf16> to vector<128x128xbf16>
    %cst_17 = arith.constant dense<0.000000e+00> : vector<24x128xf32>
    %17 = tpu.matmul %14, %16, %cst_17 {dimension_numbers = #tpu.dot_dimension_numbers<[1], [0], [0], [1], [0, 0, 1, 1], [], []>} : vector<24x128xbf16>, vector<128x128xbf16>, vector<24x128xf32> -> vector<24x128xf32>
    %18 = arith.addf %12, %17 : vector<24x128xf32>
    %c0_18 = arith.constant 0 : index
    %c6 = arith.constant 6 : index
    %c0_19 = arith.constant 0 : index
    %19 = vector.load %arg1[%c0_18, %c6, %c0_19] : memref<1x38x128xbf16, #tpu.memory_space<vmem>>, vector<1x24x128xbf16>
    %20 = vector.shape_cast %19 : vector<1x24x128xbf16> to vector<24x128xbf16>
    %c3 = arith.constant 3 : index
    %c0_20 = arith.constant 0 : index
    %c0_21 = arith.constant 0 : index
    %21 = vector.load %arg2[%c3, %c0_20, %c0_21] : memref<9x128x128xbf16, #tpu.memory_space<vmem>>, vector<1x128x128xbf16>
    %22 = vector.shape_cast %21 : vector<1x128x128xbf16> to vector<128x128xbf16>
    %cst_22 = arith.constant dense<0.000000e+00> : vector<24x128xf32>
    %23 = tpu.matmul %20, %22, %cst_22 {dimension_numbers = #tpu.dot_dimension_numbers<[1], [0], [0], [1], [0, 0, 1, 1], [], []>} : vector<24x128xbf16>, vector<128x128xbf16>, vector<24x128xf32> -> vector<24x128xf32>
    %24 = arith.addf %18, %23 : vector<24x128xf32>
    %c0_23 = arith.constant 0 : index
    %c7 = arith.constant 7 : index
    %c0_24 = arith.constant 0 : index
    %25 = vector.load %arg1[%c0_23, %c7, %c0_24] : memref<1x38x128xbf16, #tpu.memory_space<vmem>>, vector<1x24x128xbf16>
    %26 = vector.shape_cast %25 : vector<1x24x128xbf16> to vector<24x128xbf16>
    %c4 = arith.constant 4 : index
    %c0_25 = arith.constant 0 : index
    %c0_26 = arith.constant 0 : index
    %27 = vector.load %arg2[%c4, %c0_25, %c0_26] : memref<9x128x128xbf16, #tpu.memory_space<vmem>>, vector<1x128x128xbf16>
    %28 = vector.shape_cast %27 : vector<1x128x128xbf16> to vector<128x128xbf16>
    %cst_27 = arith.constant dense<0.000000e+00> : vector<24x128xf32>
    %29 = tpu.matmul %26, %28, %cst_27 {dimension_numbers = #tpu.dot_dimension_numbers<[1], [0], [0], [1], [0, 0, 1, 1], [], []>} : vector<24x128xbf16>, vector<128x128xbf16>, vector<24x128xf32> -> vector<24x128xf32>
    %30 = arith.addf %24, %29 : vector<24x128xf32>
    %c0_28 = arith.constant 0 : index
    %c8 = arith.constant 8 : index
    %c0_29 = arith.constant 0 : index
    %31 = vector.load %arg1[%c0_28, %c8, %c0_29] : memref<1x38x128xbf16, #tpu.memory_space<vmem>>, vector<1x24x128xbf16>
    %32 = vector.shape_cast %31 : vector<1x24x128xbf16> to vector<24x128xbf16>
    %c5 = arith.constant 5 : index
    %c0_30 = arith.constant 0 : index
    %c0_31 = arith.constant 0 : index
    %33 = vector.load %arg2[%c5, %c0_30, %c0_31] : memref<9x128x128xbf16, #tpu.memory_space<vmem>>, vector<1x128x128xbf16>
    %34 = vector.shape_cast %33 : vector<1x128x128xbf16> to vector<128x128xbf16>
    %cst_32 = arith.constant dense<0.000000e+00> : vector<24x128xf32>
    %35 = tpu.matmul %32, %34, %cst_32 {dimension_numbers = #tpu.dot_dimension_numbers<[1], [0], [0], [1], [0, 0, 1, 1], [], []>} : vector<24x128xbf16>, vector<128x128xbf16>, vector<24x128xf32> -> vector<24x128xf32>
    %36 = arith.addf %30, %35 : vector<24x128xf32>
    %c0_33 = arith.constant 0 : index
    %c12 = arith.constant 12 : index
    %c0_34 = arith.constant 0 : index
    %37 = vector.load %arg1[%c0_33, %c12, %c0_34] : memref<1x38x128xbf16, #tpu.memory_space<vmem>>, vector<1x24x128xbf16>
    %38 = vector.shape_cast %37 : vector<1x24x128xbf16> to vector<24x128xbf16>
    %c6_35 = arith.constant 6 : index
    %c0_36 = arith.constant 0 : index
    %c0_37 = arith.constant 0 : index
    %39 = vector.load %arg2[%c6_35, %c0_36, %c0_37] : memref<9x128x128xbf16, #tpu.memory_space<vmem>>, vector<1x128x128xbf16>
    %40 = vector.shape_cast %39 : vector<1x128x128xbf16> to vector<128x128xbf16>
    %cst_38 = arith.constant dense<0.000000e+00> : vector<24x128xf32>
    %41 = tpu.matmul %38, %40, %cst_38 {dimension_numbers = #tpu.dot_dimension_numbers<[1], [0], [0], [1], [0, 0, 1, 1], [], []>} : vector<24x128xbf16>, vector<128x128xbf16>, vector<24x128xf32> -> vector<24x128xf32>
    %42 = arith.addf %36, %41 : vector<24x128xf32>
    %c0_39 = arith.constant 0 : index
    %c13 = arith.constant 13 : index
    %c0_40 = arith.constant 0 : index
    %43 = vector.load %arg1[%c0_39, %c13, %c0_40] : memref<1x38x128xbf16, #tpu.memory_space<vmem>>, vector<1x24x128xbf16>
    %44 = vector.shape_cast %43 : vector<1x24x128xbf16> to vector<24x128xbf16>
    %c7_41 = arith.constant 7 : index
    %c0_42 = arith.constant 0 : index
    %c0_43 = arith.constant 0 : index
    %45 = vector.load %arg2[%c7_41, %c0_42, %c0_43] : memref<9x128x128xbf16, #tpu.memory_space<vmem>>, vector<1x128x128xbf16>
    %46 = vector.shape_cast %45 : vector<1x128x128xbf16> to vector<128x128xbf16>
    %cst_44 = arith.constant dense<0.000000e+00> : vector<24x128xf32>
    %47 = tpu.matmul %44, %46, %cst_44 {dimension_numbers = #tpu.dot_dimension_numbers<[1], [0], [0], [1], [0, 0, 1, 1], [], []>} : vector<24x128xbf16>, vector<128x128xbf16>, vector<24x128xf32> -> vector<24x128xf32>
    %48 = arith.addf %42, %47 : vector<24x128xf32>
    %c0_45 = arith.constant 0 : index
    %c14 = arith.constant 14 : index
    %c0_46 = arith.constant 0 : index
    %49 = vector.load %arg1[%c0_45, %c14, %c0_46] : memref<1x38x128xbf16, #tpu.memory_space<vmem>>, vector<1x24x128xbf16>
    %50 = vector.shape_cast %49 : vector<1x24x128xbf16> to vector<24x128xbf16>
    %c8_47 = arith.constant 8 : index
    %c0_48 = arith.constant 0 : index
    %c0_49 = arith.constant 0 : index
    %51 = vector.load %arg2[%c8_47, %c0_48, %c0_49] : memref<9x128x128xbf16, #tpu.memory_space<vmem>>, vector<1x128x128xbf16>
    %52 = vector.shape_cast %51 : vector<1x128x128xbf16> to vector<128x128xbf16>
    %cst_50 = arith.constant dense<0.000000e+00> : vector<24x128xf32>
    %53 = tpu.matmul %50, %52, %cst_50 {dimension_numbers = #tpu.dot_dimension_numbers<[1], [0], [0], [1], [0, 0, 1, 1], [], []>} : vector<24x128xbf16>, vector<128x128xbf16>, vector<24x128xf32> -> vector<24x128xf32>
    %54 = arith.addf %48, %53 : vector<24x128xf32>
    %c0_51 = arith.constant 0 : index
    %c0_52 = arith.constant 0 : index
    %55 = vector.load %arg3[%c0_51, %c0_52] : memref<1x128xf32, #tpu.memory_space<vmem>>, vector<1x128xf32>
    %56 = vector.broadcast %55 : vector<1x128xf32> to vector<24x128xf32>
    %57 = arith.addf %54, %56 : vector<24x128xf32>
    %58 = arith.negf %57 : vector<24x128xf32>
    %59 = math.exp %58 : vector<24x128xf32>
    %cst_53 = arith.constant 1.000000e+00 : f32
    %60 = vector.broadcast %cst_53 : f32 to vector<24x128xf32>
    %61 = arith.addf %60, %59 : vector<24x128xf32>
    %62 = arith.divf %60, %61 : vector<24x128xf32>
    %63 = arith.mulf %57, %62 : vector<24x128xf32>
    %64 = arith.truncf %63 : vector<24x128xf32> to vector<24x128xbf16>
    %c0_54 = arith.constant 0 : index
    %c0_55 = arith.constant 0 : index
    %c0_56 = arith.constant 0 : index
    %65 = vector.load %arg4[%c0_54, %c0_55, %c0_56] : memref<1x24x128xbf16, #tpu.memory_space<vmem>>, vector<1x24x128xbf16>
    %66 = vector.shape_cast %65 : vector<1x24x128xbf16> to vector<24x128xbf16>
    %67 = vector.shape_cast %64 : vector<24x128xbf16> to vector<1x24x128xbf16>
    tpu.vector_store %arg4[%c0_54, %c0_55, %c0_56], %67 {strides = array<i32>} : memref<1x24x128xbf16, #tpu.memory_space<vmem>>, vector<1x24x128xbf16>,
    return
  }
  func.func @transform_0(%arg0: i32) -> (i32, i32, i32) {
    %c0_i32 = arith.constant 0 : i32
    %c0_i32_0 = arith.constant 0 : i32
    %c0_i32_1 = arith.constant 0 : i32
    return %arg0, %c0_i32, %c0_i32_0 : i32, i32, i32
  }
  func.func @transform_1(%arg0: i32) -> (i32, i32, i32) {
    %c0_i32 = arith.constant 0 : i32
    %c0_i32_0 = arith.constant 0 : i32
    %c0_i32_1 = arith.constant 0 : i32
    %c0_i32_2 = arith.constant 0 : i32
    return %c0_i32, %c0_i32_0, %c0_i32_1 : i32, i32, i32
  }
  func.func @transform_2(%arg0: i32) -> (i32, i32) {
    %c0_i32 = arith.constant 0 : i32
    %c0_i32_0 = arith.constant 0 : i32
    %c0_i32_1 = arith.constant 0 : i32
    return %c0_i32, %c0_i32_0 : i32, i32
  }
  func.func @transform_3(%arg0: i32) -> (i32, i32, i32) {
    %c0_i32 = arith.constant 0 : i32
    %c0_i32_0 = arith.constant 0 : i32
    %c0_i32_1 = arith.constant 0 : i32
    return %arg0, %c0_i32, %c0_i32_0 : i32, i32, i32
  }
}

module attributes {stable_mosaic.version = 11 : i64} {
  func.func @kernel(%arg0: i32, %arg1: memref<4x10x128xbf16, #tpu.memory_space<vmem>>, %arg2: memref<9x128x128xbf16, #tpu.memory_space<vmem>>, %arg3: memref<1x128xf32, #tpu.memory_space<vmem>>, %arg4: memref<1x6x128xbf16, #tpu.memory_space<vmem>>) attributes {dimension_semantics = [#tpu.dimension_semantics<parallel>], iteration_bounds = array<i64: 2>, scalar_prefetch = 0 : i64, scratch_operands = 0 : i64, tpu.core_type = #tpu.core_type<tc>, window_params = [{transform_indices = @transform_0, window_bounds = array<i64: 4, 10, 128>}, {pipeline_mode = #tpu.pipeline_mode<synchronous>, transform_indices = @transform_1, window_bounds = array<i64: 9, 128, 128>}, {pipeline_mode = #tpu.pipeline_mode<synchronous>, transform_indices = @transform_2, window_bounds = array<i64: 1, 128>}, {transform_indices = @transform_3, window_bounds = array<i64: 1, 6, 128>}]} {
    %cst = arith.constant 0.000000e+00 : f32
    %0 = vector.broadcast %cst : f32 to vector<6x128xf32>
    %c0 = arith.constant 0 : index
    %c0_0 = arith.constant 0 : index
    %c0_1 = arith.constant 0 : index
    %1 = vector.load %arg1[%c0, %c0_0, %c0_1] : memref<4x10x128xbf16, #tpu.memory_space<vmem>>, vector<1x6x128xbf16>
    %2 = vector.shape_cast %1 : vector<1x6x128xbf16> to vector<6x128xbf16>
    %c0_2 = arith.constant 0 : index
    %c0_3 = arith.constant 0 : index
    %c0_4 = arith.constant 0 : index
    %3 = vector.load %arg2[%c0_2, %c0_3, %c0_4] : memref<9x128x128xbf16, #tpu.memory_space<vmem>>, vector<1x128x128xbf16>
    %4 = vector.shape_cast %3 : vector<1x128x128xbf16> to vector<128x128xbf16>
    %cst_5 = arith.constant dense<0.000000e+00> : vector<6x128xf32>
    %5 = tpu.matmul %2, %4, %cst_5 {dimension_numbers = #tpu.dot_dimension_numbers<[1], [0], [0], [1], [0, 0, 1, 1], [], []>} : vector<6x128xbf16>, vector<128x128xbf16>, vector<6x128xf32> -> vector<6x128xf32>
    %6 = arith.addf %0, %5 : vector<6x128xf32>
    %c1 = arith.constant 1 : index
    %c0_6 = arith.constant 0 : index
    %c0_7 = arith.constant 0 : index
    %7 = vector.load %arg1[%c1, %c0_6, %c0_7] : memref<4x10x128xbf16, #tpu.memory_space<vmem>>, vector<1x6x128xbf16>
    %8 = vector.shape_cast %7 : vector<1x6x128xbf16> to vector<6x128xbf16>
    %c1_8 = arith.constant 1 : index
    %c0_9 = arith.constant 0 : index
    %c0_10 = arith.constant 0 : index
    %9 = vector.load %arg2[%c1_8, %c0_9, %c0_10] : memref<9x128x128xbf16, #tpu.memory_space<vmem>>, vector<1x128x128xbf16>
    %10 = vector.shape_cast %9 : vector<1x128x128xbf16> to vector<128x128xbf16>
    %cst_11 = arith.constant dense<0.000000e+00> : vector<6x128xf32>
    %11 = tpu.matmul %8, %10, %cst_11 {dimension_numbers = #tpu.dot_dimension_numbers<[1], [0], [0], [1], [0, 0, 1, 1], [], []>} : vector<6x128xbf16>, vector<128x128xbf16>, vector<6x128xf32> -> vector<6x128xf32>
    %12 = arith.addf %6, %11 : vector<6x128xf32>
    %c0_12 = arith.constant 0 : index
    %c1_13 = arith.constant 1 : index
    %c0_14 = arith.constant 0 : index
    %13 = vector.load %arg1[%c0_12, %c1_13, %c0_14] : memref<4x10x128xbf16, #tpu.memory_space<vmem>>, vector<1x6x128xbf16>
    %14 = vector.shape_cast %13 : vector<1x6x128xbf16> to vector<6x128xbf16>
    %c2 = arith.constant 2 : index
    %c0_15 = arith.constant 0 : index
    %c0_16 = arith.constant 0 : index
    %15 = vector.load %arg2[%c2, %c0_15, %c0_16] : memref<9x128x128xbf16, #tpu.memory_space<vmem>>, vector<1x128x128xbf16>
    %16 = vector.shape_cast %15 : vector<1x128x128xbf16> to vector<128x128xbf16>
    %cst_17 = arith.constant dense<0.000000e+00> : vector<6x128xf32>
    %17 = tpu.matmul %14, %16, %cst_17 {dimension_numbers = #tpu.dot_dimension_numbers<[1], [0], [0], [1], [0, 0, 1, 1], [], []>} : vector<6x128xbf16>, vector<128x128xbf16>, vector<6x128xf32> -> vector<6x128xf32>
    %18 = arith.addf %12, %17 : vector<6x128xf32>
    %c2_18 = arith.constant 2 : index
    %c0_19 = arith.constant 0 : index
    %c0_20 = arith.constant 0 : index
    %19 = vector.load %arg1[%c2_18, %c0_19, %c0_20] : memref<4x10x128xbf16, #tpu.memory_space<vmem>>, vector<1x6x128xbf16>
    %20 = vector.shape_cast %19 : vector<1x6x128xbf16> to vector<6x128xbf16>
    %c3 = arith.constant 3 : index
    %c0_21 = arith.constant 0 : index
    %c0_22 = arith.constant 0 : index
    %21 = vector.load %arg2[%c3, %c0_21, %c0_22] : memref<9x128x128xbf16, #tpu.memory_space<vmem>>, vector<1x128x128xbf16>
    %22 = vector.shape_cast %21 : vector<1x128x128xbf16> to vector<128x128xbf16>
    %cst_23 = arith.constant dense<0.000000e+00> : vector<6x128xf32>
    %23 = tpu.matmul %20, %22, %cst_23 {dimension_numbers = #tpu.dot_dimension_numbers<[1], [0], [0], [1], [0, 0, 1, 1], [], []>} : vector<6x128xbf16>, vector<128x128xbf16>, vector<6x128xf32> -> vector<6x128xf32>
    %24 = arith.addf %18, %23 : vector<6x128xf32>
    %c3_24 = arith.constant 3 : index
    %c0_25 = arith.constant 0 : index
    %c0_26 = arith.constant 0 : index
    %25 = vector.load %arg1[%c3_24, %c0_25, %c0_26] : memref<4x10x128xbf16, #tpu.memory_space<vmem>>, vector<1x6x128xbf16>
    %26 = vector.shape_cast %25 : vector<1x6x128xbf16> to vector<6x128xbf16>
    %c4 = arith.constant 4 : index
    %c0_27 = arith.constant 0 : index
    %c0_28 = arith.constant 0 : index
    %27 = vector.load %arg2[%c4, %c0_27, %c0_28] : memref<9x128x128xbf16, #tpu.memory_space<vmem>>, vector<1x128x128xbf16>
    %28 = vector.shape_cast %27 : vector<1x128x128xbf16> to vector<128x128xbf16>
    %cst_29 = arith.constant dense<0.000000e+00> : vector<6x128xf32>
    %29 = tpu.matmul %26, %28, %cst_29 {dimension_numbers = #tpu.dot_dimension_numbers<[1], [0], [0], [1], [0, 0, 1, 1], [], []>} : vector<6x128xbf16>, vector<128x128xbf16>, vector<6x128xf32> -> vector<6x128xf32>
    %30 = arith.addf %24, %29 : vector<6x128xf32>
    %c2_30 = arith.constant 2 : index
    %c1_31 = arith.constant 1 : index
    %c0_32 = arith.constant 0 : index
    %31 = vector.load %arg1[%c2_30, %c1_31, %c0_32] : memref<4x10x128xbf16, #tpu.memory_space<vmem>>, vector<1x6x128xbf16>
    %32 = vector.shape_cast %31 : vector<1x6x128xbf16> to vector<6x128xbf16>
    %c5 = arith.constant 5 : index
    %c0_33 = arith.constant 0 : index
    %c0_34 = arith.constant 0 : index
    %33 = vector.load %arg2[%c5, %c0_33, %c0_34] : memref<9x128x128xbf16, #tpu.memory_space<vmem>>, vector<1x128x128xbf16>
    %34 = vector.shape_cast %33 : vector<1x128x128xbf16> to vector<128x128xbf16>
    %cst_35 = arith.constant dense<0.000000e+00> : vector<6x128xf32>
    %35 = tpu.matmul %32, %34, %cst_35 {dimension_numbers = #tpu.dot_dimension_numbers<[1], [0], [0], [1], [0, 0, 1, 1], [], []>} : vector<6x128xbf16>, vector<128x128xbf16>, vector<6x128xf32> -> vector<6x128xf32>
    %36 = arith.addf %30, %35 : vector<6x128xf32>
    %c0_36 = arith.constant 0 : index
    %c3_37 = arith.constant 3 : index
    %c0_38 = arith.constant 0 : index
    %37 = vector.load %arg1[%c0_36, %c3_37, %c0_38] : memref<4x10x128xbf16, #tpu.memory_space<vmem>>, vector<1x6x128xbf16>
    %38 = vector.shape_cast %37 : vector<1x6x128xbf16> to vector<6x128xbf16>
    %c6 = arith.constant 6 : index
    %c0_39 = arith.constant 0 : index
    %c0_40 = arith.constant 0 : index
    %39 = vector.load %arg2[%c6, %c0_39, %c0_40] : memref<9x128x128xbf16, #tpu.memory_space<vmem>>, vector<1x128x128xbf16>
    %40 = vector.shape_cast %39 : vector<1x128x128xbf16> to vector<128x128xbf16>
    %cst_41 = arith.constant dense<0.000000e+00> : vector<6x128xf32>
    %41 = tpu.matmul %38, %40, %cst_41 {dimension_numbers = #tpu.dot_dimension_numbers<[1], [0], [0], [1], [0, 0, 1, 1], [], []>} : vector<6x128xbf16>, vector<128x128xbf16>, vector<6x128xf32> -> vector<6x128xf32>
    %42 = arith.addf %36, %41 : vector<6x128xf32>
    %c1_42 = arith.constant 1 : index
    %c3_43 = arith.constant 3 : index
    %c0_44 = arith.constant 0 : index
    %43 = vector.load %arg1[%c1_42, %c3_43, %c0_44] : memref<4x10x128xbf16, #tpu.memory_space<vmem>>, vector<1x6x128xbf16>
    %44 = vector.shape_cast %43 : vector<1x6x128xbf16> to vector<6x128xbf16>
    %c7 = arith.constant 7 : index
    %c0_45 = arith.constant 0 : index
    %c0_46 = arith.constant 0 : index
    %45 = vector.load %arg2[%c7, %c0_45, %c0_46] : memref<9x128x128xbf16, #tpu.memory_space<vmem>>, vector<1x128x128xbf16>
    %46 = vector.shape_cast %45 : vector<1x128x128xbf16> to vector<128x128xbf16>
    %cst_47 = arith.constant dense<0.000000e+00> : vector<6x128xf32>
    %47 = tpu.matmul %44, %46, %cst_47 {dimension_numbers = #tpu.dot_dimension_numbers<[1], [0], [0], [1], [0, 0, 1, 1], [], []>} : vector<6x128xbf16>, vector<128x128xbf16>, vector<6x128xf32> -> vector<6x128xf32>
    %48 = arith.addf %42, %47 : vector<6x128xf32>
    %c0_48 = arith.constant 0 : index
    %c4_49 = arith.constant 4 : index
    %c0_50 = arith.constant 0 : index
    %49 = vector.load %arg1[%c0_48, %c4_49, %c0_50] : memref<4x10x128xbf16, #tpu.memory_space<vmem>>, vector<1x6x128xbf16>
    %50 = vector.shape_cast %49 : vector<1x6x128xbf16> to vector<6x128xbf16>
    %c8 = arith.constant 8 : index
    %c0_51 = arith.constant 0 : index
    %c0_52 = arith.constant 0 : index
    %51 = vector.load %arg2[%c8, %c0_51, %c0_52] : memref<9x128x128xbf16, #tpu.memory_space<vmem>>, vector<1x128x128xbf16>
    %52 = vector.shape_cast %51 : vector<1x128x128xbf16> to vector<128x128xbf16>
    %cst_53 = arith.constant dense<0.000000e+00> : vector<6x128xf32>
    %53 = tpu.matmul %50, %52, %cst_53 {dimension_numbers = #tpu.dot_dimension_numbers<[1], [0], [0], [1], [0, 0, 1, 1], [], []>} : vector<6x128xbf16>, vector<128x128xbf16>, vector<6x128xf32> -> vector<6x128xf32>
    %54 = arith.addf %48, %53 : vector<6x128xf32>
    %c0_54 = arith.constant 0 : index
    %c0_55 = arith.constant 0 : index
    %55 = vector.load %arg3[%c0_54, %c0_55] : memref<1x128xf32, #tpu.memory_space<vmem>>, vector<1x128xf32>
    %56 = vector.broadcast %55 : vector<1x128xf32> to vector<6x128xf32>
    %57 = arith.addf %54, %56 : vector<6x128xf32>
    %58 = arith.negf %57 : vector<6x128xf32>
    %59 = math.exp %58 : vector<6x128xf32>
    %cst_56 = arith.constant 1.000000e+00 : f32
    %60 = vector.broadcast %cst_56 : f32 to vector<6x128xf32>
    %61 = arith.addf %60, %59 : vector<6x128xf32>
    %62 = arith.divf %60, %61 : vector<6x128xf32>
    %63 = arith.mulf %57, %62 : vector<6x128xf32>
    %64 = arith.truncf %63 : vector<6x128xf32> to vector<6x128xbf16>
    %c0_57 = arith.constant 0 : index
    %c0_58 = arith.constant 0 : index
    %c0_59 = arith.constant 0 : index
    %65 = vector.load %arg4[%c0_57, %c0_58, %c0_59] : memref<1x6x128xbf16, #tpu.memory_space<vmem>>, vector<1x6x128xbf16>
    %66 = vector.shape_cast %65 : vector<1x6x128xbf16> to vector<6x128xbf16>
    %67 = vector.shape_cast %64 : vector<6x128xbf16> to vector<1x6x128xbf16>
    tpu.vector_store %arg4[%c0_57, %c0_58, %c0_59], %67 {strides = array<i32>} : memref<1x6x128xbf16, #tpu.memory_space<vmem>>, vector<1x6x128xbf16>,
    return
  }
  func.func @transform_0(%arg0: i32) -> (i32, i32, i32) {
    %c0_i32 = arith.constant 0 : i32
    %c0_i32_0 = arith.constant 0 : i32
    %c0_i32_1 = arith.constant 0 : i32
    return %arg0, %c0_i32, %c0_i32_0 : i32, i32, i32
  }
  func.func @transform_1(%arg0: i32) -> (i32, i32, i32) {
    %c0_i32 = arith.constant 0 : i32
    %c0_i32_0 = arith.constant 0 : i32
    %c0_i32_1 = arith.constant 0 : i32
    %c0_i32_2 = arith.constant 0 : i32
    return %c0_i32, %c0_i32_0, %c0_i32_1 : i32, i32, i32
  }
  func.func @transform_2(%arg0: i32) -> (i32, i32) {
    %c0_i32 = arith.constant 0 : i32
    %c0_i32_0 = arith.constant 0 : i32
    %c0_i32_1 = arith.constant 0 : i32
    return %c0_i32, %c0_i32_0 : i32, i32
  }
  func.func @transform_3(%arg0: i32) -> (i32, i32, i32) {
    %c0_i32 = arith.constant 0 : i32
    %c0_i32_0 = arith.constant 0 : i32
    %c0_i32_1 = arith.constant 0 : i32
    return %arg0, %c0_i32, %c0_i32_0 : i32, i32, i32
  }
}

module attributes {stable_mosaic.version = 11 : i64} {
  func.func @_mm_bias_silu_kernel(%arg0: i32, %arg1: i32, %arg2: memref<8x128xbf16, #tpu.memory_space<vmem>>, %arg3: memref<128x256xbf16, #tpu.memory_space<vmem>>, %arg4: memref<1x256xf32, #tpu.memory_space<vmem>>, %arg5: memref<8x256xbf16, #tpu.memory_space<vmem>>, %arg6: memref<8x256xf32, #tpu.memory_space<vmem>>) attributes {dimension_semantics = [#tpu.dimension_semantics<parallel>, #tpu.dimension_semantics<arbitrary>], iteration_bounds = array<i64: 1, 1>, scalar_prefetch = 0 : i64, scratch_operands = 1 : i64, tpu.core_type = #tpu.core_type<tc>, window_params = [{transform_indices = @transform_0, window_bounds = array<i64: 8, 128>}, {transform_indices = @transform_1, window_bounds = array<i64: 128, 256>}, {pipeline_mode = #tpu.pipeline_mode<synchronous>, transform_indices = @transform_2, window_bounds = array<i64: 1, 256>}, {transform_indices = @transform_3, window_bounds = array<i64: 8, 256>}]} {
    %c0_i32 = arith.constant 0 : i32
    %0 = arith.cmpi eq, %arg1, %c0_i32 : i32
    %1 = arith.extui %0 : i1 to i32
    %c0_i32_0 = arith.constant 0 : i32
    %2 = arith.cmpi ne, %1, %c0_i32_0 : i32
    scf.if %2 {
      %cst_10 = arith.constant 0.000000e+00 : f32
      %12 = vector.broadcast %cst_10 : f32 to vector<8x256xf32>
      %c0_11 = arith.constant 0 : index
      %c0_12 = arith.constant 0 : index
      %13 = vector.load %arg6[%c0_11, %c0_12] : memref<8x256xf32, #tpu.memory_space<vmem>>, vector<8x256xf32>
      tpu.vector_store %arg6[%c0_11, %c0_12], %12 {strides = array<i32>} : memref<8x256xf32, #tpu.memory_space<vmem>>, vector<8x256xf32>,
    } else {
    }
    %c0 = arith.constant 0 : index
    %c0_1 = arith.constant 0 : index
    %3 = vector.load %arg6[%c0, %c0_1] : memref<8x256xf32, #tpu.memory_space<vmem>>, vector<8x256xf32>
    %c0_2 = arith.constant 0 : index
    %c0_3 = arith.constant 0 : index
    %4 = vector.load %arg2[%c0_2, %c0_3] : memref<8x128xbf16, #tpu.memory_space<vmem>>, vector<8x128xbf16>
    %c0_4 = arith.constant 0 : index
    %c0_5 = arith.constant 0 : index
    %5 = vector.load %arg3[%c0_4, %c0_5] : memref<128x256xbf16, #tpu.memory_space<vmem>>, vector<128x256xbf16>
    %cst = arith.constant dense<0.000000e+00> : vector<8x256xf32>
    %6 = tpu.matmul %4, %5, %cst {dimension_numbers = #tpu.dot_dimension_numbers<[1], [0], [0], [1], [0, 0, 1, 1], [], []>} : vector<8x128xbf16>, vector<128x256xbf16>, vector<8x256xf32> -> vector<8x256xf32>
    %7 = arith.addf %3, %6 : vector<8x256xf32>
    %c0_6 = arith.constant 0 : index
    %c0_7 = arith.constant 0 : index
    %8 = vector.load %arg6[%c0_6, %c0_7] : memref<8x256xf32, #tpu.memory_space<vmem>>, vector<8x256xf32>
    tpu.vector_store %arg6[%c0_6, %c0_7], %7 {strides = array<i32>} : memref<8x256xf32, #tpu.memory_space<vmem>>, vector<8x256xf32>,
    %c0_i32_8 = arith.constant 0 : i32
    %9 = arith.cmpi eq, %arg1, %c0_i32_8 : i32
    %10 = arith.extui %9 : i1 to i32
    %c0_i32_9 = arith.constant 0 : i32
    %11 = arith.cmpi ne, %10, %c0_i32_9 : i32
    scf.if %11 {
      %c0_10 = arith.constant 0 : index
      %c0_11 = arith.constant 0 : index
      %12 = vector.load %arg6[%c0_10, %c0_11] : memref<8x256xf32, #tpu.memory_space<vmem>>, vector<8x256xf32>
      %c0_12 = arith.constant 0 : index
      %c0_13 = arith.constant 0 : index
      %13 = vector.load %arg4[%c0_12, %c0_13] : memref<1x256xf32, #tpu.memory_space<vmem>>, vector<1x256xf32>
      %14 = vector.broadcast %13 : vector<1x256xf32> to vector<8x256xf32>
      %15 = arith.addf %12, %14 : vector<8x256xf32>
      %16 = arith.negf %15 : vector<8x256xf32>
      %17 = math.exp %16 : vector<8x256xf32>
      %cst_14 = arith.constant 1.000000e+00 : f32
      %18 = vector.broadcast %cst_14 : f32 to vector<8x256xf32>
      %19 = arith.addf %18, %17 : vector<8x256xf32>
      %20 = arith.divf %18, %19 : vector<8x256xf32>
      %21 = arith.mulf %15, %20 : vector<8x256xf32>
      %22 = arith.truncf %21 : vector<8x256xf32> to vector<8x256xbf16>
      %c0_15 = arith.constant 0 : index
      %c0_16 = arith.constant 0 : index
      %23 = vector.load %arg5[%c0_15, %c0_16] : memref<8x256xbf16, #tpu.memory_space<vmem>>, vector<8x256xbf16>
      tpu.vector_store %arg5[%c0_15, %c0_16], %22 {strides = array<i32>} : memref<8x256xbf16, #tpu.memory_space<vmem>>, vector<8x256xbf16>,
    } else {
    }
    return
  }
  func.func @transform_0(%arg0: i32, %arg1: i32) -> (i32, i32) {
    %c0_i32 = arith.constant 0 : i32
    return %arg0, %arg1 : i32, i32
  }
  func.func @transform_1(%arg0: i32, %arg1: i32) -> (i32, i32) {
    %c0_i32 = arith.constant 0 : i32
    %c0_i32_0 = arith.constant 0 : i32
    return %arg1, %c0_i32 : i32, i32
  }
  func.func @transform_2(%arg0: i32, %arg1: i32) -> (i32, i32) {
    %c0_i32 = arith.constant 0 : i32
    %c0_i32_0 = arith.constant 0 : i32
    %c0_i32_1 = arith.constant 0 : i32
    return %c0_i32, %c0_i32_0 : i32, i32
  }
  func.func @transform_3(%arg0: i32, %arg1: i32) -> (i32, i32) {
    %c0_i32 = arith.constant 0 : i32
    %c0_i32_0 = arith.constant 0 : i32
    return %arg0, %c0_i32 : i32, i32
  }
}

module attributes {stable_mosaic.version = 11 : i64} {
  func.func @kernel(%arg0: i32, %arg1: memref<1x18x128xbf16, #tpu.memory_space<vmem>>, %arg2: memref<9x128x128xbf16, #tpu.memory_space<vmem>>, %arg3: memref<1x128xf32, #tpu.memory_space<vmem>>, %arg4: memref<1x8x128xbf16, #tpu.memory_space<vmem>>, %arg5: memref<1x8x128xbf16, #tpu.memory_space<vmem>>) attributes {dimension_semantics = [#tpu.dimension_semantics<parallel>], iteration_bounds = array<i64: 2>, scalar_prefetch = 0 : i64, scratch_operands = 0 : i64, tpu.core_type = #tpu.core_type<tc>, window_params = [{transform_indices = @transform_0, window_bounds = array<i64: 1, 18, 128>}, {pipeline_mode = #tpu.pipeline_mode<synchronous>, transform_indices = @transform_1, window_bounds = array<i64: 9, 128, 128>}, {pipeline_mode = #tpu.pipeline_mode<synchronous>, transform_indices = @transform_2, window_bounds = array<i64: 1, 128>}, {transform_indices = @transform_3, window_bounds = array<i64: 1, 8, 128>}, {transform_indices = @transform_4, window_bounds = array<i64: 1, 8, 128>}]} {
    %cst = arith.constant 0.000000e+00 : f32
    %0 = vector.broadcast %cst : f32 to vector<8x128xf32>
    %c0 = arith.constant 0 : index
    %c0_0 = arith.constant 0 : index
    %c0_1 = arith.constant 0 : index
    %1 = vector.load %arg1[%c0, %c0_0, %c0_1] : memref<1x18x128xbf16, #tpu.memory_space<vmem>>, vector<1x8x128xbf16>
    %2 = vector.shape_cast %1 : vector<1x8x128xbf16> to vector<8x128xbf16>
    %c0_2 = arith.constant 0 : index
    %c0_3 = arith.constant 0 : index
    %c0_4 = arith.constant 0 : index
    %3 = vector.load %arg2[%c0_2, %c0_3, %c0_4] : memref<9x128x128xbf16, #tpu.memory_space<vmem>>, vector<1x128x128xbf16>
    %4 = vector.shape_cast %3 : vector<1x128x128xbf16> to vector<128x128xbf16>
    %cst_5 = arith.constant dense<0.000000e+00> : vector<8x128xf32>
    %5 = tpu.matmul %2, %4, %cst_5 {dimension_numbers = #tpu.dot_dimension_numbers<[1], [0], [0], [1], [0, 0, 1, 1], [], []>} : vector<8x128xbf16>, vector<128x128xbf16>, vector<8x128xf32> -> vector<8x128xf32>
    %6 = arith.addf %0, %5 : vector<8x128xf32>
    %c0_6 = arith.constant 0 : index
    %c1 = arith.constant 1 : index
    %c0_7 = arith.constant 0 : index
    %7 = vector.load %arg1[%c0_6, %c1, %c0_7] : memref<1x18x128xbf16, #tpu.memory_space<vmem>>, vector<1x8x128xbf16>
    %8 = vector.shape_cast %7 : vector<1x8x128xbf16> to vector<8x128xbf16>
    %c1_8 = arith.constant 1 : index
    %c0_9 = arith.constant 0 : index
    %c0_10 = arith.constant 0 : index
    %9 = vector.load %arg2[%c1_8, %c0_9, %c0_10] : memref<9x128x128xbf16, #tpu.memory_space<vmem>>, vector<1x128x128xbf16>
    %10 = vector.shape_cast %9 : vector<1x128x128xbf16> to vector<128x128xbf16>
    %cst_11 = arith.constant dense<0.000000e+00> : vector<8x128xf32>
    %11 = tpu.matmul %8, %10, %cst_11 {dimension_numbers = #tpu.dot_dimension_numbers<[1], [0], [0], [1], [0, 0, 1, 1], [], []>} : vector<8x128xbf16>, vector<128x128xbf16>, vector<8x128xf32> -> vector<8x128xf32>
    %12 = arith.addf %6, %11 : vector<8x128xf32>
    %c0_12 = arith.constant 0 : index
    %c2 = arith.constant 2 : index
    %c0_13 = arith.constant 0 : index
    %13 = vector.load %arg1[%c0_12, %c2, %c0_13] : memref<1x18x128xbf16, #tpu.memory_space<vmem>>, vector<1x8x128xbf16>
    %14 = vector.shape_cast %13 : vector<1x8x128xbf16> to vector<8x128xbf16>
    %c2_14 = arith.constant 2 : index
    %c0_15 = arith.constant 0 : index
    %c0_16 = arith.constant 0 : index
    %15 = vector.load %arg2[%c2_14, %c0_15, %c0_16] : memref<9x128x128xbf16, #tpu.memory_space<vmem>>, vector<1x128x128xbf16>
    %16 = vector.shape_cast %15 : vector<1x128x128xbf16> to vector<128x128xbf16>
    %cst_17 = arith.constant dense<0.000000e+00> : vector<8x128xf32>
    %17 = tpu.matmul %14, %16, %cst_17 {dimension_numbers = #tpu.dot_dimension_numbers<[1], [0], [0], [1], [0, 0, 1, 1], [], []>} : vector<8x128xbf16>, vector<128x128xbf16>, vector<8x128xf32> -> vector<8x128xf32>
    %18 = arith.addf %12, %17 : vector<8x128xf32>
    %c0_18 = arith.constant 0 : index
    %c4 = arith.constant 4 : index
    %c0_19 = arith.constant 0 : index
    %19 = vector.load %arg1[%c0_18, %c4, %c0_19] : memref<1x18x128xbf16, #tpu.memory_space<vmem>>, vector<1x8x128xbf16>
    %20 = vector.shape_cast %19 : vector<1x8x128xbf16> to vector<8x128xbf16>
    %c3 = arith.constant 3 : index
    %c0_20 = arith.constant 0 : index
    %c0_21 = arith.constant 0 : index
    %21 = vector.load %arg2[%c3, %c0_20, %c0_21] : memref<9x128x128xbf16, #tpu.memory_space<vmem>>, vector<1x128x128xbf16>
    %22 = vector.shape_cast %21 : vector<1x128x128xbf16> to vector<128x128xbf16>
    %cst_22 = arith.constant dense<0.000000e+00> : vector<8x128xf32>
    %23 = tpu.matmul %20, %22, %cst_22 {dimension_numbers = #tpu.dot_dimension_numbers<[1], [0], [0], [1], [0, 0, 1, 1], [], []>} : vector<8x128xbf16>, vector<128x128xbf16>, vector<8x128xf32> -> vector<8x128xf32>
    %24 = arith.addf %18, %23 : vector<8x128xf32>
    %c0_23 = arith.constant 0 : index
    %c5 = arith.constant 5 : index
    %c0_24 = arith.constant 0 : index
    %25 = vector.load %arg1[%c0_23, %c5, %c0_24] : memref<1x18x128xbf16, #tpu.memory_space<vmem>>, vector<1x8x128xbf16>
    %26 = vector.shape_cast %25 : vector<1x8x128xbf16> to vector<8x128xbf16>
    %c4_25 = arith.constant 4 : index
    %c0_26 = arith.constant 0 : index
    %c0_27 = arith.constant 0 : index
    %27 = vector.load %arg2[%c4_25, %c0_26, %c0_27] : memref<9x128x128xbf16, #tpu.memory_space<vmem>>, vector<1x128x128xbf16>
    %28 = vector.shape_cast %27 : vector<1x128x128xbf16> to vector<128x128xbf16>
    %cst_28 = arith.constant dense<0.000000e+00> : vector<8x128xf32>
    %29 = tpu.matmul %26, %28, %cst_28 {dimension_numbers = #tpu.dot_dimension_numbers<[1], [0], [0], [1], [0, 0, 1, 1], [], []>} : vector<8x128xbf16>, vector<128x128xbf16>, vector<8x128xf32> -> vector<8x128xf32>
    %30 = arith.addf %24, %29 : vector<8x128xf32>
    %c0_29 = arith.constant 0 : index
    %c6 = arith.constant 6 : index
    %c0_30 = arith.constant 0 : index
    %31 = vector.load %arg1[%c0_29, %c6, %c0_30] : memref<1x18x128xbf16, #tpu.memory_space<vmem>>, vector<1x8x128xbf16>
    %32 = vector.shape_cast %31 : vector<1x8x128xbf16> to vector<8x128xbf16>
    %c5_31 = arith.constant 5 : index
    %c0_32 = arith.constant 0 : index
    %c0_33 = arith.constant 0 : index
    %33 = vector.load %arg2[%c5_31, %c0_32, %c0_33] : memref<9x128x128xbf16, #tpu.memory_space<vmem>>, vector<1x128x128xbf16>
    %34 = vector.shape_cast %33 : vector<1x128x128xbf16> to vector<128x128xbf16>
    %cst_34 = arith.constant dense<0.000000e+00> : vector<8x128xf32>
    %35 = tpu.matmul %32, %34, %cst_34 {dimension_numbers = #tpu.dot_dimension_numbers<[1], [0], [0], [1], [0, 0, 1, 1], [], []>} : vector<8x128xbf16>, vector<128x128xbf16>, vector<8x128xf32> -> vector<8x128xf32>
    %36 = arith.addf %30, %35 : vector<8x128xf32>
    %c0_35 = arith.constant 0 : index
    %c8 = arith.constant 8 : index
    %c0_36 = arith.constant 0 : index
    %37 = vector.load %arg1[%c0_35, %c8, %c0_36] : memref<1x18x128xbf16, #tpu.memory_space<vmem>>, vector<1x8x128xbf16>
    %38 = vector.shape_cast %37 : vector<1x8x128xbf16> to vector<8x128xbf16>
    %c6_37 = arith.constant 6 : index
    %c0_38 = arith.constant 0 : index
    %c0_39 = arith.constant 0 : index
    %39 = vector.load %arg2[%c6_37, %c0_38, %c0_39] : memref<9x128x128xbf16, #tpu.memory_space<vmem>>, vector<1x128x128xbf16>
    %40 = vector.shape_cast %39 : vector<1x128x128xbf16> to vector<128x128xbf16>
    %cst_40 = arith.constant dense<0.000000e+00> : vector<8x128xf32>
    %41 = tpu.matmul %38, %40, %cst_40 {dimension_numbers = #tpu.dot_dimension_numbers<[1], [0], [0], [1], [0, 0, 1, 1], [], []>} : vector<8x128xbf16>, vector<128x128xbf16>, vector<8x128xf32> -> vector<8x128xf32>
    %42 = arith.addf %36, %41 : vector<8x128xf32>
    %c0_41 = arith.constant 0 : index
    %c9 = arith.constant 9 : index
    %c0_42 = arith.constant 0 : index
    %43 = vector.load %arg1[%c0_41, %c9, %c0_42] : memref<1x18x128xbf16, #tpu.memory_space<vmem>>, vector<1x8x128xbf16>
    %44 = vector.shape_cast %43 : vector<1x8x128xbf16> to vector<8x128xbf16>
    %c7 = arith.constant 7 : index
    %c0_43 = arith.constant 0 : index
    %c0_44 = arith.constant 0 : index
    %45 = vector.load %arg2[%c7, %c0_43, %c0_44] : memref<9x128x128xbf16, #tpu.memory_space<vmem>>, vector<1x128x128xbf16>
    %46 = vector.shape_cast %45 : vector<1x128x128xbf16> to vector<128x128xbf16>
    %cst_45 = arith.constant dense<0.000000e+00> : vector<8x128xf32>
    %47 = tpu.matmul %44, %46, %cst_45 {dimension_numbers = #tpu.dot_dimension_numbers<[1], [0], [0], [1], [0, 0, 1, 1], [], []>} : vector<8x128xbf16>, vector<128x128xbf16>, vector<8x128xf32> -> vector<8x128xf32>
    %48 = arith.addf %42, %47 : vector<8x128xf32>
    %c0_46 = arith.constant 0 : index
    %c10 = arith.constant 10 : index
    %c0_47 = arith.constant 0 : index
    %49 = vector.load %arg1[%c0_46, %c10, %c0_47] : memref<1x18x128xbf16, #tpu.memory_space<vmem>>, vector<1x8x128xbf16>
    %50 = vector.shape_cast %49 : vector<1x8x128xbf16> to vector<8x128xbf16>
    %c8_48 = arith.constant 8 : index
    %c0_49 = arith.constant 0 : index
    %c0_50 = arith.constant 0 : index
    %51 = vector.load %arg2[%c8_48, %c0_49, %c0_50] : memref<9x128x128xbf16, #tpu.memory_space<vmem>>, vector<1x128x128xbf16>
    %52 = vector.shape_cast %51 : vector<1x128x128xbf16> to vector<128x128xbf16>
    %cst_51 = arith.constant dense<0.000000e+00> : vector<8x128xf32>
    %53 = tpu.matmul %50, %52, %cst_51 {dimension_numbers = #tpu.dot_dimension_numbers<[1], [0], [0], [1], [0, 0, 1, 1], [], []>} : vector<8x128xbf16>, vector<128x128xbf16>, vector<8x128xf32> -> vector<8x128xf32>
    %54 = arith.addf %48, %53 : vector<8x128xf32>
    %c0_52 = arith.constant 0 : index
    %c0_53 = arith.constant 0 : index
    %55 = vector.load %arg3[%c0_52, %c0_53] : memref<1x128xf32, #tpu.memory_space<vmem>>, vector<1x128xf32>
    %56 = vector.broadcast %55 : vector<1x128xf32> to vector<8x128xf32>
    %57 = arith.addf %54, %56 : vector<8x128xf32>
    %58 = arith.negf %57 : vector<8x128xf32>
    %59 = math.exp %58 : vector<8x128xf32>
    %cst_54 = arith.constant 1.000000e+00 : f32
    %60 = vector.broadcast %cst_54 : f32 to vector<8x128xf32>
    %61 = arith.addf %60, %59 : vector<8x128xf32>
    %62 = arith.divf %60, %61 : vector<8x128xf32>
    %63 = arith.mulf %57, %62 : vector<8x128xf32>
    %c0_55 = arith.constant 0 : index
    %c0_56 = arith.constant 0 : index
    %c0_57 = arith.constant 0 : index
    %64 = vector.load %arg4[%c0_55, %c0_56, %c0_57] : memref<1x8x128xbf16, #tpu.memory_space<vmem>>, vector<1x8x128xbf16>
    %65 = vector.shape_cast %64 : vector<1x8x128xbf16> to vector<8x128xbf16>
    %66 = arith.extf %65 : vector<8x128xbf16> to vector<8x128xf32>
    %67 = arith.addf %63, %66 : vector<8x128xf32>
    %68 = arith.truncf %67 : vector<8x128xf32> to vector<8x128xbf16>
    %c0_58 = arith.constant 0 : index
    %c0_59 = arith.constant 0 : index
    %c0_60 = arith.constant 0 : index
    %69 = vector.load %arg5[%c0_58, %c0_59, %c0_60] : memref<1x8x128xbf16, #tpu.memory_space<vmem>>, vector<1x8x128xbf16>
    %70 = vector.shape_cast %69 : vector<1x8x128xbf16> to vector<8x128xbf16>
    %71 = vector.shape_cast %68 : vector<8x128xbf16> to vector<1x8x128xbf16>
    tpu.vector_store %arg5[%c0_58, %c0_59, %c0_60], %71 {strides = array<i32>} : memref<1x8x128xbf16, #tpu.memory_space<vmem>>, vector<1x8x128xbf16>,
    return
  }
  func.func @transform_0(%arg0: i32) -> (i32, i32, i32) {
    %c0_i32 = arith.constant 0 : i32
    %c0_i32_0 = arith.constant 0 : i32
    %c0_i32_1 = arith.constant 0 : i32
    return %arg0, %c0_i32, %c0_i32_0 : i32, i32, i32
  }
  func.func @transform_1(%arg0: i32) -> (i32, i32, i32) {
    %c0_i32 = arith.constant 0 : i32
    %c0_i32_0 = arith.constant 0 : i32
    %c0_i32_1 = arith.constant 0 : i32
    %c0_i32_2 = arith.constant 0 : i32
    return %c0_i32, %c0_i32_0, %c0_i32_1 : i32, i32, i32
  }
  func.func @transform_2(%arg0: i32) -> (i32, i32) {
    %c0_i32 = arith.constant 0 : i32
    %c0_i32_0 = arith.constant 0 : i32
    %c0_i32_1 = arith.constant 0 : i32
    return %c0_i32, %c0_i32_0 : i32, i32
  }
  func.func @transform_3(%arg0: i32) -> (i32, i32, i32) {
    %c0_i32 = arith.constant 0 : i32
    %c0_i32_0 = arith.constant 0 : i32
    %c0_i32_1 = arith.constant 0 : i32
    return %arg0, %c0_i32, %c0_i32_0 : i32, i32, i32
  }
  func.func @transform_4(%arg0: i32) -> (i32, i32, i32) {
    %c0_i32 = arith.constant 0 : i32
    %c0_i32_0 = arith.constant 0 : i32
    %c0_i32_1 = arith.constant 0 : i32
    return %arg0, %c0_i32, %c0_i32_0 : i32, i32, i32
  }
}

module attributes {stable_mosaic.version = 11 : i64} {
  func.func @kernel(%arg0: i32, %arg1: memref<1x18x128xbf16, #tpu.memory_space<vmem>>, %arg2: memref<9x128x128xbf16, #tpu.memory_space<vmem>>, %arg3: memref<1x128xf32, #tpu.memory_space<vmem>>, %arg4: memref<1x8x128xbf16, #tpu.memory_space<vmem>>) attributes {dimension_semantics = [#tpu.dimension_semantics<parallel>], iteration_bounds = array<i64: 2>, scalar_prefetch = 0 : i64, scratch_operands = 0 : i64, tpu.core_type = #tpu.core_type<tc>, window_params = [{transform_indices = @transform_0, window_bounds = array<i64: 1, 18, 128>}, {pipeline_mode = #tpu.pipeline_mode<synchronous>, transform_indices = @transform_1, window_bounds = array<i64: 9, 128, 128>}, {pipeline_mode = #tpu.pipeline_mode<synchronous>, transform_indices = @transform_2, window_bounds = array<i64: 1, 128>}, {transform_indices = @transform_3, window_bounds = array<i64: 1, 8, 128>}]} {
    %cst = arith.constant 0.000000e+00 : f32
    %0 = vector.broadcast %cst : f32 to vector<8x128xf32>
    %c0 = arith.constant 0 : index
    %c0_0 = arith.constant 0 : index
    %c0_1 = arith.constant 0 : index
    %1 = vector.load %arg1[%c0, %c0_0, %c0_1] : memref<1x18x128xbf16, #tpu.memory_space<vmem>>, vector<1x8x128xbf16>
    %2 = vector.shape_cast %1 : vector<1x8x128xbf16> to vector<8x128xbf16>
    %c0_2 = arith.constant 0 : index
    %c0_3 = arith.constant 0 : index
    %c0_4 = arith.constant 0 : index
    %3 = vector.load %arg2[%c0_2, %c0_3, %c0_4] : memref<9x128x128xbf16, #tpu.memory_space<vmem>>, vector<1x128x128xbf16>
    %4 = vector.shape_cast %3 : vector<1x128x128xbf16> to vector<128x128xbf16>
    %cst_5 = arith.constant dense<0.000000e+00> : vector<8x128xf32>
    %5 = tpu.matmul %2, %4, %cst_5 {dimension_numbers = #tpu.dot_dimension_numbers<[1], [0], [0], [1], [0, 0, 1, 1], [], []>} : vector<8x128xbf16>, vector<128x128xbf16>, vector<8x128xf32> -> vector<8x128xf32>
    %6 = arith.addf %0, %5 : vector<8x128xf32>
    %c0_6 = arith.constant 0 : index
    %c1 = arith.constant 1 : index
    %c0_7 = arith.constant 0 : index
    %7 = vector.load %arg1[%c0_6, %c1, %c0_7] : memref<1x18x128xbf16, #tpu.memory_space<vmem>>, vector<1x8x128xbf16>
    %8 = vector.shape_cast %7 : vector<1x8x128xbf16> to vector<8x128xbf16>
    %c1_8 = arith.constant 1 : index
    %c0_9 = arith.constant 0 : index
    %c0_10 = arith.constant 0 : index
    %9 = vector.load %arg2[%c1_8, %c0_9, %c0_10] : memref<9x128x128xbf16, #tpu.memory_space<vmem>>, vector<1x128x128xbf16>
    %10 = vector.shape_cast %9 : vector<1x128x128xbf16> to vector<128x128xbf16>
    %cst_11 = arith.constant dense<0.000000e+00> : vector<8x128xf32>
    %11 = tpu.matmul %8, %10, %cst_11 {dimension_numbers = #tpu.dot_dimension_numbers<[1], [0], [0], [1], [0, 0, 1, 1], [], []>} : vector<8x128xbf16>, vector<128x128xbf16>, vector<8x128xf32> -> vector<8x128xf32>
    %12 = arith.addf %6, %11 : vector<8x128xf32>
    %c0_12 = arith.constant 0 : index
    %c2 = arith.constant 2 : index
    %c0_13 = arith.constant 0 : index
    %13 = vector.load %arg1[%c0_12, %c2, %c0_13] : memref<1x18x128xbf16, #tpu.memory_space<vmem>>, vector<1x8x128xbf16>
    %14 = vector.shape_cast %13 : vector<1x8x128xbf16> to vector<8x128xbf16>
    %c2_14 = arith.constant 2 : index
    %c0_15 = arith.constant 0 : index
    %c0_16 = arith.constant 0 : index
    %15 = vector.load %arg2[%c2_14, %c0_15, %c0_16] : memref<9x128x128xbf16, #tpu.memory_space<vmem>>, vector<1x128x128xbf16>
    %16 = vector.shape_cast %15 : vector<1x128x128xbf16> to vector<128x128xbf16>
    %cst_17 = arith.constant dense<0.000000e+00> : vector<8x128xf32>
    %17 = tpu.matmul %14, %16, %cst_17 {dimension_numbers = #tpu.dot_dimension_numbers<[1], [0], [0], [1], [0, 0, 1, 1], [], []>} : vector<8x128xbf16>, vector<128x128xbf16>, vector<8x128xf32> -> vector<8x128xf32>
    %18 = arith.addf %12, %17 : vector<8x128xf32>
    %c0_18 = arith.constant 0 : index
    %c4 = arith.constant 4 : index
    %c0_19 = arith.constant 0 : index
    %19 = vector.load %arg1[%c0_18, %c4, %c0_19] : memref<1x18x128xbf16, #tpu.memory_space<vmem>>, vector<1x8x128xbf16>
    %20 = vector.shape_cast %19 : vector<1x8x128xbf16> to vector<8x128xbf16>
    %c3 = arith.constant 3 : index
    %c0_20 = arith.constant 0 : index
    %c0_21 = arith.constant 0 : index
    %21 = vector.load %arg2[%c3, %c0_20, %c0_21] : memref<9x128x128xbf16, #tpu.memory_space<vmem>>, vector<1x128x128xbf16>
    %22 = vector.shape_cast %21 : vector<1x128x128xbf16> to vector<128x128xbf16>
    %cst_22 = arith.constant dense<0.000000e+00> : vector<8x128xf32>
    %23 = tpu.matmul %20, %22, %cst_22 {dimension_numbers = #tpu.dot_dimension_numbers<[1], [0], [0], [1], [0, 0, 1, 1], [], []>} : vector<8x128xbf16>, vector<128x128xbf16>, vector<8x128xf32> -> vector<8x128xf32>
    %24 = arith.addf %18, %23 : vector<8x128xf32>
    %c0_23 = arith.constant 0 : index
    %c5 = arith.constant 5 : index
    %c0_24 = arith.constant 0 : index
    %25 = vector.load %arg1[%c0_23, %c5, %c0_24] : memref<1x18x128xbf16, #tpu.memory_space<vmem>>, vector<1x8x128xbf16>
    %26 = vector.shape_cast %25 : vector<1x8x128xbf16> to vector<8x128xbf16>
    %c4_25 = arith.constant 4 : index
    %c0_26 = arith.constant 0 : index
    %c0_27 = arith.constant 0 : index
    %27 = vector.load %arg2[%c4_25, %c0_26, %c0_27] : memref<9x128x128xbf16, #tpu.memory_space<vmem>>, vector<1x128x128xbf16>
    %28 = vector.shape_cast %27 : vector<1x128x128xbf16> to vector<128x128xbf16>
    %cst_28 = arith.constant dense<0.000000e+00> : vector<8x128xf32>
    %29 = tpu.matmul %26, %28, %cst_28 {dimension_numbers = #tpu.dot_dimension_numbers<[1], [0], [0], [1], [0, 0, 1, 1], [], []>} : vector<8x128xbf16>, vector<128x128xbf16>, vector<8x128xf32> -> vector<8x128xf32>
    %30 = arith.addf %24, %29 : vector<8x128xf32>
    %c0_29 = arith.constant 0 : index
    %c6 = arith.constant 6 : index
    %c0_30 = arith.constant 0 : index
    %31 = vector.load %arg1[%c0_29, %c6, %c0_30] : memref<1x18x128xbf16, #tpu.memory_space<vmem>>, vector<1x8x128xbf16>
    %32 = vector.shape_cast %31 : vector<1x8x128xbf16> to vector<8x128xbf16>
    %c5_31 = arith.constant 5 : index
    %c0_32 = arith.constant 0 : index
    %c0_33 = arith.constant 0 : index
    %33 = vector.load %arg2[%c5_31, %c0_32, %c0_33] : memref<9x128x128xbf16, #tpu.memory_space<vmem>>, vector<1x128x128xbf16>
    %34 = vector.shape_cast %33 : vector<1x128x128xbf16> to vector<128x128xbf16>
    %cst_34 = arith.constant dense<0.000000e+00> : vector<8x128xf32>
    %35 = tpu.matmul %32, %34, %cst_34 {dimension_numbers = #tpu.dot_dimension_numbers<[1], [0], [0], [1], [0, 0, 1, 1], [], []>} : vector<8x128xbf16>, vector<128x128xbf16>, vector<8x128xf32> -> vector<8x128xf32>
    %36 = arith.addf %30, %35 : vector<8x128xf32>
    %c0_35 = arith.constant 0 : index
    %c8 = arith.constant 8 : index
    %c0_36 = arith.constant 0 : index
    %37 = vector.load %arg1[%c0_35, %c8, %c0_36] : memref<1x18x128xbf16, #tpu.memory_space<vmem>>, vector<1x8x128xbf16>
    %38 = vector.shape_cast %37 : vector<1x8x128xbf16> to vector<8x128xbf16>
    %c6_37 = arith.constant 6 : index
    %c0_38 = arith.constant 0 : index
    %c0_39 = arith.constant 0 : index
    %39 = vector.load %arg2[%c6_37, %c0_38, %c0_39] : memref<9x128x128xbf16, #tpu.memory_space<vmem>>, vector<1x128x128xbf16>
    %40 = vector.shape_cast %39 : vector<1x128x128xbf16> to vector<128x128xbf16>
    %cst_40 = arith.constant dense<0.000000e+00> : vector<8x128xf32>
    %41 = tpu.matmul %38, %40, %cst_40 {dimension_numbers = #tpu.dot_dimension_numbers<[1], [0], [0], [1], [0, 0, 1, 1], [], []>} : vector<8x128xbf16>, vector<128x128xbf16>, vector<8x128xf32> -> vector<8x128xf32>
    %42 = arith.addf %36, %41 : vector<8x128xf32>
    %c0_41 = arith.constant 0 : index
    %c9 = arith.constant 9 : index
    %c0_42 = arith.constant 0 : index
    %43 = vector.load %arg1[%c0_41, %c9, %c0_42] : memref<1x18x128xbf16, #tpu.memory_space<vmem>>, vector<1x8x128xbf16>
    %44 = vector.shape_cast %43 : vector<1x8x128xbf16> to vector<8x128xbf16>
    %c7 = arith.constant 7 : index
    %c0_43 = arith.constant 0 : index
    %c0_44 = arith.constant 0 : index
    %45 = vector.load %arg2[%c7, %c0_43, %c0_44] : memref<9x128x128xbf16, #tpu.memory_space<vmem>>, vector<1x128x128xbf16>
    %46 = vector.shape_cast %45 : vector<1x128x128xbf16> to vector<128x128xbf16>
    %cst_45 = arith.constant dense<0.000000e+00> : vector<8x128xf32>
    %47 = tpu.matmul %44, %46, %cst_45 {dimension_numbers = #tpu.dot_dimension_numbers<[1], [0], [0], [1], [0, 0, 1, 1], [], []>} : vector<8x128xbf16>, vector<128x128xbf16>, vector<8x128xf32> -> vector<8x128xf32>
    %48 = arith.addf %42, %47 : vector<8x128xf32>
    %c0_46 = arith.constant 0 : index
    %c10 = arith.constant 10 : index
    %c0_47 = arith.constant 0 : index
    %49 = vector.load %arg1[%c0_46, %c10, %c0_47] : memref<1x18x128xbf16, #tpu.memory_space<vmem>>, vector<1x8x128xbf16>
    %50 = vector.shape_cast %49 : vector<1x8x128xbf16> to vector<8x128xbf16>
    %c8_48 = arith.constant 8 : index
    %c0_49 = arith.constant 0 : index
    %c0_50 = arith.constant 0 : index
    %51 = vector.load %arg2[%c8_48, %c0_49, %c0_50] : memref<9x128x128xbf16, #tpu.memory_space<vmem>>, vector<1x128x128xbf16>
    %52 = vector.shape_cast %51 : vector<1x128x128xbf16> to vector<128x128xbf16>
    %cst_51 = arith.constant dense<0.000000e+00> : vector<8x128xf32>
    %53 = tpu.matmul %50, %52, %cst_51 {dimension_numbers = #tpu.dot_dimension_numbers<[1], [0], [0], [1], [0, 0, 1, 1], [], []>} : vector<8x128xbf16>, vector<128x128xbf16>, vector<8x128xf32> -> vector<8x128xf32>
    %54 = arith.addf %48, %53 : vector<8x128xf32>
    %c0_52 = arith.constant 0 : index
    %c0_53 = arith.constant 0 : index
    %55 = vector.load %arg3[%c0_52, %c0_53] : memref<1x128xf32, #tpu.memory_space<vmem>>, vector<1x128xf32>
    %56 = vector.broadcast %55 : vector<1x128xf32> to vector<8x128xf32>
    %57 = arith.addf %54, %56 : vector<8x128xf32>
    %58 = arith.negf %57 : vector<8x128xf32>
    %59 = math.exp %58 : vector<8x128xf32>
    %cst_54 = arith.constant 1.000000e+00 : f32
    %60 = vector.broadcast %cst_54 : f32 to vector<8x128xf32>
    %61 = arith.addf %60, %59 : vector<8x128xf32>
    %62 = arith.divf %60, %61 : vector<8x128xf32>
    %63 = arith.mulf %57, %62 : vector<8x128xf32>
    %64 = arith.truncf %63 : vector<8x128xf32> to vector<8x128xbf16>
    %c0_55 = arith.constant 0 : index
    %c0_56 = arith.constant 0 : index
    %c0_57 = arith.constant 0 : index
    %65 = vector.load %arg4[%c0_55, %c0_56, %c0_57] : memref<1x8x128xbf16, #tpu.memory_space<vmem>>, vector<1x8x128xbf16>
    %66 = vector.shape_cast %65 : vector<1x8x128xbf16> to vector<8x128xbf16>
    %67 = vector.shape_cast %64 : vector<8x128xbf16> to vector<1x8x128xbf16>
    tpu.vector_store %arg4[%c0_55, %c0_56, %c0_57], %67 {strides = array<i32>} : memref<1x8x128xbf16, #tpu.memory_space<vmem>>, vector<1x8x128xbf16>,
    return
  }
  func.func @transform_0(%arg0: i32) -> (i32, i32, i32) {
    %c0_i32 = arith.constant 0 : i32
    %c0_i32_0 = arith.constant 0 : i32
    %c0_i32_1 = arith.constant 0 : i32
    return %arg0, %c0_i32, %c0_i32_0 : i32, i32, i32
  }
  func.func @transform_1(%arg0: i32) -> (i32, i32, i32) {
    %c0_i32 = arith.constant 0 : i32
    %c0_i32_0 = arith.constant 0 : i32
    %c0_i32_1 = arith.constant 0 : i32
    %c0_i32_2 = arith.constant 0 : i32
    return %c0_i32, %c0_i32_0, %c0_i32_1 : i32, i32, i32
  }
  func.func @transform_2(%arg0: i32) -> (i32, i32) {
    %c0_i32 = arith.constant 0 : i32
    %c0_i32_0 = arith.constant 0 : i32
    %c0_i32_1 = arith.constant 0 : i32
    return %c0_i32, %c0_i32_0 : i32, i32
  }
  func.func @transform_3(%arg0: i32) -> (i32, i32, i32) {
    %c0_i32 = arith.constant 0 : i32
    %c0_i32_0 = arith.constant 0 : i32
    %c0_i32_1 = arith.constant 0 : i32
    return %arg0, %c0_i32, %c0_i32_0 : i32, i32, i32
  }
}

module attributes {stable_mosaic.version = 11 : i64} {
  func.func @_mm_bias_silu_kernel(%arg0: i32, %arg1: i32, %arg2: memref<8x128xbf16, #tpu.memory_space<vmem>>, %arg3: memref<128x128xbf16, #tpu.memory_space<vmem>>, %arg4: memref<1x128xf32, #tpu.memory_space<vmem>>, %arg5: memref<8x128xbf16, #tpu.memory_space<vmem>>, %arg6: memref<8x128xf32, #tpu.memory_space<vmem>>) attributes {dimension_semantics = [#tpu.dimension_semantics<parallel>, #tpu.dimension_semantics<arbitrary>], iteration_bounds = array<i64: 1, 3>, scalar_prefetch = 0 : i64, scratch_operands = 1 : i64, tpu.core_type = #tpu.core_type<tc>, window_params = [{transform_indices = @transform_0, window_bounds = array<i64: 8, 128>}, {transform_indices = @transform_1, window_bounds = array<i64: 128, 128>}, {pipeline_mode = #tpu.pipeline_mode<synchronous>, transform_indices = @transform_2, window_bounds = array<i64: 1, 128>}, {transform_indices = @transform_3, window_bounds = array<i64: 8, 128>}]} {
    %c0_i32 = arith.constant 0 : i32
    %0 = arith.cmpi eq, %arg1, %c0_i32 : i32
    %1 = arith.extui %0 : i1 to i32
    %c0_i32_0 = arith.constant 0 : i32
    %2 = arith.cmpi ne, %1, %c0_i32_0 : i32
    scf.if %2 {
      %cst_9 = arith.constant 0.000000e+00 : f32
      %12 = vector.broadcast %cst_9 : f32 to vector<8x128xf32>
      %c0_10 = arith.constant 0 : index
      %c0_11 = arith.constant 0 : index
      %13 = vector.load %arg6[%c0_10, %c0_11] : memref<8x128xf32, #tpu.memory_space<vmem>>, vector<8x128xf32>
      tpu.vector_store %arg6[%c0_10, %c0_11], %12 {strides = array<i32>} : memref<8x128xf32, #tpu.memory_space<vmem>>, vector<8x128xf32>,
    } else {
    }
    %c0 = arith.constant 0 : index
    %c0_1 = arith.constant 0 : index
    %3 = vector.load %arg6[%c0, %c0_1] : memref<8x128xf32, #tpu.memory_space<vmem>>, vector<8x128xf32>
    %c0_2 = arith.constant 0 : index
    %c0_3 = arith.constant 0 : index
    %4 = vector.load %arg2[%c0_2, %c0_3] : memref<8x128xbf16, #tpu.memory_space<vmem>>, vector<8x128xbf16>
    %c0_4 = arith.constant 0 : index
    %c0_5 = arith.constant 0 : index
    %5 = vector.load %arg3[%c0_4, %c0_5] : memref<128x128xbf16, #tpu.memory_space<vmem>>, vector<128x128xbf16>
    %cst = arith.constant dense<0.000000e+00> : vector<8x128xf32>
    %6 = tpu.matmul %4, %5, %cst {dimension_numbers = #tpu.dot_dimension_numbers<[1], [0], [0], [1], [0, 0, 1, 1], [], []>} : vector<8x128xbf16>, vector<128x128xbf16>, vector<8x128xf32> -> vector<8x128xf32>
    %7 = arith.addf %3, %6 : vector<8x128xf32>
    %c0_6 = arith.constant 0 : index
    %c0_7 = arith.constant 0 : index
    %8 = vector.load %arg6[%c0_6, %c0_7] : memref<8x128xf32, #tpu.memory_space<vmem>>, vector<8x128xf32>
    tpu.vector_store %arg6[%c0_6, %c0_7], %7 {strides = array<i32>} : memref<8x128xf32, #tpu.memory_space<vmem>>, vector<8x128xf32>,
    %c2_i32 = arith.constant 2 : i32
    %9 = arith.cmpi eq, %arg1, %c2_i32 : i32
    %10 = arith.extui %9 : i1 to i32
    %c0_i32_8 = arith.constant 0 : i32
    %11 = arith.cmpi ne, %10, %c0_i32_8 : i32
    scf.if %11 {
      %c0_9 = arith.constant 0 : index
      %c0_10 = arith.constant 0 : index
      %12 = vector.load %arg6[%c0_9, %c0_10] : memref<8x128xf32, #tpu.memory_space<vmem>>, vector<8x128xf32>
      %c0_11 = arith.constant 0 : index
      %c0_12 = arith.constant 0 : index
      %13 = vector.load %arg4[%c0_11, %c0_12] : memref<1x128xf32, #tpu.memory_space<vmem>>, vector<1x128xf32>
      %14 = vector.broadcast %13 : vector<1x128xf32> to vector<8x128xf32>
      %15 = arith.addf %12, %14 : vector<8x128xf32>
      %16 = arith.negf %15 : vector<8x128xf32>
      %17 = math.exp %16 : vector<8x128xf32>
      %cst_13 = arith.constant 1.000000e+00 : f32
      %18 = vector.broadcast %cst_13 : f32 to vector<8x128xf32>
      %19 = arith.addf %18, %17 : vector<8x128xf32>
      %20 = arith.divf %18, %19 : vector<8x128xf32>
      %21 = arith.mulf %15, %20 : vector<8x128xf32>
      %22 = arith.truncf %21 : vector<8x128xf32> to vector<8x128xbf16>
      %c0_14 = arith.constant 0 : index
      %c0_15 = arith.constant 0 : index
      %23 = vector.load %arg5[%c0_14, %c0_15] : memref<8x128xbf16, #tpu.memory_space<vmem>>, vector<8x128xbf16>
      tpu.vector_store %arg5[%c0_14, %c0_15], %22 {strides = array<i32>} : memref<8x128xbf16, #tpu.memory_space<vmem>>, vector<8x128xbf16>,
    } else {
    }
    return
  }
  func.func @transform_0(%arg0: i32, %arg1: i32) -> (i32, i32) {
    %c0_i32 = arith.constant 0 : i32
    return %arg0, %arg1 : i32, i32
  }
  func.func @transform_1(%arg0: i32, %arg1: i32) -> (i32, i32) {
    %c0_i32 = arith.constant 0 : i32
    %c0_i32_0 = arith.constant 0 : i32
    return %arg1, %c0_i32 : i32, i32
  }
  func.func @transform_2(%arg0: i32, %arg1: i32) -> (i32, i32) {
    %c0_i32 = arith.constant 0 : i32
    %c0_i32_0 = arith.constant 0 : i32
    %c0_i32_1 = arith.constant 0 : i32
    return %c0_i32, %c0_i32_0 : i32, i32
  }
  func.func @transform_3(%arg0: i32, %arg1: i32) -> (i32, i32) {
    %c0_i32 = arith.constant 0 : i32
    %c0_i32_0 = arith.constant 0 : i32
    return %arg0, %c0_i32 : i32, i32
  }
}

</mosaic_0001>

<bundles_post_ra>
// kernel: a_call__.11
= control target key start
LH: loop header
LB: loop body
LE: loop exit
PB: predicated region body
PF: predicated region fallthrough
CT: control target
= control target key end

     0   :  { %s3136_s12 = smov 0   ;;  %s3719_s0 = inlined_call_operand.vmem [shape: bf16[8,82,128], index: 0, kind: input, shape index: {}]   ;;  %s3720_s1 = inlined_call_operand.vmem [shape: bf16[9,128,128], index: 1, kind: input, shape index: {}]   ;;  %s3721_s2 = inlined_call_operand.vmem [shape: f32[1,128], index: 2, kind: input, shape index: {}]   ;;  %s3722_s3 = inlined_call_operand.vmem [shape: bf16[2,72,128], index: 3, kind: output, shape index: {}]  }
   0x1 LB: > { %s3142_s13 = sadd.s32 4294967295, %s3112_s12   ;;  %p2143_p0 = scmp.ge.s32.totalorder %s3112_s12, 1  ;;  %s3112_s12 = sphi %s3136_s12, %s13_s12  }
   0x2   : > { %p139_p1 = scmp.lt.s32.totalorder %s3112_s12, 3 }
   0x4   : > { %p140_p2 = pnand %p2143_p0, %p139_p1 }
   0x5   : > { %s2144_s20 = sshll.u32 (!%p140_p2), %s3142_s13, 2  ;;  %p171_p4 = scmp.lt.s32.totalorder (!%p140_p2), %s3142_s13, 1 }
   0x6   : > { %143 = sbr.rel (%p140_p2) target bundleno = 460 (0x1cc), region = 32  ;;  %p165_p3 = scmp.lt.s32.totalorder (!%p140_p2), %s2144_s20, 7 }
   0xb   : > { %v2957_v0 = vld [vmem:[%s3720_s1 + $0x78] sm:$0xff]   ;;  %v3114_v1 = vmov 0.0   ;;  %v2959_v3 = vld [vmem:[%s3720_s1 + $0x70] sm:$0xff]   ;;  %vm3115_vm0 = vmmov 0   ;;  %v2961_v5 = vld [vmem:[%s3720_s1 + $0x68] sm:$0xff]   ;;  %s3724_s20 = smov (!%p165_p3, %s2144_s20), 7 }
   0xc   : > { %2605 = vmatprep.subr.bf16.mxu0 %v3114_v1  ;;  %2641 = vmatprep.subr.bf16.mxu1 %v3114_v1  ;;  %v2958_v2 = vld [vmem:[%s3720_s1 + $0x38] sm:$0xff]   ;;  %v2960_v4 = vld [vmem:[%s3720_s1 + $0x30] sm:$0xff]   ;;  %v2962_v6 = vld [vmem:[%s3720_s1 + $0x28] sm:$0xff]   ;;  %s2945_s4 = smul.u32 44, %s3724_s20  ;;  %vm577_vm1 = vsmask.f32 7424 }
   0xd   : > { %2606 = vmatpush3.bf16.msra.mxu0 %v2957_v0  ;;  %2621 = vmatprep.mubr.msk.bf16.mxu0 %vm3115_vm0, %v3114_v1  ;;  %v2963_v7 = vld [vmem:[%s3720_s1 + $0x60] sm:$0xff]   ;;  %v2965_v9 = vld [vmem:[%s3720_s1 + $0x58] sm:$0xff]   ;;  %v2967_v11 = vld [vmem:[%s3720_s1 + $0x50] sm:$0xff]   ;;  %vm1815_vm2 = vcmask 1046528   ;;  %s3726_s13 = smov (!%p171_p4, %s3142_s13), 1 }
   0xe   : > { %2642 = vmatpush3.bf16.msra.mxu1 %v2958_v2  ;;  %2607 = vmatprep.subr.bf16.mxu0 %v3114_v1  ;;  %v2964_v8 = vld [vmem:[%s3720_s1 + $0x20] sm:$0xff]   ;;  %v2966_v10 = vld [vmem:[%s3720_s1 + $0x18] sm:$0xff]   ;;  %s3193_s11 = scalar_lea.vmem %s3719_s0, %s2945_s4  ;;  %v2968_v12 = vld [vmem:[%s3720_s1 + $0x10] sm:$0xff]   ;;  %s2946_s19 = smul.u32 36, %s3726_s13 }
   0xf   : > { %2643 = vmatprep.subr.bf16.mxu1 %v3114_v1  ;;  %2657 = vmatprep.mubr.msk.bf16.mxu1 %vm3115_vm0, %v3114_v1  ;;  %v2969_v13 = vld [vmem:[%s3720_s1 + $0x48] sm:$0xff]   ;;  %v2971_v15 = vld [vmem:[%s3720_s1 + $0x40] sm:$0xff]   ;;  %v2975_v19 = vld [vmem:[%s3720_s1 + $0xb8] sm:$0xff]  }
  0x10   : > { %v2970_v14 = vld [vmem:[%s3720_s1 + $0x8] sm:$0xff]   ;;  %v2972_v16 = vld [vmem:[%s3720_s1] sm:$0xff]   ;;  %v2979_v20 = vld [vmem:[%s3720_s1 + $0xf8] sm:$0xff]   ;;  %s175_s22 = scalar_lea.vmem %s3722_s3, %s2946_s19 }
  0x11   : > { %2608 = vmatpush3.bf16.msra.mxu0 %v2959_v3  ;;  %v2973_v17 = vld [vmem:[%s3193_s11 + $0x2c] sm:$0xff]   ;;  %v2974_v18 = vld [vmem:[%s3193_s11] sm:$0xff]   ;;  %v2977_v22 = vld [vmem:[%s3193_s11 + $0x34] sm:$0xff]  }
  0x12   : > { %2644 = vmatpush3.bf16.msra.mxu1 %v2960_v4  ;;  %2609 = vmatprep.subr.bf16.mxu0 %v3114_v1  ;;  %v2976_v21 = vld [vmem:[%s3720_s1 + $0xb0] sm:$0xff]   ;;  %v2978_v24 = vld [vmem:[%s3193_s11 + $0x8] sm:$0xff]   ;;  %v2984_v27 = vld [vmem:[%s3720_s1 + $0xa0] sm:$0xff]  }
  0x13   : > { %2645 = vmatprep.subr.bf16.mxu1 %v3114_v1  ;;  %v2981_v23 = vld [vmem:[%s3720_s1 + $0xf0] sm:$0xff]   ;;  %v2980_v25 = vld [vmem:[%s3720_s1 + $0xa8] sm:$0xff]   ;;  %v2982_v28 = vld [vmem:[%s3193_s11 + $0x3c] sm:$0xff]  }
  0x14   : > { %v2985_v26 = vld [vmem:[%s3720_s1 + $0xe8] sm:$0xff]   ;;  %v2987_v29 = vld [vmem:[%s3720_s1 + $0xe0] sm:$0xff]   ;;  %v2983_v30 = vld [vmem:[%s3193_s11 + $0x10] sm:$0xff]  }
  0x15   : > { %2610 = vmatpush3.bf16.msra.mxu0 %v2961_v5  ;;  %v2986_v31 = vld [vmem:[%s3720_s1 + $0x98] sm:$0xff]   ;;  %v2991_v33 = vld [vmem:[%s3720_s1 + $0x90] sm:$0xff]   ;;  %v2988_v34 = vld [vmem:[%s3193_s11 + $0x44] sm:$0xff]  }
  0x16   : > { %2646 = vmatpush3.bf16.msra.mxu1 %v2962_v6  ;;  %2611 = vmatprep.subr.bf16.mxu0 %v3114_v1  ;;  %v2990_v32 = vld [vmem:[%s3720_s1 + $0xd8] sm:$0xff]   ;;  %v2992_v35 = vld [vmem:[%s3720_s1 + $0xd0] sm:$0xff]   ;;  %v2999_v37 = vld [vmem:[%s3193_s11] sm:$0xff]  }
  0x17   : > { %2647 = vmatprep.subr.bf16.mxu1 %v3114_v1  ;;  %v2989_v36 = vld [vmem:[%s3193_s11 + $0x18] sm:$0xff]   ;;  %v2993_v38 = vld [vmem:[%s3720_s1 + $0x88] sm:$0xff]   ;;  %v581_v41 = vshll.u32 %v2999_v37, 16  ;;  %v2997_v43 = vld [vmem:[%s3720_s1 + $0x80] sm:$0xff]   ;;  %v579_v46 = vshrl.u32 %v2999_v37, 16 }
  0x18   : > { %v2996_v39 = vld [vmem:[%s3720_s1 + $0xc8] sm:$0xff]   ;;  %v2995_v44 = vld [vmem:[%s3193_s11 + $0x20] ss:$0 sps:$4 sm:$0xff]   ;;  %v3004_v51 = vld [vmem:[%s3193_s11 + $0x10] sm:$0xff]  }
  0x19   : > { %2612 = vmatpush3.bf16.msra.mxu0 %v2963_v7  ;;  %v3000_v40 = vld [vmem:[%s3193_s11 + $0x8] sm:$0xff]   ;;  %v2998_v45 = vld [vmem:[%s3720_s1 + $0xc0] sm:$0xff]   ;;  %v583_v47 = vrot.slane %v581_v41, 1  ;;  %v3001_v52 = vld [vmem:[%s3193_s11 + $0x58] sm:$0xff]   ;;  %v594_v56 = vshll.u32 %v3004_v51, 16  ;;  %v598_v4 = vshrl.u32 %v3004_v51, 16 }
  0x1a   : > { %2648 = vmatpush3.bf16.msra.mxu1 %v2964_v8  ;;  %2613 = vmatprep.subr.bf16.mxu0 %v3114_v1  ;;  %v2994_v42 = vld [vmem:[%s3193_s11 + $0x4c] ss:$0 sps:$4 sm:$0xff]   ;;  %v586_v48 = vshll.u32 %v3000_v40, 16  ;;  %v3002_v53 = vld [vmem:[%s3720_s1 + $0x138] sm:$0xff]   ;;  %v590_v55 = vshrl.u32 %v3000_v40, 16  ;;  %v3003_v59 = vld [vmem:[%s3720_s1 + $0x130] sm:$0xff]  }
  0x1b   : > { %2649 = vmatprep.subr.bf16.mxu1 %v3114_v1  ;;  %v584_v49 = vor.u32 %v583_v47, %v579_v46  ;;  %v3006_v57 = vld [vmem:[%s3720_s1 + $0x178] sm:$0xff]   ;;  %v596_v61 = vrot.slane %v594_v56, 1  ;;  %v3008_v62 = vld [vmem:[%s3720_s1 + $0x170] sm:$0xff]   ;;  %v3005_v63 = vld [vmem:[%s3193_s11 + $0x60] sm:$0xff]  }
  0x1c   : > { %v588_v50 = vrot.slane %v586_v48, 1  ;;  %v3009_v58 = vld [vmem:[%s3193_s11 + $0x18] sm:$0xff]   ;;  %v3007_v3 = vld [vmem:[%s3720_s1 + $0x128] sm:$0xff]   ;;  %v3011_v7 = vld [vmem:[%s3720_s1 + $0x120] sm:$0xff]  }
  0x1d   : > { %2614 = vmatpush3.bf16.msra.mxu0 %v2965_v9  ;;  %v602_v0 = vshll.u32 %v3009_v58, 16  ;;  %v3012_v5 = vld [vmem:[%s3720_s1 + $0x168] sm:$0xff]   ;;  %v600_v8 = vor.u32 %v598_v4, %v596_v61  ;;  %v3015_v9 = vld [vmem:[%s3193_s11 + $0x20] sm:$0x1f]   ;;  %v3028_v40 = vld [vmem:[%s3720_s1 + $0x1b8] sm:$0xff]  }
  0x1e   : > { %2650 = vmatpush3.bf16.msra.mxu1 %v2966_v10  ;;  %2615 = vmatprep.subr.bf16.mxu0 %v3114_v1  ;;  %v589_v54 = vsel %vm577_vm1, %v584_v49, %v588_v50  ;;  %v592_v60 = vor.u32 %v590_v55, %v588_v50  ;;  %v3014_v10 = vld [vmem:[%s3720_s1 + $0x160] sm:$0xff]   ;;  %v3036_v48 = vld [vmem:[%s3193_s11 + $0x70] sm:$0xff]   ;;  %v3033_v51 = vld [vmem:[%s3720_s1 + $0x1a8] sm:$0xff]  }
  0x1f   : > { %2651 = vmatprep.subr.bf16.mxu1 %v3114_v1  ;;  %v604_v6 = vrot.slane %v602_v0, 1  ;;  %v3034_v49 = vld [vmem:[%s3720_s1 + $0x1f0] sm:$0xff]   ;;  %v3038_v55 = vld [vmem:[%s3720_s1 + $0x1e8] sm:$0xff]   ;;  %v3037_v56 = vld [vmem:[%s3720_s1 + $0x1a0] sm:$0xff]   ;;  %v1199_v0 = vshrl.u32 %v3036_v48, 16 }
  0x20   : > { %v597_v2 = vsel %vm577_vm1, %v592_v60, %v596_v61  ;;  %v3030_v50 = vld [vmem:[%s3193_s11 + $0x8c] sm:$0xff]   ;;  %v3040_v60 = vld [vmem:[%s3720_s1 + $0x1e0] sm:$0xff]   ;;  %v3035_v61 = vld [vmem:[%s3193_s11 + $0x94] sm:$0xff]  }
  0x21   : > { %2616 = vmatpush3.bf16.msra.mxu0 %v2967_v11  ;;  %v3010_v11 = vld [vmem:[%s3193_s11 + $0x68] sm:$0xff]   ;;  %v3044_v4 = vld [vmem:[%s3720_s1 + $0x190] sm:$0xff]  }
  0x22   : > { %2652 = vmatpush3.bf16.msra.mxu1 %v2968_v12  ;;  %2617 = vmatprep.subr.bf16.mxu0 %v3114_v1  ;;  %v606_v12 = vshrl.u32 %v3009_v58, 16 }
  0x23   : > { %2653 = vmatprep.subr.bf16.mxu1 %v3114_v1 }
  0x25   : > { %2618 = vmatpush3.bf16.msra.mxu0 %v2969_v13  ;;  %v605_v13 = vsel %vm577_vm1, %v600_v8, %v604_v6  ;;  %v3480_v8 = vld [vmem:[%s3193_s11 + $0x8] sm:$0xf] }
  0x26   : > { %2654 = vmatpush3.bf16.msra.mxu1 %v2970_v14  ;;  %2619 = vmatprep.subr.bf16.mxu0 %v3114_v1  ;;  %v3013_v14 = vld [vmem:[%s3720_s1 + $0x118] sm:$0xff]  }
  0x27   : > { %2655 = vmatprep.subr.bf16.mxu1 %v3114_v1 }
  0x29   : > { %2620 = vmatpush3.bf16.msra.mxu0 %v2971_v15  ;;  %v610_v15 = vshll.u32 %v3015_v9, 16 }
  0x2a   : > { %2656 = vmatpush3.bf16.msra.mxu1 %v2972_v16  ;;  %2677 = vmatprep.subr.bf16.mxu0 %v3114_v1  ;;  %v3017_v16 = vld [vmem:[%s3720_s1 + $0x158] sm:$0xff]  }
  0x2b   : > { %2713 = vmatprep.subr.bf16.mxu1 %v3114_v1 }
  0x2c   : > { %2622 = vmatmul.mubr.bf16.vlgmr.msra.gmra.mxu0 %v2973_v17  ;;  %v608_v17 = vor.u32 %v606_v12, %v604_v6 }
  0x2d   : > { %2658 = vmatmul.mubr.bf16.vlgmr.msra.gmra.mxu1 %v2974_v18  ;;  %2678 = vmatpush3.bf16.msra.mxu0 %v2975_v19  ;;  %v612_v18 = vrot.slane %v610_v15, 1  ;;  %v3018_v19 = vld [vmem:[%s3720_s1 + $0x110] sm:$0xff]   ;;  %v3048_v15 = vld [vmem:[%s3720_s1 + $0x1c8] sm:$0xff]  }
  0x2e   : > { %2679 = vmatprep.subr.bf16.mxu0 %v3114_v1  ;;  %2625 = vmatprep.mubr.msk.bf16.mxu0 %vm3115_vm0, %v3114_v1 }
  0x2f   : > { %2661 = vmatprep.mubr.msk.bf16.mxu1 %vm3115_vm0, %v3114_v1  ;;  %2714 = vmatpush3.bf16.msra.mxu1 %v2979_v20  ;;  %v3019_v20 = vld [vmem:[%s3720_s1 + $0x150] sm:$0xff]  }
  0x30   : > { %2715 = vmatprep.subr.bf16.mxu1 %v3114_v1 }
  0x31   : > { %2680 = vmatpush3.bf16.msra.mxu0 %v2976_v21  ;;  %v3016_v21 = vld [vmem:[%s3193_s11 + $0x70] sm:$0xff]  }
  0x32   : > { %2681 = vmatprep.subr.bf16.mxu0 %v3114_v1 }
  0x33   : > { %2716 = vmatpush3.bf16.msra.mxu1 %v2981_v23  ;;  %v613_v23 = vsel %vm577_vm1, %v608_v17, %v612_v18  ;;  %v3502_v17 = vld [vmem:[%s3193_s11 + $0xc] sm:$0xff]  }
  0x34   : > { %2626 = vmatmul.mubr.bf16.gmra.mxu0 %v2977_v22  ;;  %2717 = vmatprep.subr.bf16.mxu1 %v3114_v1  ;;  %v3020_v22 = vld [vmem:[%s3720_s1 + $0x108] sm:$0xff]  }
  0x35   : > { %2662 = vmatmul.mubr.bf16.gmra.mxu1 %v2978_v24  ;;  %2682 = vmatpush3.bf16.msra.mxu0 %v2980_v25  ;;  %v3026_v24 = vld [vmem:[%s3193_s11 + $0x58] sm:$0xff]   ;;  %v3022_v25 = vld [vmem:[%s3720_s1 + $0x148] sm:$0xff]  }
  0x36   : > { %2629 = vmatprep.mubr.msk.bf16.mxu0 %vm3115_vm0, %v3114_v1  ;;  %2665 = vmatprep.mubr.msk.bf16.mxu1 %vm3115_vm0, %v3114_v1 }
  0x37   : > { %2683 = vmatprep.subr.bf16.mxu0 %v3114_v1  ;;  %2718 = vmatpush3.bf16.msra.mxu1 %v2985_v26  ;;  %v614_v26 = vshrl.u32 %v3015_v9, 16  ;;  %v3045_v9 = vld [vmem:[%s3720_s1 + $0x1d0] sm:$0xff]  }
  0x38   : > { %2719 = vmatprep.subr.bf16.mxu1 %v3114_v1 }
  0x39   : > { %2684 = vmatpush3.bf16.msra.mxu0 %v2984_v27  ;;  %v3023_v27 = vld [vmem:[%s3720_s1 + $0x100] sm:$0xff]  }
  0x3a   : > { %2685 = vmatprep.subr.bf16.mxu0 %v3114_v1 }
  0x3b   : > { %2720 = vmatpush3.bf16.msra.mxu1 %v2987_v29  ;;  %v1174_v29 = vshll.u32 %v3026_v24, 16 }
  0x3c   : > { %2630 = vmatmul.mubr.bf16.gmra.mxu0 %v2982_v28  ;;  %2721 = vmatprep.subr.bf16.mxu1 %v3114_v1  ;;  %v3027_v28 = vld [vmem:[%s3193_s11 + $0x60] sm:$0xff]  }
  0x3d   : > { %2666 = vmatmul.mubr.bf16.gmra.mxu1 %v2983_v30  ;;  %2686 = vmatpush3.bf16.msra.mxu0 %v2986_v31  ;;  %v3024_v30 = vld [vmem:[%s3720_s1 + $0x140] sm:$0xff]   ;;  %v616_v31 = vor.u32 %v614_v26, %v612_v18 }
  0x3e   : > { %2633 = vmatprep.mubr.msk.bf16.mxu0 %vm3115_vm0, %v3114_v1  ;;  %2669 = vmatprep.mubr.msk.bf16.mxu1 %vm3115_vm0, %v3114_v1 }
  0x3f   : > { %2687 = vmatprep.subr.bf16.mxu0 %v3114_v1  ;;  %2722 = vmatpush3.bf16.msra.mxu1 %v2990_v32  ;;  %v3021_v32 = vld [vmem:[%s3193_s11 + $0x78] ss:$0 sps:$4 sm:$0xff]  }
  0x40   : > { %2723 = vmatprep.subr.bf16.mxu1 %v3114_v1 }
  0x41   : > { %2688 = vmatpush3.bf16.msra.mxu0 %v2991_v33  ;;  %v1172_v33 = vshrl.u32 %v3026_v24, 16 }
  0x42   : > { %2689 = vmatprep.subr.bf16.mxu0 %v3114_v1 }
  0x43   : > { %2724 = vmatpush3.bf16.msra.mxu1 %v2992_v35  ;;  %v1179_v35 = vshll.u32 %v3027_v28, 16 }
  0x44   : > { %2634 = vmatmul.mubr.bf16.gmra.mxu0 %v2988_v34  ;;  %2725 = vmatprep.subr.bf16.mxu1 %v3114_v1  ;;  %v1176_v34 = vrot.slane %v1174_v29, 1 }
  0x45   : > { %2670 = vmatmul.mubr.bf16.gmra.mxu1 %v2989_v36  ;;  %2637 = vmatprep.mubr.msk.bf16.mxu0 %vm3115_vm0, %v3114_v1  ;;  %v1181_v37 = vrot.slane %v1179_v35, 1 }
  0x46   : > { %2673 = vmatprep.mubr.msk.bf16.mxu1 %vm3115_vm0, %v3114_v1  ;;  %2690 = vmatpush3.bf16.msra.mxu0 %v2993_v38  ;;  %v1177_v36 = vor.u32 %v1176_v34, %v1172_v33  ;;  %v3031_v38 = vld [vmem:[%s3193_s11 + $0x68] sm:$0xff]   ;;  %v3522_v33 = vld [vmem:[%s3193_s11 + $0x14] sm:$0xff]  }
  0x47   : > { %2726 = vmatpush3.bf16.msra.mxu1 %v2996_v39  ;;  %2691 = vmatprep.subr.bf16.mxu0 %v3114_v1  ;;  %v3025_v39 = vld [vmem:[%s3193_s11 + $0x84] sm:$0xff]  }
  0x48   : > { %2727 = vmatprep.subr.bf16.mxu1 %v3114_v1  ;;  %v1182_v41 = vsel %vm577_vm1, %v1177_v36, %v1181_v37  ;;  %v3058_v36 = vld [vmem:[%s3193_s11 + $0x40] sm:$0xff]  }
  0x4a   : > { %2692 = vmatpush3.bf16.msra.mxu0 %v2997_v43  ;;  %v1187_v43 = vshll.u32 %v3031_v38, 16 }
  0x4b   : > { %2728 = vmatpush3.bf16.msra.mxu1 %v2998_v45  ;;  %2749 = vmatprep.subr.bf16.mxu0 %v3114_v1  ;;  %v3029_v45 = vld [vmem:[%s3720_s1 + $0x1b0] sm:$0xff]  }
  0x4c   : > { %2638 = vmatmul.mubr.bf16.gmra.mxu0 %v2994_v42  ;;  %2785 = vmatprep.subr.bf16.mxu1 %v3114_v1  ;;  %v1183_v42 = vshrl.u32 %v3027_v28, 16  ;;  %v1189_v47 = vrot.slane %v1187_v43, 1  ;;  %v1637_v43 = vshll.u32 %v3058_v36, 16 }
  0x4d   : > { %2674 = vmatmul.mubr.bf16.gmra.mxu1 %v2995_v44  ;;  %2693 = vmatprep.mubr.msk.bf16.mxu0 %vm3115_vm0, %v3114_v1  ;;  %v3032_v44 = vld [vmem:[%s3720_s1 + $0x1f8] sm:$0xff]  }
  0x4e   : > { %2729 = vmatprep.mubr.msk.bf16.mxu1 %vm3115_vm0, %v3114_v1  ;;  %v1185_v46 = vor.u32 %v1183_v42, %v1181_v37 }
  0x54   : > { %2694 = vmatmul.mubr.bf16.vlgmr.msra.gmra.mxu0 %v589_v54  ;;  %v1195_v54 = vshll.u32 %v3036_v48, 16 }
  0x55   : > { %2730 = vmatmul.mubr.bf16.vlgmr.msra.gmra.mxu1 %v3001_v52  ;;  %2750 = vmatpush3.bf16.msra.mxu0 %v3002_v53  ;;  %v1190_v52 = vsel %vm577_vm1, %v1185_v46, %v1189_v47  ;;  %v1191_v53 = vshrl.u32 %v3031_v38, 16  ;;  %v3055_v38 = vld [vmem:[%s3720_s1 + $0x238] sm:$0xff]  }
  0x56   : > { %2751 = vmatprep.subr.bf16.mxu0 %v3114_v1  ;;  %2697 = vmatprep.mubr.msk.bf16.mxu0 %vm3115_vm0, %v3114_v1  ;;  %v1197_v58 = vrot.slane %v1195_v54, 1 }
  0x57   : > { %2733 = vmatprep.mubr.msk.bf16.mxu1 %vm3115_vm0, %v3114_v1  ;;  %2786 = vmatpush3.bf16.msra.mxu1 %v3006_v57  ;;  %v1193_v57 = vor.u32 %v1191_v53, %v1189_v47  ;;  %v3538_v47 = vld [vmem:[%s3193_s11 + $0x1c] sm:$0xff]   ;;  %v1416_v53 = vshrl.u32 %v3522_v33, 16 }
  0x58   : > { %2787 = vmatprep.subr.bf16.mxu1 %v3114_v1  ;;  %v1420_v54 = vshll.u32 %v3538_v47, 16 }
  0x59   : > { %2752 = vmatpush3.bf16.msra.mxu0 %v3003_v59  ;;  %v3042_v59 = vld [vmem:[%s3193_s11 + $0x78] sm:$0x1f]  }
  0x5a   : > { %2753 = vmatprep.subr.bf16.mxu0 %v3114_v1 }
  0x5b   : > { %2788 = vmatpush3.bf16.msra.mxu1 %v3008_v62  ;;  %v3039_v62 = vld [vmem:[%s3720_s1 + $0x198] sm:$0xff]  }
  0x5c   : > { %2698 = vmatmul.mubr.bf16.gmra.mxu0 %v597_v2  ;;  %2789 = vmatprep.subr.bf16.mxu1 %v3114_v1  ;;  %v1203_v2 = vshll.u32 %v3042_v59, 16 }
  0x5d   : > { %2734 = vmatmul.mubr.bf16.gmra.mxu1 %v3005_v63  ;;  %2754 = vmatpush3.bf16.msra.mxu0 %v3007_v3  ;;  %v1198_v63 = vsel %vm577_vm1, %v1193_v57, %v1197_v58  ;;  %v3043_v3 = vld [vmem:[%s3720_s1 + $0x1d8] sm:$0xff]  }
  0x5e   : > { %2701 = vmatprep.mubr.msk.bf16.mxu0 %vm3115_vm0, %v3114_v1  ;;  %2737 = vmatprep.mubr.msk.bf16.mxu1 %vm3115_vm0, %v3114_v1  ;;  %v1205_v6 = vrot.slane %v1203_v2, 1 }
  0x5f   : > { %2755 = vmatprep.subr.bf16.mxu0 %v3114_v1  ;;  %2790 = vmatpush3.bf16.msra.mxu1 %v3012_v5  ;;  %v1201_v5 = vor.u32 %v1199_v0, %v1197_v58  ;;  %v3065_v0 = vld [vmem:[%s3193_s11 + $0x50] sm:$0x1f]  }
  0x60   : > { %2791 = vmatprep.subr.bf16.mxu1 %v3114_v1 }
  0x61   : > { %2756 = vmatpush3.bf16.msra.mxu0 %v3011_v7  ;;  %v1344_v7 = vld [vmem:[%s3193_s11 + $0x4] sm:$0xf]  ;;  %v1206_v12 = vsel %vm577_vm1, %v1201_v5, %v1205_v6 }
  0x62   : > { %2757 = vmatprep.subr.bf16.mxu0 %v3114_v1 }
  0x63   : > { %2792 = vmatpush3.bf16.msra.mxu1 %v3014_v10  ;;  %v3041_v10 = vld [vmem:[%s3193_s11 + $0x9c] sm:$0xff]  }
  0x64   : > { %2702 = vmatmul.mubr.bf16.gmra.mxu0 %v605_v13  ;;  %2793 = vmatprep.subr.bf16.mxu1 %v3114_v1  ;;  %v3046_v13 = vld [vmem:[%s3720_s1 + $0x188] sm:$0xff]  }
  0x65   : > { %2738 = vmatmul.mubr.bf16.gmra.mxu1 %v3010_v11  ;;  %2758 = vmatpush3.bf16.msra.mxu0 %v3013_v14  ;;  %v2358_v11 = vcombine.low %v1344_v7, %v3480_v8  ;;  %v3053_v14 = vld [vmem:[%s3193_s11 + $0x30] sm:$0xff]  }
  0x66   : > { %2705 = vmatprep.mubr.msk.bf16.mxu0 %vm3115_vm0, %v3114_v1  ;;  %2741 = vmatprep.mubr.msk.bf16.mxu1 %vm3115_vm0, %v3114_v1  ;;  %v1622_v28 = vshrl.u32 %v3053_v14, 16 }
  0x67   : > { %2759 = vmatprep.subr.bf16.mxu0 %v3114_v1  ;;  %2794 = vmatpush3.bf16.msra.mxu1 %v3017_v16  ;;  %v1207_v16 = vshrl.u32 %v3042_v59, 16  ;;  %v1399_v18 = vshll.u32 %v2358_v11, 16  ;;  %v1422_v59 = vrot.slane %v1420_v54, 1 }
  0x68   : > { %2795 = vmatprep.subr.bf16.mxu1 %v3114_v1 }
  0x69   : > { %2760 = vmatpush3.bf16.msra.mxu0 %v3018_v19  ;;  %v3049_v19 = vld [vmem:[%s3720_s1 + $0x180] sm:$0xff]   ;;  %v1209_v24 = vor.u32 %v1207_v16, %v1205_v6  ;;  %v1401_v26 = vrot.slane %v1399_v18, 1  ;;  %v3067_v18 = vld [vmem:[%s3720_s1 + $0x208] sm:$0xff]  }
  0x6a   : > { %2761 = vmatprep.subr.bf16.mxu0 %v3114_v1 }
  0x6b   : > { %2796 = vmatpush3.bf16.msra.mxu1 %v3019_v20  ;;  %v3054_v20 = vld [vmem:[%s3193_s11 + $0x38] sm:$0xff]  }
  0x6c   : > { %2706 = vmatmul.mubr.bf16.gmra.mxu0 %v613_v23  ;;  %2797 = vmatprep.subr.bf16.mxu1 %v3114_v1  ;;  %v3047_v23 = vld [vmem:[%s3193_s11 + $0xa4] ss:$0 sps:$4 sm:$0xff]   ;;  %v1633_v42 = vshrl.u32 %v3054_v20, 16 }
  0x6d   : > { %2742 = vmatmul.mubr.bf16.gmra.mxu1 %v3016_v21  ;;  %2709 = vmatprep.mubr.msk.bf16.mxu0 %vm3115_vm0, %v3114_v1  ;;  %v1624_v21 = vshll.u32 %v3053_v14, 16 }
  0x6e   : > { %2745 = vmatprep.mubr.msk.bf16.mxu1 %vm3115_vm0, %v3114_v1  ;;  %2762 = vmatpush3.bf16.msra.mxu0 %v3020_v22  ;;  %v3050_v22 = vld [vmem:[%s3720_s1 + $0x1c0] sm:$0xff]  }
  0x6f   : > { %2798 = vmatpush3.bf16.msra.mxu1 %v3022_v25  ;;  %2763 = vmatprep.subr.bf16.mxu0 %v3114_v1  ;;  %v1397_v25 = vshrl.u32 %v2358_v11, 16  ;;  %v1626_v29 = vrot.slane %v1624_v21, 1  ;;  %v3068_v21 = vld [vmem:[%s3720_s1 + $0x200] sm:$0xff]  }
  0x70   : > { %2799 = vmatprep.subr.bf16.mxu1 %v3114_v1 }
  0x71   : > { %v1627_v34 = vor.u32 %v1626_v29, %v1622_v28  ;;  %v1821_v28 = vrot.slane %v3538_v47, 1 }
  0x72   : > { %2764 = vmatpush3.bf16.msra.mxu0 %v3023_v27  ;;  %v1404_v27 = vshll.u32 %v3502_v17, 16 }
  0x73   : > { %2800 = vmatpush3.bf16.msra.mxu1 %v3024_v30  ;;  %2821 = vmatprep.subr.bf16.mxu0 %v3114_v1  ;;  %v1629_v30 = vshll.u32 %v3054_v20, 16  ;;  %v1657_v20 = vshrl.u32 %v3065_v0, 16 }
  0x74   : > { %2710 = vmatmul.mubr.bf16.gmra.mxu0 %v616_v31  ;;  %2857 = vmatprep.subr.bf16.mxu1 %v3114_v1  ;;  %v1402_v31 = vor.u32 %v1401_v26, %v1397_v25 }
  0x75   : > { %2746 = vmatmul.mubr.bf16.gmra.mxu1 %v3021_v32  ;;  %2765 = vmatprep.mubr.msk.bf16.mxu0 %vm3115_vm0, %v3114_v1  ;;  %v1406_v32 = vrot.slane %v1404_v27, 1  ;;  %v1631_v35 = vrot.slane %v1629_v30, 1  ;;  %v1817_v27 = vrot.slane %v3502_v17, 1 }
  0x76   : > { %2801 = vmatprep.mubr.msk.bf16.mxu1 %vm3115_vm0, %v3114_v1 }
  0x77   : > { %v1407_v37 = vsel %vm577_vm1, %v1402_v31, %v1406_v32  ;;  %v1635_v48 = vor.u32 %v1633_v42, %v1631_v35  ;;  %v1819_v31 = vrot.slane %v3522_v33, 1 }
  0x7c   : > { %2766 = vmatmul.mubr.bf16.vlgmr.msra.gmra.mxu0 %v3025_v39  ;;  %v1408_v39 = vshrl.u32 %v3502_v17, 16  ;;  %v1820_v17 = vsel %vm1815_vm2, %v1817_v27, %v1819_v31 }
  0x7d   : > { %2802 = vmatmul.mubr.bf16.vlgmr.msra.gmra.mxu1 %v1182_v41  ;;  %2822 = vmatpush3.bf16.msra.mxu0 %v3028_v40  ;;  %v1412_v40 = vshll.u32 %v3522_v33, 16  ;;  %v1632_v41 = vsel %vm577_vm1, %v1627_v34, %v1631_v35 }
  0x7e   : > { %2823 = vmatprep.subr.bf16.mxu0 %v3114_v1  ;;  %2769 = vmatprep.mubr.msk.bf16.mxu0 %vm3115_vm0, %v3114_v1 }
  0x7f   : > { %2805 = vmatprep.mubr.msk.bf16.mxu1 %vm3115_vm0, %v3114_v1  ;;  %2858 = vmatpush3.bf16.msra.mxu1 %v3032_v44  ;;  %v3056_v44 = vld [vmem:[%s3720_s1 + $0x230] sm:$0xff]   ;;  %v1414_v46 = vrot.slane %v1412_v40, 1 }
  0x80   : > { %2859 = vmatprep.subr.bf16.mxu1 %v3114_v1 }
  0x81   : > { %2824 = vmatpush3.bf16.msra.mxu0 %v3029_v45  ;;  %v1410_v45 = vor.u32 %v1408_v39, %v1406_v32  ;;  %v1418_v58 = vor.u32 %v1416_v53, %v1414_v46  ;;  %v1822_v32 = vsel %vm1815_vm2, %v1819_v31, %v1821_v28 }
  0x82   : > { %2825 = vmatprep.subr.bf16.mxu0 %v3114_v1 }
  0x83   : > { %2860 = vmatpush3.bf16.msra.mxu1 %v3034_v49  ;;  %v1639_v49 = vrot.slane %v1637_v43, 1  ;;  %v1423_v2 = vsel %vm577_vm1, %v1418_v58, %v1422_v59 }
  0x84   : > { %2770 = vmatmul.mubr.bf16.gmra.mxu0 %v3030_v50  ;;  %2861 = vmatprep.subr.bf16.mxu1 %v3114_v1  ;;  %v3061_v50 = vld [vmem:[%s3193_s11 + $0x48] sm:$0xff]  }
  0x85   : > { %2806 = vmatmul.mubr.bf16.gmra.mxu1 %v1190_v52  ;;  %2826 = vmatpush3.bf16.msra.mxu0 %v3033_v51  ;;  %v1415_v51 = vsel %vm577_vm1, %v1410_v45, %v1414_v46  ;;  %v3059_v52 = vld [vmem:[%s3720_s1 + $0x228] sm:$0xff]   ;;  %v1645_v57 = vshll.u32 %v3061_v50, 16  ;;  %v1649_v7 = vshrl.u32 %v3061_v50, 16 }
  0x86   : > { %2773 = vmatprep.mubr.msk.bf16.mxu0 %vm3115_vm0, %v3114_v1  ;;  %2809 = vmatprep.mubr.msk.bf16.mxu1 %vm3115_vm0, %v3114_v1 }
  0x87   : > { %2827 = vmatprep.subr.bf16.mxu0 %v3114_v1  ;;  %2862 = vmatpush3.bf16.msra.mxu1 %v3038_v55  ;;  %v1640_v55 = vsel %vm577_vm1, %v1635_v48, %v1639_v49 }
  0x88   : > { %2863 = vmatprep.subr.bf16.mxu1 %v3114_v1 }
  0x89   : > { %2828 = vmatpush3.bf16.msra.mxu0 %v3037_v56  ;;  %v1641_v56 = vshrl.u32 %v3058_v36, 16 }
  0x8a   : > { %2829 = vmatprep.subr.bf16.mxu0 %v3114_v1 }
  0x8b   : > { %2864 = vmatpush3.bf16.msra.mxu1 %v3040_v60  ;;  %v3062_v60 = vld [vmem:[%s3720_s1 + $0x220] sm:$0xff]  }
  0x8c   : > { %2774 = vmatmul.mubr.bf16.gmra.mxu0 %v3035_v61  ;;  %2865 = vmatprep.subr.bf16.mxu1 %v3114_v1  ;;  %v3560_v61 = vld [vmem:[%s3193_s11 + $0x24] sm:$0x1f]  }
  0x8d   : > { %2810 = vmatmul.mubr.bf16.gmra.mxu1 %v1198_v63  ;;  %2830 = vmatpush3.bf16.msra.mxu0 %v3039_v62  ;;  %v1643_v62 = vor.u32 %v1641_v56, %v1639_v49  ;;  %v1647_v63 = vrot.slane %v1645_v57, 1  ;;  %v1428_v5 = vshll.u32 %v3560_v61, 16  ;;  %v1823_v29 = vrot.slane %v3560_v61, 1 }
  0x8e   : > { %2777 = vmatprep.mubr.msk.bf16.mxu0 %vm3115_vm0, %v3114_v1  ;;  %2813 = vmatprep.mubr.msk.bf16.mxu1 %vm3115_vm0, %v3114_v1 }
  0x8f   : > { %2831 = vmatprep.subr.bf16.mxu0 %v3114_v1  ;;  %2866 = vmatpush3.bf16.msra.mxu1 %v3043_v3  ;;  %v3063_v3 = vld [vmem:[%s3720_s1 + $0x218] sm:$0xff]   ;;  %v1648_v6 = vsel %vm577_vm1, %v1643_v62, %v1647_v63  ;;  %v1430_v11 = vrot.slane %v1428_v5, 1 }
  0x90   : > { %2867 = vmatprep.subr.bf16.mxu1 %v3114_v1 }
  0x91   : > { %2832 = vmatpush3.bf16.msra.mxu0 %v3044_v4  ;;  %v1424_v4 = vshrl.u32 %v3538_v47, 16 }
  0x92   : > { %2833 = vmatprep.subr.bf16.mxu0 %v3114_v1 }
  0x93   : > { %2868 = vmatpush3.bf16.msra.mxu1 %v3045_v9  ;;  %v1653_v9 = vshll.u32 %v3065_v0, 16 }
  0x94   : > { %2778 = vmatmul.mubr.bf16.gmra.mxu0 %v3041_v10  ;;  %2869 = vmatprep.subr.bf16.mxu1 %v3114_v1  ;;  %v1426_v10 = vor.u32 %v1424_v4, %v1422_v59 }
  0x95   : > { %2814 = vmatmul.mubr.bf16.gmra.mxu1 %v1206_v12  ;;  %2781 = vmatprep.mubr.msk.bf16.mxu0 %vm3115_vm0, %v3114_v1  ;;  %v3066_v12 = vld [vmem:[%s3720_s1 + $0x210] sm:$0xff]   ;;  %v1655_v14 = vrot.slane %v1653_v9, 1 }
  0x96   : > { %2817 = vmatprep.mubr.msk.bf16.mxu1 %vm3115_vm0, %v3114_v1  ;;  %2834 = vmatpush3.bf16.msra.mxu0 %v3046_v13  ;;  %v1651_v13 = vor.u32 %v1649_v7, %v1647_v63 }
  0x97   : > { %2870 = vmatpush3.bf16.msra.mxu1 %v3048_v15  ;;  %2835 = vmatprep.subr.bf16.mxu0 %v3114_v1  ;;  %v1431_v15 = vsel %vm577_vm1, %v1426_v10, %v1430_v11 }
  0x98   : > { %2871 = vmatprep.subr.bf16.mxu1 %v3114_v1  ;;  %v1656_v16 = vsel %vm577_vm1, %v1651_v13, %v1655_v14 }
  0x9a   : > { %2836 = vmatpush3.bf16.msra.mxu0 %v3049_v19  ;;  %v1432_v19 = vshrl.u32 %v3560_v61, 16 }
  0x9b   : > { %2872 = vmatpush3.bf16.msra.mxu1 %v3050_v22  ;;  %2893 = vmatprep.subr.bf16.mxu0 %v3114_v1  ;;  %v1794_v22 = vld [vmem:[%s3193_s11 + $0x4] sm:$0xe] }
  0x9c   : > { %2782 = vmatmul.mubr.bf16.gmra.mxu0 %v3047_v23  ;;  %2929 = vmatprep.subr.bf16.mxu1 %v3114_v1  ;;  %v1434_v23 = vor.u32 %v1432_v19, %v1430_v11  ;;  %v2426_v25 = vcombine.low %v1794_v22, %v3480_v8  ;;  %v1824_v8 = vsel %vm1815_vm2, %v1821_v28, %v1823_v29 }
  0x9d   : > { %2818 = vmatmul.mubr.bf16.gmra.mxu1 %v1209_v24  ;;  %2837 = vmatprep.mubr.msk.bf16.mxu0 %vm3115_vm0, %v3114_v1  ;;  %v1659_v24 = vor.u32 %v1657_v20, %v1655_v14 }
  0x9e   : > { %2873 = vmatprep.mubr.msk.bf16.mxu1 %vm3115_vm0, %v3114_v1  ;;  %v1816_v26 = vrot.slane %v2426_v25, 1 }
  0xa0   : > { %v1818_v30 = vsel %vm1815_vm2, %v1816_v26, %v1817_v27 }
  0xa4   : > { %2838 = vmatmul.mubr.bf16.vlgmr.msra.gmra.mxu0 %v1407_v37 }
  0xa5   : > { %2874 = vmatmul.mubr.bf16.vlgmr.msra.gmra.mxu1 %v1632_v41  ;;  %2894 = vmatpush3.bf16.msra.mxu0 %v3055_v38 }
  0xa6   : > { %2895 = vmatprep.subr.bf16.mxu0 %v3114_v1  ;;  %2841 = vmatprep.mubr.msk.bf16.mxu0 %vm3115_vm0, %v3114_v1 }
  0xa7   : > { %2877 = vmatprep.mubr.msk.bf16.mxu1 %vm3115_vm0, %v3114_v1  ;;  %2937 = vmatpush3.bf16.msra.mxu1 %v3055_v38 }
  0xa8   : > { %2930 = vmatprep.subr.bf16.mxu1 %v3114_v1 }
  0xa9   : > { %2896 = vmatpush3.bf16.msra.mxu0 %v3056_v44 }
  0xaa   : > { %2897 = vmatprep.subr.bf16.mxu0 %v3114_v1 }
  0xab   : > { %2938 = vmatpush3.bf16.msra.mxu1 %v3056_v44 }
  0xac   : > { %2842 = vmatmul.mubr.bf16.gmra.mxu0 %v1415_v51  ;;  %2931 = vmatprep.subr.bf16.mxu1 %v3114_v1 }
  0xad   : > { %2878 = vmatmul.mubr.bf16.gmra.mxu1 %v1640_v55  ;;  %2898 = vmatpush3.bf16.msra.mxu0 %v3059_v52 }
  0xae   : > { %2845 = vmatprep.mubr.msk.bf16.mxu0 %vm3115_vm0, %v3114_v1  ;;  %2881 = vmatprep.mubr.msk.bf16.mxu1 %vm3115_vm0, %v3114_v1 }
  0xaf   : > { %2899 = vmatprep.subr.bf16.mxu0 %v3114_v1  ;;  %2939 = vmatpush3.bf16.msra.mxu1 %v3059_v52 }
  0xb0   : > { %2932 = vmatprep.subr.bf16.mxu1 %v3114_v1 }
  0xb1   : > { %2900 = vmatpush3.bf16.msra.mxu0 %v3062_v60 }
  0xb2   : > { %2901 = vmatprep.subr.bf16.mxu0 %v3114_v1 }
  0xb3   : > { %2940 = vmatpush3.bf16.msra.mxu1 %v3062_v60 }
  0xb4   : > { %2846 = vmatmul.mubr.bf16.gmra.mxu0 %v1423_v2  ;;  %2933 = vmatprep.subr.bf16.mxu1 %v3114_v1 }
  0xb5   : > { %2882 = vmatmul.mubr.bf16.gmra.mxu1 %v1648_v6  ;;  %2902 = vmatpush3.bf16.msra.mxu0 %v3063_v3 }
  0xb6   : > { %2849 = vmatprep.mubr.msk.bf16.mxu0 %vm3115_vm0, %v3114_v1  ;;  %2885 = vmatprep.mubr.msk.bf16.mxu1 %vm3115_vm0, %v3114_v1 }
  0xb7   : > { %2941 = vmatpush3.bf16.msra.mxu1 %v3063_v3  ;;  %2903 = vmatprep.subr.bf16.mxu0 %v3114_v1 }
  0xb8   : > { %2934 = vmatprep.subr.bf16.mxu1 %v3114_v1 }
  0xb9   : > { %2904 = vmatpush3.bf16.msra.mxu0 %v3066_v12 }
  0xba   : > { %2905 = vmatprep.subr.bf16.mxu0 %v3114_v1 }
  0xbb   : > { %2942 = vmatpush3.bf16.msra.mxu1 %v3066_v12 }
  0xbc   : > { %2850 = vmatmul.mubr.bf16.gmra.mxu0 %v1431_v15  ;;  %2935 = vmatprep.subr.bf16.mxu1 %v3114_v1 }
  0xbd   : > { %2886 = vmatmul.mubr.bf16.gmra.mxu1 %v1656_v16  ;;  %2853 = vmatprep.mubr.msk.bf16.mxu0 %vm3115_vm0, %v3114_v1 }
  0xbe   : > { %2889 = vmatprep.mubr.msk.bf16.mxu1 %vm3115_vm0, %v3114_v1  ;;  %2906 = vmatpush3.bf16.msra.mxu0 %v3067_v18 }
  0xbf   : > { %2943 = vmatpush3.bf16.msra.mxu1 %v3067_v18  ;;  %2907 = vmatprep.subr.bf16.mxu0 %v3114_v1 }
  0xc0   : > { %2936 = vmatprep.subr.bf16.mxu1 %v3114_v1 }
  0xc2   : > { %2908 = vmatpush3.bf16.msra.mxu0 %v3068_v21 }
  0xc3   : > { %2944 = vmatpush3.bf16.msra.mxu1 %v3068_v21 }
  0xc4   : > { %2854 = vmatmul.mubr.bf16.gmra.mxu0 %v1434_v23 }
  0xc5   : > { %2890 = vmatmul.mubr.bf16.gmra.mxu1 %v1659_v24  ;;  %2909 = vmatprep.mubr.msk.bf16.mxu0 %vm3115_vm0, %v3114_v1 }
  0xc6   : > { %2921 = vmatprep.mubr.msk.bf16.mxu1 %vm3115_vm0, %v3114_v1 }
  0xcc   : > { %2910 = vmatmul.mubr.bf16.vlgmr.msra.gmra.mxu0 %v1818_v30 }
  0xcd   : > { %2922 = vmatmul.mubr.bf16.vlgmr.msra.gmra.mxu1 %v1824_v8  ;;  %2913 = vmatprep.mubr.msk.bf16.mxu0 %vm3115_vm0, %v3114_v1 }
  0xce   : > { %2925 = vmatprep.mubr.msk.bf16.mxu1 %vm3115_vm0, %v3114_v1 }
  0xd4   : > { %2914 = vmatmul.mubr.bf16.gmra.mxu0 %v1820_v17 }
  0xd5   : > { %2926 = vmatmul.mubr.bf16.gmra.mxu1 %v1823_v29  ;;  %2917 = vmatprep.mubr.msk.bf16.mxu0 %vm3115_vm0, %v3114_v1 }
  0xdc   : > { %2918 = vmatmul.mubr.bf16.gmra.mxu0 %v1822_v32 }
  0xec   : > { %v339_v34 = vpop.f32.mrf.mxu0 }
  0xed   : > { %v487_v35 = vpop.f32.mrf.mxu1 }
  0xee   : > { %v488_v36 = vadd.f32 %v487_v35, %v339_v34  ;;  %v2623_v37 = vpop.f32.mrf.mxu0 }
  0xef   : > { %v2659_v38 = vpop.f32.mrf.mxu1 }
  0xf0   : > { %v342_v39 = vpop.f32.mrf.mxu0 }
  0xf1   : > { %v490_v40 = vpop.f32.mrf.mxu1 }
  0xf2   : > { %v491_v41 = vadd.f32 %v490_v40, %v342_v39  ;;  %v2624_v33 = vpop.f32.mrf.mxu0 }
  0xf3   : > { %v2660_v42 = vpop.f32.mrf.mxu1 }
  0xf4   : > { %v347_v43 = vpop.f32.mrf.mxu0 }
  0xf5   : > { %v495_v44 = vpop.f32.mrf.mxu1 }
  0xf6   : > { %v496_v45 = vadd.f32 %v495_v44, %v347_v43  ;;  %v2627_v46 = vpop.f32.mrf.mxu0 }
  0xf7   : > { %v2663_v47 = vpop.f32.mrf.mxu1 }
  0xf8   : > { %v350_v48 = vpop.f32.mrf.mxu0 }
  0xf9   : > { %v498_v49 = vpop.f32.mrf.mxu1 }
  0xfa   : > { %v499_v1 = vadd.f32 %v498_v49, %v350_v48  ;;  %v2628_v50 = vpop.f32.mrf.mxu0 }
  0xfb   : > { %v2664_v51 = vpop.f32.mrf.mxu1 }
  0xfc   : > { %v355_v52 = vpop.f32.mrf.mxu0 }
  0xfd   : > { %v503_v53 = vpop.f32.mrf.mxu1 }
  0xfe   : > { %v504_v54 = vadd.f32 %v503_v53, %v355_v52  ;;  %v2631_v55 = vpop.f32.mrf.mxu0 }
  0xff   : > { %v2667_v56 = vpop.f32.mrf.mxu1 }
 0x100   : > { %v358_v57 = vpop.f32.mrf.mxu0 }
 0x101   : > { %v506_v58 = vpop.f32.mrf.mxu1 }
 0x102   : > { %v507_v59 = vadd.f32 %v506_v58, %v358_v57  ;;  %v2632_v60 = vpop.f32.mrf.mxu0 }
 0x103   : > { %v2668_v61 = vpop.f32.mrf.mxu1 }
 0x104   : > { %v363_v62 = vpop.f32.mrf.mxu0 }
 0x105   : > { %v511_v63 = vpop.f32.mrf.mxu1 }
 0x106   : > { %v512_v0 = vadd.f32 %v511_v63, %v363_v62  ;;  %v2635_v2 = vpop.f32.mrf.mxu0 }
 0x107   : > { %v2671_v3 = vpop.f32.mrf.mxu1 }
 0x108   : > { %v366_v4 = vpop.f32.mrf.mxu0 }
 0x109   : > { %v514_v5 = vpop.f32.mrf.mxu1 }
 0x10a   : > { %v515_v6 = vadd.f32 %v514_v5, %v366_v4  ;;  %v2636_v7 = vpop.f32.mrf.mxu0 }
 0x10b   : > { %v2672_v9 = vpop.f32.mrf.mxu1 }
 0x10c   : > { %v371_v10 = vpop.f32.mrf.mxu0 }
 0x10d   : > { %v519_v11 = vpop.f32.mrf.mxu1 }
 0x10e   : > { %v520_v12 = vadd.f32 %v519_v11, %v371_v10  ;;  %v2639_v13 = vpop.f32.mrf.mxu0 }
 0x10f   : > { %v2675_v14 = vpop.f32.mrf.mxu1 }
 0x110   : > { %v374_v15 = vpop.f32.mrf.mxu0 }
 0x111   : > { %v522_v16 = vpop.f32.mrf.mxu1 }
 0x112   : > { %v2640_v18 = vpop.f32.mrf.mxu0 }
 0x113   : > { %v2676_v19 = vpop.f32.mrf.mxu1 }
 0x114   : > { %v704_v20 = vpop.f32.mrf.mxu0 }
 0x115   : > { %v742_v21 = vadd.f32 %v704_v20, %v488_v36  ;;  %v888_v22 = vpop.f32.mrf.mxu1 }
 0x116   : > { %v2695_v23 = vpop.f32.mrf.mxu0 }
 0x117   : > { %v926_v24 = vadd.f32 %v888_v22, %v742_v21  ;;  %v2731_v25 = vpop.f32.mrf.mxu1 }
 0x118   : > { %v707_v26 = vpop.f32.mrf.mxu0 }
 0x119   : > { %v743_v27 = vadd.f32 %v707_v26, %v491_v41  ;;  %v891_v28 = vpop.f32.mrf.mxu1 }
 0x11a   : > { %v2696_v29 = vpop.f32.mrf.mxu0 }
 0x11b   : > { %v927_v30 = vadd.f32 %v891_v28, %v743_v27  ;;  %v2732_v8 = vpop.f32.mrf.mxu1 }
 0x11c   : > { %v712_v31 = vpop.f32.mrf.mxu0 }
 0x11d   : > { %v744_v17 = vadd.f32 %v712_v31, %v496_v45  ;;  %v896_v32 = vpop.f32.mrf.mxu1 }
 0x11e   : > { %v2699_v34 = vpop.f32.mrf.mxu0 }
 0x11f   : > { %v928_v35 = vadd.f32 %v896_v32, %v744_v17  ;;  %v2735_v37 = vpop.f32.mrf.mxu1 }
 0x120   : > { %v715_v38 = vpop.f32.mrf.mxu0 }
 0x121   : > { %v745_v39 = vadd.f32 %v715_v38, %v499_v1  ;;  %v899_v40 = vpop.f32.mrf.mxu1 }
 0x122   : > { %v2700_v36 = vpop.f32.mrf.mxu0 }
 0x123   : > { %v929_v33 = vadd.f32 %v899_v40, %v745_v39  ;;  %v2736_v42 = vpop.f32.mrf.mxu1 }
 0x124   : > { %v720_v43 = vpop.f32.mrf.mxu0 }
 0x125   : > { %v746_v44 = vadd.f32 %v720_v43, %v504_v54  ;;  %v904_v46 = vpop.f32.mrf.mxu1 }
 0x126   : > { %v2703_v41 = vpop.f32.mrf.mxu0 }
 0x127   : > { %v930_v47 = vadd.f32 %v904_v46, %v746_v44  ;;  %v2739_v48 = vpop.f32.mrf.mxu1 }
 0x128   : > { %v723_v49 = vpop.f32.mrf.mxu0 }
 0x129   : > { %v747_v50 = vadd.f32 %v723_v49, %v507_v59  ;;  %v907_v51 = vpop.f32.mrf.mxu1 }
 0x12a   : > { %v2704_v45 = vpop.f32.mrf.mxu0 }
 0x12b   : > { %v931_v52 = vadd.f32 %v907_v51, %v747_v50  ;;  %v2740_v53 = vpop.f32.mrf.mxu1 }
 0x12c   : > { %v728_v55 = vpop.f32.mrf.mxu0 }
 0x12d   : > { %v748_v56 = vadd.f32 %v728_v55, %v512_v0  ;;  %v912_v57 = vpop.f32.mrf.mxu1 }
 0x12e   : > { %v2707_v1 = vpop.f32.mrf.mxu0 }
 0x12f   : > { %v3620_v58 = vadd.f32 %v912_v57, %v748_v56  ;;  %v2743_v60 = vpop.f32.mrf.mxu1 }
 0x130   : > { %v731_v61 = vpop.f32.mrf.mxu0 }
 0x131   : > { %v749_v62 = vadd.f32 %v731_v61, %v515_v6  ;;  %v915_v54 = vpop.f32.mrf.mxu1 }
 0x132   : > { %v2708_v63 = vpop.f32.mrf.mxu0 }
 0x133   : > { %v3622_v2 = vadd.f32 %v915_v54, %v749_v62  ;;  %v2744_v3 = vpop.f32.mrf.mxu1 }
 0x134   : > { %v736_v4 = vpop.f32.mrf.mxu0 }
 0x135   : > { %v750_v59 = vadd.f32 %v736_v4, %v520_v12  ;;  %v920_v5 = vpop.f32.mrf.mxu1 }
 0x136   : > { %v2711_v7 = vpop.f32.mrf.mxu0 }
 0x137   : > { %v3624_v9 = vadd.f32 %v920_v5, %v750_v59  ;;  %v2747_v10 = vpop.f32.mrf.mxu1 }
 0x138   : > { %v739_v0 = vpop.f32.mrf.mxu0 }
 0x139   : > { %v923_v11 = vpop.f32.mrf.mxu1 }
 0x13a   : > { %v2712_v13 = vpop.f32.mrf.mxu0 }
 0x13b   : > { %v2748_v14 = vpop.f32.mrf.mxu1 }
 0x13c   : > { %v1072_v15 = vpop.f32.mrf.mxu0 }
 0x13d   : > { %v1110_v16 = vadd.f32 %v1072_v15, %v926_v24  ;;  %v1297_v18 = vpop.f32.mrf.mxu1 }
 0x13e   : > { %v2767_v6 = vpop.f32.mrf.mxu0 }
 0x13f   : > { %v3626_v19 = vadd.f32 %v1297_v18, %v1110_v16  ;;  %v2803_v20 = vpop.f32.mrf.mxu1 }
 0x140   : > { %v1075_v21 = vpop.f32.mrf.mxu0 }
 0x141   : > { %v1111_v22 = vadd.f32 %v1075_v21, %v927_v30  ;;  %v1300_v23 = vpop.f32.mrf.mxu1 }
 0x142   : > { %v2768_v12 = vpop.f32.mrf.mxu0 }
 0x143   : > { %v3628_v25 = vadd.f32 %v1300_v23, %v1111_v22  ;;  %v2804_v26 = vpop.f32.mrf.mxu1 }
 0x144   : > { %v1080_v27 = vpop.f32.mrf.mxu0 }
 0x145   : > { %v1112_v28 = vadd.f32 %v1080_v27, %v928_v35  ;;  %v1305_v29 = vpop.f32.mrf.mxu1 }
 0x146   : > { %v2771_v8 = vpop.f32.mrf.mxu0 }
 0x147   : > { %v3630_v31 = vadd.f32 %v1305_v29, %v1112_v28  ;;  %v2807_v17 = vpop.f32.mrf.mxu1 }
 0x148   : > { %v1083_v24 = vpop.f32.mrf.mxu0 }
 0x149   : > { %v1113_v32 = vadd.f32 %v1083_v24, %v929_v33  ;;  %v1308_v34 = vpop.f32.mrf.mxu1 }
 0x14a   : > { %v2772_v37 = vpop.f32.mrf.mxu0 }
 0x14b   : > { %v3632_v38 = vadd.f32 %v1308_v34, %v1113_v32  ;;  %v2808_v39 = vpop.f32.mrf.mxu1 }
 0x14c   : > { %v1088_v30 = vpop.f32.mrf.mxu0 }
 0x14d   : > { %v1114_v40 = vadd.f32 %v1088_v30, %v930_v47  ;;  %v1313_v36 = vpop.f32.mrf.mxu1 }
 0x14e   : > { %v2775_v42 = vpop.f32.mrf.mxu0 }
 0x14f   : > { %v3634_v43 = vadd.f32 %v1313_v36, %v1114_v40  ;;  %v2811_v44 = vpop.f32.mrf.mxu1 }
 0x150   : > { %v1091_v35 = vpop.f32.mrf.mxu0 }
 0x151   : > { %v1115_v46 = vadd.f32 %v1091_v35, %v931_v52  ;;  %v1316_v41 = vpop.f32.mrf.mxu1 }
 0x152   : > { %v2776_v48 = vpop.f32.mrf.mxu0 }
 0x153   : > { %v3636_v49 = vadd.f32 %v1316_v41, %v1115_v46  ;;  %v2812_v50 = vpop.f32.mrf.mxu1 }
 0x154   : > { %v1096_v33 = vpop.f32.mrf.mxu0 }
 0x155   : > { %v1321_v51 = vpop.f32.mrf.mxu1  ;;  %v1116_v40 = vadd.f32 %v1096_v33, %v3620_v58 }
 0x156   : > { %v2779_v45 = vpop.f32.mrf.mxu0 }
 0x157   : > { %v2815_v53 = vpop.f32.mrf.mxu1  ;;  %v1341_v46 = vadd.f32 %v1321_v51, %v1116_v40 }
 0x158   : > { %v1099_v55 = vpop.f32.mrf.mxu0 }
 0x159   : > { %v1324_v56 = vpop.f32.mrf.mxu1  ;;  %v1117_v41 = vadd.f32 %v1099_v55, %v3622_v2  ;;  %v3658_v2 = vld [vmem:[%s3721_s2] ss:$0 sm:$0xff] }
 0x15a   : > { %v2780_v57 = vpop.f32.mrf.mxu0 }
 0x15b   : > { %v2816_v47 = vpop.f32.mrf.mxu1 }
 0x15c   : > { %v1104_v1 = vpop.f32.mrf.mxu0 }
 0x15d   : > { %v1329_v60 = vpop.f32.mrf.mxu1 }
 0x15e   : > { %v2783_v61 = vpop.f32.mrf.mxu0 }
 0x15f   : > { %v2819_v62 = vpop.f32.mrf.mxu1  ;;  %v1342_v61 = vadd.f32 %v1324_v56, %v1117_v41 }
 0x160   : > { %v1107_v54 = vpop.f32.mrf.mxu0  ;;  %v1118_v62 = vadd.f32 %v1104_v1, %v3624_v9 }
 0x161   : > { %v1332_v63 = vpop.f32.mrf.mxu1 }
 0x162   : > { %v2784_v52 = vpop.f32.mrf.mxu0 }
 0x163   : > { %v2820_v3 = vpop.f32.mrf.mxu1 }
 0x164   : > { %v1522_v4 = vpop.f32.mrf.mxu0 }
 0x165   : > { %v1747_v59 = vpop.f32.mrf.mxu1  ;;  %v1560_v50 = vadd.f32 %v1522_v4, %v3626_v19  ;;  %v1343_v4 = vadd.f32 %v1329_v60, %v1118_v62 }
 0x166   : > { %v2839_v5 = vpop.f32.mrf.mxu0 }
 0x167   : > { %v2875_v7 = vpop.f32.mrf.mxu1  ;;  %v1785_v63 = vadd.f32 %v1747_v59, %v1560_v50 }
 0x168   : > { %v1525_v10 = vpop.f32.mrf.mxu0 }
 0x169   : > { %v1750_v0 = vpop.f32.mrf.mxu1  ;;  %v1561_v58 = vadd.f32 %v1525_v10, %v3628_v25 }
 0x16a   : > { %v2840_v11 = vpop.f32.mrf.mxu0 }
 0x16b   : > { %v2876_v13 = vpop.f32.mrf.mxu1  ;;  %v1786_v7 = vadd.f32 %v1750_v0, %v1561_v58 }
 0x16c   : > { %v1530_v14 = vpop.f32.mrf.mxu0 }
 0x16d   : > { %v3638_v15 = vpop.f32.mrf.mxu1  ;;  %v1562_v9 = vadd.f32 %v1530_v14, %v3630_v31 }
 0x16e   : > { %v2843_v16 = vpop.f32.mrf.mxu0 }
 0x16f   : > { %v2879_v18 = vpop.f32.mrf.mxu1  ;;  %v1787_v31 = vadd.f32 %v3638_v15, %v1562_v9 }
 0x170   : > { %v1533_v6 = vpop.f32.mrf.mxu0 }
 0x171   : > { %v3640_v20 = vpop.f32.mrf.mxu1  ;;  %v1563_v14 = vadd.f32 %v1533_v6, %v3632_v38 }
 0x172   : > { %v2844_v21 = vpop.f32.mrf.mxu0 }
 0x173   : > { %v2880_v22 = vpop.f32.mrf.mxu1  ;;  %v1788_v38 = vadd.f32 %v3640_v20, %v1563_v14 }
 0x174   : > { %v3642_v23 = vpop.f32.mrf.mxu0 }
 0x175   : > { %v3644_v12 = vpop.f32.mrf.mxu1  ;;  %v1564_v6 = vadd.f32 %v3642_v23, %v3634_v43 }
 0x176   : > { %v2847_v26 = vpop.f32.mrf.mxu0 }
 0x177   : > { %v2883_v27 = vpop.f32.mrf.mxu1  ;;  %v1789_v50 = vadd.f32 %v3644_v12, %v1564_v6 }
 0x178   : > { %v3646_v28 = vpop.f32.mrf.mxu0 }
 0x179   : > { %v3648_v29 = vpop.f32.mrf.mxu1  ;;  %v1565_v43 = vadd.f32 %v3646_v28, %v3636_v49 }
 0x17a   : > { %v2848_v8 = vpop.f32.mrf.mxu0 }
 0x17b   : > { %v2884_v17 = vpop.f32.mrf.mxu1  ;;  %v1790_v62 = vadd.f32 %v3648_v29, %v1565_v43 }
 0x17c   : > { %v1546_v24 = vpop.f32.mrf.mxu0 }
 0x17d   : > { %v1771_v32 = vpop.f32.mrf.mxu1  ;;  %v1566_v53 = vadd.f32 %v1546_v24, %v1341_v46 }
 0x17e   : > { %v2851_v34 = vpop.f32.mrf.mxu0 }
 0x17f   : > { %v2887_v37 = vpop.f32.mrf.mxu1  ;;  %v1791_v52 = vadd.f32 %v1771_v32, %v1566_v53 }
 0x180   : > { %v1549_v39 = vpop.f32.mrf.mxu0 }
 0x181   : > { %v1774_v30 = vpop.f32.mrf.mxu1  ;;  %v1567_v3 = vadd.f32 %v1549_v39, %v1342_v61 }
 0x182   : > { %v2852_v36 = vpop.f32.mrf.mxu0 }
 0x183   : > { %v2888_v42 = vpop.f32.mrf.mxu1  ;;  %v1792_v59 = vadd.f32 %v1774_v30, %v1567_v3 }
 0x184   : > { %v1554_v44 = vpop.f32.mrf.mxu0 }
 0x185   : > { %v1779_v35 = vpop.f32.mrf.mxu1  ;;  %v1568_v10 = vadd.f32 %v1554_v44, %v1343_v4 }
 0x186   : > { %v2855_v48 = vpop.f32.mrf.mxu0 }
 0x187   : > { %v2891_v45 = vpop.f32.mrf.mxu1  ;;  %v1793_v8 = vadd.f32 %v1779_v35, %v1568_v10 }
 0x188   : > { %v1557_v57 = vpop.f32.mrf.mxu0 }
 0x189   : > { %v1782_v47 = vpop.f32.mrf.mxu1 }
 0x18a   : > { %v2856_v54 = vpop.f32.mrf.mxu0 }
 0x18b   : > { %v2892_v33 = vpop.f32.mrf.mxu1 }
 0x18c   : > { %v1912_v51 = vpop.f32.mrf.mxu0 }
 0x18d   : > { %v1950_v19 = vadd.f32 %v1912_v51, %v1785_v63  ;;  %v1936_v55 = vpop.f32.mrf.mxu1 }
 0x18e   : > { %v1956_v5 = vadd.f32 %v1936_v55, %v1791_v52  ;;  %v2911_v56 = vpop.f32.mrf.mxu0 }
 0x18f   : > { %v3662_v1 = vadd.f32 %v3658_v2, %v1950_v19  ;;  %v2923_v25 = vpop.f32.mrf.mxu1 }
 0x190   : > { %v3665_v11 = vadd.f32 %v3658_v2, %v1956_v5  ;;  %v1915_v13 = vpop.f32.mrf.mxu0 }
 0x191   : > { %v2436_v16 = vmul.f32 -1.442695, %v3662_v1  ;;  %v1951_v18 = vadd.f32 %v1915_v13, %v1786_v7  ;;  %v1939_v21 = vpop.f32.mrf.mxu1 }
 0x192   : > { %v2442_v60 = vmul.f32 -1.442695, %v3665_v11  ;;  %v1957_v22 = vadd.f32 %v1939_v21, %v1792_v59  ;;  %v2912_v0 = vpop.f32.mrf.mxu0 }
 0x193   : > { %3070 = vpow2.f32 %v2436_v16  ;;  %v3672_v26 = vadd.f32 %v3658_v2, %v1951_v18  ;;  %v2924_v27 = vpop.f32.mrf.mxu1 }
 0x194   : > { %3072 = vpow2.f32 %v2442_v60  ;;  %v3675_v17 = vadd.f32 %v3658_v2, %v1957_v22  ;;  %v1920_v24 = vpop.f32.mrf.mxu0 }
 0x195   : > { %v2437_v32 = vmul.f32 -1.442695, %v3672_v26  ;;  %v1952_v34 = vadd.f32 %v1920_v24, %v1787_v31  ;;  %v1944_v37 = vpop.f32.mrf.mxu1 }
 0x196   : > { %v2443_v39 = vmul.f32 -1.442695, %v3675_v17  ;;  %v1958_v15 = vadd.f32 %v1944_v37, %v1793_v8  ;;  %v2915_v30 = vpop.f32.mrf.mxu0 }
 0x197   : > { %3074 = vpow2.f32 %v2437_v32  ;;  %v3683_v40 = vadd.f32 %v3658_v2, %v1952_v34  ;;  %v2927_v36 = vpop.f32.mrf.mxu1 }
 0x198   : > { %3076 = vpow2.f32 %v2443_v39  ;;  %v3686_v42 = vadd.f32 %v3658_v2, %v1958_v15  ;;  %v1923_v44 = vpop.f32.mrf.mxu0 }
 0x199   : > { %v2438_v35 = vmul.f32 -1.442695, %v3683_v40  ;;  %v1953_v46 = vadd.f32 %v1923_v44, %v1788_v38  ;;  %v1947_v41 = vpop.f32.mrf.mxu1 }
 0x19a   : > { %v2444_v48 = vmul.f32 -1.442695, %v3686_v42  ;;  %v2916_v20 = vpop.f32.mrf.mxu0 }
 0x19b   : > { %3078 = vpow2.f32 %v2438_v35  ;;  %v3694_v23 = vadd.f32 %v3658_v2, %v1953_v46  ;;  %v2928_v45 = vpop.f32.mrf.mxu1 }
 0x19c   : > { %3080 = vpow2.f32 %v2444_v48  ;;  %v1928_v53 = vpop.f32.mrf.mxu0 }
 0x19d   : > { %v2439_v57 = vmul.f32 -1.442695, %v3694_v23  ;;  %v1954_v47 = vadd.f32 %v1928_v53, %v1789_v50 }
 0x19e   : > { %v2919_v61 = vpop.f32.mrf.mxu0 }
 0x19f   : > { %3082 = vpow2.f32 %v2439_v57  ;;  %v3699_v54 = vadd.f32 %v3658_v2, %v1954_v47 }
 0x1a0   : > { %v3071_v12 = vpop.eup %3070  ;;  %v1931_v63 = vpop.f32.mrf.mxu0 }
 0x1a1   : > { %v3073_v49 = vpop.eup %3072  ;;  %v2002_v28 = vadd.f32 1.0, %v3071_v12  ;;  %v2440_v58 = vmul.f32 -1.442695, %v3699_v54  ;;  %v1955_v33 = vadd.f32 %v1931_v63, %v1790_v62 }
 0x1a2   : > { %v2008_v52 = vadd.f32 1.0, %v3073_v49  ;;  %v2920_v3 = vpop.f32.mrf.mxu0 }
 0x1a3   : > { %v1971_v51 = vadd.f32 %v3658_v2, %v1955_v33  ;;  %3084 = vrcp.f32 %v2002_v28 }
 0x1a4   : > { %v3075_v19 = vpop.eup %3074  ;;  %3086 = vpow2.f32 %v2440_v58 }
 0x1a5   : > { %v3077_v55 = vpop.eup %3076  ;;  %v2003_v29 = vadd.f32 1.0, %v3075_v19  ;;  %v2441_v4 = vmul.f32 -1.442695, %v1971_v51  ;;  %3088 = vrcp.f32 %v2008_v52 }
 0x1a6   : > { %v2009_v5 = vadd.f32 1.0, %v3077_v55 }
 0x1a7   : > { %3090 = vrcp.f32 %v2003_v29 }
 0x1a8   : > { %v3079_v56 = vpop.eup %3078  ;;  %3092 = vrcp.f32 %v2009_v5 }
 0x1a9   : > { %v3081_v7 = vpop.eup %3080  ;;  %v2004_v9 = vadd.f32 1.0, %v3079_v56  ;;  %3094 = vpow2.f32 %v2441_v4 }
 0x1aa   : > { %v2010_v25 = vadd.f32 1.0, %v3081_v7 }
 0x1ac   : > { %v3083_v59 = vpop.eup %3082  ;;  %3096 = vrcp.f32 %v2010_v25 }
 0x1ad   : > { %3098 = vrcp.f32 %v2004_v9  ;;  %v2005_v2 = vadd.f32 1.0, %v3083_v59 }
 0x1af   : > { %3100 = vrcp.f32 %v2005_v2 }
 0x1b0   : > { %v3085_v10 = vpop.eup %3084 }
 0x1b1   : > { %v3087_v13 = vpop.eup %3086  ;;  %v2029_v22 = vmul.f32 %v3085_v10, %v3662_v1 }
 0x1b2   : > { %v3089_v16 = vpop.eup %3088  ;;  %v2006_v18 = vadd.f32 1.0, %v3087_v13 }
 0x1b3   : > { %v2035_v14 = vmul.f32 %v3089_v16, %v3665_v11 }
 0x1b4   : > { %v3091_v21 = vpop.eup %3090  ;;  %3102 = vrcp.f32 %v2006_v18 }
 0x1b5   : > { %v3093_v60 = vpop.eup %3092  ;;  %v2030_v0 = vmul.f32 %v3091_v21, %v3672_v26 }
 0x1b6   : > { %v3095_v31 = vpop.eup %3094  ;;  %v2036_v27 = vmul.f32 %v3093_v60, %v3675_v17 }
 0x1b7   : > { %v2468_v8 = vpack.c.bf16 %v2030_v0, %v2029_v22  ;;  %v2007_v24 = vadd.f32 1.0, %v3095_v31 }
 0x1b8   : > { %v2483_v32 = vpack.c.bf16 %v2036_v27, %v2035_v14 }
 0x1b9   : > { %v3097_v34 = vpop.eup %3096  ;;  %2469 = vst [vmem:[%s175_s22] sm:$0xff] %v2468_v8   ;;  %3104 = vrcp.f32 %v2007_v24 }
 0x1ba   : > { %v3099_v37 = vpop.eup %3098  ;;  %2487 = vst [vmem:[%s175_s22 + $0x18] sm:$0xff] %v2483_v32   ;;  %v2037_v1 = vmul.f32 %v3097_v34, %v3686_v42 }
 0x1bb   : > { %v2031_v11 = vmul.f32 %v3099_v37, %v3683_v40 }
 0x1bc   : > { %v3101_v26 = vpop.eup %3100  ;;  %v2464_v39 = vpack.c.bf16 %v2037_v1, %v2037_v1 }
 0x1bd   : > { %v2032_v15 = vmul.f32 %v3101_v26, %v3694_v23 }
 0x1be   : > { %2083 = vst [vmem:[%s175_s22 + $0x20] sm:$0xf] %v2464_v39 }
 0x1bf   : > { %v2473_v30 = vpack.c.bf16 %v2032_v15, %v2031_v11 }
 0x1c1   : > { %2485 = vst [vmem:[%s175_s22 + $0x8] sm:$0xff] %v2473_v30   ;;  %v3103_v17 = vpop.eup %3102 }
 0x1c2   : > { %v2033_v6 = vmul.f32 %v3103_v17, %v3699_v54 }
 0x1c6   : > { %v3105_v38 = vpop.eup %3104 }
 0x1c7   : > { %v2034_v36 = vmul.f32 %v3105_v38, %v1971_v51 }
 0x1c9   : > { %v2478_v44 = vpack.c.bf16 %v2034_v36, %v2033_v6 }
 0x1cb   : > { %2486 = vst [vmem:[%s175_s22 + $0x10] sm:$0xff] %v2478_v44  }
 0x1cc PF: > { %s13_s12 = sadd.s32 1, %s3112_s12  }
 0x1cd   : > { %p10_p5 = scmp.ge.s32.totalorder %s13_s12, 4  }
 0x1cf   :  { %12 = sbr.rel (!%p10_p5) target bundleno = 1 (0x1), region = 73 }

// kernel: a_call__.13
= control target key start
LH: loop header
LB: loop body
LE: loop exit
PB: predicated region body
PF: predicated region fallthrough
CT: control target
= control target key end

     0   :  { %v444_v1 = vmov 0   ;;  %v229_v19 = vlaneseq  ;;  %s534_s1 = inlined_call_operand.vmem [shape: bf16[128,256], index: 1, kind: input, shape index: {}]   ;;  %s535_s0 = inlined_call_operand.vmem [shape: bf16[32,128], index: 0, kind: input, shape index: {}]   ;;  %s536_s2 = inlined_call_operand.vmem [shape: f32[1,256], index: 2, kind: input, shape index: {}]   ;;  %s537_s3 = inlined_call_operand.vmem [shape: bf16[32,256], index: 3, kind: output, shape index: {}]  }
   0x1   :  { %v386_v0 = vld [vmem:[%s534_s1 + $0x74] ss:$8 sps:$4 sm:$0xff]   ;;  %179 = vmatprep.mubr.bf16.mxu0 %v444_v1  ;;  %189 = vmatprep.mubr.bf16.mxu1 %v444_v1  ;;  %v388_v2 = vld [vmem:[%s534_s1 + $0x70] ss:$8 sps:$4 sm:$0xff]   ;;  %v389_v3 = vld [vmem:[%s534_s1 + $0x64] ss:$8 sps:$4 sm:$0xff]  }
   0x2   :  { %147 = vmatprep.subr.bf16.mxu0 %v386_v0  ;;  %369 = vmatprep.subr.bf16.mxu1 %v386_v0  ;;  %v391_v4 = vld [vmem:[%s534_s1 + $0x60] ss:$8 sps:$4 sm:$0xff]   ;;  %v392_v5 = vld [vmem:[%s534_s1 + $0x54] ss:$8 sps:$4 sm:$0xff]   ;;  %v394_v6 = vld [vmem:[%s534_s1 + $0x50] ss:$8 sps:$4 sm:$0xff]  }
   0x3   :  { %148 = vmatpush1.bf16.msra.mxu0 %v388_v2  ;;  %377 = vmatpush1.bf16.msra.mxu1 %v388_v2  ;;  %v395_v7 = vld [vmem:[%s534_s1 + $0x44] ss:$8 sps:$4 sm:$0xff]   ;;  %v397_v8 = vld [vmem:[%s534_s1 + $0x40] ss:$8 sps:$4 sm:$0xff]   ;;  %v398_v9 = vld [vmem:[%s534_s1 + $0x34] ss:$8 sps:$4 sm:$0xff]  }
   0x4   :  { %149 = vmatprep.subr.bf16.mxu0 %v389_v3  ;;  %370 = vmatprep.subr.bf16.mxu1 %v389_v3  ;;  %v400_v10 = vld [vmem:[%s534_s1 + $0x30] ss:$8 sps:$4 sm:$0xff]   ;;  %v401_v11 = vld [vmem:[%s534_s1 + $0x24] ss:$8 sps:$4 sm:$0xff]   ;;  %v403_v12 = vld [vmem:[%s534_s1 + $0x20] ss:$8 sps:$4 sm:$0xff]  }
   0x5   :  { %v404_v13 = vld [vmem:[%s534_s1 + $0x14] ss:$8 sps:$4 sm:$0xff]   ;;  %v406_v14 = vld [vmem:[%s534_s1 + $0x10] ss:$8 sps:$4 sm:$0xff]   ;;  %v407_v15 = vld [vmem:[%s534_s1 + $0x4] ss:$8 sps:$4 sm:$0xff]  }
   0x6   :  { %v409_v16 = vld [vmem:[%s534_s1] ss:$8 sps:$4 sm:$0xff]   ;;  %v230_v20 = vshrl.u32 %v229_v19, 7 }
   0x7   :  { %150 = vmatpush1.bf16.msra.mxu0 %v391_v4  ;;  %378 = vmatpush1.bf16.msra.mxu1 %v391_v4  ;;  %v410_v17 = vld [vmem:[%s535_s0] sm:$0xff]   ;;  %v411_v18 = vld [vmem:[%s535_s0 + $0x8] sm:$0xff]  }
   0x8   :  { %151 = vmatprep.subr.bf16.mxu0 %v392_v5  ;;  %371 = vmatprep.subr.bf16.mxu1 %v392_v5  ;;  %v231_v21 = vsub.s32 0, %v230_v20  ;;  %v227_v22 = vld [vmem:[%s536_s2] sm:$0x3]  ;;  %v235_v23 = vsub.s32 1, %v230_v20 }
   0xa   :  { %v232_v24 = vrot.slane %v227_v22, %v231_v21  ;;  %v236_v25 = vrot.slane %v227_v22, %v235_v23 }
   0xb   :  { %152 = vmatpush1.bf16.msra.mxu0 %v394_v6  ;;  %379 = vmatpush1.bf16.msra.mxu1 %v394_v6 }
   0xc   :  { %153 = vmatprep.subr.bf16.mxu0 %v395_v7  ;;  %372 = vmatprep.subr.bf16.mxu1 %v395_v7 }
   0xf   :  { %154 = vmatpush1.bf16.msra.mxu0 %v397_v8  ;;  %380 = vmatpush1.bf16.msra.mxu1 %v397_v8 }
  0x10   :  { %155 = vmatprep.subr.bf16.mxu0 %v398_v9  ;;  %373 = vmatprep.subr.bf16.mxu1 %v398_v9 }
  0x13   :  { %156 = vmatpush1.bf16.msra.mxu0 %v400_v10  ;;  %381 = vmatpush1.bf16.msra.mxu1 %v400_v10 }
  0x14   :  { %157 = vmatprep.subr.bf16.mxu0 %v401_v11  ;;  %374 = vmatprep.subr.bf16.mxu1 %v401_v11 }
  0x17   :  { %158 = vmatpush1.bf16.msra.mxu0 %v403_v12  ;;  %382 = vmatpush1.bf16.msra.mxu1 %v403_v12 }
  0x18   :  { %159 = vmatprep.subr.bf16.mxu0 %v404_v13  ;;  %375 = vmatprep.subr.bf16.mxu1 %v404_v13 }
  0x1b   :  { %160 = vmatpush1.bf16.msra.mxu0 %v406_v14  ;;  %383 = vmatpush1.bf16.msra.mxu1 %v406_v14 }
  0x1c   :  { %161 = vmatprep.subr.bf16.mxu0 %v407_v15  ;;  %376 = vmatprep.subr.bf16.mxu1 %v407_v15 }
  0x1f   :  { %162 = vmatpush1.bf16.msra.mxu0 %v409_v16  ;;  %384 = vmatpush1.bf16.msra.mxu1 %v409_v16 }
  0x22   :  { %180 = vmatmul.mubr.bf16.vlgmr.msra.gmra.mxu0 %v410_v17  ;;  %190 = vmatmul.mubr.bf16.vlgmr.msra.gmra.mxu1 %v411_v18 }
  0xe2   :  { %v181_v26 = vpop.f32.mrf.mxu0  ;;  %v191_v27 = vpop.f32.mrf.mxu1 }
  0xe3   :  { %v239_v28 = vadd.f32 %v232_v24, %v181_v26  ;;  %v243_v29 = vadd.f32 %v232_v24, %v191_v27 }
  0xe4   :  { %v183_v30 = vpop.f32.mrf.mxu0  ;;  %v193_v31 = vpop.f32.mrf.mxu1 }
  0xe5   :  { %v353_v32 = vmul.f32 -1.442695, %v239_v28  ;;  %v357_v33 = vmul.f32 -1.442695, %v243_v29  ;;  %v240_v34 = vadd.f32 %v236_v25, %v183_v30  ;;  %v244_v35 = vadd.f32 %v236_v25, %v193_v31 }
  0xe6   :  { %v185_v36 = vpop.f32.mrf.mxu0  ;;  %v195_v37 = vpop.f32.mrf.mxu1 }
  0xe7   :  { %412 = vpow2.f32 %v353_v32  ;;  %v354_v38 = vmul.f32 -1.442695, %v240_v34  ;;  %v358_v39 = vmul.f32 -1.442695, %v244_v35  ;;  %v241_v40 = vadd.f32 %v232_v24, %v185_v36 }
  0xe8   :  { %414 = vpow2.f32 %v357_v33  ;;  %v245_v41 = vadd.f32 %v232_v24, %v195_v37  ;;  %v187_v42 = vpop.f32.mrf.mxu0  ;;  %v197_v43 = vpop.f32.mrf.mxu1 }
  0xe9   :  { %416 = vpow2.f32 %v354_v38  ;;  %v355_v44 = vmul.f32 -1.442695, %v241_v40  ;;  %v242_v45 = vadd.f32 %v236_v25, %v187_v42  ;;  %v246_v46 = vadd.f32 %v236_v25, %v197_v43 }
  0xea   :  { %418 = vpow2.f32 %v358_v39  ;;  %v359_v47 = vmul.f32 -1.442695, %v245_v41 }
  0xeb   :  { %420 = vpow2.f32 %v355_v44  ;;  %v356_v48 = vmul.f32 -1.442695, %v242_v45  ;;  %v360_v49 = vmul.f32 -1.442695, %v246_v46 }
  0xec   :  { %422 = vpow2.f32 %v359_v47 }
  0xed   :  { %424 = vpow2.f32 %v356_v48 }
  0xee   :  { %426 = vpow2.f32 %v360_v49 }
  0xf4   :  { %v413_v50 = vpop.eup %412 }
  0xf5   :  { %v415_v51 = vpop.eup %414  ;;  %v271_v52 = vadd.f32 1.0, %v413_v50 }
  0xf6   :  { %v417_v53 = vpop.eup %416  ;;  %v275_v54 = vadd.f32 1.0, %v415_v51 }
  0xf7   :  { %v419_v55 = vpop.eup %418  ;;  %428 = vrcp.f32 %v271_v52  ;;  %v272_v56 = vadd.f32 1.0, %v417_v53 }
  0xf8   :  { %v421_v57 = vpop.eup %420  ;;  %430 = vrcp.f32 %v275_v54  ;;  %v276_v58 = vadd.f32 1.0, %v419_v55 }
  0xf9   :  { %v423_v59 = vpop.eup %422  ;;  %432 = vrcp.f32 %v272_v56  ;;  %v273_v60 = vadd.f32 1.0, %v421_v57 }
  0xfa   :  { %v425_v61 = vpop.eup %424  ;;  %434 = vrcp.f32 %v276_v58  ;;  %v277_v62 = vadd.f32 1.0, %v423_v59 }
  0xfb   :  { %v427_v63 = vpop.eup %426  ;;  %436 = vrcp.f32 %v273_v60  ;;  %v274_v0 = vadd.f32 1.0, %v425_v61 }
  0xfc   :  { %438 = vrcp.f32 %v277_v62  ;;  %v278_v1 = vadd.f32 1.0, %v427_v63 }
  0xfd   :  { %440 = vrcp.f32 %v274_v0 }
  0xfe   :  { %442 = vrcp.f32 %v278_v1 }
 0x104   :  { %v429_v2 = vpop.eup %428 }
 0x105   :  { %v431_v3 = vpop.eup %430  ;;  %v295_v6 = vmul.f32 %v429_v2, %v239_v28 }
 0x106   :  { %v433_v4 = vpop.eup %432  ;;  %v299_v9 = vmul.f32 %v431_v3, %v243_v29 }
 0x107   :  { %v435_v5 = vpop.eup %434  ;;  %v296_v7 = vmul.f32 %v433_v4, %v240_v34 }
 0x108   :  { %v437_v8 = vpop.eup %436  ;;  %v300_v10 = vmul.f32 %v435_v5, %v244_v35 }
 0x109   :  { %v439_v11 = vpop.eup %438  ;;  %v365_v12 = vpack.c.bf16 %v296_v7, %v295_v6  ;;  %v297_v16 = vmul.f32 %v437_v8, %v241_v40 }
 0x10a   :  { %v441_v13 = vpop.eup %440  ;;  %v367_v14 = vpack.c.bf16 %v300_v10, %v299_v9  ;;  %v301_v18 = vmul.f32 %v439_v11, %v245_v41 }
 0x10b   :  { %v443_v15 = vpop.eup %442  ;;  %327 = vst [vmem:[%s537_s3] sm:$0xff] %v365_v12  ;;  %v298_v17 = vmul.f32 %v441_v13, %v242_v45 }
 0x10c   :  { %329 = vst [vmem:[%s537_s3 + $0x10] sm:$0xff] %v367_v14  ;;  %v302_v19 = vmul.f32 %v443_v15, %v246_v46 }
 0x10d   :  { %v366_v20 = vpack.c.bf16 %v298_v17, %v297_v16 }
 0x10e   :  { %v368_v21 = vpack.c.bf16 %v302_v19, %v301_v18 }
 0x10f   :  { %328 = vst [vmem:[%s537_s3 + $0x8] sm:$0xff] %v366_v20 }
 0x110   :  { %330 = vst [vmem:[%s537_s3 + $0x18] sm:$0xff] %v368_v21 }

// kernel: a_call__.12
= control target key start
LH: loop header
LB: loop body
LE: loop exit
PB: predicated region body
PF: predicated region fallthrough
CT: control target
= control target key end

     0   :  { %s2153_s12 = smov 0   ;;  %s2439_s0 = inlined_call_operand.vmem [shape: bf16[8,26,128], index: 0, kind: input, shape index: {}]   ;;  %s2440_s1 = inlined_call_operand.vmem [shape: bf16[9,128,128], index: 1, kind: input, shape index: {}]   ;;  %s2441_s2 = inlined_call_operand.vmem [shape: f32[1,128], index: 2, kind: input, shape index: {}]   ;;  %s2442_s3 = inlined_call_operand.vmem [shape: bf16[2,20,128], index: 3, kind: output, shape index: {}]  }
   0x1 LB: > { %s2159_s13 = sadd.s32 4294967295, %s2131_s12   ;;  %p1495_p0 = scmp.ge.s32.totalorder %s2131_s12, 1  ;;  %s2131_s12 = sphi %s2153_s12, %s13_s12  }
   0x2   : > { %p139_p1 = scmp.lt.s32.totalorder %s2131_s12, 3 }
   0x4   : > { %p140_p2 = pnand %p1495_p0, %p139_p1 }
   0x5   : > { %s1496_s16 = sshll.u32 (!%p140_p2), %s2159_s13, 2  ;;  %p171_p4 = scmp.lt.s32.totalorder (!%p140_p2), %s2159_s13, 1 }
   0x6   : > { %143 = sbr.rel (%p140_p2) target bundleno = 412 (0x19c), region = 32  ;;  %p165_p3 = scmp.lt.s32.totalorder (!%p140_p2), %s1496_s16, 7 }
   0xb   : > { %v2026_v0 = vld [vmem:[%s2440_s1 + $0x78] sm:$0xff]   ;;  %v2028_v2 = vld [vmem:[%s2440_s1 + $0x70] sm:$0xff]   ;;  %v2030_v4 = vld [vmem:[%s2440_s1 + $0x68] sm:$0xff]   ;;  %s2444_s16 = smov (!%p165_p3, %s1496_s16), 7  ;;  %vm450_vm0 = vsmask.f32 7424 }
   0xc   : > { %v2027_v1 = vld [vmem:[%s2440_s1 + $0x38] sm:$0xff]   ;;  %1837 = vmatprep.subr.bf16.mxu0 %v2026_v0  ;;  %v2029_v3 = vld [vmem:[%s2440_s1 + $0x30] sm:$0xff]   ;;  %v2031_v5 = vld [vmem:[%s2440_s1 + $0x28] sm:$0xff]   ;;  %s1738_s4 = sshll.u32 %s2444_s16, 4  ;;  %vm995_vm1 = vsmask.f32 5376 }
   0xd   : > { %1857 = vmatprep.subr.bf16.mxu1 %v2027_v1  ;;  %1838 = vmatpush3.bf16.msra.mxu0 %v2026_v0  ;;  %v2032_v6 = vld [vmem:[%s2440_s1 + $0x60] sm:$0xff]   ;;  %v2034_v8 = vld [vmem:[%s2440_s1 + $0x58] sm:$0xff]   ;;  %s2197_s11 = scalar_lea.vmem %s2439_s0, %s1738_s4  ;;  %v2036_v10 = vld [vmem:[%s2440_s1 + $0x50] sm:$0xff]   ;;  %vm1284_vm2 = vcmask 1044480   ;;  %s2446_s13 = smov (!%p171_p4, %s2159_s13), 1 }
   0xe   : > { %1858 = vmatpush3.bf16.msra.mxu1 %v2027_v1  ;;  %1839 = vmatprep.subr.bf16.mxu0 %v2028_v2  ;;  %v2033_v7 = vld [vmem:[%s2440_s1 + $0x20] sm:$0xff]   ;;  %v2035_v9 = vld [vmem:[%s2440_s1 + $0x18] sm:$0xff]   ;;  %v2037_v11 = vld [vmem:[%s2440_s1 + $0x10] sm:$0xff]   ;;  %s2017_s19 = smul.u32 12, %s2446_s13 }
   0xf   : > { %1859 = vmatprep.subr.bf16.mxu1 %v2029_v3  ;;  %v2042_v12 = vld [vmem:[%s2197_s11 + $0x10] sm:$0xff]   ;;  %v2043_v13 = vld [vmem:[%s2197_s11] sm:$0xff]   ;;  %v2038_v14 = vld [vmem:[%s2440_s1 + $0x48] sm:$0xff]  }
  0x10   : > { %1853 = vmatprep.mubr.bf16.mxu0 %v2042_v12  ;;  %1873 = vmatprep.mubr.bf16.mxu1 %v2043_v13  ;;  %v2039_v15 = vld [vmem:[%s2440_s1 + $0x8] sm:$0xff]   ;;  %v2040_v16 = vld [vmem:[%s2440_s1 + $0x40] sm:$0xff]   ;;  %v2044_v18 = vld [vmem:[%s2197_s11 + $0x18] ss:$0 sps:$4 sm:$0x33]   ;;  %v454_v22 = vshll.u32 %v2043_v13, 16  ;;  %s175_s22 = scalar_lea.vmem %s2442_s3, %s2017_s19 }
  0x11   : > { %1840 = vmatpush3.bf16.msra.mxu0 %v2028_v2  ;;  %v2041_v17 = vld [vmem:[%s2440_s1] sm:$0xff]   ;;  %v2046_v19 = vld [vmem:[%s2440_s1 + $0xb8] sm:$0xff]   ;;  %v2045_v20 = vld [vmem:[%s2197_s11 + $0x8] ss:$0 sps:$4 sm:$0x33]   ;;  %v452_v25 = vshrl.u32 %v2043_v13, 16 }
  0x12   : > { %1860 = vmatpush3.bf16.msra.mxu1 %v2029_v3  ;;  %1841 = vmatprep.subr.bf16.mxu0 %v2030_v4  ;;  %v2047_v21 = vld [vmem:[%s2440_s1 + $0xf8] sm:$0xff]   ;;  %v2048_v23 = vld [vmem:[%s2440_s1 + $0xb0] sm:$0xff]   ;;  %v456_v26 = vrot.slane %v454_v22, 1  ;;  %v2050_v27 = vld [vmem:[%s2440_s1 + $0xa8] sm:$0xff]  }
  0x13   : > { %1861 = vmatprep.subr.bf16.mxu1 %v2031_v5  ;;  %v2049_v24 = vld [vmem:[%s2440_s1 + $0xf0] sm:$0xff]   ;;  %v2051_v28 = vld [vmem:[%s2440_s1 + $0xe8] sm:$0xff]   ;;  %v2064_v32 = vld [vmem:[%s2197_s11 + $0x20] sm:$0xff]  }
  0x14   : > { %v2062_v29 = vld [vmem:[%s2197_s11 + $0x8] ss:$0 sps:$4 sm:$0x77]   ;;  %v457_v30 = vor.u32 %v456_v26, %v452_v25  ;;  %v2052_v33 = vld [vmem:[%s2440_s1 + $0xa0] sm:$0xff]   ;;  %v2054_v37 = vld [vmem:[%s2440_s1 + $0x98] sm:$0xff]   ;;  %v851_v43 = vshll.u32 %v2064_v32, 16 }
  0x15   : > { %1842 = vmatpush3.bf16.msra.mxu0 %v2030_v4  ;;  %v459_v31 = vshll.u32 %v2062_v29, 16  ;;  %v2053_v34 = vld [vmem:[%s2440_s1 + $0xe0] sm:$0xff]   ;;  %v2055_v38 = vld [vmem:[%s2440_s1 + $0xd8] sm:$0xff]   ;;  %v2056_v39 = vld [vmem:[%s2440_s1 + $0x90] sm:$0xff]   ;;  %v463_v46 = vshrl.u32 %v2062_v29, 16  ;;  %v849_v48 = vshrl.u32 %v2064_v32, 16 }
  0x16   : > { %1862 = vmatpush3.bf16.msra.mxu1 %v2031_v5  ;;  %1843 = vmatprep.subr.bf16.mxu0 %v2032_v6  ;;  %v2057_v40 = vld [vmem:[%s2440_s1 + $0xd0] sm:$0xff]   ;;  %v2058_v41 = vld [vmem:[%s2440_s1 + $0x88] sm:$0xff]   ;;  %v2060_v44 = vld [vmem:[%s2440_s1 + $0x80] sm:$0xff]   ;;  %v853_v49 = vrot.slane %v851_v43, 1 }
  0x17   : > { %1863 = vmatprep.subr.bf16.mxu1 %v2033_v7  ;;  %v461_v35 = vrot.slane %v459_v31, 1  ;;  %v2059_v42 = vld [vmem:[%s2440_s1 + $0xc8] sm:$0xff]   ;;  %v2061_v45 = vld [vmem:[%s2440_s1 + $0xc0] sm:$0xff]   ;;  %v2063_v50 = vld [vmem:[%s2440_s1 + $0x138] sm:$0xff]  }
  0x18   : > { %v2273_v47 = vld [vmem:[%s2197_s11 + $0x28] ss:$0 sps:$4 sm:$0x77]   ;;  %v2066_v53 = vld [vmem:[%s2440_s1 + $0x178] sm:$0xff]   ;;  %v2067_v55 = vld [vmem:[%s2440_s1 + $0x130] sm:$0xff]   ;;  %v854_v56 = vor.u32 %v853_v49, %v849_v48 }
  0x19   : > { %1844 = vmatpush3.bf16.msra.mxu0 %v2032_v6  ;;  %v462_v36 = vsel %vm450_vm0, %v457_v30, %v461_v35  ;;  %v856_v51 = vshll.u32 %v2273_v47, 16  ;;  %v2065_v52 = vld [vmem:[%s2197_s11 + $0x28] ss:$0 sps:$4 sm:$0x33]   ;;  %v465_v54 = vor.u32 %v463_v46, %v461_v35  ;;  %v2068_v58 = vld [vmem:[%s2440_s1 + $0x170] sm:$0xff]   ;;  %v2071_v63 = vld [vmem:[%s2440_s1 + $0x120] sm:$0xff]  }
  0x1a   : > { %1864 = vmatpush3.bf16.msra.mxu1 %v2033_v7  ;;  %1845 = vmatprep.subr.bf16.mxu0 %v2034_v8  ;;  %v2081_v59 = vld [vmem:[%s2197_s11 + $0x30] sm:$0xff]   ;;  %v2069_v61 = vld [vmem:[%s2440_s1 + $0x128] sm:$0xff]   ;;  %v2072_v0 = vld [vmem:[%s2440_s1 + $0x160] sm:$0xff]  }
  0x1b   : > { %1865 = vmatprep.subr.bf16.mxu1 %v2035_v9  ;;  %v2286_v57 = vrot.slane %v856_v51, 1  ;;  %v2070_v62 = vld [vmem:[%s2440_s1 + $0x168] sm:$0xff]   ;;  %v2073_v1 = vld [vmem:[%s2440_s1 + $0x118] sm:$0xff]   ;;  %v964_v3 = vld [vmem:[%s2197_s11] sm:$0xc] }
  0x1c   : > { %v2074_v2 = vld [vmem:[%s2440_s1 + $0x158] sm:$0xff]   ;;  %v2314_v4 = vld [vmem:[%s2197_s11 + $0x4] sm:$0xf]  ;;  %v2075_v5 = vld [vmem:[%s2440_s1 + $0x110] sm:$0xff]  }
  0x1d   : > { %1846 = vmatpush3.bf16.msra.mxu0 %v2034_v8  ;;  %v859_v60 = vsel %vm450_vm0, %v854_v56, %v2286_v57  ;;  %v2076_v6 = vld [vmem:[%s2440_s1 + $0x150] sm:$0xff]   ;;  %v1664_v7 = vcombine.low %v964_v3, %v2314_v4  ;;  %v2324_v8 = vld [vmem:[%s2197_s11 + $0x8] sm:$0x1f]   ;;  %v2080_v22 = vld [vmem:[%s2440_s1 + $0x140] sm:$0xff]  }
  0x1e   : > { %1866 = vmatpush3.bf16.msra.mxu1 %v2035_v9  ;;  %1847 = vmatprep.subr.bf16.mxu0 %v2036_v10  ;;  %v2077_v9 = vld [vmem:[%s2440_s1 + $0x108] sm:$0xff]   ;;  %v2090_v46 = vld [vmem:[%s2440_s1 + $0x1a0] sm:$0xff]   ;;  %v2092_v48 = vld [vmem:[%s2440_s1 + $0x198] sm:$0xff]  }
  0x1f   : > { %1867 = vmatprep.subr.bf16.mxu1 %v2037_v11  ;;  %v2078_v12 = vld [vmem:[%s2440_s1 + $0x148] sm:$0xff]   ;;  %v997_v13 = vshrl.u32 %v1664_v7, 16  ;;  %v2093_v49 = vld [vmem:[%s2440_s1 + $0x1d8] sm:$0xff]   ;;  %v2095_v51 = vld [vmem:[%s2440_s1 + $0x1d0] sm:$0xff]  }
  0x20   : > { %v2099_v56 = vld [vmem:[%s2440_s1 + $0x1c0] sm:$0xff]   ;;  %v2110_v3 = vld [vmem:[%s2440_s1 + $0x208] sm:$0xff]  }
  0x21   : > { %1848 = vmatpush3.bf16.msra.mxu0 %v2036_v10  ;;  %v2103_v10 = vld [vmem:[%s2197_s11 + $0x10] sm:$0xfc]  }
  0x22   : > { %1868 = vmatpush3.bf16.msra.mxu1 %v2037_v11  ;;  %1849 = vmatprep.subr.bf16.mxu0 %v2038_v14  ;;  %v2104_v11 = vld [vmem:[%s2197_s11 + $0x18] sm:$0x1f]  }
  0x23   : > { %1869 = vmatprep.subr.bf16.mxu1 %v2039_v15 }
  0x25   : > { %1850 = vmatpush3.bf16.msra.mxu0 %v2038_v14  ;;  %v1000_v14 = vshll.u32 %v1664_v7, 16 }
  0x26   : > { %1870 = vmatpush3.bf16.msra.mxu1 %v2039_v15  ;;  %1851 = vmatprep.subr.bf16.mxu0 %v2040_v16  ;;  %v1005_v15 = vshrl.u32 %v2324_v8, 16 }
  0x27   : > { %1871 = vmatprep.subr.bf16.mxu1 %v2041_v17  ;;  %v1002_v25 = vrot.slane %v1000_v14, 3 }
  0x28   : > { %v1007_v26 = vrot.slane %v1005_v15, 2 }
  0x29   : > { %1852 = vmatpush3.bf16.msra.mxu0 %v2040_v16  ;;  %v1008_v16 = vshll.u32 %v2324_v8, 16 }
  0x2a   : > { %1872 = vmatpush3.bf16.msra.mxu1 %v2041_v17  ;;  %1877 = vmatprep.subr.bf16.mxu0 %v2046_v19  ;;  %v1146_v17 = vshrl.u32 %v2103_v10, 16 }
  0x2b   : > { %1897 = vmatprep.subr.bf16.mxu1 %v2047_v21 }
  0x2c   : > { %1854 = vmatmul.mubr.bf16.vlgmr.msra.gmra.mxu0 %v2044_v18  ;;  %v1149_v18 = vshll.u32 %v2103_v10, 16 }
  0x2d   : > { %1874 = vmatmul.mubr.bf16.vlgmr.msra.gmra.mxu1 %v2045_v20  ;;  %1878 = vmatpush3.bf16.msra.mxu0 %v2046_v19  ;;  %v1154_v19 = vshrl.u32 %v2104_v11, 16  ;;  %v1157_v20 = vshll.u32 %v2104_v11, 16 }
  0x2e   : > { %1898 = vmatpush3.bf16.msra.mxu1 %v2047_v21  ;;  %1879 = vmatprep.subr.bf16.mxu0 %v2048_v23  ;;  %v2079_v21 = vld [vmem:[%s2440_s1 + $0x100] sm:$0xff]   ;;  %v1151_v29 = vrot.slane %v1149_v18, 3 }
  0x2f   : > { %1899 = vmatprep.subr.bf16.mxu1 %v2049_v24  ;;  %1913 = vmatprep.mubr.bf16.mxu1 %v2064_v32  ;;  %v1156_v30 = vrot.slane %v1154_v19, 2  ;;  %v1159_v31 = vrot.slane %v1157_v20, 3  ;;  %v2083_v32 = vld [vmem:[%s2440_s1 + $0x1b8] sm:$0xff]  }
  0x30   : > { %1893 = vmatprep.mubr.bf16.mxu0 %v462_v36 }
  0x31   : > { %1880 = vmatpush3.bf16.msra.mxu0 %v2048_v23  ;;  %v860_v23 = vshrl.u32 %v2273_v47, 16  ;;  %v2091_v47 = vld [vmem:[%s2440_s1 + $0x1e0] sm:$0xff]  }
  0x32   : > { %1900 = vmatpush3.bf16.msra.mxu1 %v2049_v24  ;;  %1881 = vmatprep.subr.bf16.mxu0 %v2050_v27  ;;  %v999_v24 = vrot.slane %v997_v13, 2 }
  0x33   : > { %1901 = vmatprep.subr.bf16.mxu1 %v2051_v28 }
  0x34   : > { %v1003_v35 = vor.u32 %v1002_v25, %v999_v24 }
  0x35   : > { %1882 = vmatpush3.bf16.msra.mxu0 %v2050_v27  ;;  %v1010_v27 = vrot.slane %v1008_v16, 3 }
  0x36   : > { %1902 = vmatpush3.bf16.msra.mxu1 %v2051_v28  ;;  %1883 = vmatprep.subr.bf16.mxu0 %v2052_v33  ;;  %v1148_v28 = vrot.slane %v1146_v17, 2 }
  0x37   : > { %1903 = vmatprep.subr.bf16.mxu1 %v2053_v34  ;;  %v2350_v36 = vor.u32 %v1010_v27, %v1007_v26 }
  0x39   : > { %1884 = vmatpush3.bf16.msra.mxu0 %v2052_v33  ;;  %v2085_v33 = vld [vmem:[%s2440_s1 + $0x1f8] sm:$0xff]  }
  0x3a   : > { %1904 = vmatpush3.bf16.msra.mxu1 %v2053_v34  ;;  %1885 = vmatprep.subr.bf16.mxu0 %v2054_v37  ;;  %v2082_v34 = vld [vmem:[%s2197_s11 + $0x38] ss:$0 sps:$4 sm:$0x33]  }
  0x3b   : > { %1905 = vmatprep.subr.bf16.mxu1 %v2055_v38 }
  0x3d   : > { %1886 = vmatpush3.bf16.msra.mxu0 %v2054_v37  ;;  %v862_v37 = vor.u32 %v860_v23, %v2286_v57 }
  0x3e   : > { %1906 = vmatpush3.bf16.msra.mxu1 %v2055_v38  ;;  %1887 = vmatprep.subr.bf16.mxu0 %v2056_v39  ;;  %v1152_v38 = vor.u32 %v1151_v29, %v1148_v28 }
  0x3f   : > { %1907 = vmatprep.subr.bf16.mxu1 %v2057_v40 }
  0x41   : > { %1888 = vmatpush3.bf16.msra.mxu0 %v2056_v39  ;;  %v2353_v39 = vor.u32 %v1159_v31, %v1156_v30 }
  0x42   : > { %1908 = vmatpush3.bf16.msra.mxu1 %v2057_v40  ;;  %1889 = vmatprep.subr.bf16.mxu0 %v2058_v41  ;;  %v2086_v40 = vld [vmem:[%s2440_s1 + $0x1b0] sm:$0xff]  }
  0x43   : > { %1909 = vmatprep.subr.bf16.mxu1 %v2059_v42  ;;  %v1161_v43 = vsel %vm995_vm1, %v1152_v38, %v2353_v39 }
  0x45   : > { %1890 = vmatpush3.bf16.msra.mxu0 %v2058_v41  ;;  %v2087_v41 = vld [vmem:[%s2440_s1 + $0x1f0] sm:$0xff]  }
  0x46   : > { %1910 = vmatpush3.bf16.msra.mxu1 %v2059_v42  ;;  %1891 = vmatprep.subr.bf16.mxu0 %v2060_v44  ;;  %v1012_v42 = vsel %vm995_vm1, %v1003_v35, %v2350_v36 }
  0x47   : > { %1911 = vmatprep.subr.bf16.mxu1 %v2061_v45 }
  0x49   : > { %1892 = vmatpush3.bf16.msra.mxu0 %v2060_v44  ;;  %v2088_v44 = vld [vmem:[%s2440_s1 + $0x1a8] sm:$0xff]  }
  0x4a   : > { %1912 = vmatpush3.bf16.msra.mxu1 %v2061_v45  ;;  %1917 = vmatprep.subr.bf16.mxu0 %v2063_v50  ;;  %v2089_v45 = vld [vmem:[%s2440_s1 + $0x1e8] sm:$0xff]  }
  0x4b   : > { %1937 = vmatprep.subr.bf16.mxu1 %v2066_v53 }
  0x4c   : > { %1894 = vmatmul.mubr.bf16.vlgmr.msra.gmra.mxu0 %v465_v54  ;;  %v1263_v54 = vld [vmem:[%s2197_s11] sm:$0x8] }
  0x4d   : > { %1918 = vmatpush3.bf16.msra.mxu0 %v2063_v50  ;;  %1914 = vmatmul.mubr.bf16.vlgmr.msra.gmra.mxu1 %v2065_v52  ;;  %v2094_v50 = vld [vmem:[%s2440_s1 + $0x190] sm:$0xff]   ;;  %v2096_v52 = vld [vmem:[%s2440_s1 + $0x188] sm:$0xff]   ;;  %v1720_v57 = vcombine.low %v1263_v54, %v2314_v4  ;;  %v2111_v4 = vld [vmem:[%s2440_s1 + $0x200] sm:$0xff]  }
  0x4e   : > { %1938 = vmatpush3.bf16.msra.mxu1 %v2066_v53  ;;  %1919 = vmatprep.subr.bf16.mxu0 %v2067_v55  ;;  %v2097_v53 = vld [vmem:[%s2440_s1 + $0x1c8] sm:$0xff]  }
  0x4f   : > { %1939 = vmatprep.subr.bf16.mxu1 %v2068_v58  ;;  %1933 = vmatprep.mubr.bf16.mxu0 %v2081_v59  ;;  %v1285_v59 = vrot.slane %v1720_v57, 3 }
  0x50   : > { %1953 = vmatprep.mubr.bf16.mxu1 %v859_v60  ;;  %v1286_v60 = vrot.slane %v2324_v8, 3 }
  0x51   : > { %1920 = vmatpush3.bf16.msra.mxu0 %v2067_v55  ;;  %v2098_v55 = vld [vmem:[%s2440_s1 + $0x180] sm:$0xff]  }
  0x52   : > { %1940 = vmatpush3.bf16.msra.mxu1 %v2068_v58  ;;  %1921 = vmatprep.subr.bf16.mxu0 %v2069_v61  ;;  %v2102_v58 = vld [vmem:[%s2440_s1 + $0x238] sm:$0xff]  }
  0x53   : > { %1941 = vmatprep.subr.bf16.mxu1 %v2070_v62 }
  0x55   : > { %1922 = vmatpush3.bf16.msra.mxu0 %v2069_v61  ;;  %v2105_v61 = vld [vmem:[%s2440_s1 + $0x230] sm:$0xff]  }
  0x56   : > { %1942 = vmatpush3.bf16.msra.mxu1 %v2070_v62  ;;  %1923 = vmatprep.subr.bf16.mxu0 %v2071_v63  ;;  %v1287_v62 = vsel %vm1284_vm2, %v1285_v59, %v1286_v60 }
  0x57   : > { %1943 = vmatprep.subr.bf16.mxu1 %v2072_v0 }
  0x59   : > { %1924 = vmatpush3.bf16.msra.mxu0 %v2071_v63  ;;  %v2106_v63 = vld [vmem:[%s2440_s1 + $0x228] sm:$0xff]  }
  0x5a   : > { %1944 = vmatpush3.bf16.msra.mxu1 %v2072_v0  ;;  %1925 = vmatprep.subr.bf16.mxu0 %v2073_v1  ;;  %v2107_v0 = vld [vmem:[%s2440_s1 + $0x220] sm:$0xff]  }
  0x5b   : > { %1945 = vmatprep.subr.bf16.mxu1 %v2074_v2 }
  0x5d   : > { %1926 = vmatpush3.bf16.msra.mxu0 %v2073_v1  ;;  %v2108_v1 = vld [vmem:[%s2440_s1 + $0x218] sm:$0xff]  }
  0x5e   : > { %1946 = vmatpush3.bf16.msra.mxu1 %v2074_v2  ;;  %1927 = vmatprep.subr.bf16.mxu0 %v2075_v5  ;;  %v2109_v2 = vld [vmem:[%s2440_s1 + $0x210] sm:$0xff]  }
  0x5f   : > { %1947 = vmatprep.subr.bf16.mxu1 %v2076_v6 }
  0x61   : > { %1928 = vmatpush3.bf16.msra.mxu0 %v2075_v5 }
  0x62   : > { %1948 = vmatpush3.bf16.msra.mxu1 %v2076_v6  ;;  %1929 = vmatprep.subr.bf16.mxu0 %v2077_v9 }
  0x63   : > { %1949 = vmatprep.subr.bf16.mxu1 %v2078_v12 }
  0x65   : > { %1930 = vmatpush3.bf16.msra.mxu0 %v2077_v9 }
  0x66   : > { %1950 = vmatpush3.bf16.msra.mxu1 %v2078_v12  ;;  %1931 = vmatprep.subr.bf16.mxu0 %v2079_v21 }
  0x67   : > { %1951 = vmatprep.subr.bf16.mxu1 %v2080_v22 }
  0x69   : > { %1932 = vmatpush3.bf16.msra.mxu0 %v2079_v21 }
  0x6a   : > { %1952 = vmatpush3.bf16.msra.mxu1 %v2080_v22  ;;  %1957 = vmatprep.subr.bf16.mxu0 %v2083_v32 }
  0x6b   : > { %1977 = vmatprep.subr.bf16.mxu1 %v2085_v33 }
  0x6c   : > { %1934 = vmatmul.mubr.bf16.vlgmr.msra.gmra.mxu0 %v2082_v34 }
  0x6d   : > { %1958 = vmatpush3.bf16.msra.mxu0 %v2083_v32  ;;  %1954 = vmatmul.mubr.bf16.vlgmr.msra.gmra.mxu1 %v862_v37 }
  0x6e   : > { %1978 = vmatpush3.bf16.msra.mxu1 %v2085_v33  ;;  %1959 = vmatprep.subr.bf16.mxu0 %v2086_v40 }
  0x6f   : > { %1979 = vmatprep.subr.bf16.mxu1 %v2087_v41  ;;  %1973 = vmatprep.mubr.bf16.mxu0 %v1012_v42 }
  0x70   : > { %1993 = vmatprep.mubr.bf16.mxu1 %v1161_v43 }
  0x71   : > { %1960 = vmatpush3.bf16.msra.mxu0 %v2086_v40 }
  0x72   : > { %1980 = vmatpush3.bf16.msra.mxu1 %v2087_v41  ;;  %1961 = vmatprep.subr.bf16.mxu0 %v2088_v44 }
  0x73   : > { %1981 = vmatprep.subr.bf16.mxu1 %v2089_v45 }
  0x75   : > { %1962 = vmatpush3.bf16.msra.mxu0 %v2088_v44 }
  0x76   : > { %1982 = vmatpush3.bf16.msra.mxu1 %v2089_v45  ;;  %1963 = vmatprep.subr.bf16.mxu0 %v2090_v46 }
  0x77   : > { %1983 = vmatprep.subr.bf16.mxu1 %v2091_v47 }
  0x79   : > { %1964 = vmatpush3.bf16.msra.mxu0 %v2090_v46 }
  0x7a   : > { %1984 = vmatpush3.bf16.msra.mxu1 %v2091_v47  ;;  %1965 = vmatprep.subr.bf16.mxu0 %v2092_v48 }
  0x7b   : > { %1985 = vmatprep.subr.bf16.mxu1 %v2093_v49 }
  0x7d   : > { %1966 = vmatpush3.bf16.msra.mxu0 %v2092_v48 }
  0x7e   : > { %1986 = vmatpush3.bf16.msra.mxu1 %v2093_v49  ;;  %1967 = vmatprep.subr.bf16.mxu0 %v2094_v50 }
  0x7f   : > { %1987 = vmatprep.subr.bf16.mxu1 %v2095_v51 }
  0x81   : > { %1968 = vmatpush3.bf16.msra.mxu0 %v2094_v50 }
  0x82   : > { %1988 = vmatpush3.bf16.msra.mxu1 %v2095_v51  ;;  %1969 = vmatprep.subr.bf16.mxu0 %v2096_v52 }
  0x83   : > { %1989 = vmatprep.subr.bf16.mxu1 %v2097_v53 }
  0x85   : > { %1970 = vmatpush3.bf16.msra.mxu0 %v2096_v52 }
  0x86   : > { %1990 = vmatpush3.bf16.msra.mxu1 %v2097_v53  ;;  %1971 = vmatprep.subr.bf16.mxu0 %v2098_v55 }
  0x87   : > { %1991 = vmatprep.subr.bf16.mxu1 %v2099_v56 }
  0x89   : > { %1972 = vmatpush3.bf16.msra.mxu0 %v2098_v55  ;;  %v1729_v55 = vld [vmem:[%s2441_s2] ss:$0 sm:$0xff] }
  0x8a   : > { %1992 = vmatpush3.bf16.msra.mxu1 %v2099_v56  ;;  %1997 = vmatprep.subr.bf16.mxu0 %v2102_v58 }
  0x8c   : > { %1974 = vmatmul.mubr.bf16.vlgmr.msra.gmra.mxu0 %v2350_v36 }
  0x8d   : > { %1998 = vmatpush3.bf16.msra.mxu0 %v2102_v58  ;;  %1994 = vmatmul.mubr.bf16.vlgmr.msra.gmra.mxu1 %v2353_v39 }
  0x8e   : > { %1999 = vmatprep.subr.bf16.mxu0 %v2105_v61  ;;  %2013 = vmatprep.mubr.bf16.mxu0 %v1287_v62 }
  0x91   : > { %2000 = vmatpush3.bf16.msra.mxu0 %v2105_v61 }
  0x92   : > { %2001 = vmatprep.subr.bf16.mxu0 %v2106_v63 }
  0x95   : > { %2002 = vmatpush3.bf16.msra.mxu0 %v2106_v63 }
  0x96   : > { %2003 = vmatprep.subr.bf16.mxu0 %v2107_v0 }
  0x99   : > { %2004 = vmatpush3.bf16.msra.mxu0 %v2107_v0 }
  0x9a   : > { %2005 = vmatprep.subr.bf16.mxu0 %v2108_v1 }
  0x9d   : > { %2006 = vmatpush3.bf16.msra.mxu0 %v2108_v1 }
  0x9e   : > { %2007 = vmatprep.subr.bf16.mxu0 %v2109_v2 }
  0xa1   : > { %2008 = vmatpush3.bf16.msra.mxu0 %v2109_v2 }
  0xa2   : > { %2009 = vmatprep.subr.bf16.mxu0 %v2110_v3 }
  0xa5   : > { %2010 = vmatpush3.bf16.msra.mxu0 %v2110_v3 }
  0xa6   : > { %2011 = vmatprep.subr.bf16.mxu0 %v2111_v4 }
  0xa9   : > { %2012 = vmatpush3.bf16.msra.mxu0 %v2111_v4 }
  0xac   : > { %2014 = vmatmul.mubr.bf16.vlgmr.msra.gmra.mxu0 %v1286_v60 }
  0xec   : > { %v1855_v5 = vpop.f32.mrf.mxu0 }
  0xed   : > { %v1875_v6 = vpop.f32.mrf.mxu1 }
  0xee   : > { %v424_v7 = vadd.f32 %v1875_v6, %v1855_v5  ;;  %v309_v8 = vpop.f32.mrf.mxu0 }
  0xef   : > { %v415_v9 = vpop.f32.mrf.mxu1 }
  0xf0   : > { %v416_v10 = vadd.f32 %v415_v9, %v309_v8  ;;  %v1856_v11 = vpop.f32.mrf.mxu0 }
  0xf1   : > { %v1876_v12 = vpop.f32.mrf.mxu1 }
  0xf2   : > { %v312_v13 = vpop.f32.mrf.mxu0 }
  0xf3   : > { %v418_v14 = vpop.f32.mrf.mxu1 }
  0xf4   : > { %v419_v15 = vadd.f32 %v418_v14, %v312_v13 }
 0x10c   : > { %v1895_v16 = vpop.f32.mrf.mxu0 }
 0x10d   : > { %v566_v17 = vadd.f32 %v1895_v16, %v424_v7  ;;  %v1915_v18 = vpop.f32.mrf.mxu1 }
 0x10e   : > { %v550_v19 = vpop.f32.mrf.mxu0 }
 0x10f   : > { %v564_v20 = vadd.f32 %v550_v19, %v416_v10  ;;  %v696_v21 = vadd.f32 %v1915_v18, %v566_v17  ;;  %v680_v22 = vpop.f32.mrf.mxu1 }
 0x110   : > { %v1896_v23 = vpop.f32.mrf.mxu0 }
 0x111   : > { %v694_v24 = vadd.f32 %v680_v22, %v564_v20  ;;  %v1916_v25 = vpop.f32.mrf.mxu1 }
 0x112   : > { %v553_v26 = vpop.f32.mrf.mxu0 }
 0x113   : > { %v683_v27 = vpop.f32.mrf.mxu1  ;;  %v565_v42 = vadd.f32 %v553_v26, %v419_v15 }
 0x115   : > { %v695_v45 = vadd.f32 %v683_v27, %v565_v42 }
 0x12c   : > { %v1935_v28 = vpop.f32.mrf.mxu0 }
 0x12d   : > { %v1955_v29 = vpop.f32.mrf.mxu1  ;;  %v826_v43 = vadd.f32 %v1935_v28, %v696_v21 }
 0x12e   : > { %v810_v30 = vpop.f32.mrf.mxu0 }
 0x12f   : > { %v947_v31 = vpop.f32.mrf.mxu1  ;;  %v824_v44 = vadd.f32 %v810_v30, %v694_v24  ;;  %v963_v46 = vadd.f32 %v1955_v29, %v826_v43 }
 0x130   : > { %v1936_v32 = vpop.f32.mrf.mxu0 }
 0x131   : > { %v1956_v33 = vpop.f32.mrf.mxu1  ;;  %v961_v47 = vadd.f32 %v947_v31, %v824_v44 }
 0x132   : > { %v813_v34 = vpop.f32.mrf.mxu0 }
 0x133   : > { %v950_v35 = vpop.f32.mrf.mxu1  ;;  %v825_v48 = vadd.f32 %v813_v34, %v695_v45 }
 0x135   : > { %v962_v52 = vadd.f32 %v950_v35, %v825_v48 }
 0x14c   : > { %v1975_v36 = vpop.f32.mrf.mxu0 }
 0x14d   : > { %v1995_v37 = vpop.f32.mrf.mxu1  ;;  %v1113_v49 = vadd.f32 %v1975_v36, %v963_v46 }
 0x14e   : > { %v1097_v38 = vpop.f32.mrf.mxu0 }
 0x14f   : > { %v1246_v39 = vpop.f32.mrf.mxu1  ;;  %v1111_v50 = vadd.f32 %v1097_v38, %v961_v47  ;;  %v1262_v53 = vadd.f32 %v1995_v37, %v1113_v49 }
 0x150   : > { %v1976_v40 = vpop.f32.mrf.mxu0 }
 0x151   : > { %v1996_v41 = vpop.f32.mrf.mxu1  ;;  %v1260_v56 = vadd.f32 %v1246_v39, %v1111_v50 }
 0x152   : > { %v1100_v51 = vpop.f32.mrf.mxu0 }
 0x153   : > { %v1112_v57 = vadd.f32 %v1100_v51, %v962_v52  ;;  %v1249_v59 = vpop.f32.mrf.mxu1 }
 0x155   : > { %v1261_v0 = vadd.f32 %v1249_v59, %v1112_v57 }
 0x16c   : > { %v2015_v54 = vpop.f32.mrf.mxu0 }
 0x16d   : > { %v1388_v58 = vadd.f32 %v2015_v54, %v1262_v53 }
 0x16e   : > { %v1372_v60 = vpop.f32.mrf.mxu0 }
 0x16f   : > { %v1398_v61 = vadd.f32 %v1729_v55, %v1388_v58  ;;  %v1386_v62 = vadd.f32 %v1372_v60, %v1260_v56 }
 0x170   : > { %v2016_v63 = vpop.f32.mrf.mxu0 }
 0x171   : > { %v1732_v1 = vmul.f32 -1.442695, %v1398_v61  ;;  %v1396_v2 = vadd.f32 %v1729_v55, %v1386_v62 }
 0x172   : > { %v1375_v3 = vpop.f32.mrf.mxu0 }
 0x173   : > { %2113 = vpow2.f32 %v1732_v1  ;;  %v1730_v4 = vmul.f32 -1.442695, %v1396_v2  ;;  %v1387_v5 = vadd.f32 %v1375_v3, %v1261_v0 }
 0x175   : > { %2115 = vpow2.f32 %v1730_v4  ;;  %v1397_v6 = vadd.f32 %v1729_v55, %v1387_v5 }
 0x177   : > { %v1731_v7 = vmul.f32 -1.442695, %v1397_v6 }
 0x179   : > { %2117 = vpow2.f32 %v1731_v7 }
 0x180   : > { %v2114_v8 = vpop.eup %2113 }
 0x181   : > { %v1410_v9 = vadd.f32 1.0, %v2114_v8 }
 0x182   : > { %v2116_v10 = vpop.eup %2115 }
 0x183   : > { %2119 = vrcp.f32 %v1410_v9  ;;  %v1408_v11 = vadd.f32 1.0, %v2116_v10 }
 0x185   : > { %2121 = vrcp.f32 %v1408_v11 }
 0x186   : > { %v2118_v12 = vpop.eup %2117 }
 0x187   : > { %v1409_v13 = vadd.f32 1.0, %v2118_v12 }
 0x189   : > { %2123 = vrcp.f32 %v1409_v13 }
 0x190   : > { %v2120_v14 = vpop.eup %2119 }
 0x191   : > { %v1419_v15 = vmul.f32 %v2120_v14, %v1398_v61 }
 0x192   : > { %v2122_v17 = vpop.eup %2121 }
 0x193   : > { %v1741_v16 = vpack.c.bf16 %v1419_v15, %v1419_v15  ;;  %v1417_v19 = vmul.f32 %v2122_v17, %v1396_v2 }
 0x195   : > { %1435 = vst [vmem:[%s175_s22 + $0x8] sm:$0x3] %v1741_v16 }
 0x196   : > { %v2124_v18 = vpop.eup %2123 }
 0x197   : > { %v1418_v20 = vmul.f32 %v2124_v18, %v1397_v6 }
 0x199   : > { %v1745_v21 = vpack.c.bf16 %v1418_v20, %v1417_v19 }
 0x19b   : > { %1746 = vst [vmem:[%s175_s22] sm:$0xff] %v1745_v21  }
 0x19c PF: > { %s13_s12 = sadd.s32 1, %s2131_s12  }
 0x19d   : > { %p10_p5 = scmp.ge.s32.totalorder %s13_s12, 4  }
 0x19f   :  { %12 = sbr.rel (!%p10_p5) target bundleno = 1 (0x1), region = 73 }

// kernel: a_call__.16
= control target key start
LH: loop header
LB: loop body
LE: loop exit
PB: predicated region body
PF: predicated region fallthrough
CT: control target
= control target key end

     0   :  { %s773_s12 = smov 0   ;;  %s775_s13 = smov 0   ;;  %s866_s0 = inlined_call_operand.vmem [shape: bf16[32,384], index: 0, kind: input, shape index: {}]   ;;  %s867_s1 = inlined_call_operand.vmem [shape: bf16[384,128], index: 1, kind: input, shape index: {}]   ;;  %s868_s2 = inlined_call_operand.vmem [shape: f32[1,128], index: 2, kind: input, shape index: {}]   ;;  %s869_s3 = inlined_call_operand.vmem [shape: bf16[32,128], index: 3, kind: output, shape index: {}]  }
   0x1   :  { %s777_s14 = smov 0   ;;  %s779_s15 = smov 0  }
   0x2   :  { %s781_s16 = smov 0  }
   0x3 LB: > { %s22_s17 = sadd.s32 1, %s746_s15  ;;  %p41_p1 = scmp.ne.s32.totalorder %s738_s13, %s734_s12  ;;  %s750_s16 = sphi %s781_s16, %s13_s16   ;;  %s746_s15 = sphi %s779_s15, %s873_s15   ;;  %s742_s14 = sphi %s777_s14, %s872_s14   ;;  %s738_s13 = sphi %s775_s13, %s871_s13   ;;  %s734_s12 = sphi %s773_s12, %s870_s12  }
   0x4   : > { %p23_p0 = scmp.ge.s32.totalorder %s22_s17, 3  ;;  %p42_p2 = scmp.eq.s32.totalorder %s750_s16, 0 }
   0x5   : > { %s34_s19 = sadd.s32 1, %s738_s13  ;;  %p568_p5 = scmp.ge.s32.totalorder %s750_s16, 3 }
   0x6   : > { %s875_s17 = smov (%p23_p0, %s22_s17), 0  ;;  %p43_p3 = por %p42_p2, %p41_p1 }
   0x7   : > { %s30_s18 = ssub.s32 %s746_s15, %s875_s17  ;;  %143 = sbr.rel (%p568_p5) target bundleno = 18 (0x12), region = 20 }
   0x8   : > { %p32_p4 = scmp.eq.s32.totalorder %s30_s18, 0 }
   0xa   : > { %s808_s20 = scalar_select %p32_p4, %s738_s13, %s34_s19  }
   0xc   : > { %146 = sbr.rel (!%p43_p3) target bundleno = 18 (0x12), region = 24  ;;  %s148_s21 = sand.u32 (%p43_p3), 1, %s738_s13  }
   0xd   : > { %s570_s22 = sshll.u32 (%p43_p3), %s746_s15, 2  ;;  %s569_s23 = sshll.u32 (%p43_p3), %s148_s21, 4 }
   0xe   : > { %s155_s26 = scalar_lea.vmem (%p43_p3), %s866_s0, %s570_s22  ;;  %s150_s27 = scalar_lea.vmem (%p43_p3), [#allocation3], %s569_s23 }
   0xf   : > { %v172_v0 = vld [vmem:[%s155_s26] sm:$0xf] (%p43_p3)  ;;  %v174_v1 = vld [vmem:[%s155_s26 + $0xc] sm:$0xf] (%p43_p3)  ;;  %v176_v2 = vld [vmem:[%s155_s26 + $0x18] sm:$0xf] (%p43_p3) }
  0x10   : > { %173 = vst [vmem:[%s150_s27] sm:$0xf] (%p43_p3), %v172_v0  ;;  %175 = vst [vmem:[%s150_s27 + $0x4] sm:$0xf] (%p43_p3), %v174_v1  ;;  %v178_v3 = vld [vmem:[%s155_s26 + $0x24] sm:$0xf] (%p43_p3) }
  0x11   : > { %177 = vst [vmem:[%s150_s27 + $0x8] sm:$0xf] %v176_v2  ;;  %179 = vst [vmem:[%s150_s27 + $0xc] sm:$0xf] %v178_v3 }
  0x12 PF: > { %p571_p6 = scmp.ge.s32.totalorder %s750_s16, 1  ;;  %p219_p7 = scmp.lt.s32.totalorder %s750_s16, 4 }
  0x14   : > { %p220_p8 = pnand %p571_p6, %p219_p7 }
  0x15   : > { %s226_s28 = sand.u32 (!%p220_p8), 1, %s734_s12   ;;  %s573_s29 = sshll.u32 (!%p220_p8), %s742_s14, 4 }
  0x16   : > { %223 = sbr.rel (%p220_p8) target bundleno = 318 (0x13e), region = 69  ;;  %s820_s30 = sshll.u32 (!%p220_p8), %s226_s28, 4 }
  0x17   : > { %p256_p9 = scmp.lt.s32.totalorder (!%p220_p8), %s573_s29, 47  ;;  %s228_s8 = scalar_lea.vmem (!%p220_p8), [#allocation3], %s820_s30 }
  0x18   : > { %p575_p10 = scmp.ne.s32.totalorder (!%p220_p8), %s742_s14, 0 }
  0x1b   : > { %s877_s29 = smov (!%p256_p9, %s573_s29), 47  ;;  %271 = sbr.rel (%p575_p10) target bundleno = 35 (0x23), region = 77 }
  0x1c   : > { %s574_s4 = sshll.u32 %s877_s29, 2 }
  0x1d   : > { %s825_s7 = scalar_lea.vmem %s867_s1, %s574_s4 }
  0x20   : > { %v752_v4 = vmov 0.0  }
  0x21   : > { %272 = vst [vmem:[#allocation2 + $0x10] sm:$0xff] %v752_v4  ;;  %273 = vst [vmem:[#allocation2] sm:$0xff] %v752_v4 }
  0x22   : > { %274 = vst [vmem:[#allocation2 + $0x18] sm:$0xff] %v752_v4  ;;  %275 = vst [vmem:[#allocation2 + $0x8] sm:$0xff] %v752_v4 }
  0x23 PF: > { %v686_v5 = vld [vmem:[%s825_s7 + $0x38] sm:$0xff]   ;;  %v687_v6 = vld [vmem:[%s825_s7 + $0x30] sm:$0xff]   ;;  %v688_v7 = vld [vmem:[%s825_s7 + $0x28] sm:$0xff]   ;;  %p586_p11 = scmp.ne.s32.totalorder %s742_s14, 2 }
  0x24   : > { %625 = vmatprep.subr.bf16.mxu0 %v686_v5  ;;  %v689_v8 = vld [vmem:[%s825_s7 + $0x20] sm:$0xff]   ;;  %v690_v10 = vld [vmem:[%s825_s7 + $0x18] sm:$0xff]   ;;  %v691_v11 = vld [vmem:[%s825_s7 + $0x10] sm:$0xff]  }
  0x25   : > { %626 = vmatpush3.bf16.msra.mxu0 %v686_v5  ;;  %v694_v9 = vld [vmem:[%s228_s8] sm:$0xff]   ;;  %v692_v12 = vld [vmem:[%s825_s7 + $0x8] sm:$0xff]  }
  0x26   : > { %627 = vmatprep.subr.bf16.mxu0 %v687_v6  ;;  %641 = vmatprep.mubr.bf16.mxu0 %v694_v9  ;;  %v693_v13 = vld [vmem:[%s825_s7] sm:$0xff]   ;;  %v695_v14 = vld [vmem:[%s228_s8 + $0x8] sm:$0xff]  }
  0x28   : > { %v276_v17 = vld [vmem:[#allocation2 + $0x10] sm:$0xff]  ;;  %v277_v23 = vld [vmem:[#allocation2] sm:$0xff] }
  0x29   : > { %628 = vmatpush3.bf16.msra.mxu0 %v687_v6  ;;  %v278_v15 = vld [vmem:[#allocation2 + $0x18] sm:$0xff]  ;;  %v279_v20 = vld [vmem:[#allocation2 + $0x8] sm:$0xff] }
  0x2a   : > { %629 = vmatprep.subr.bf16.mxu0 %v688_v7 }
  0x2d   : > { %630 = vmatpush3.bf16.msra.mxu0 %v688_v7 }
  0x2e   : > { %631 = vmatprep.subr.bf16.mxu0 %v689_v8 }
  0x31   : > { %632 = vmatpush3.bf16.msra.mxu0 %v689_v8 }
  0x32   : > { %633 = vmatprep.subr.bf16.mxu0 %v690_v10 }
  0x35   : > { %634 = vmatpush3.bf16.msra.mxu0 %v690_v10 }
  0x36   : > { %635 = vmatprep.subr.bf16.mxu0 %v691_v11 }
  0x39   : > { %636 = vmatpush3.bf16.msra.mxu0 %v691_v11 }
  0x3a   : > { %637 = vmatprep.subr.bf16.mxu0 %v692_v12 }
  0x3d   : > { %638 = vmatpush3.bf16.msra.mxu0 %v692_v12 }
  0x3e   : > { %639 = vmatprep.subr.bf16.mxu0 %v693_v13 }
  0x41   : > { %640 = vmatpush3.bf16.msra.mxu0 %v693_v13 }
  0x44   : > { %642 = vmatmul.mubr.bf16.vlgmr.msra.gmra.mxu0 %v695_v14 }
 0x104   : > { %v643_v16 = vpop.f32.mrf.mxu0 }
 0x105   : > { %v411_v18 = vadd.f32 %v643_v16, %v278_v15 }
 0x106   : > { %v394_v19 = vpop.f32.mrf.mxu0 }
 0x107   : > { %415 = vst [vmem:[#allocation2 + $0x18] sm:$0xff] %v411_v18  ;;  %v409_v21 = vadd.f32 %v394_v19, %v276_v17 }
 0x108   : > { %v644_v22 = vpop.f32.mrf.mxu0 }
 0x109   : > { %413 = vst [vmem:[#allocation2 + $0x10] sm:$0xff] %v409_v21  ;;  %v412_v24 = vadd.f32 %v644_v22, %v279_v20  ;;  %420 = sbr.rel (%p586_p11) target bundleno = 318 (0x13e), region = 81 }
 0x10a   : > { %v397_v25 = vpop.f32.mrf.mxu0 }
 0x10b   : > { %416 = vst [vmem:[#allocation2 + $0x8] sm:$0xff] %v412_v24  ;;  %v410_v26 = vadd.f32 %v397_v25, %v277_v23 }
 0x10d   : > { %414 = vst [vmem:[#allocation2] sm:$0xff] %v410_v26 }
 0x10e   : > { %v587_v29 = vld [vmem:[%s868_s2] ss:$0 sm:$0xff]  ;;  %v423_v32 = vld [vmem:[#allocation2 + $0x18] sm:$0xff] }
 0x10f   : > { %v434_v34 = vadd.f32 %v587_v29, %v423_v32 }
 0x110   : > { %v421_v27 = vld [vmem:[#allocation2 + $0x10] sm:$0xff] }
 0x111   : > { %v432_v30 = vadd.f32 %v587_v29, %v421_v27  ;;  %v590_v38 = vmul.f32 -1.442695, %v434_v34 }
 0x112   : > { %v424_v33 = vld [vmem:[#allocation2 + $0x8] sm:$0xff] }
 0x113   : > { %v435_v35 = vadd.f32 %v587_v29, %v424_v33  ;;  %v588_v36 = vmul.f32 -1.442695, %v432_v30 }
 0x114   : > { %v422_v28 = vld [vmem:[#allocation2] sm:$0xff] }
 0x115   : > { %v433_v31 = vadd.f32 %v587_v29, %v422_v28  ;;  %v591_v39 = vmul.f32 -1.442695, %v435_v35  ;;  %696 = vpow2.f32 %v588_v36 }
 0x117   : > { %v589_v37 = vmul.f32 -1.442695, %v433_v31 }
 0x119   : > { %698 = vpow2.f32 %v589_v37 }
 0x11a   : > { %700 = vpow2.f32 %v590_v38 }
 0x11b   : > { %702 = vpow2.f32 %v591_v39 }
 0x122   : > { %v697_v40 = vpop.eup %696 }
 0x123   : > { %v448_v42 = vadd.f32 1.0, %v697_v40 }
 0x125   : > { %704 = vrcp.f32 %v448_v42 }
 0x126   : > { %v699_v41 = vpop.eup %698 }
 0x127   : > { %v701_v43 = vpop.eup %700  ;;  %v449_v44 = vadd.f32 1.0, %v699_v41 }
 0x128   : > { %v703_v45 = vpop.eup %702  ;;  %v450_v46 = vadd.f32 1.0, %v701_v43 }
 0x129   : > { %706 = vrcp.f32 %v449_v44  ;;  %v451_v47 = vadd.f32 1.0, %v703_v45 }
 0x12a   : > { %708 = vrcp.f32 %v450_v46 }
 0x12b   : > { %710 = vrcp.f32 %v451_v47 }
 0x132   : > { %v705_v48 = vpop.eup %704 }
 0x133   : > { %v460_v50 = vmul.f32 %v705_v48, %v432_v30 }
 0x136   : > { %v707_v49 = vpop.eup %706 }
 0x137   : > { %v709_v51 = vpop.eup %708  ;;  %v461_v52 = vmul.f32 %v707_v49, %v433_v31 }
 0x138   : > { %v711_v53 = vpop.eup %710  ;;  %v462_v54 = vmul.f32 %v709_v51, %v434_v34 }
 0x139   : > { %v607_v55 = vpack.c.bf16 %v461_v52, %v460_v50  ;;  %v463_v56 = vmul.f32 %v711_v53, %v435_v35 }
 0x13b   : > { %608 = vst [vmem:[%s869_s3] sm:$0xff] %v607_v55   ;;  %v612_v57 = vpack.c.bf16 %v463_v56, %v462_v54 }
 0x13d   : > { %614 = vst [vmem:[%s869_s3 + $0x8] sm:$0xff] %v612_v57  }
 0x13e PF: > { %s13_s16 = sadd.s32 1, %s750_s16   ;;  %s870_s12 = smov %s738_s13 }
 0x13f   : > { %p10_p12 = scmp.ge.s32.totalorder %s13_s16, 5   ;;  %s871_s13 = smov %s808_s20 }
 0x140   : > { %s872_s14 = smov %s746_s15  ;;  %s873_s15 = smov %s875_s17 }
 0x141   :  { %12 = sbr.rel (!%p10_p12) target bundleno = 3 (0x3), region = 119 }

// kernel: a_call__.15
= control target key start
LH: loop header
LB: loop body
LE: loop exit
PB: predicated region body
PF: predicated region fallthrough
CT: control target
= control target key end

     0   :  { %s2171_s15 = smov 0   ;;  %s2482_s0 = inlined_call_operand.vmem [shape: bf16[2,38,128], index: 0, kind: input, shape index: {}]   ;;  %s2483_s1 = inlined_call_operand.vmem [shape: bf16[9,128,128], index: 1, kind: input, shape index: {}]   ;;  %s2484_s2 = inlined_call_operand.vmem [shape: f32[1,128], index: 2, kind: input, shape index: {}]   ;;  %s2485_s3 = inlined_call_operand.vmem [shape: bf16[2,24,128], index: 3, kind: input, shape index: {}]   ;;  %s2486_s4 = inlined_call_operand.vmem [shape: bf16[2,24,128], index: 4, kind: output, shape index: {}]  }
   0x1 LB: > { %s1519_s16 = sadd.s32 4294967295, %s2144_s15   ;;  %p1523_p0 = scmp.ge.s32.totalorder %s2144_s15, 1  ;;  %s2144_s15 = sphi %s2171_s15, %s14_s15  }
   0x2   : > { %p172_p1 = scmp.lt.s32.totalorder %s2144_s15, 3 }
   0x4   : > { %p173_p2 = pnand %p1523_p0, %p172_p1 }
   0x5   : > { %p203_p3 = scmp.lt.s32.totalorder (!%p173_p2), %s1519_s16, 1 }
   0x6   : > { %176 = sbr.rel (%p173_p2) target bundleno = 414 (0x19e), region = 36 }
   0xb   : > { %v2041_v0 = vld [vmem:[%s2483_s1 + $0x78] sm:$0xff]   ;;  %v2043_v2 = vld [vmem:[%s2483_s1 + $0x70] sm:$0xff]   ;;  %v2045_v4 = vld [vmem:[%s2483_s1 + $0x68] sm:$0xff]   ;;  %s2488_s16 = smov (!%p203_p3, %s1519_s16), 1  ;;  %vm266_vm0 = vsmask.f32 7424 }
   0xc   : > { %v2042_v1 = vld [vmem:[%s2483_s1 + $0x38] sm:$0xff]   ;;  %1851 = vmatprep.subr.bf16.mxu0 %v2041_v0  ;;  %v2044_v3 = vld [vmem:[%s2483_s1 + $0x30] sm:$0xff]   ;;  %v2046_v5 = vld [vmem:[%s2483_s1 + $0x28] sm:$0xff]   ;;  %s2031_s7 = smul.u32 20, %s2488_s16  ;;  %vm500_vm1 = vcmask 1046528   ;;  %vm630_vm2 = vcmask 1044480  }
   0xd   : > { %1871 = vmatprep.subr.bf16.mxu1 %v2042_v1  ;;  %1852 = vmatpush3.bf16.msra.mxu0 %v2041_v0  ;;  %v2047_v6 = vld [vmem:[%s2483_s1 + $0x60] sm:$0xff]   ;;  %v2049_v8 = vld [vmem:[%s2483_s1 + $0x58] sm:$0xff]   ;;  %v2051_v10 = vld [vmem:[%s2483_s1 + $0x50] sm:$0xff]   ;;  %vm756_vm3 = vsmask.f32 4352  ;;  %vm1026_vm4 = vcmask 1045504  }
   0xe   : > { %1872 = vmatpush3.bf16.msra.mxu1 %v2042_v1  ;;  %1853 = vmatprep.subr.bf16.mxu0 %v2043_v2  ;;  %v2048_v7 = vld [vmem:[%s2483_s1 + $0x20] sm:$0xff]   ;;  %v2050_v9 = vld [vmem:[%s2483_s1 + $0x18] sm:$0xff]   ;;  %s2215_s14 = scalar_lea.vmem %s2482_s0, %s2031_s7  ;;  %v2052_v14 = vld [vmem:[%s2483_s1 + $0x10] sm:$0xff]   ;;  %vm1152_vm5 = vsmask.f32 5376  ;;  %s2032_s25 = smul.u32 12, %s2488_s16 }
   0xf   : > { %1873 = vmatprep.subr.bf16.mxu1 %v2044_v3  ;;  %v219_v11 = vld [vmem:[%s2215_s14] sm:$0xf]  ;;  %v2222_v12 = vld [vmem:[%s2215_s14 + $0x4] sm:$0xf]  ;;  %v2225_v13 = vld [vmem:[%s2215_s14 + $0x8] sm:$0xf] }
  0x10   : > { %v238_v15 = vld [vmem:[%s2215_s14 + $0xc] sm:$0x1]  ;;  %v1543_v16 = vcombine.low %v219_v11, %v2222_v12  ;;  %v2055_v26 = vld [vmem:[%s2483_s1 + $0x40] sm:$0xff]   ;;  %v2060_v30 = vld [vmem:[%s2483_s1 + $0xb8] sm:$0xff]   ;;  %v1553_v33 = vcombine.low %v2225_v13, %v2225_v13  ;;  %s212_s28 = scalar_lea.vmem %s2485_s3, %s2032_s25  ;;  %s217_s5 = scalar_lea.vmem %s2486_s4, %s2032_s25 }
  0x11   : > { %1854 = vmatpush3.bf16.msra.mxu0 %v2043_v2  ;;  %v2233_v17 = vcombine.low %v2225_v13, %v238_v15  ;;  %v2053_v20 = vld [vmem:[%s2483_s1 + $0x48] sm:$0xff]   ;;  %v2056_v27 = vld [vmem:[%s2483_s1] sm:$0xff]   ;;  %v2061_v31 = vld [vmem:[%s2483_s1 + $0xf8] sm:$0xff]   ;;  %v1654_v15 = vcombine.low %v2222_v12, %v2225_v13 }
  0x12   : > { %1874 = vmatpush3.bf16.msra.mxu1 %v2044_v3  ;;  %1855 = vmatprep.subr.bf16.mxu0 %v2045_v4  ;;  %v268_v18 = vshrl.u32 %v1543_v16, 16  ;;  %v270_v19 = vshll.u32 %v1543_v16, 16  ;;  %v2054_v22 = vld [vmem:[%s2483_s1 + $0x8] sm:$0xff]   ;;  %v2062_v34 = vld [vmem:[%s2483_s1 + $0xb0] sm:$0xff]   ;;  %v479_v36 = vld [vmem:[%s2215_s14] sm:$0xe] }
  0x13   : > { %1875 = vmatprep.subr.bf16.mxu1 %v2046_v5  ;;  %1887 = vmatprep.mubr.bf16.mxu1 %v1543_v16  ;;  %v275_v21 = vshll.u32 %v2233_v17, 16  ;;  %v279_v29 = vshrl.u32 %v2233_v17, 16  ;;  %v2063_v35 = vld [vmem:[%s2483_s1 + $0xf0] sm:$0xff]   ;;  %v1578_v37 = vcombine.low %v479_v36, %v2222_v12  ;;  %v502_v38 = vrot.slane %v2233_v17, 1  ;;  %v605_v39 = vld [vmem:[%s2215_s14] sm:$0x8] }
  0x14   : > { %v272_v23 = vrot.slane %v270_v19, 1  ;;  %v606_v40 = vld [vmem:[%s2215_s14 + $0xc] sm:$0x7]  ;;  %v1603_v42 = vcombine.low %v605_v39, %v2222_v12  ;;  %v2066_v49 = vld [vmem:[%s2483_s1 + $0xa0] sm:$0xff]   ;;  %v2068_v52 = vld [vmem:[%s2483_s1 + $0x98] sm:$0xff]  }
  0x15   : > { %1856 = vmatpush3.bf16.msra.mxu0 %v2045_v4  ;;  %v277_v24 = vrot.slane %v275_v21, 1  ;;  %v2064_v41 = vld [vmem:[%s2483_s1 + $0xa8] sm:$0xff]   ;;  %v1604_v43 = vcombine.low %v2225_v13, %v606_v40  ;;  %v501_v45 = vrot.slane %v1578_v37, 1  ;;  %v2067_v51 = vld [vmem:[%s2483_s1 + $0xe0] sm:$0xff]   ;;  %v2069_v53 = vld [vmem:[%s2483_s1 + $0xd8] sm:$0xff]  }
  0x16   : > { %1876 = vmatpush3.bf16.msra.mxu1 %v2046_v5  ;;  %1857 = vmatprep.subr.bf16.mxu0 %v2047_v6  ;;  %v273_v25 = vor.u32 %v272_v23, %v268_v18  ;;  %v2065_v44 = vld [vmem:[%s2483_s1 + $0xe8] sm:$0xff]   ;;  %v631_v46 = vrot.slane %v1603_v42, 3  ;;  %v2070_v54 = vld [vmem:[%s2483_s1 + $0x90] sm:$0xff]   ;;  %v758_v58 = vshrl.u32 %v1603_v42, 16  ;;  %v761_v59 = vshll.u32 %v1603_v42, 16  ;;  %v2074_v0 = vld [vmem:[%s2483_s1 + $0x80] sm:$0xff]  }
  0x17   : > { %1877 = vmatprep.subr.bf16.mxu1 %v2048_v7  ;;  %v281_v32 = vor.u32 %v279_v29, %v277_v24  ;;  %v2277_v47 = vrot.slane %v1604_v43, 3  ;;  %v503_v48 = vsel %vm500_vm1, %v501_v45, %v502_v38  ;;  %v2071_v55 = vld [vmem:[%s2483_s1 + $0xd0] sm:$0xff]   ;;  %v2072_v56 = vld [vmem:[%s2483_s1 + $0x88] sm:$0xff]   ;;  %v2075_v1 = vld [vmem:[%s2483_s1 + $0xc0] sm:$0xff]  }
  0x18   : > { %v278_v28 = vsel %vm266_vm0, %v273_v25, %v277_v24  ;;  %v2306_v57 = vld [vmem:[%s2215_s14 + $0xc] sm:$0xf]  ;;  %v760_v2 = vrot.slane %v758_v58, 3  ;;  %v763_v3 = vrot.slane %v761_v59, 4  ;;  %v2082_v11 = vld [vmem:[%s2483_s1 + $0x170] sm:$0xff]   ;;  %v2085_v12 = vld [vmem:[%s2483_s1 + $0x120] sm:$0xff]  }
  0x19   : > { %1858 = vmatpush3.bf16.msra.mxu0 %v2047_v6  ;;  %1867 = vmatprep.mubr.bf16.mxu0 %v278_v28  ;;  %v633_v50 = vsel %vm630_vm2, %v631_v46, %v2277_v47  ;;  %v1629_v60 = vcombine.low %v2225_v13, %v2306_v57  ;;  %v2073_v61 = vld [vmem:[%s2483_s1 + $0xc8] sm:$0xff]   ;;  %v2077_v6 = vld [vmem:[%s2483_s1 + $0x138] sm:$0xff]   ;;  %v2086_v13 = vld [vmem:[%s2483_s1 + $0x160] sm:$0xff]  }
  0x1a   : > { %1878 = vmatpush3.bf16.msra.mxu1 %v2048_v7  ;;  %1859 = vmatprep.subr.bf16.mxu0 %v2049_v8  ;;  %v2080_v7 = vld [vmem:[%s2483_s1 + $0x178] sm:$0xff]   ;;  %v2083_v16 = vld [vmem:[%s2483_s1 + $0x128] sm:$0xff]   ;;  %v1131_v19 = vld [vmem:[%s2215_s14 + $0x10] sm:$0x7] }
  0x1b   : > { %1879 = vmatprep.subr.bf16.mxu1 %v2050_v9  ;;  %v766_v62 = vshrl.u32 %v1629_v60, 16  ;;  %v769_v63 = vshll.u32 %v1629_v60, 16  ;;  %v2084_v17 = vld [vmem:[%s2483_s1 + $0x168] sm:$0xff]   ;;  %v2088_v21 = vld [vmem:[%s2483_s1 + $0x158] sm:$0xff]   ;;  %v1271_v24 = vld [vmem:[%s2215_s14 + $0x4] sm:$0x8] }
  0x1c   : > { %v997_v18 = vld [vmem:[%s2215_s14 + $0xc] sm:$0xf]  ;;  %v996_v23 = vld [vmem:[%s2215_s14 + $0x8] sm:$0xf]  ;;  %v995_v28 = vld [vmem:[%s2215_s14 + $0x4] sm:$0xc] }
  0x1d   : > { %1860 = vmatpush3.bf16.msra.mxu0 %v2049_v8  ;;  %v768_v4 = vrot.slane %v766_v62, 3  ;;  %v771_v5 = vrot.slane %v769_v63, 4  ;;  %v764_v8 = vor.u32 %v763_v3, %v760_v2  ;;  %v1731_v25 = vcombine.low %v1271_v24, %v996_v23  ;;  %v2090_v29 = vld [vmem:[%s2483_s1 + $0x150] sm:$0xff]   ;;  %v2093_v40 = vld [vmem:[%s2483_s1 + $0x100] sm:$0xff]   ;;  %v2102_v58 = vld [vmem:[%s2483_s1 + $0x1a8] sm:$0xff]  }
  0x1e   : > { %1880 = vmatpush3.bf16.msra.mxu1 %v2050_v9  ;;  %1861 = vmatprep.subr.bf16.mxu0 %v2051_v10  ;;  %v2103_v59 = vld [vmem:[%s2483_s1 + $0x1e8] sm:$0xff]   ;;  %v2104_v60 = vld [vmem:[%s2483_s1 + $0x1a0] sm:$0xff]   ;;  %v2106_v62 = vld [vmem:[%s2483_s1 + $0x198] sm:$0xff]  }
  0x1f   : > { %1881 = vmatprep.subr.bf16.mxu1 %v2052_v14  ;;  %v2325_v9 = vor.u32 %v771_v5, %v768_v4  ;;  %v2107_v63 = vld [vmem:[%s2483_s1 + $0x1d8] sm:$0xff]   ;;  %v2110_v2 = vld [vmem:[%s2483_s1 + $0x188] sm:$0xff]   ;;  %v2112_v4 = vld [vmem:[%s2483_s1 + $0x180] sm:$0xff]  }
  0x20   : > { %v2111_v3 = vld [vmem:[%s2483_s1 + $0x1c8] sm:$0xff]   ;;  %v2113_v5 = vld [vmem:[%s2483_s1 + $0x1c0] sm:$0xff]  }
  0x21   : > { %1862 = vmatpush3.bf16.msra.mxu0 %v2051_v10  ;;  %v2081_v10 = vld [vmem:[%s2483_s1 + $0x130] sm:$0xff]  }
  0x22   : > { %1882 = vmatpush3.bf16.msra.mxu1 %v2052_v14  ;;  %1863 = vmatprep.subr.bf16.mxu0 %v2053_v20  ;;  %v773_v14 = vsel %vm756_vm3, %v764_v8, %v2325_v9  ;;  %v2119_v8 = vld [vmem:[%s2483_s1 + $0x228] sm:$0xff]  }
  0x23   : > { %1883 = vmatprep.subr.bf16.mxu1 %v2054_v22 }
  0x25   : > { %1864 = vmatpush3.bf16.msra.mxu0 %v2053_v20  ;;  %v2087_v20 = vld [vmem:[%s2483_s1 + $0x118] sm:$0xff]  }
  0x26   : > { %1884 = vmatpush3.bf16.msra.mxu1 %v2054_v22  ;;  %1865 = vmatprep.subr.bf16.mxu0 %v2055_v26  ;;  %v2359_v22 = vcombine.low %v997_v18, %v1131_v19 }
  0x27   : > { %1885 = vmatprep.subr.bf16.mxu1 %v2056_v27 }
  0x28   : > { %v1165_v39 = vshll.u32 %v2359_v22, 16 }
  0x29   : > { %1866 = vmatpush3.bf16.msra.mxu0 %v2055_v26  ;;  %v1293_v26 = vrot.slane %v2359_v22, 3 }
  0x2a   : > { %1886 = vmatpush3.bf16.msra.mxu1 %v2056_v27  ;;  %1891 = vmatprep.subr.bf16.mxu0 %v2060_v30  ;;  %v2089_v27 = vld [vmem:[%s2483_s1 + $0x110] sm:$0xff]   ;;  %v1167_v46 = vrot.slane %v1165_v39, 3 }
  0x2b   : > { %1911 = vmatprep.subr.bf16.mxu1 %v2061_v31 }
  0x2c   : > { %1868 = vmatmul.mubr.bf16.vlgmr.msra.gmra.mxu0 %v281_v32 }
  0x2d   : > { %1888 = vmatmul.mubr.bf16.vlgmr.msra.gmra.mxu1 %v1553_v33  ;;  %1892 = vmatpush3.bf16.msra.mxu0 %v2060_v30  ;;  %v1292_v30 = vrot.slane %v1731_v25, 3  ;;  %v2091_v33 = vld [vmem:[%s2483_s1 + $0x108] sm:$0xff]  }
  0x2e   : > { %1912 = vmatpush3.bf16.msra.mxu1 %v2061_v31  ;;  %1893 = vmatprep.subr.bf16.mxu0 %v2062_v34  ;;  %v1680_v31 = vcombine.low %v995_v28, %v996_v23 }
  0x2f   : > { %1913 = vmatprep.subr.bf16.mxu1 %v2063_v35  ;;  %1907 = vmatprep.mubr.bf16.mxu0 %v503_v48  ;;  %v2374_v32 = vsel %vm630_vm2, %v1292_v30, %v1293_v26  ;;  %v2099_v48 = vld [vmem:[%s2483_s1 + $0x1f8] sm:$0xff]  }
  0x30   : > { %1927 = vmatprep.mubr.bf16.mxu1 %v633_v50  ;;  %v1154_v36 = vshrl.u32 %v1680_v31, 16  ;;  %v1157_v37 = vshll.u32 %v1680_v31, 16 }
  0x31   : > { %1894 = vmatpush3.bf16.msra.mxu0 %v2062_v34  ;;  %v2092_v34 = vld [vmem:[%s2483_s1 + $0x148] sm:$0xff]  }
  0x32   : > { %1914 = vmatpush3.bf16.msra.mxu1 %v2063_v35  ;;  %1895 = vmatprep.subr.bf16.mxu0 %v2064_v41  ;;  %v998_v35 = vld [vmem:[%s2215_s14 + $0x10] sm:$0x3]  ;;  %v1156_v43 = vrot.slane %v1154_v36, 2 }
  0x33   : > { %1915 = vmatprep.subr.bf16.mxu1 %v2065_v44  ;;  %v1681_v42 = vcombine.low %v997_v18, %v998_v35 }
  0x35   : > { %1896 = vmatpush3.bf16.msra.mxu0 %v2064_v41  ;;  %v2094_v41 = vld [vmem:[%s2483_s1 + $0x140] sm:$0xff]   ;;  %v1028_v50 = vrot.slane %v1681_v42, 2 }
  0x36   : > { %1916 = vmatpush3.bf16.msra.mxu1 %v2065_v44  ;;  %1897 = vmatprep.subr.bf16.mxu0 %v2066_v49  ;;  %v1159_v44 = vrot.slane %v1157_v37, 3 }
  0x37   : > { %1917 = vmatprep.subr.bf16.mxu1 %v2067_v51 }
  0x39   : > { %1898 = vmatpush3.bf16.msra.mxu0 %v2066_v49  ;;  %v1027_v49 = vrot.slane %v1680_v31, 2 }
  0x3a   : > { %1918 = vmatpush3.bf16.msra.mxu1 %v2067_v51  ;;  %1899 = vmatprep.subr.bf16.mxu0 %v2068_v52  ;;  %v1655_v51 = vcombine.low %v2306_v57, %v2306_v57 }
  0x3b   : > { %1919 = vmatprep.subr.bf16.mxu1 %v2069_v53 }
  0x3d   : > { %1900 = vmatpush3.bf16.msra.mxu0 %v2068_v52  ;;  %v1160_v52 = vor.u32 %v1159_v44, %v1156_v43 }
  0x3e   : > { %1920 = vmatpush3.bf16.msra.mxu1 %v2069_v53  ;;  %1901 = vmatprep.subr.bf16.mxu0 %v2070_v54 }
  0x3f   : > { %1921 = vmatprep.subr.bf16.mxu1 %v2071_v55 }
  0x41   : > { %1902 = vmatpush3.bf16.msra.mxu0 %v2070_v54  ;;  %v2100_v54 = vld [vmem:[%s2483_s1 + $0x1b0] sm:$0xff]  }
  0x42   : > { %1922 = vmatpush3.bf16.msra.mxu1 %v2071_v55  ;;  %1903 = vmatprep.subr.bf16.mxu0 %v2072_v56  ;;  %v2101_v55 = vld [vmem:[%s2483_s1 + $0x1f0] sm:$0xff]  }
  0x43   : > { %1923 = vmatprep.subr.bf16.mxu1 %v2073_v61 }
  0x45   : > { %1904 = vmatpush3.bf16.msra.mxu0 %v2072_v56  ;;  %v1029_v56 = vsel %vm1026_vm4, %v1027_v49, %v1028_v50 }
  0x46   : > { %1924 = vmatpush3.bf16.msra.mxu1 %v2073_v61  ;;  %1905 = vmatprep.subr.bf16.mxu0 %v2074_v0  ;;  %v2105_v61 = vld [vmem:[%s2483_s1 + $0x1e0] sm:$0xff]  }
  0x47   : > { %1925 = vmatprep.subr.bf16.mxu1 %v2075_v1 }
  0x49   : > { %1906 = vmatpush3.bf16.msra.mxu0 %v2074_v0  ;;  %v2108_v0 = vld [vmem:[%s2483_s1 + $0x190] sm:$0xff]  }
  0x4a   : > { %1926 = vmatpush3.bf16.msra.mxu1 %v2075_v1  ;;  %1931 = vmatprep.subr.bf16.mxu0 %v2077_v6  ;;  %v2109_v1 = vld [vmem:[%s2483_s1 + $0x1d0] sm:$0xff]  }
  0x4b   : > { %1951 = vmatprep.subr.bf16.mxu1 %v2080_v7 }
  0x4c   : > { %1908 = vmatmul.mubr.bf16.vlgmr.msra.gmra.mxu0 %v502_v38  ;;  %v1162_v38 = vshrl.u32 %v2359_v22, 16 }
  0x4d   : > { %1932 = vmatpush3.bf16.msra.mxu0 %v2077_v6  ;;  %1928 = vmatmul.mubr.bf16.vlgmr.msra.gmra.mxu1 %v2277_v47  ;;  %v2096_v47 = vld [vmem:[%s2483_s1 + $0x1b8] sm:$0xff]  }
  0x4e   : > { %1952 = vmatpush3.bf16.msra.mxu1 %v2080_v7  ;;  %1933 = vmatprep.subr.bf16.mxu0 %v2081_v10  ;;  %v1164_v45 = vrot.slane %v1162_v38, 2  ;;  %v2117_v6 = vld [vmem:[%s2483_s1 + $0x238] sm:$0xff]   ;;  %v2118_v7 = vld [vmem:[%s2483_s1 + $0x230] sm:$0xff]  }
  0x4f   : > { %1953 = vmatprep.subr.bf16.mxu1 %v2082_v11  ;;  %1947 = vmatprep.mubr.bf16.mxu0 %v773_v14  ;;  %v2123_v14 = vld [vmem:[%s2483_s1 + $0x208] sm:$0xff]  }
  0x50   : > { %1967 = vmatprep.mubr.bf16.mxu1 %v1654_v15  ;;  %v1168_v53 = vor.u32 %v1167_v46, %v1164_v45  ;;  %v2124_v15 = vld [vmem:[%s2483_s1 + $0x200] sm:$0xff]  }
  0x51   : > { %1934 = vmatpush3.bf16.msra.mxu0 %v2081_v10  ;;  %v2121_v10 = vld [vmem:[%s2483_s1 + $0x218] sm:$0xff]  }
  0x52   : > { %1954 = vmatpush3.bf16.msra.mxu1 %v2082_v11  ;;  %1935 = vmatprep.subr.bf16.mxu0 %v2083_v16  ;;  %v1169_v57 = vsel %vm1152_vm5, %v1160_v52, %v1168_v53  ;;  %v2122_v11 = vld [vmem:[%s2483_s1 + $0x210] sm:$0xff]  }
  0x53   : > { %1955 = vmatprep.subr.bf16.mxu1 %v2084_v17 }
  0x55   : > { %1936 = vmatpush3.bf16.msra.mxu0 %v2083_v16 }
  0x56   : > { %1956 = vmatpush3.bf16.msra.mxu1 %v2084_v17  ;;  %1937 = vmatprep.subr.bf16.mxu0 %v2085_v12 }
  0x57   : > { %1957 = vmatprep.subr.bf16.mxu1 %v2086_v13 }
  0x59   : > { %1938 = vmatpush3.bf16.msra.mxu0 %v2085_v12 }
  0x5a   : > { %1958 = vmatpush3.bf16.msra.mxu1 %v2086_v13  ;;  %1939 = vmatprep.subr.bf16.mxu0 %v2087_v20 }
  0x5b   : > { %1959 = vmatprep.subr.bf16.mxu1 %v2088_v21 }
  0x5d   : > { %1940 = vmatpush3.bf16.msra.mxu0 %v2087_v20 }
  0x5e   : > { %1960 = vmatpush3.bf16.msra.mxu1 %v2088_v21  ;;  %1941 = vmatprep.subr.bf16.mxu0 %v2089_v27 }
  0x5f   : > { %1961 = vmatprep.subr.bf16.mxu1 %v2090_v29 }
  0x61   : > { %1942 = vmatpush3.bf16.msra.mxu0 %v2089_v27 }
  0x62   : > { %1962 = vmatpush3.bf16.msra.mxu1 %v2090_v29  ;;  %1943 = vmatprep.subr.bf16.mxu0 %v2091_v33 }
  0x63   : > { %1963 = vmatprep.subr.bf16.mxu1 %v2092_v34 }
  0x65   : > { %1944 = vmatpush3.bf16.msra.mxu0 %v2091_v33 }
  0x66   : > { %1964 = vmatpush3.bf16.msra.mxu1 %v2092_v34  ;;  %1945 = vmatprep.subr.bf16.mxu0 %v2093_v40 }
  0x67   : > { %1965 = vmatprep.subr.bf16.mxu1 %v2094_v41 }
  0x69   : > { %1946 = vmatpush3.bf16.msra.mxu0 %v2093_v40 }
  0x6a   : > { %1966 = vmatpush3.bf16.msra.mxu1 %v2094_v41  ;;  %1971 = vmatprep.subr.bf16.mxu0 %v2096_v47 }
  0x6b   : > { %1991 = vmatprep.subr.bf16.mxu1 %v2099_v48 }
  0x6c   : > { %1948 = vmatmul.mubr.bf16.vlgmr.msra.gmra.mxu0 %v2325_v9  ;;  %v2120_v9 = vld [vmem:[%s2483_s1 + $0x220] sm:$0xff]  }
  0x6d   : > { %1972 = vmatpush3.bf16.msra.mxu0 %v2096_v47  ;;  %1968 = vmatmul.mubr.bf16.vlgmr.msra.gmra.mxu1 %v1655_v51 }
  0x6e   : > { %1992 = vmatpush3.bf16.msra.mxu1 %v2099_v48  ;;  %1973 = vmatprep.subr.bf16.mxu0 %v2100_v54 }
  0x6f   : > { %1993 = vmatprep.subr.bf16.mxu1 %v2101_v55  ;;  %1987 = vmatprep.mubr.bf16.mxu0 %v1029_v56 }
  0x70   : > { %2007 = vmatprep.mubr.bf16.mxu1 %v1169_v57 }
  0x71   : > { %1974 = vmatpush3.bf16.msra.mxu0 %v2100_v54 }
  0x72   : > { %1994 = vmatpush3.bf16.msra.mxu1 %v2101_v55  ;;  %1975 = vmatprep.subr.bf16.mxu0 %v2102_v58 }
  0x73   : > { %1995 = vmatprep.subr.bf16.mxu1 %v2103_v59 }
  0x75   : > { %1976 = vmatpush3.bf16.msra.mxu0 %v2102_v58 }
  0x76   : > { %1996 = vmatpush3.bf16.msra.mxu1 %v2103_v59  ;;  %1977 = vmatprep.subr.bf16.mxu0 %v2104_v60 }
  0x77   : > { %1997 = vmatprep.subr.bf16.mxu1 %v2105_v61 }
  0x79   : > { %1978 = vmatpush3.bf16.msra.mxu0 %v2104_v60 }
  0x7a   : > { %1998 = vmatpush3.bf16.msra.mxu1 %v2105_v61  ;;  %1979 = vmatprep.subr.bf16.mxu0 %v2106_v62 }
  0x7b   : > { %1999 = vmatprep.subr.bf16.mxu1 %v2107_v63 }
  0x7d   : > { %1980 = vmatpush3.bf16.msra.mxu0 %v2106_v62 }
  0x7e   : > { %2000 = vmatpush3.bf16.msra.mxu1 %v2107_v63  ;;  %1981 = vmatprep.subr.bf16.mxu0 %v2108_v0 }
  0x7f   : > { %2001 = vmatprep.subr.bf16.mxu1 %v2109_v1 }
  0x81   : > { %1982 = vmatpush3.bf16.msra.mxu0 %v2108_v0  ;;  %v1740_v0 = vld [vmem:[%s2484_s2] ss:$0 sm:$0xff] }
  0x82   : > { %2002 = vmatpush3.bf16.msra.mxu1 %v2109_v1  ;;  %1983 = vmatprep.subr.bf16.mxu0 %v2110_v2 }
  0x83   : > { %2003 = vmatprep.subr.bf16.mxu1 %v2111_v3 }
  0x85   : > { %1984 = vmatpush3.bf16.msra.mxu0 %v2110_v2 }
  0x86   : > { %2004 = vmatpush3.bf16.msra.mxu1 %v2111_v3  ;;  %1985 = vmatprep.subr.bf16.mxu0 %v2112_v4 }
  0x87   : > { %2005 = vmatprep.subr.bf16.mxu1 %v2113_v5 }
  0x89   : > { %1986 = vmatpush3.bf16.msra.mxu0 %v2112_v4 }
  0x8a   : > { %2006 = vmatpush3.bf16.msra.mxu1 %v2113_v5  ;;  %2011 = vmatprep.subr.bf16.mxu0 %v2117_v6 }
  0x8c   : > { %1988 = vmatmul.mubr.bf16.vlgmr.msra.gmra.mxu0 %v1028_v50 }
  0x8d   : > { %2012 = vmatpush3.bf16.msra.mxu0 %v2117_v6  ;;  %2008 = vmatmul.mubr.bf16.vlgmr.msra.gmra.mxu1 %v1168_v53 }
  0x8e   : > { %2013 = vmatprep.subr.bf16.mxu0 %v2118_v7  ;;  %2027 = vmatprep.mubr.bf16.mxu0 %v2374_v32 }
  0x91   : > { %2014 = vmatpush3.bf16.msra.mxu0 %v2118_v7 }
  0x92   : > { %2015 = vmatprep.subr.bf16.mxu0 %v2119_v8 }
  0x95   : > { %2016 = vmatpush3.bf16.msra.mxu0 %v2119_v8 }
  0x96   : > { %2017 = vmatprep.subr.bf16.mxu0 %v2120_v9 }
  0x99   : > { %2018 = vmatpush3.bf16.msra.mxu0 %v2120_v9 }
  0x9a   : > { %2019 = vmatprep.subr.bf16.mxu0 %v2121_v10 }
  0x9d   : > { %2020 = vmatpush3.bf16.msra.mxu0 %v2121_v10 }
  0x9e   : > { %2021 = vmatprep.subr.bf16.mxu0 %v2122_v11 }
  0xa1   : > { %2022 = vmatpush3.bf16.msra.mxu0 %v2122_v11 }
  0xa2   : > { %2023 = vmatprep.subr.bf16.mxu0 %v2123_v14 }
  0xa5   : > { %2024 = vmatpush3.bf16.msra.mxu0 %v2123_v14 }
  0xa6   : > { %2025 = vmatprep.subr.bf16.mxu0 %v2124_v15 }
  0xa9   : > { %2026 = vmatpush3.bf16.msra.mxu0 %v2124_v15 }
  0xac   : > { %2028 = vmatmul.mubr.bf16.vlgmr.msra.gmra.mxu0 %v1293_v26 }
  0xec   : > { %v1869_v16 = vpop.f32.mrf.mxu0 }
  0xed   : > { %v1889_v17 = vpop.f32.mrf.mxu1 }
  0xee   : > { %v474_v12 = vadd.f32 %v1889_v17, %v1869_v16  ;;  %v366_v13 = vpop.f32.mrf.mxu0 }
  0xef   : > { %v465_v18 = vpop.f32.mrf.mxu1 }
  0xf0   : > { %v466_v19 = vadd.f32 %v465_v18, %v366_v13  ;;  %v1870_v20 = vpop.f32.mrf.mxu0 }
  0xf1   : > { %v1890_v21 = vpop.f32.mrf.mxu1 }
  0xf2   : > { %v369_v23 = vpop.f32.mrf.mxu0 }
  0xf3   : > { %v468_v24 = vpop.f32.mrf.mxu1 }
  0xf4   : > { %v469_v25 = vadd.f32 %v468_v24, %v369_v23  ;;  %v1429_v24 = vld [vmem:[%s212_s28 + $0x8] sm:$0xf] }
 0x10c   : > { %v1909_v27 = vpop.f32.mrf.mxu0 }
 0x10d   : > { %v604_v28 = vadd.f32 %v1909_v27, %v474_v12  ;;  %v1929_v29 = vpop.f32.mrf.mxu1 }
 0x10e   : > { %v588_v30 = vpop.f32.mrf.mxu0 }
 0x10f   : > { %v602_v31 = vadd.f32 %v588_v30, %v466_v19  ;;  %v734_v32 = vadd.f32 %v1929_v29, %v604_v28  ;;  %v718_v33 = vpop.f32.mrf.mxu1  ;;  %v1753_v30 = vld [vmem:[%s212_s28] sm:$0xff]  }
 0x110   : > { %v1910_v22 = vpop.f32.mrf.mxu0 }
 0x111   : > { %v732_v26 = vadd.f32 %v718_v33, %v602_v31  ;;  %v1930_v34 = vpop.f32.mrf.mxu1  ;;  %v1754_v22 = vunpack.c.l.bf16 %v1753_v30 }
 0x112   : > { %v591_v35 = vpop.f32.mrf.mxu0 }
 0x113   : > { %v721_v36 = vpop.f32.mrf.mxu1  ;;  %v603_v51 = vadd.f32 %v591_v35, %v469_v25  ;;  %v1432_v25 = vunpack.c.l.bf16 %v1429_v24 }
 0x115   : > { %v733_v54 = vadd.f32 %v721_v36, %v603_v51 }
 0x12c   : > { %v1949_v37 = vpop.f32.mrf.mxu0 }
 0x12d   : > { %v1969_v38 = vpop.f32.mrf.mxu1  ;;  %v874_v52 = vadd.f32 %v1949_v37, %v734_v32 }
 0x12e   : > { %v858_v39 = vpop.f32.mrf.mxu0 }
 0x12f   : > { %v978_v40 = vpop.f32.mrf.mxu1  ;;  %v872_v53 = vadd.f32 %v858_v39, %v732_v26  ;;  %v994_v55 = vadd.f32 %v1969_v38, %v874_v52  ;;  %v1755_v26 = vunpack.c.h.bf16 %v1753_v30 }
 0x130   : > { %v1950_v41 = vpop.f32.mrf.mxu0 }
 0x131   : > { %v1970_v42 = vpop.f32.mrf.mxu1  ;;  %v992_v56 = vadd.f32 %v978_v40, %v872_v53 }
 0x132   : > { %v861_v43 = vpop.f32.mrf.mxu0 }
 0x133   : > { %v981_v44 = vpop.f32.mrf.mxu1  ;;  %v873_v57 = vadd.f32 %v861_v43, %v733_v54 }
 0x135   : > { %v993_v61 = vadd.f32 %v981_v44, %v873_v57 }
 0x14c   : > { %v1989_v45 = vpop.f32.mrf.mxu0 }
 0x14d   : > { %v2009_v46 = vpop.f32.mrf.mxu1  ;;  %v1130_v58 = vadd.f32 %v1989_v45, %v994_v55 }
 0x14e   : > { %v1114_v47 = vpop.f32.mrf.mxu0 }
 0x14f   : > { %v1254_v48 = vpop.f32.mrf.mxu1  ;;  %v1128_v59 = vadd.f32 %v1114_v47, %v992_v56  ;;  %v1270_v62 = vadd.f32 %v2009_v46, %v1130_v58 }
 0x150   : > { %v1990_v49 = vpop.f32.mrf.mxu0 }
 0x151   : > { %v2010_v50 = vpop.f32.mrf.mxu1  ;;  %v1268_v1 = vadd.f32 %v1254_v48, %v1128_v59 }
 0x152   : > { %v1117_v60 = vpop.f32.mrf.mxu0 }
 0x153   : > { %v1129_v2 = vadd.f32 %v1117_v60, %v993_v61  ;;  %v1257_v4 = vpop.f32.mrf.mxu1 }
 0x155   : > { %v1269_v9 = vadd.f32 %v1257_v4, %v1129_v2 }
 0x16c   : > { %v2029_v63 = vpop.f32.mrf.mxu0 }
 0x16d   : > { %v1395_v3 = vadd.f32 %v2029_v63, %v1270_v62 }
 0x16e   : > { %v1379_v5 = vpop.f32.mrf.mxu0 }
 0x16f   : > { %v1405_v6 = vadd.f32 %v1740_v0, %v1395_v3  ;;  %v1393_v7 = vadd.f32 %v1379_v5, %v1268_v1 }
 0x170   : > { %v2030_v8 = vpop.f32.mrf.mxu0 }
 0x171   : > { %v1743_v10 = vmul.f32 -1.442695, %v1405_v6  ;;  %v1403_v11 = vadd.f32 %v1740_v0, %v1393_v7 }
 0x172   : > { %v1382_v14 = vpop.f32.mrf.mxu0 }
 0x173   : > { %2126 = vpow2.f32 %v1743_v10  ;;  %v1741_v15 = vmul.f32 -1.442695, %v1403_v11  ;;  %v1394_v16 = vadd.f32 %v1382_v14, %v1269_v9 }
 0x175   : > { %2128 = vpow2.f32 %v1741_v15  ;;  %v1404_v17 = vadd.f32 %v1740_v0, %v1394_v16 }
 0x177   : > { %v1742_v12 = vmul.f32 -1.442695, %v1404_v17 }
 0x179   : > { %2130 = vpow2.f32 %v1742_v12 }
 0x180   : > { %v2127_v13 = vpop.eup %2126 }
 0x181   : > { %v1417_v18 = vadd.f32 1.0, %v2127_v13 }
 0x182   : > { %v2129_v19 = vpop.eup %2128 }
 0x183   : > { %2132 = vrcp.f32 %v1417_v18  ;;  %v1415_v20 = vadd.f32 1.0, %v2129_v19 }
 0x185   : > { %2134 = vrcp.f32 %v1415_v20 }
 0x186   : > { %v2131_v21 = vpop.eup %2130 }
 0x187   : > { %v1416_v23 = vadd.f32 1.0, %v2131_v21 }
 0x189   : > { %2136 = vrcp.f32 %v1416_v23 }
 0x190   : > { %v2133_v27 = vpop.eup %2132 }
 0x191   : > { %v1426_v28 = vmul.f32 %v2133_v27, %v1405_v6 }
 0x192   : > { %v2135_v29 = vpop.eup %2134 }
 0x193   : > { %v1435_v31 = vadd.f32 %v1432_v25, %v1426_v28  ;;  %v1424_v33 = vmul.f32 %v2135_v29, %v1403_v11 }
 0x195   : > { %v1751_v32 = vpack.c.bf16 %v1435_v31, %v1435_v31  ;;  %v1433_v36 = vadd.f32 %v1754_v22, %v1424_v33 }
 0x196   : > { %v2137_v34 = vpop.eup %2136 }
 0x197   : > { %1451 = vst [vmem:[%s217_s5 + $0x8] sm:$0xf] %v1751_v32  ;;  %v1425_v35 = vmul.f32 %v2137_v34, %v1404_v17 }
 0x199   : > { %v1434_v37 = vadd.f32 %v1755_v26, %v1425_v35 }
 0x19b   : > { %v1759_v38 = vpack.c.bf16 %v1434_v37, %v1433_v36 }
 0x19d   : > { %1760 = vst [vmem:[%s217_s5] sm:$0xff] %v1759_v38  }
 0x19e PF: > { %s14_s15 = sadd.s32 1, %s2144_s15  }
 0x19f   : > { %p11_p4 = scmp.ge.s32.totalorder %s14_s15, 4  }
 0x1a1   :  { %13 = sbr.rel (!%p11_p4) target bundleno = 1 (0x1), region = 77 }

// kernel: a_call__.14
= control target key start
LH: loop header
LB: loop body
LE: loop exit
PB: predicated region body
PF: predicated region fallthrough
CT: control target
= control target key end

     0   :  { %s2093_s12 = smov 0   ;;  %s2401_s0 = inlined_call_operand.vmem [shape: bf16[2,38,128], index: 0, kind: input, shape index: {}]   ;;  %s2402_s1 = inlined_call_operand.vmem [shape: bf16[9,128,128], index: 1, kind: input, shape index: {}]   ;;  %s2403_s2 = inlined_call_operand.vmem [shape: f32[1,128], index: 2, kind: input, shape index: {}]   ;;  %s2404_s3 = inlined_call_operand.vmem [shape: bf16[2,24,128], index: 3, kind: output, shape index: {}]  }
   0x1 LB: > { %s1451_s13 = sadd.s32 4294967295, %s2071_s12   ;;  %p1455_p0 = scmp.ge.s32.totalorder %s2071_s12, 1  ;;  %s2071_s12 = sphi %s2093_s12, %s13_s12  }
   0x2   : > { %p137_p1 = scmp.lt.s32.totalorder %s2071_s12, 3 }
   0x4   : > { %p138_p2 = pnand %p1455_p0, %p137_p1 }
   0x5   : > { %p161_p3 = scmp.lt.s32.totalorder (!%p138_p2), %s1451_s13, 1 }
   0x6   : > { %141 = sbr.rel (%p138_p2) target bundleno = 412 (0x19c), region = 32 }
   0xb   : > { %v1968_v0 = vld [vmem:[%s2402_s1 + $0x78] sm:$0xff]   ;;  %v1970_v2 = vld [vmem:[%s2402_s1 + $0x70] sm:$0xff]   ;;  %v1972_v4 = vld [vmem:[%s2402_s1 + $0x68] sm:$0xff]   ;;  %s2406_s13 = smov (!%p161_p3, %s1451_s13), 1  ;;  %vm219_vm0 = vsmask.f32 7424 }
   0xc   : > { %v1969_v1 = vld [vmem:[%s2402_s1 + $0x38] sm:$0xff]   ;;  %1778 = vmatprep.subr.bf16.mxu0 %v1968_v0  ;;  %v1971_v3 = vld [vmem:[%s2402_s1 + $0x30] sm:$0xff]   ;;  %v1973_v5 = vld [vmem:[%s2402_s1 + $0x28] sm:$0xff]   ;;  %s1958_s30 = smul.u32 20, %s2406_s13  ;;  %vm453_vm1 = vcmask 1046528   ;;  %vm583_vm2 = vcmask 1044480  }
   0xd   : > { %1798 = vmatprep.subr.bf16.mxu1 %v1969_v1  ;;  %1779 = vmatpush3.bf16.msra.mxu0 %v1968_v0  ;;  %v1974_v6 = vld [vmem:[%s2402_s1 + $0x60] sm:$0xff]   ;;  %v1976_v8 = vld [vmem:[%s2402_s1 + $0x58] sm:$0xff]   ;;  %v1978_v10 = vld [vmem:[%s2402_s1 + $0x50] sm:$0xff]   ;;  %vm709_vm3 = vsmask.f32 4352  ;;  %vm979_vm4 = vcmask 1045504  }
   0xe   : > { %1799 = vmatpush3.bf16.msra.mxu1 %v1969_v1  ;;  %1780 = vmatprep.subr.bf16.mxu0 %v1970_v2  ;;  %v1975_v7 = vld [vmem:[%s2402_s1 + $0x20] sm:$0xff]   ;;  %v1977_v9 = vld [vmem:[%s2402_s1 + $0x18] sm:$0xff]   ;;  %s2137_s10 = scalar_lea.vmem %s2401_s0, %s1958_s30  ;;  %v1979_v14 = vld [vmem:[%s2402_s1 + $0x10] sm:$0xff]   ;;  %vm1105_vm5 = vsmask.f32 5376 }
   0xf   : > { %1800 = vmatprep.subr.bf16.mxu1 %v1971_v3  ;;  %v172_v11 = vld [vmem:[%s2137_s10] sm:$0xf]  ;;  %v2144_v12 = vld [vmem:[%s2137_s10 + $0x4] sm:$0xf]  ;;  %v2147_v13 = vld [vmem:[%s2137_s10 + $0x8] sm:$0xf] }
  0x10   : > { %v191_v15 = vld [vmem:[%s2137_s10 + $0xc] sm:$0x1]  ;;  %v1474_v16 = vcombine.low %v172_v11, %v2144_v12  ;;  %v1982_v26 = vld [vmem:[%s2402_s1 + $0x40] sm:$0xff]   ;;  %v1987_v30 = vld [vmem:[%s2402_s1 + $0xb8] sm:$0xff]   ;;  %v1484_v33 = vcombine.low %v2147_v13, %v2147_v13 }
  0x11   : > { %1781 = vmatpush3.bf16.msra.mxu0 %v1970_v2  ;;  %v2155_v17 = vcombine.low %v2147_v13, %v191_v15  ;;  %v1980_v20 = vld [vmem:[%s2402_s1 + $0x48] sm:$0xff]   ;;  %v1983_v27 = vld [vmem:[%s2402_s1] sm:$0xff]   ;;  %v1988_v31 = vld [vmem:[%s2402_s1 + $0xf8] sm:$0xff]   ;;  %v1585_v15 = vcombine.low %v2144_v12, %v2147_v13 }
  0x12   : > { %1801 = vmatpush3.bf16.msra.mxu1 %v1971_v3  ;;  %1782 = vmatprep.subr.bf16.mxu0 %v1972_v4  ;;  %v221_v18 = vshrl.u32 %v1474_v16, 16  ;;  %v223_v19 = vshll.u32 %v1474_v16, 16  ;;  %v1981_v22 = vld [vmem:[%s2402_s1 + $0x8] sm:$0xff]   ;;  %v1989_v34 = vld [vmem:[%s2402_s1 + $0xb0] sm:$0xff]   ;;  %v432_v36 = vld [vmem:[%s2137_s10] sm:$0xe] }
  0x13   : > { %1802 = vmatprep.subr.bf16.mxu1 %v1973_v5  ;;  %1814 = vmatprep.mubr.bf16.mxu1 %v1474_v16  ;;  %v228_v21 = vshll.u32 %v2155_v17, 16  ;;  %v232_v29 = vshrl.u32 %v2155_v17, 16  ;;  %v1990_v35 = vld [vmem:[%s2402_s1 + $0xf0] sm:$0xff]   ;;  %v1509_v37 = vcombine.low %v432_v36, %v2144_v12  ;;  %v455_v38 = vrot.slane %v2155_v17, 1  ;;  %v558_v39 = vld [vmem:[%s2137_s10] sm:$0x8] }
  0x14   : > { %v225_v23 = vrot.slane %v223_v19, 1  ;;  %v559_v40 = vld [vmem:[%s2137_s10 + $0xc] sm:$0x7]  ;;  %v1534_v42 = vcombine.low %v558_v39, %v2144_v12  ;;  %v1993_v49 = vld [vmem:[%s2402_s1 + $0xa0] sm:$0xff]   ;;  %v1995_v52 = vld [vmem:[%s2402_s1 + $0x98] sm:$0xff]  }
  0x15   : > { %1783 = vmatpush3.bf16.msra.mxu0 %v1972_v4  ;;  %v230_v24 = vrot.slane %v228_v21, 1  ;;  %v1991_v41 = vld [vmem:[%s2402_s1 + $0xa8] sm:$0xff]   ;;  %v1535_v43 = vcombine.low %v2147_v13, %v559_v40  ;;  %v454_v45 = vrot.slane %v1509_v37, 1  ;;  %v1994_v51 = vld [vmem:[%s2402_s1 + $0xe0] sm:$0xff]   ;;  %v1996_v53 = vld [vmem:[%s2402_s1 + $0xd8] sm:$0xff]  }
  0x16   : > { %1803 = vmatpush3.bf16.msra.mxu1 %v1973_v5  ;;  %1784 = vmatprep.subr.bf16.mxu0 %v1974_v6  ;;  %v226_v25 = vor.u32 %v225_v23, %v221_v18  ;;  %v1992_v44 = vld [vmem:[%s2402_s1 + $0xe8] sm:$0xff]   ;;  %v584_v46 = vrot.slane %v1534_v42, 3  ;;  %v1997_v54 = vld [vmem:[%s2402_s1 + $0x90] sm:$0xff]   ;;  %v711_v58 = vshrl.u32 %v1534_v42, 16  ;;  %v714_v59 = vshll.u32 %v1534_v42, 16  ;;  %v2001_v0 = vld [vmem:[%s2402_s1 + $0x80] sm:$0xff]  }
  0x17   : > { %1804 = vmatprep.subr.bf16.mxu1 %v1975_v7  ;;  %v234_v32 = vor.u32 %v232_v29, %v230_v24  ;;  %v2199_v47 = vrot.slane %v1535_v43, 3  ;;  %v456_v48 = vsel %vm453_vm1, %v454_v45, %v455_v38  ;;  %v1998_v55 = vld [vmem:[%s2402_s1 + $0xd0] sm:$0xff]   ;;  %v1999_v56 = vld [vmem:[%s2402_s1 + $0x88] sm:$0xff]   ;;  %v2002_v1 = vld [vmem:[%s2402_s1 + $0xc0] sm:$0xff]  }
  0x18   : > { %v231_v28 = vsel %vm219_vm0, %v226_v25, %v230_v24  ;;  %v2228_v57 = vld [vmem:[%s2137_s10 + $0xc] sm:$0xf]  ;;  %v713_v2 = vrot.slane %v711_v58, 3  ;;  %v716_v3 = vrot.slane %v714_v59, 4  ;;  %v2009_v11 = vld [vmem:[%s2402_s1 + $0x170] sm:$0xff]   ;;  %v2012_v12 = vld [vmem:[%s2402_s1 + $0x120] sm:$0xff]  }
  0x19   : > { %1785 = vmatpush3.bf16.msra.mxu0 %v1974_v6  ;;  %1794 = vmatprep.mubr.bf16.mxu0 %v231_v28  ;;  %v586_v50 = vsel %vm583_vm2, %v584_v46, %v2199_v47  ;;  %v1560_v60 = vcombine.low %v2147_v13, %v2228_v57  ;;  %v2000_v61 = vld [vmem:[%s2402_s1 + $0xc8] sm:$0xff]   ;;  %v2004_v6 = vld [vmem:[%s2402_s1 + $0x138] sm:$0xff]   ;;  %v2013_v13 = vld [vmem:[%s2402_s1 + $0x160] sm:$0xff]  }
  0x1a   : > { %1805 = vmatpush3.bf16.msra.mxu1 %v1975_v7  ;;  %1786 = vmatprep.subr.bf16.mxu0 %v1976_v8  ;;  %v2007_v7 = vld [vmem:[%s2402_s1 + $0x178] sm:$0xff]   ;;  %v2010_v16 = vld [vmem:[%s2402_s1 + $0x128] sm:$0xff]   ;;  %v1084_v19 = vld [vmem:[%s2137_s10 + $0x10] sm:$0x7] }
  0x1b   : > { %1806 = vmatprep.subr.bf16.mxu1 %v1977_v9  ;;  %v719_v62 = vshrl.u32 %v1560_v60, 16  ;;  %v722_v63 = vshll.u32 %v1560_v60, 16  ;;  %v2011_v17 = vld [vmem:[%s2402_s1 + $0x168] sm:$0xff]   ;;  %v2015_v21 = vld [vmem:[%s2402_s1 + $0x158] sm:$0xff]   ;;  %v1224_v24 = vld [vmem:[%s2137_s10 + $0x4] sm:$0x8] }
  0x1c   : > { %v950_v18 = vld [vmem:[%s2137_s10 + $0xc] sm:$0xf]  ;;  %v949_v23 = vld [vmem:[%s2137_s10 + $0x8] sm:$0xf]  ;;  %v948_v28 = vld [vmem:[%s2137_s10 + $0x4] sm:$0xc] }
  0x1d   : > { %1787 = vmatpush3.bf16.msra.mxu0 %v1976_v8  ;;  %v721_v4 = vrot.slane %v719_v62, 3  ;;  %v724_v5 = vrot.slane %v722_v63, 4  ;;  %v717_v8 = vor.u32 %v716_v3, %v713_v2  ;;  %v1662_v25 = vcombine.low %v1224_v24, %v949_v23  ;;  %v2017_v29 = vld [vmem:[%s2402_s1 + $0x150] sm:$0xff]   ;;  %v2020_v40 = vld [vmem:[%s2402_s1 + $0x100] sm:$0xff]   ;;  %v2029_v58 = vld [vmem:[%s2402_s1 + $0x1a8] sm:$0xff]  }
  0x1e   : > { %1807 = vmatpush3.bf16.msra.mxu1 %v1977_v9  ;;  %1788 = vmatprep.subr.bf16.mxu0 %v1978_v10  ;;  %v2030_v59 = vld [vmem:[%s2402_s1 + $0x1e8] sm:$0xff]   ;;  %v2031_v60 = vld [vmem:[%s2402_s1 + $0x1a0] sm:$0xff]   ;;  %v2033_v62 = vld [vmem:[%s2402_s1 + $0x198] sm:$0xff]  }
  0x1f   : > { %1808 = vmatprep.subr.bf16.mxu1 %v1979_v14  ;;  %v2247_v9 = vor.u32 %v724_v5, %v721_v4  ;;  %v2034_v63 = vld [vmem:[%s2402_s1 + $0x1d8] sm:$0xff]   ;;  %v2037_v2 = vld [vmem:[%s2402_s1 + $0x188] sm:$0xff]   ;;  %v2039_v4 = vld [vmem:[%s2402_s1 + $0x180] sm:$0xff]  }
  0x20   : > { %v2038_v3 = vld [vmem:[%s2402_s1 + $0x1c8] sm:$0xff]   ;;  %v2040_v5 = vld [vmem:[%s2402_s1 + $0x1c0] sm:$0xff]  }
  0x21   : > { %1789 = vmatpush3.bf16.msra.mxu0 %v1978_v10  ;;  %v2008_v10 = vld [vmem:[%s2402_s1 + $0x130] sm:$0xff]  }
  0x22   : > { %1809 = vmatpush3.bf16.msra.mxu1 %v1979_v14  ;;  %1790 = vmatprep.subr.bf16.mxu0 %v1980_v20  ;;  %v726_v14 = vsel %vm709_vm3, %v717_v8, %v2247_v9  ;;  %v2046_v8 = vld [vmem:[%s2402_s1 + $0x228] sm:$0xff]  }
  0x23   : > { %1810 = vmatprep.subr.bf16.mxu1 %v1981_v22 }
  0x25   : > { %1791 = vmatpush3.bf16.msra.mxu0 %v1980_v20  ;;  %v2014_v20 = vld [vmem:[%s2402_s1 + $0x118] sm:$0xff]  }
  0x26   : > { %1811 = vmatpush3.bf16.msra.mxu1 %v1981_v22  ;;  %1792 = vmatprep.subr.bf16.mxu0 %v1982_v26  ;;  %v2281_v22 = vcombine.low %v950_v18, %v1084_v19 }
  0x27   : > { %1812 = vmatprep.subr.bf16.mxu1 %v1983_v27 }
  0x28   : > { %v1118_v39 = vshll.u32 %v2281_v22, 16 }
  0x29   : > { %1793 = vmatpush3.bf16.msra.mxu0 %v1982_v26  ;;  %v1246_v26 = vrot.slane %v2281_v22, 3 }
  0x2a   : > { %1813 = vmatpush3.bf16.msra.mxu1 %v1983_v27  ;;  %1818 = vmatprep.subr.bf16.mxu0 %v1987_v30  ;;  %v2016_v27 = vld [vmem:[%s2402_s1 + $0x110] sm:$0xff]   ;;  %v1120_v46 = vrot.slane %v1118_v39, 3 }
  0x2b   : > { %1838 = vmatprep.subr.bf16.mxu1 %v1988_v31 }
  0x2c   : > { %1795 = vmatmul.mubr.bf16.vlgmr.msra.gmra.mxu0 %v234_v32 }
  0x2d   : > { %1815 = vmatmul.mubr.bf16.vlgmr.msra.gmra.mxu1 %v1484_v33  ;;  %1819 = vmatpush3.bf16.msra.mxu0 %v1987_v30  ;;  %v1245_v30 = vrot.slane %v1662_v25, 3  ;;  %v2018_v33 = vld [vmem:[%s2402_s1 + $0x108] sm:$0xff]  }
  0x2e   : > { %1839 = vmatpush3.bf16.msra.mxu1 %v1988_v31  ;;  %1820 = vmatprep.subr.bf16.mxu0 %v1989_v34  ;;  %v1611_v31 = vcombine.low %v948_v28, %v949_v23 }
  0x2f   : > { %1840 = vmatprep.subr.bf16.mxu1 %v1990_v35  ;;  %1834 = vmatprep.mubr.bf16.mxu0 %v456_v48  ;;  %v2296_v32 = vsel %vm583_vm2, %v1245_v30, %v1246_v26  ;;  %v2026_v48 = vld [vmem:[%s2402_s1 + $0x1f8] sm:$0xff]  }
  0x30   : > { %1854 = vmatprep.mubr.bf16.mxu1 %v586_v50  ;;  %v1107_v36 = vshrl.u32 %v1611_v31, 16  ;;  %v1110_v37 = vshll.u32 %v1611_v31, 16 }
  0x31   : > { %1821 = vmatpush3.bf16.msra.mxu0 %v1989_v34  ;;  %v2019_v34 = vld [vmem:[%s2402_s1 + $0x148] sm:$0xff]  }
  0x32   : > { %1841 = vmatpush3.bf16.msra.mxu1 %v1990_v35  ;;  %1822 = vmatprep.subr.bf16.mxu0 %v1991_v41  ;;  %v951_v35 = vld [vmem:[%s2137_s10 + $0x10] sm:$0x3]  ;;  %v1109_v43 = vrot.slane %v1107_v36, 2  ;;  %s1959_s10 = smul.u32 12, %s2406_s13 }
  0x33   : > { %1842 = vmatprep.subr.bf16.mxu1 %v1992_v44  ;;  %v1612_v42 = vcombine.low %v950_v18, %v951_v35 }
  0x34   : > { %s170_s19 = scalar_lea.vmem %s2404_s3, %s1959_s10 }
  0x35   : > { %1823 = vmatpush3.bf16.msra.mxu0 %v1991_v41  ;;  %v2021_v41 = vld [vmem:[%s2402_s1 + $0x140] sm:$0xff]   ;;  %v981_v50 = vrot.slane %v1612_v42, 2 }
  0x36   : > { %1843 = vmatpush3.bf16.msra.mxu1 %v1992_v44  ;;  %1824 = vmatprep.subr.bf16.mxu0 %v1993_v49  ;;  %v1112_v44 = vrot.slane %v1110_v37, 3 }
  0x37   : > { %1844 = vmatprep.subr.bf16.mxu1 %v1994_v51 }
  0x39   : > { %1825 = vmatpush3.bf16.msra.mxu0 %v1993_v49  ;;  %v980_v49 = vrot.slane %v1611_v31, 2 }
  0x3a   : > { %1845 = vmatpush3.bf16.msra.mxu1 %v1994_v51  ;;  %1826 = vmatprep.subr.bf16.mxu0 %v1995_v52  ;;  %v1586_v51 = vcombine.low %v2228_v57, %v2228_v57 }
  0x3b   : > { %1846 = vmatprep.subr.bf16.mxu1 %v1996_v53 }
  0x3d   : > { %1827 = vmatpush3.bf16.msra.mxu0 %v1995_v52  ;;  %v1113_v52 = vor.u32 %v1112_v44, %v1109_v43 }
  0x3e   : > { %1847 = vmatpush3.bf16.msra.mxu1 %v1996_v53  ;;  %1828 = vmatprep.subr.bf16.mxu0 %v1997_v54 }
  0x3f   : > { %1848 = vmatprep.subr.bf16.mxu1 %v1998_v55 }
  0x41   : > { %1829 = vmatpush3.bf16.msra.mxu0 %v1997_v54  ;;  %v2027_v54 = vld [vmem:[%s2402_s1 + $0x1b0] sm:$0xff]  }
  0x42   : > { %1849 = vmatpush3.bf16.msra.mxu1 %v1998_v55  ;;  %1830 = vmatprep.subr.bf16.mxu0 %v1999_v56  ;;  %v2028_v55 = vld [vmem:[%s2402_s1 + $0x1f0] sm:$0xff]  }
  0x43   : > { %1850 = vmatprep.subr.bf16.mxu1 %v2000_v61 }
  0x45   : > { %1831 = vmatpush3.bf16.msra.mxu0 %v1999_v56  ;;  %v982_v56 = vsel %vm979_vm4, %v980_v49, %v981_v50 }
  0x46   : > { %1851 = vmatpush3.bf16.msra.mxu1 %v2000_v61  ;;  %1832 = vmatprep.subr.bf16.mxu0 %v2001_v0  ;;  %v2032_v61 = vld [vmem:[%s2402_s1 + $0x1e0] sm:$0xff]  }
  0x47   : > { %1852 = vmatprep.subr.bf16.mxu1 %v2002_v1 }
  0x49   : > { %1833 = vmatpush3.bf16.msra.mxu0 %v2001_v0  ;;  %v2035_v0 = vld [vmem:[%s2402_s1 + $0x190] sm:$0xff]  }
  0x4a   : > { %1853 = vmatpush3.bf16.msra.mxu1 %v2002_v1  ;;  %1858 = vmatprep.subr.bf16.mxu0 %v2004_v6  ;;  %v2036_v1 = vld [vmem:[%s2402_s1 + $0x1d0] sm:$0xff]  }
  0x4b   : > { %1878 = vmatprep.subr.bf16.mxu1 %v2007_v7 }
  0x4c   : > { %1835 = vmatmul.mubr.bf16.vlgmr.msra.gmra.mxu0 %v455_v38  ;;  %v1115_v38 = vshrl.u32 %v2281_v22, 16 }
  0x4d   : > { %1859 = vmatpush3.bf16.msra.mxu0 %v2004_v6  ;;  %1855 = vmatmul.mubr.bf16.vlgmr.msra.gmra.mxu1 %v2199_v47  ;;  %v2023_v47 = vld [vmem:[%s2402_s1 + $0x1b8] sm:$0xff]  }
  0x4e   : > { %1879 = vmatpush3.bf16.msra.mxu1 %v2007_v7  ;;  %1860 = vmatprep.subr.bf16.mxu0 %v2008_v10  ;;  %v1117_v45 = vrot.slane %v1115_v38, 2  ;;  %v2044_v6 = vld [vmem:[%s2402_s1 + $0x238] sm:$0xff]   ;;  %v2045_v7 = vld [vmem:[%s2402_s1 + $0x230] sm:$0xff]  }
  0x4f   : > { %1880 = vmatprep.subr.bf16.mxu1 %v2009_v11  ;;  %1874 = vmatprep.mubr.bf16.mxu0 %v726_v14  ;;  %v2050_v14 = vld [vmem:[%s2402_s1 + $0x208] sm:$0xff]  }
  0x50   : > { %1894 = vmatprep.mubr.bf16.mxu1 %v1585_v15  ;;  %v1121_v53 = vor.u32 %v1120_v46, %v1117_v45  ;;  %v2051_v15 = vld [vmem:[%s2402_s1 + $0x200] sm:$0xff]  }
  0x51   : > { %1861 = vmatpush3.bf16.msra.mxu0 %v2008_v10  ;;  %v2048_v10 = vld [vmem:[%s2402_s1 + $0x218] sm:$0xff]  }
  0x52   : > { %1881 = vmatpush3.bf16.msra.mxu1 %v2009_v11  ;;  %1862 = vmatprep.subr.bf16.mxu0 %v2010_v16  ;;  %v1122_v57 = vsel %vm1105_vm5, %v1113_v52, %v1121_v53  ;;  %v2049_v11 = vld [vmem:[%s2402_s1 + $0x210] sm:$0xff]  }
  0x53   : > { %1882 = vmatprep.subr.bf16.mxu1 %v2011_v17 }
  0x55   : > { %1863 = vmatpush3.bf16.msra.mxu0 %v2010_v16 }
  0x56   : > { %1883 = vmatpush3.bf16.msra.mxu1 %v2011_v17  ;;  %1864 = vmatprep.subr.bf16.mxu0 %v2012_v12 }
  0x57   : > { %1884 = vmatprep.subr.bf16.mxu1 %v2013_v13 }
  0x59   : > { %1865 = vmatpush3.bf16.msra.mxu0 %v2012_v12 }
  0x5a   : > { %1885 = vmatpush3.bf16.msra.mxu1 %v2013_v13  ;;  %1866 = vmatprep.subr.bf16.mxu0 %v2014_v20 }
  0x5b   : > { %1886 = vmatprep.subr.bf16.mxu1 %v2015_v21 }
  0x5d   : > { %1867 = vmatpush3.bf16.msra.mxu0 %v2014_v20 }
  0x5e   : > { %1887 = vmatpush3.bf16.msra.mxu1 %v2015_v21  ;;  %1868 = vmatprep.subr.bf16.mxu0 %v2016_v27 }
  0x5f   : > { %1888 = vmatprep.subr.bf16.mxu1 %v2017_v29 }
  0x61   : > { %1869 = vmatpush3.bf16.msra.mxu0 %v2016_v27 }
  0x62   : > { %1889 = vmatpush3.bf16.msra.mxu1 %v2017_v29  ;;  %1870 = vmatprep.subr.bf16.mxu0 %v2018_v33 }
  0x63   : > { %1890 = vmatprep.subr.bf16.mxu1 %v2019_v34 }
  0x65   : > { %1871 = vmatpush3.bf16.msra.mxu0 %v2018_v33 }
  0x66   : > { %1891 = vmatpush3.bf16.msra.mxu1 %v2019_v34  ;;  %1872 = vmatprep.subr.bf16.mxu0 %v2020_v40 }
  0x67   : > { %1892 = vmatprep.subr.bf16.mxu1 %v2021_v41 }
  0x69   : > { %1873 = vmatpush3.bf16.msra.mxu0 %v2020_v40 }
  0x6a   : > { %1893 = vmatpush3.bf16.msra.mxu1 %v2021_v41  ;;  %1898 = vmatprep.subr.bf16.mxu0 %v2023_v47 }
  0x6b   : > { %1918 = vmatprep.subr.bf16.mxu1 %v2026_v48 }
  0x6c   : > { %1875 = vmatmul.mubr.bf16.vlgmr.msra.gmra.mxu0 %v2247_v9  ;;  %v2047_v9 = vld [vmem:[%s2402_s1 + $0x220] sm:$0xff]  }
  0x6d   : > { %1899 = vmatpush3.bf16.msra.mxu0 %v2023_v47  ;;  %1895 = vmatmul.mubr.bf16.vlgmr.msra.gmra.mxu1 %v1586_v51 }
  0x6e   : > { %1919 = vmatpush3.bf16.msra.mxu1 %v2026_v48  ;;  %1900 = vmatprep.subr.bf16.mxu0 %v2027_v54 }
  0x6f   : > { %1920 = vmatprep.subr.bf16.mxu1 %v2028_v55  ;;  %1914 = vmatprep.mubr.bf16.mxu0 %v982_v56 }
  0x70   : > { %1934 = vmatprep.mubr.bf16.mxu1 %v1122_v57 }
  0x71   : > { %1901 = vmatpush3.bf16.msra.mxu0 %v2027_v54 }
  0x72   : > { %1921 = vmatpush3.bf16.msra.mxu1 %v2028_v55  ;;  %1902 = vmatprep.subr.bf16.mxu0 %v2029_v58 }
  0x73   : > { %1922 = vmatprep.subr.bf16.mxu1 %v2030_v59 }
  0x75   : > { %1903 = vmatpush3.bf16.msra.mxu0 %v2029_v58 }
  0x76   : > { %1923 = vmatpush3.bf16.msra.mxu1 %v2030_v59  ;;  %1904 = vmatprep.subr.bf16.mxu0 %v2031_v60 }
  0x77   : > { %1924 = vmatprep.subr.bf16.mxu1 %v2032_v61 }
  0x79   : > { %1905 = vmatpush3.bf16.msra.mxu0 %v2031_v60 }
  0x7a   : > { %1925 = vmatpush3.bf16.msra.mxu1 %v2032_v61  ;;  %1906 = vmatprep.subr.bf16.mxu0 %v2033_v62 }
  0x7b   : > { %1926 = vmatprep.subr.bf16.mxu1 %v2034_v63 }
  0x7d   : > { %1907 = vmatpush3.bf16.msra.mxu0 %v2033_v62 }
  0x7e   : > { %1927 = vmatpush3.bf16.msra.mxu1 %v2034_v63  ;;  %1908 = vmatprep.subr.bf16.mxu0 %v2035_v0 }
  0x7f   : > { %1928 = vmatprep.subr.bf16.mxu1 %v2036_v1 }
  0x81   : > { %1909 = vmatpush3.bf16.msra.mxu0 %v2035_v0  ;;  %v1671_v0 = vld [vmem:[%s2403_s2] ss:$0 sm:$0xff] }
  0x82   : > { %1929 = vmatpush3.bf16.msra.mxu1 %v2036_v1  ;;  %1910 = vmatprep.subr.bf16.mxu0 %v2037_v2 }
  0x83   : > { %1930 = vmatprep.subr.bf16.mxu1 %v2038_v3 }
  0x85   : > { %1911 = vmatpush3.bf16.msra.mxu0 %v2037_v2 }
  0x86   : > { %1931 = vmatpush3.bf16.msra.mxu1 %v2038_v3  ;;  %1912 = vmatprep.subr.bf16.mxu0 %v2039_v4 }
  0x87   : > { %1932 = vmatprep.subr.bf16.mxu1 %v2040_v5 }
  0x89   : > { %1913 = vmatpush3.bf16.msra.mxu0 %v2039_v4 }
  0x8a   : > { %1933 = vmatpush3.bf16.msra.mxu1 %v2040_v5  ;;  %1938 = vmatprep.subr.bf16.mxu0 %v2044_v6 }
  0x8c   : > { %1915 = vmatmul.mubr.bf16.vlgmr.msra.gmra.mxu0 %v981_v50 }
  0x8d   : > { %1939 = vmatpush3.bf16.msra.mxu0 %v2044_v6  ;;  %1935 = vmatmul.mubr.bf16.vlgmr.msra.gmra.mxu1 %v1121_v53 }
  0x8e   : > { %1940 = vmatprep.subr.bf16.mxu0 %v2045_v7  ;;  %1954 = vmatprep.mubr.bf16.mxu0 %v2296_v32 }
  0x91   : > { %1941 = vmatpush3.bf16.msra.mxu0 %v2045_v7 }
  0x92   : > { %1942 = vmatprep.subr.bf16.mxu0 %v2046_v8 }
  0x95   : > { %1943 = vmatpush3.bf16.msra.mxu0 %v2046_v8 }
  0x96   : > { %1944 = vmatprep.subr.bf16.mxu0 %v2047_v9 }
  0x99   : > { %1945 = vmatpush3.bf16.msra.mxu0 %v2047_v9 }
  0x9a   : > { %1946 = vmatprep.subr.bf16.mxu0 %v2048_v10 }
  0x9d   : > { %1947 = vmatpush3.bf16.msra.mxu0 %v2048_v10 }
  0x9e   : > { %1948 = vmatprep.subr.bf16.mxu0 %v2049_v11 }
  0xa1   : > { %1949 = vmatpush3.bf16.msra.mxu0 %v2049_v11 }
  0xa2   : > { %1950 = vmatprep.subr.bf16.mxu0 %v2050_v14 }
  0xa5   : > { %1951 = vmatpush3.bf16.msra.mxu0 %v2050_v14 }
  0xa6   : > { %1952 = vmatprep.subr.bf16.mxu0 %v2051_v15 }
  0xa9   : > { %1953 = vmatpush3.bf16.msra.mxu0 %v2051_v15 }
  0xac   : > { %1955 = vmatmul.mubr.bf16.vlgmr.msra.gmra.mxu0 %v1246_v26 }
  0xec   : > { %v1796_v16 = vpop.f32.mrf.mxu0 }
  0xed   : > { %v1816_v17 = vpop.f32.mrf.mxu1 }
  0xee   : > { %v427_v12 = vadd.f32 %v1816_v17, %v1796_v16  ;;  %v319_v13 = vpop.f32.mrf.mxu0 }
  0xef   : > { %v418_v18 = vpop.f32.mrf.mxu1 }
  0xf0   : > { %v419_v19 = vadd.f32 %v418_v18, %v319_v13  ;;  %v1797_v20 = vpop.f32.mrf.mxu0 }
  0xf1   : > { %v1817_v21 = vpop.f32.mrf.mxu1 }
  0xf2   : > { %v322_v23 = vpop.f32.mrf.mxu0 }
  0xf3   : > { %v421_v24 = vpop.f32.mrf.mxu1 }
  0xf4   : > { %v422_v25 = vadd.f32 %v421_v24, %v322_v23 }
 0x10c   : > { %v1836_v27 = vpop.f32.mrf.mxu0 }
 0x10d   : > { %v557_v28 = vadd.f32 %v1836_v27, %v427_v12  ;;  %v1856_v29 = vpop.f32.mrf.mxu1 }
 0x10e   : > { %v541_v30 = vpop.f32.mrf.mxu0 }
 0x10f   : > { %v555_v31 = vadd.f32 %v541_v30, %v419_v19  ;;  %v687_v32 = vadd.f32 %v1856_v29, %v557_v28  ;;  %v671_v33 = vpop.f32.mrf.mxu1 }
 0x110   : > { %v1837_v22 = vpop.f32.mrf.mxu0 }
 0x111   : > { %v685_v26 = vadd.f32 %v671_v33, %v555_v31  ;;  %v1857_v34 = vpop.f32.mrf.mxu1 }
 0x112   : > { %v544_v35 = vpop.f32.mrf.mxu0 }
 0x113   : > { %v674_v36 = vpop.f32.mrf.mxu1  ;;  %v556_v51 = vadd.f32 %v544_v35, %v422_v25 }
 0x115   : > { %v686_v54 = vadd.f32 %v674_v36, %v556_v51 }
 0x12c   : > { %v1876_v37 = vpop.f32.mrf.mxu0 }
 0x12d   : > { %v1896_v38 = vpop.f32.mrf.mxu1  ;;  %v827_v52 = vadd.f32 %v1876_v37, %v687_v32 }
 0x12e   : > { %v811_v39 = vpop.f32.mrf.mxu0 }
 0x12f   : > { %v931_v40 = vpop.f32.mrf.mxu1  ;;  %v825_v53 = vadd.f32 %v811_v39, %v685_v26  ;;  %v947_v55 = vadd.f32 %v1896_v38, %v827_v52 }
 0x130   : > { %v1877_v41 = vpop.f32.mrf.mxu0 }
 0x131   : > { %v1897_v42 = vpop.f32.mrf.mxu1  ;;  %v945_v56 = vadd.f32 %v931_v40, %v825_v53 }
 0x132   : > { %v814_v43 = vpop.f32.mrf.mxu0 }
 0x133   : > { %v934_v44 = vpop.f32.mrf.mxu1  ;;  %v826_v57 = vadd.f32 %v814_v43, %v686_v54 }
 0x135   : > { %v946_v61 = vadd.f32 %v934_v44, %v826_v57 }
 0x14c   : > { %v1916_v45 = vpop.f32.mrf.mxu0 }
 0x14d   : > { %v1936_v46 = vpop.f32.mrf.mxu1  ;;  %v1083_v58 = vadd.f32 %v1916_v45, %v947_v55 }
 0x14e   : > { %v1067_v47 = vpop.f32.mrf.mxu0 }
 0x14f   : > { %v1207_v48 = vpop.f32.mrf.mxu1  ;;  %v1081_v59 = vadd.f32 %v1067_v47, %v945_v56  ;;  %v1223_v62 = vadd.f32 %v1936_v46, %v1083_v58 }
 0x150   : > { %v1917_v49 = vpop.f32.mrf.mxu0 }
 0x151   : > { %v1937_v50 = vpop.f32.mrf.mxu1  ;;  %v1221_v1 = vadd.f32 %v1207_v48, %v1081_v59 }
 0x152   : > { %v1070_v60 = vpop.f32.mrf.mxu0 }
 0x153   : > { %v1082_v2 = vadd.f32 %v1070_v60, %v946_v61  ;;  %v1210_v4 = vpop.f32.mrf.mxu1 }
 0x155   : > { %v1222_v9 = vadd.f32 %v1210_v4, %v1082_v2 }
 0x16c   : > { %v1956_v63 = vpop.f32.mrf.mxu0 }
 0x16d   : > { %v1348_v3 = vadd.f32 %v1956_v63, %v1223_v62 }
 0x16e   : > { %v1332_v5 = vpop.f32.mrf.mxu0 }
 0x16f   : > { %v1358_v6 = vadd.f32 %v1671_v0, %v1348_v3  ;;  %v1346_v7 = vadd.f32 %v1332_v5, %v1221_v1 }
 0x170   : > { %v1957_v8 = vpop.f32.mrf.mxu0 }
 0x171   : > { %v1674_v10 = vmul.f32 -1.442695, %v1358_v6  ;;  %v1356_v11 = vadd.f32 %v1671_v0, %v1346_v7 }
 0x172   : > { %v1335_v14 = vpop.f32.mrf.mxu0 }
 0x173   : > { %2053 = vpow2.f32 %v1674_v10  ;;  %v1672_v15 = vmul.f32 -1.442695, %v1356_v11  ;;  %v1347_v16 = vadd.f32 %v1335_v14, %v1222_v9 }
 0x175   : > { %2055 = vpow2.f32 %v1672_v15  ;;  %v1357_v17 = vadd.f32 %v1671_v0, %v1347_v16 }
 0x177   : > { %v1673_v12 = vmul.f32 -1.442695, %v1357_v17 }
 0x179   : > { %2057 = vpow2.f32 %v1673_v12 }
 0x180   : > { %v2054_v13 = vpop.eup %2053 }
 0x181   : > { %v1370_v18 = vadd.f32 1.0, %v2054_v13 }
 0x182   : > { %v2056_v19 = vpop.eup %2055 }
 0x183   : > { %2059 = vrcp.f32 %v1370_v18  ;;  %v1368_v20 = vadd.f32 1.0, %v2056_v19 }
 0x185   : > { %2061 = vrcp.f32 %v1368_v20 }
 0x186   : > { %v2058_v21 = vpop.eup %2057 }
 0x187   : > { %v1369_v23 = vadd.f32 1.0, %v2058_v21 }
 0x189   : > { %2063 = vrcp.f32 %v1369_v23 }
 0x190   : > { %v2060_v24 = vpop.eup %2059 }
 0x191   : > { %v1379_v25 = vmul.f32 %v2060_v24, %v1358_v6 }
 0x192   : > { %v2062_v28 = vpop.eup %2061 }
 0x193   : > { %v1682_v27 = vpack.c.bf16 %v1379_v25, %v1379_v25  ;;  %v1377_v30 = vmul.f32 %v2062_v28, %v1356_v11 }
 0x195   : > { %1395 = vst [vmem:[%s170_s19 + $0x8] sm:$0xf] %v1682_v27 }
 0x196   : > { %v2064_v29 = vpop.eup %2063 }
 0x197   : > { %v1378_v31 = vmul.f32 %v2064_v29, %v1357_v17 }
 0x199   : > { %v1686_v32 = vpack.c.bf16 %v1378_v31, %v1377_v30 }
 0x19b   : > { %1687 = vst [vmem:[%s170_s19] sm:$0xff] %v1686_v32  }
 0x19c PF: > { %s13_s12 = sadd.s32 1, %s2071_s12  }
 0x19d   : > { %p10_p4 = scmp.ge.s32.totalorder %s13_s12, 4  }
 0x19f   :  { %12 = sbr.rel (!%p10_p4) target bundleno = 1 (0x1), region = 70 }

// kernel: a_call__.18
= control target key start
LH: loop header
LB: loop body
LE: loop exit
PB: predicated region body
PF: predicated region fallthrough
CT: control target
= control target key end

     0   :  { %v264_v1 = vmov 0   ;;  %v172_v18 = vlaneseq  ;;  %s342_s1 = inlined_call_operand.vmem [shape: bf16[128,256], index: 1, kind: input, shape index: {}]   ;;  %s343_s0 = inlined_call_operand.vmem [shape: bf16[8,128], index: 0, kind: input, shape index: {}]   ;;  %s344_s2 = inlined_call_operand.vmem [shape: f32[1,256], index: 2, kind: input, shape index: {}]   ;;  %s345_s3 = inlined_call_operand.vmem [shape: bf16[8,256], index: 3, kind: output, shape index: {}]  }
   0x1   :  { %v232_v0 = vld [vmem:[%s342_s1 + $0x74] ss:$8 sps:$4 sm:$0xff]   ;;  %152 = vmatprep.mubr.bf16.mxu0 %v264_v1  ;;  %v234_v2 = vld [vmem:[%s342_s1 + $0x70] ss:$8 sps:$4 sm:$0xff]   ;;  %v235_v3 = vld [vmem:[%s342_s1 + $0x64] ss:$8 sps:$4 sm:$0xff]  }
   0x2   :  { %120 = vmatprep.subr.bf16.mxu0 %v232_v0  ;;  %v237_v4 = vld [vmem:[%s342_s1 + $0x60] ss:$8 sps:$4 sm:$0xff]   ;;  %v238_v5 = vld [vmem:[%s342_s1 + $0x54] ss:$8 sps:$4 sm:$0xff]   ;;  %v240_v6 = vld [vmem:[%s342_s1 + $0x50] ss:$8 sps:$4 sm:$0xff]  }
   0x3   :  { %121 = vmatpush1.bf16.msra.mxu0 %v234_v2  ;;  %v241_v7 = vld [vmem:[%s342_s1 + $0x44] ss:$8 sps:$4 sm:$0xff]   ;;  %v243_v8 = vld [vmem:[%s342_s1 + $0x40] ss:$8 sps:$4 sm:$0xff]   ;;  %v244_v9 = vld [vmem:[%s342_s1 + $0x34] ss:$8 sps:$4 sm:$0xff]  }
   0x4   :  { %122 = vmatprep.subr.bf16.mxu0 %v235_v3  ;;  %v246_v10 = vld [vmem:[%s342_s1 + $0x30] ss:$8 sps:$4 sm:$0xff]   ;;  %v247_v11 = vld [vmem:[%s342_s1 + $0x24] ss:$8 sps:$4 sm:$0xff]   ;;  %v249_v12 = vld [vmem:[%s342_s1 + $0x20] ss:$8 sps:$4 sm:$0xff]  }
   0x5   :  { %v250_v13 = vld [vmem:[%s342_s1 + $0x14] ss:$8 sps:$4 sm:$0xff]   ;;  %v252_v14 = vld [vmem:[%s342_s1 + $0x10] ss:$8 sps:$4 sm:$0xff]   ;;  %v253_v15 = vld [vmem:[%s342_s1 + $0x4] ss:$8 sps:$4 sm:$0xff]  }
   0x6   :  { %v255_v16 = vld [vmem:[%s342_s1] ss:$8 sps:$4 sm:$0xff]   ;;  %v173_v19 = vshrl.u32 %v172_v18, 7 }
   0x7   :  { %123 = vmatpush1.bf16.msra.mxu0 %v237_v4  ;;  %v23_v17 = vld [vmem:[%s343_s0] sm:$0xf] }
   0x8   :  { %124 = vmatprep.subr.bf16.mxu0 %v238_v5  ;;  %v174_v20 = vsub.s32 0, %v173_v19  ;;  %v170_v21 = vld [vmem:[%s344_s2] sm:$0x3]  ;;  %v178_v22 = vsub.s32 1, %v173_v19 }
   0xa   :  { %v175_v23 = vrot.slane %v170_v21, %v174_v20  ;;  %v179_v24 = vrot.slane %v170_v21, %v178_v22 }
   0xb   :  { %125 = vmatpush1.bf16.msra.mxu0 %v240_v6 }
   0xc   :  { %126 = vmatprep.subr.bf16.mxu0 %v241_v7 }
   0xf   :  { %127 = vmatpush1.bf16.msra.mxu0 %v243_v8 }
  0x10   :  { %128 = vmatprep.subr.bf16.mxu0 %v244_v9 }
  0x13   :  { %129 = vmatpush1.bf16.msra.mxu0 %v246_v10 }
  0x14   :  { %130 = vmatprep.subr.bf16.mxu0 %v247_v11 }
  0x17   :  { %131 = vmatpush1.bf16.msra.mxu0 %v249_v12 }
  0x18   :  { %132 = vmatprep.subr.bf16.mxu0 %v250_v13 }
  0x1b   :  { %133 = vmatpush1.bf16.msra.mxu0 %v252_v14 }
  0x1c   :  { %134 = vmatprep.subr.bf16.mxu0 %v253_v15 }
  0x1f   :  { %135 = vmatpush1.bf16.msra.mxu0 %v255_v16 }
  0x22   :  { %153 = vmatmul.mubr.bf16.vlgmr.msra.gmra.mxu0 %v23_v17 }
  0xe2   :  { %v154_v25 = vpop.f32.mrf.mxu0 }
  0xe3   :  { %v182_v26 = vadd.f32 %v175_v23, %v154_v25 }
  0xe4   :  { %v156_v27 = vpop.f32.mrf.mxu0 }
  0xe5   :  { %v227_v28 = vmul.f32 -1.442695, %v182_v26  ;;  %v183_v29 = vadd.f32 %v179_v24, %v156_v27 }
  0xe6   :  { %v158_v30 = vpop.f32.mrf.mxu0 }
  0xe7   :  { %256 = vpow2.f32 %v227_v28  ;;  %v228_v31 = vmul.f32 -1.442695, %v183_v29 }
  0xe8   :  { %v159_v32 = vpop.f32.mrf.mxu0 }
  0xe9   :  { %258 = vpow2.f32 %v228_v31 }
  0xf4   :  { %v257_v33 = vpop.eup %256 }
  0xf5   :  { %v190_v34 = vadd.f32 1.0, %v257_v33 }
  0xf6   :  { %v259_v35 = vpop.eup %258 }
  0xf7   :  { %260 = vrcp.f32 %v190_v34  ;;  %v191_v36 = vadd.f32 1.0, %v259_v35 }
  0xf9   :  { %262 = vrcp.f32 %v191_v36 }
 0x104   :  { %v261_v37 = vpop.eup %260 }
 0x105   :  { %v196_v39 = vmul.f32 %v261_v37, %v182_v26 }
 0x106   :  { %v263_v38 = vpop.eup %262 }
 0x107   :  { %v197_v40 = vmul.f32 %v263_v38, %v183_v29 }
 0x109   :  { %v230_v41 = vpack.c.bf16 %v197_v40, %v196_v39 }
 0x10b   :  { %206 = vst [vmem:[%s345_s3] sm:$0xff] %v230_v41 }

// kernel: a_call__.17
= control target key start
LH: loop header
LB: loop body
LE: loop exit
PB: predicated region body
PF: predicated region fallthrough
CT: control target
= control target key end

     0   :  { %s1872_s12 = smov 0   ;;  %s2219_s0 = inlined_call_operand.vmem [shape: bf16[8,10,128], index: 0, kind: input, shape index: {}]   ;;  %s2220_s1 = inlined_call_operand.vmem [shape: bf16[9,128,128], index: 1, kind: input, shape index: {}]   ;;  %s2221_s2 = inlined_call_operand.vmem [shape: f32[1,128], index: 2, kind: input, shape index: {}]   ;;  %s2222_s3 = inlined_call_operand.vmem [shape: bf16[2,6,128], index: 3, kind: output, shape index: {}]  }
   0x1 LB: > { %s1878_s13 = sadd.s32 4294967295, %s1848_s12   ;;  %p1269_p0 = scmp.ge.s32.totalorder %s1848_s12, 1  ;;  %s1848_s12 = sphi %s1872_s12, %s13_s12  }
   0x2   : > { %p139_p1 = scmp.lt.s32.totalorder %s1848_s12, 3 }
   0x4   : > { %p140_p2 = pnand %p1269_p0, %p139_p1 }
   0x5   : > { %s1270_s30 = sshll.u32 (!%p140_p2), %s1878_s13, 2  ;;  %p170_p4 = scmp.lt.s32.totalorder (!%p140_p2), %s1878_s13, 1 }
   0x6   : > { %143 = sbr.rel (%p140_p2) target bundleno = 406 (0x196), region = 32  ;;  %p164_p3 = scmp.lt.s32.totalorder (!%p140_p2), %s1270_s30, 7 }
   0xb   : > { %v1761_v0 = vld [vmem:[%s2220_s1 + $0x78] sm:$0xff]   ;;  %v1850_v1 = vmov 0.0   ;;  %v1763_v3 = vld [vmem:[%s2220_s1 + $0x70] sm:$0xff]   ;;  %vm1851_vm0 = vmmov 0   ;;  %v1765_v5 = vld [vmem:[%s2220_s1 + $0x68] sm:$0xff]   ;;  %s2224_s30 = smov (!%p164_p3, %s1270_s30), 7 }
   0xc   : > { %1571 = vmatprep.subr.bf16.mxu0 %v1850_v1  ;;  %1591 = vmatprep.subr.bf16.mxu1 %v1850_v1  ;;  %v1762_v2 = vld [vmem:[%s2220_s1 + $0x38] sm:$0xff]   ;;  %v1764_v4 = vld [vmem:[%s2220_s1 + $0x30] sm:$0xff]   ;;  %v1766_v6 = vld [vmem:[%s2220_s1 + $0x28] sm:$0xff]   ;;  %s1489_s16 = sshll.u32 %s2224_s30, 3  ;;  %s2226_s13 = smov (!%p170_p4, %s1878_s13), 1 }
   0xd   : > { %1572 = vmatpush3.bf16.msra.mxu0 %v1761_v0  ;;  %1587 = vmatprep.mubr.msk.bf16.mxu0 %vm1851_vm0, %v1850_v1  ;;  %v1767_v7 = vld [vmem:[%s2220_s1 + $0x60] sm:$0xff]   ;;  %v1769_v9 = vld [vmem:[%s2220_s1 + $0x58] sm:$0xff]   ;;  %v1771_v11 = vld [vmem:[%s2220_s1 + $0x50] sm:$0xff]   ;;  %s1946_s21 = scalar_lea.vmem %s2219_s0, %s1489_s16  ;;  %s1273_s18 = sshll.u32 %s2226_s13, 2 }
   0xe   : > { %1592 = vmatpush3.bf16.msra.mxu1 %v1762_v2  ;;  %1573 = vmatprep.subr.bf16.mxu0 %v1850_v1  ;;  %v1768_v8 = vld [vmem:[%s2220_s1 + $0x20] sm:$0xff]   ;;  %v1770_v10 = vld [vmem:[%s2220_s1 + $0x18] sm:$0xff]   ;;  %v1772_v12 = vld [vmem:[%s2220_s1 + $0x10] sm:$0xff]   ;;  %s173_s22 = scalar_lea.vmem %s2222_s3, %s1273_s18 }
   0xf   : > { %1593 = vmatprep.subr.bf16.mxu1 %v1850_v1  ;;  %1607 = vmatprep.mubr.msk.bf16.mxu1 %vm1851_vm0, %v1850_v1  ;;  %v1773_v13 = vld [vmem:[%s2220_s1 + $0x48] sm:$0xff]   ;;  %v1775_v15 = vld [vmem:[%s2220_s1 + $0x40] sm:$0xff]   ;;  %v1777_v19 = vld [vmem:[%s2220_s1 + $0xb8] sm:$0xff]  }
  0x10   : > { %v1774_v14 = vld [vmem:[%s2220_s1 + $0x8] sm:$0xff]   ;;  %v1776_v16 = vld [vmem:[%s2220_s1] sm:$0xff]   ;;  %v1778_v20 = vld [vmem:[%s2220_s1 + $0xf8] sm:$0xff]  }
  0x11   : > { %1574 = vmatpush3.bf16.msra.mxu0 %v1763_v3  ;;  %v1274_v17 = vld [vmem:[%s1946_s21 + $0x8] sm:$0x7]  ;;  %v175_v18 = vld [vmem:[%s1946_s21] sm:$0x7]  ;;  %v1779_v21 = vld [vmem:[%s2220_s1 + $0xb0] sm:$0xff]  }
  0x12   : > { %1594 = vmatpush3.bf16.msra.mxu1 %v1764_v4  ;;  %1575 = vmatprep.subr.bf16.mxu0 %v1850_v1  ;;  %v1780_v22 = vld [vmem:[%s2220_s1 + $0xf0] sm:$0xff]   ;;  %v1781_v23 = vld [vmem:[%s2220_s1 + $0xa8] sm:$0xff]   ;;  %v1783_v25 = vld [vmem:[%s2220_s1 + $0xa0] sm:$0xff]  }
  0x13   : > { %1595 = vmatprep.subr.bf16.mxu1 %v1850_v1  ;;  %v1782_v24 = vld [vmem:[%s2220_s1 + $0xe8] sm:$0xff]   ;;  %v1784_v26 = vld [vmem:[%s2220_s1 + $0xe0] sm:$0xff]   ;;  %v1785_v27 = vld [vmem:[%s2220_s1 + $0x98] sm:$0xff]  }
  0x14   : > { %v1786_v28 = vld [vmem:[%s2220_s1 + $0xd8] sm:$0xff]   ;;  %v1793_v29 = vld [vmem:[%s1946_s21] ss:$0 sps:$4 sm:$0xff]   ;;  %v1787_v30 = vld [vmem:[%s2220_s1 + $0x90] sm:$0xff]  }
  0x15   : > { %1576 = vmatpush3.bf16.msra.mxu0 %v1765_v5  ;;  %v1788_v31 = vld [vmem:[%s2220_s1 + $0xd0] sm:$0xff]   ;;  %v1789_v32 = vld [vmem:[%s2220_s1 + $0x88] sm:$0xff]   ;;  %v411_v33 = vshll.u32 %v1793_v29, 16  ;;  %v409_v35 = vshrl.u32 %v1793_v29, 16  ;;  %v1791_v37 = vld [vmem:[%s2220_s1 + $0x80] sm:$0xff]  }
  0x16   : > { %1596 = vmatpush3.bf16.msra.mxu1 %v1766_v6  ;;  %1577 = vmatprep.subr.bf16.mxu0 %v1850_v1  ;;  %v1790_v34 = vld [vmem:[%s2220_s1 + $0xc8] sm:$0xff]   ;;  %v1792_v38 = vld [vmem:[%s2220_s1 + $0xc0] sm:$0xff]   ;;  %v1794_v40 = vld [vmem:[%s2220_s1 + $0x138] sm:$0xff]  }
  0x17   : > { %1597 = vmatprep.subr.bf16.mxu1 %v1850_v1  ;;  %v413_v36 = vrot.slane %v411_v33, 1  ;;  %v1332_v41 = vld [vmem:[%s1946_s21 + $0x10] sm:$0x7]  ;;  %v1795_v42 = vld [vmem:[%s2220_s1 + $0x178] sm:$0xff]   ;;  %v1798_v45 = vld [vmem:[%s2220_s1 + $0x128] sm:$0xff]  }
  0x18   : > { %v1796_v43 = vld [vmem:[%s2220_s1 + $0x130] sm:$0xff]   ;;  %v1799_v46 = vld [vmem:[%s2220_s1 + $0x168] sm:$0xff]   ;;  %v1800_v47 = vld [vmem:[%s2220_s1 + $0x120] sm:$0xff]  }
  0x19   : > { %1578 = vmatpush3.bf16.msra.mxu0 %v1767_v7  ;;  %v414_v39 = vor.u32 %v413_v36, %v409_v35  ;;  %v1797_v44 = vld [vmem:[%s2220_s1 + $0x170] sm:$0xff]   ;;  %v1801_v48 = vld [vmem:[%s2220_s1 + $0x160] sm:$0xff]   ;;  %v1802_v49 = vld [vmem:[%s2220_s1 + $0x118] sm:$0xff]  }
  0x1a   : > { %1598 = vmatpush3.bf16.msra.mxu1 %v1768_v8  ;;  %1579 = vmatprep.subr.bf16.mxu0 %v1850_v1  ;;  %v1803_v50 = vld [vmem:[%s2220_s1 + $0x158] sm:$0xff]   ;;  %v1804_v51 = vld [vmem:[%s2220_s1 + $0x110] sm:$0xff]   ;;  %v1806_v54 = vld [vmem:[%s2220_s1 + $0x108] sm:$0xff]  }
  0x1b   : > { %1599 = vmatprep.subr.bf16.mxu1 %v1850_v1  ;;  %v1811_v52 = vld [vmem:[%s1946_s21 + $0x10] ss:$0 sps:$4 sm:$0xff]   ;;  %v1807_v56 = vld [vmem:[%s2220_s1 + $0x148] sm:$0xff]   ;;  %v1808_v57 = vld [vmem:[%s2220_s1 + $0x100] sm:$0xff]  }
  0x1c   : > { %v1805_v53 = vld [vmem:[%s2220_s1 + $0x150] sm:$0xff]   ;;  %v745_v55 = vshll.u32 %v1811_v52, 16  ;;  %v743_v58 = vshrl.u32 %v1811_v52, 16  ;;  %v1809_v60 = vld [vmem:[%s2220_s1 + $0x140] sm:$0xff]   ;;  %v1357_v61 = vld [vmem:[%s1946_s21 + $0x18] sm:$0x7] }
  0x1d   : > { %1580 = vmatpush3.bf16.msra.mxu0 %v1769_v9  ;;  %v1810_v62 = vld [vmem:[%s2220_s1 + $0x1b8] sm:$0xff]   ;;  %v1813_v2 = vld [vmem:[%s2220_s1 + $0x1b0] sm:$0xff]   ;;  %v1815_v4 = vld [vmem:[%s2220_s1 + $0x1a8] sm:$0xff]  }
  0x1e   : > { %1600 = vmatpush3.bf16.msra.mxu1 %v1770_v10  ;;  %1581 = vmatprep.subr.bf16.mxu0 %v1850_v1  ;;  %v747_v59 = vrot.slane %v745_v55, 1  ;;  %v1812_v0 = vld [vmem:[%s2220_s1 + $0x1f8] sm:$0xff]   ;;  %v1814_v3 = vld [vmem:[%s2220_s1 + $0x1f0] sm:$0xff]   ;;  %v1816_v5 = vld [vmem:[%s2220_s1 + $0x1e8] sm:$0xff]  }
  0x1f   : > { %1601 = vmatprep.subr.bf16.mxu1 %v1850_v1  ;;  %v1817_v6 = vld [vmem:[%s2220_s1 + $0x1a0] sm:$0xff]   ;;  %v1819_v8 = vld [vmem:[%s2220_s1 + $0x198] sm:$0xff]   ;;  %v1834_v35 = vld [vmem:[%s2220_s1 + $0x210] sm:$0xff]  }
  0x20   : > { %v748_v63 = vor.u32 %v747_v59, %v743_v58  ;;  %v1818_v7 = vld [vmem:[%s2220_s1 + $0x1e0] sm:$0xff]   ;;  %v1828_v29 = vld [vmem:[%s2220_s1 + $0x238] sm:$0xff]   ;;  %v1835_v36 = vld [vmem:[%s2220_s1 + $0x208] sm:$0xff]  }
  0x21   : > { %1582 = vmatpush3.bf16.msra.mxu0 %v1771_v11  ;;  %v839_v9 = vld [vmem:[%s1946_s21] sm:$0xe]  ;;  %v2139_v10 = vld [vmem:[%s1946_s21 + $0x4] sm:$0x1]  ;;  %v1820_v11 = vld [vmem:[%s2220_s1 + $0x1d8] sm:$0xff]  }
  0x22   : > { %1602 = vmatpush3.bf16.msra.mxu1 %v1772_v12  ;;  %1583 = vmatprep.subr.bf16.mxu0 %v1850_v1  ;;  %v1424_v12 = vcombine.low %v839_v9, %v2139_v10  ;;  %v1832_v33 = vld [vmem:[%s2220_s1 + $0x220] sm:$0xff]  }
  0x23   : > { %1603 = vmatprep.subr.bf16.mxu1 %v1850_v1 }
  0x25   : > { %1584 = vmatpush3.bf16.msra.mxu0 %v1773_v13  ;;  %v1821_v13 = vld [vmem:[%s2220_s1 + $0x190] sm:$0xff]  }
  0x26   : > { %1604 = vmatpush3.bf16.msra.mxu1 %v1774_v14  ;;  %1585 = vmatprep.subr.bf16.mxu0 %v1850_v1  ;;  %v1829_v14 = vld [vmem:[%s1946_s21 + $0x8] sm:$0x1e]  }
  0x27   : > { %1605 = vmatprep.subr.bf16.mxu1 %v1850_v1 }
  0x29   : > { %1586 = vmatpush3.bf16.msra.mxu0 %v1775_v15  ;;  %v1822_v15 = vld [vmem:[%s2220_s1 + $0x1d0] sm:$0xff]  }
  0x2a   : > { %1606 = vmatpush3.bf16.msra.mxu1 %v1776_v16  ;;  %1611 = vmatprep.subr.bf16.mxu0 %v1850_v1  ;;  %v864_v16 = vshrl.u32 %v1424_v12, 16 }
  0x2b   : > { %1631 = vmatprep.subr.bf16.mxu1 %v1850_v1 }
  0x2c   : > { %1588 = vmatmul.mubr.bf16.vlgmr.msra.gmra.mxu0 %v1274_v17  ;;  %v867_v17 = vshll.u32 %v1424_v12, 16 }
  0x2d   : > { %1608 = vmatmul.mubr.bf16.vlgmr.msra.gmra.mxu1 %v175_v18  ;;  %1612 = vmatpush3.bf16.msra.mxu0 %v1777_v19  ;;  %v1823_v18 = vld [vmem:[%s2220_s1 + $0x188] sm:$0xff]   ;;  %v986_v19 = vshrl.u32 %v1829_v14, 16 }
  0x2e   : > { %1632 = vmatpush3.bf16.msra.mxu1 %v1778_v20  ;;  %1613 = vmatprep.subr.bf16.mxu0 %v1850_v1  ;;  %v989_v20 = vshll.u32 %v1829_v14, 16 }
  0x2f   : > { %1633 = vmatprep.subr.bf16.mxu1 %v1850_v1  ;;  %1627 = vmatprep.mubr.msk.bf16.mxu0 %vm1851_vm0, %v1850_v1 }
  0x30   : > { %1647 = vmatprep.mubr.msk.bf16.mxu1 %vm1851_vm0, %v1850_v1 }
  0x31   : > { %1614 = vmatpush3.bf16.msra.mxu0 %v1779_v21  ;;  %v1824_v21 = vld [vmem:[%s2220_s1 + $0x1c8] sm:$0xff]  }
  0x32   : > { %1634 = vmatpush3.bf16.msra.mxu1 %v1780_v22  ;;  %1615 = vmatprep.subr.bf16.mxu0 %v1850_v1  ;;  %v866_v22 = vrot.slane %v864_v16, 1 }
  0x33   : > { %1635 = vmatprep.subr.bf16.mxu1 %v1850_v1 }
  0x35   : > { %1616 = vmatpush3.bf16.msra.mxu0 %v1781_v23  ;;  %v869_v23 = vrot.slane %v867_v17, 2  ;;  %v1485_v17 = vld [vmem:[%s2221_s2] ss:$0 sm:$0xff] }
  0x36   : > { %1636 = vmatpush3.bf16.msra.mxu1 %v1782_v24  ;;  %1617 = vmatprep.subr.bf16.mxu0 %v1850_v1  ;;  %v1825_v24 = vld [vmem:[%s2220_s1 + $0x180] sm:$0xff]  }
  0x37   : > { %1637 = vmatprep.subr.bf16.mxu1 %v1850_v1 }
  0x39   : > { %1618 = vmatpush3.bf16.msra.mxu0 %v1783_v25  ;;  %v988_v25 = vrot.slane %v986_v19, 1 }
  0x3a   : > { %1638 = vmatpush3.bf16.msra.mxu1 %v1784_v26  ;;  %1619 = vmatprep.subr.bf16.mxu0 %v1850_v1  ;;  %v991_v26 = vrot.slane %v989_v20, 2 }
  0x3b   : > { %1639 = vmatprep.subr.bf16.mxu1 %v1850_v1 }
  0x3d   : > { %1620 = vmatpush3.bf16.msra.mxu0 %v1785_v27  ;;  %v1826_v27 = vld [vmem:[%s2220_s1 + $0x1c0] sm:$0xff]  }
  0x3e   : > { %1640 = vmatpush3.bf16.msra.mxu1 %v1786_v28  ;;  %1621 = vmatprep.subr.bf16.mxu0 %v1850_v1  ;;  %v870_v28 = vor.u32 %v869_v23, %v866_v22 }
  0x3f   : > { %1641 = vmatprep.subr.bf16.mxu1 %v1850_v1 }
  0x41   : > { %1622 = vmatpush3.bf16.msra.mxu0 %v1787_v30  ;;  %v992_v30 = vor.u32 %v991_v26, %v988_v25 }
  0x42   : > { %1642 = vmatpush3.bf16.msra.mxu1 %v1788_v31  ;;  %1623 = vmatprep.subr.bf16.mxu0 %v1850_v1  ;;  %v1830_v31 = vld [vmem:[%s2220_s1 + $0x230] sm:$0xff]  }
  0x43   : > { %1643 = vmatprep.subr.bf16.mxu1 %v1850_v1 }
  0x45   : > { %1624 = vmatpush3.bf16.msra.mxu0 %v1789_v32  ;;  %v1831_v32 = vld [vmem:[%s2220_s1 + $0x228] sm:$0xff]  }
  0x46   : > { %1644 = vmatpush3.bf16.msra.mxu1 %v1790_v34  ;;  %1625 = vmatprep.subr.bf16.mxu0 %v1850_v1  ;;  %v1833_v34 = vld [vmem:[%s2220_s1 + $0x218] sm:$0xff]  }
  0x47   : > { %1645 = vmatprep.subr.bf16.mxu1 %v1850_v1 }
  0x49   : > { %1626 = vmatpush3.bf16.msra.mxu0 %v1791_v37  ;;  %v1083_v37 = vld [vmem:[%s1946_s21] sm:$0xc] }
  0x4a   : > { %1646 = vmatpush3.bf16.msra.mxu1 %v1792_v38  ;;  %1651 = vmatprep.subr.bf16.mxu0 %v1850_v1  ;;  %v1476_v38 = vcombine.low %v1083_v37, %v2139_v10 }
  0x4b   : > { %1671 = vmatprep.subr.bf16.mxu1 %v1850_v1 }
  0x4c   : > { %1628 = vmatmul.mubr.bf16.vlgmr.msra.gmra.mxu0 %v414_v39  ;;  %v1836_v39 = vld [vmem:[%s2220_s1 + $0x200] sm:$0xff]  }
  0x4d   : > { %1652 = vmatpush3.bf16.msra.mxu0 %v1794_v40  ;;  %1648 = vmatmul.mubr.bf16.vlgmr.msra.gmra.mxu1 %v1332_v41  ;;  %v1104_v40 = vrot.slane %v1476_v38, 2 }
  0x4e   : > { %1672 = vmatpush3.bf16.msra.mxu1 %v1795_v42  ;;  %1653 = vmatprep.subr.bf16.mxu0 %v1850_v1 }
  0x4f   : > { %1673 = vmatprep.subr.bf16.mxu1 %v1850_v1  ;;  %1667 = vmatprep.mubr.msk.bf16.mxu0 %vm1851_vm0, %v1850_v1 }
  0x50   : > { %1687 = vmatprep.mubr.msk.bf16.mxu1 %vm1851_vm0, %v1850_v1 }
  0x51   : > { %1654 = vmatpush3.bf16.msra.mxu0 %v1796_v43 }
  0x52   : > { %1674 = vmatpush3.bf16.msra.mxu1 %v1797_v44  ;;  %1655 = vmatprep.subr.bf16.mxu0 %v1850_v1 }
  0x53   : > { %1675 = vmatprep.subr.bf16.mxu1 %v1850_v1 }
  0x55   : > { %1656 = vmatpush3.bf16.msra.mxu0 %v1798_v45 }
  0x56   : > { %1676 = vmatpush3.bf16.msra.mxu1 %v1799_v46  ;;  %1657 = vmatprep.subr.bf16.mxu0 %v1850_v1 }
  0x57   : > { %1677 = vmatprep.subr.bf16.mxu1 %v1850_v1 }
  0x59   : > { %1658 = vmatpush3.bf16.msra.mxu0 %v1800_v47 }
  0x5a   : > { %1678 = vmatpush3.bf16.msra.mxu1 %v1801_v48  ;;  %1659 = vmatprep.subr.bf16.mxu0 %v1850_v1 }
  0x5b   : > { %1679 = vmatprep.subr.bf16.mxu1 %v1850_v1 }
  0x5d   : > { %1660 = vmatpush3.bf16.msra.mxu0 %v1802_v49 }
  0x5e   : > { %1680 = vmatpush3.bf16.msra.mxu1 %v1803_v50  ;;  %1661 = vmatprep.subr.bf16.mxu0 %v1850_v1 }
  0x5f   : > { %1681 = vmatprep.subr.bf16.mxu1 %v1850_v1 }
  0x61   : > { %1662 = vmatpush3.bf16.msra.mxu0 %v1804_v51 }
  0x62   : > { %1682 = vmatpush3.bf16.msra.mxu1 %v1805_v53  ;;  %1663 = vmatprep.subr.bf16.mxu0 %v1850_v1 }
  0x63   : > { %1683 = vmatprep.subr.bf16.mxu1 %v1850_v1 }
  0x65   : > { %1664 = vmatpush3.bf16.msra.mxu0 %v1806_v54 }
  0x66   : > { %1684 = vmatpush3.bf16.msra.mxu1 %v1807_v56  ;;  %1665 = vmatprep.subr.bf16.mxu0 %v1850_v1 }
  0x67   : > { %1685 = vmatprep.subr.bf16.mxu1 %v1850_v1 }
  0x69   : > { %1666 = vmatpush3.bf16.msra.mxu0 %v1808_v57 }
  0x6a   : > { %1686 = vmatpush3.bf16.msra.mxu1 %v1809_v60  ;;  %1691 = vmatprep.subr.bf16.mxu0 %v1850_v1 }
  0x6b   : > { %1711 = vmatprep.subr.bf16.mxu1 %v1850_v1 }
  0x6c   : > { %1668 = vmatmul.mubr.bf16.vlgmr.msra.gmra.mxu0 %v1357_v61 }
  0x6d   : > { %1692 = vmatpush3.bf16.msra.mxu0 %v1810_v62  ;;  %1688 = vmatmul.mubr.bf16.vlgmr.msra.gmra.mxu1 %v748_v63 }
  0x6e   : > { %1712 = vmatpush3.bf16.msra.mxu1 %v1812_v0  ;;  %1693 = vmatprep.subr.bf16.mxu0 %v1850_v1 }
  0x6f   : > { %1713 = vmatprep.subr.bf16.mxu1 %v1850_v1  ;;  %1707 = vmatprep.mubr.msk.bf16.mxu0 %vm1851_vm0, %v1850_v1 }
  0x70   : > { %1727 = vmatprep.mubr.msk.bf16.mxu1 %vm1851_vm0, %v1850_v1 }
  0x71   : > { %1694 = vmatpush3.bf16.msra.mxu0 %v1813_v2 }
  0x72   : > { %1714 = vmatpush3.bf16.msra.mxu1 %v1814_v3  ;;  %1695 = vmatprep.subr.bf16.mxu0 %v1850_v1 }
  0x73   : > { %1715 = vmatprep.subr.bf16.mxu1 %v1850_v1 }
  0x75   : > { %1696 = vmatpush3.bf16.msra.mxu0 %v1815_v4 }
  0x76   : > { %1716 = vmatpush3.bf16.msra.mxu1 %v1816_v5  ;;  %1697 = vmatprep.subr.bf16.mxu0 %v1850_v1 }
  0x77   : > { %1717 = vmatprep.subr.bf16.mxu1 %v1850_v1 }
  0x79   : > { %1698 = vmatpush3.bf16.msra.mxu0 %v1817_v6 }
  0x7a   : > { %1718 = vmatpush3.bf16.msra.mxu1 %v1818_v7  ;;  %1699 = vmatprep.subr.bf16.mxu0 %v1850_v1 }
  0x7b   : > { %1719 = vmatprep.subr.bf16.mxu1 %v1850_v1 }
  0x7d   : > { %1700 = vmatpush3.bf16.msra.mxu0 %v1819_v8 }
  0x7e   : > { %1720 = vmatpush3.bf16.msra.mxu1 %v1820_v11  ;;  %1701 = vmatprep.subr.bf16.mxu0 %v1850_v1 }
  0x7f   : > { %1721 = vmatprep.subr.bf16.mxu1 %v1850_v1 }
  0x81   : > { %1702 = vmatpush3.bf16.msra.mxu0 %v1821_v13 }
  0x82   : > { %1722 = vmatpush3.bf16.msra.mxu1 %v1822_v15  ;;  %1703 = vmatprep.subr.bf16.mxu0 %v1850_v1 }
  0x83   : > { %1723 = vmatprep.subr.bf16.mxu1 %v1850_v1 }
  0x85   : > { %1704 = vmatpush3.bf16.msra.mxu0 %v1823_v18 }
  0x86   : > { %1724 = vmatpush3.bf16.msra.mxu1 %v1824_v21  ;;  %1705 = vmatprep.subr.bf16.mxu0 %v1850_v1 }
  0x87   : > { %1725 = vmatprep.subr.bf16.mxu1 %v1850_v1 }
  0x89   : > { %1706 = vmatpush3.bf16.msra.mxu0 %v1825_v24 }
  0x8a   : > { %1726 = vmatpush3.bf16.msra.mxu1 %v1826_v27  ;;  %1731 = vmatprep.subr.bf16.mxu0 %v1850_v1 }
  0x8c   : > { %1708 = vmatmul.mubr.bf16.vlgmr.msra.gmra.mxu0 %v870_v28 }
  0x8d   : > { %1732 = vmatpush3.bf16.msra.mxu0 %v1828_v29  ;;  %1728 = vmatmul.mubr.bf16.vlgmr.msra.gmra.mxu1 %v992_v30 }
  0x8e   : > { %1733 = vmatprep.subr.bf16.mxu0 %v1850_v1  ;;  %1747 = vmatprep.mubr.msk.bf16.mxu0 %vm1851_vm0, %v1850_v1 }
  0x91   : > { %1734 = vmatpush3.bf16.msra.mxu0 %v1830_v31 }
  0x92   : > { %1735 = vmatprep.subr.bf16.mxu0 %v1850_v1 }
  0x95   : > { %1736 = vmatpush3.bf16.msra.mxu0 %v1831_v32 }
  0x96   : > { %1737 = vmatprep.subr.bf16.mxu0 %v1850_v1 }
  0x99   : > { %1738 = vmatpush3.bf16.msra.mxu0 %v1832_v33 }
  0x9a   : > { %1739 = vmatprep.subr.bf16.mxu0 %v1850_v1 }
  0x9d   : > { %1740 = vmatpush3.bf16.msra.mxu0 %v1833_v34 }
  0x9e   : > { %1741 = vmatprep.subr.bf16.mxu0 %v1850_v1 }
  0xa1   : > { %1742 = vmatpush3.bf16.msra.mxu0 %v1834_v35 }
  0xa2   : > { %1743 = vmatprep.subr.bf16.mxu0 %v1850_v1 }
  0xa5   : > { %1744 = vmatpush3.bf16.msra.mxu0 %v1835_v36 }
  0xa6   : > { %1745 = vmatprep.subr.bf16.mxu0 %v1850_v1 }
  0xa9   : > { %1746 = vmatpush3.bf16.msra.mxu0 %v1836_v39 }
  0xac   : > { %1748 = vmatmul.mubr.bf16.vlgmr.msra.gmra.mxu0 %v1104_v40 }
  0xec   : > { %v293_v41 = vpop.f32.mrf.mxu0 }
  0xed   : > { %v381_v42 = vpop.f32.mrf.mxu1 }
  0xee   : > { %v382_v43 = vadd.f32 %v381_v42, %v293_v41  ;;  %v1589_v44 = vpop.f32.mrf.mxu0 }
  0xef   : > { %v1609_v45 = vpop.f32.mrf.mxu1 }
  0xf0   : > { %v296_v46 = vpop.f32.mrf.mxu0 }
  0xf1   : > { %v384_v47 = vpop.f32.mrf.mxu1 }
  0xf2   : > { %v1590_v48 = vpop.f32.mrf.mxu0 }
  0xf3   : > { %v1610_v49 = vpop.f32.mrf.mxu1 }
 0x10c   : > { %v498_v50 = vpop.f32.mrf.mxu0 }
 0x10d   : > { %v504_v51 = vadd.f32 %v498_v50, %v382_v43  ;;  %v606_v52 = vpop.f32.mrf.mxu1 }
 0x10e   : > { %v1629_v53 = vpop.f32.mrf.mxu0 }
 0x10f   : > { %v612_v54 = vadd.f32 %v606_v52, %v504_v51  ;;  %v1649_v55 = vpop.f32.mrf.mxu1 }
 0x110   : > { %v501_v56 = vpop.f32.mrf.mxu0 }
 0x111   : > { %v609_v1 = vpop.f32.mrf.mxu1 }
 0x112   : > { %v1630_v57 = vpop.f32.mrf.mxu0 }
 0x113   : > { %v1650_v58 = vpop.f32.mrf.mxu1 }
 0x12c   : > { %v714_v59 = vpop.f32.mrf.mxu0 }
 0x12d   : > { %v832_v60 = vpop.f32.mrf.mxu1  ;;  %v720_v12 = vadd.f32 %v714_v59, %v612_v54 }
 0x12e   : > { %v1669_v61 = vpop.f32.mrf.mxu0 }
 0x12f   : > { %v1689_v62 = vpop.f32.mrf.mxu1  ;;  %v838_v13 = vadd.f32 %v832_v60, %v720_v12 }
 0x130   : > { %v717_v63 = vpop.f32.mrf.mxu0 }
 0x131   : > { %v835_v0 = vpop.f32.mrf.mxu1 }
 0x132   : > { %v1670_v2 = vpop.f32.mrf.mxu0 }
 0x133   : > { %v1690_v3 = vpop.f32.mrf.mxu1 }
 0x14c   : > { %v954_v4 = vpop.f32.mrf.mxu0 }
 0x14d   : > { %v1076_v5 = vpop.f32.mrf.mxu1  ;;  %v960_v14 = vadd.f32 %v954_v4, %v838_v13 }
 0x14e   : > { %v1709_v6 = vpop.f32.mrf.mxu0 }
 0x14f   : > { %v1729_v7 = vpop.f32.mrf.mxu1  ;;  %v1082_v15 = vadd.f32 %v1076_v5, %v960_v14 }
 0x150   : > { %v957_v8 = vpop.f32.mrf.mxu0 }
 0x151   : > { %v1079_v9 = vpop.f32.mrf.mxu1 }
 0x152   : > { %v1710_v10 = vpop.f32.mrf.mxu0 }
 0x153   : > { %v1730_v11 = vpop.f32.mrf.mxu1 }
 0x16c   : > { %v1188_v16 = vpop.f32.mrf.mxu0 }
 0x16d   : > { %v1194_v18 = vadd.f32 %v1188_v16, %v1082_v15 }
 0x16e   : > { %v1749_v19 = vpop.f32.mrf.mxu0 }
 0x16f   : > { %v1202_v20 = vadd.f32 %v1485_v17, %v1194_v18 }
 0x170   : > { %v1191_v21 = vpop.f32.mrf.mxu0 }
 0x171   : > { %v1486_v22 = vmul.f32 -1.442695, %v1202_v20 }
 0x172   : > { %v1750_v23 = vpop.f32.mrf.mxu0 }
 0x173   : > { %1838 = vpow2.f32 %v1486_v22 }
 0x180   : > { %v1839_v24 = vpop.eup %1838 }
 0x181   : > { %v1206_v25 = vadd.f32 1.0, %v1839_v24 }
 0x183   : > { %1840 = vrcp.f32 %v1206_v25 }
 0x190   : > { %v1841_v26 = vpop.eup %1840 }
 0x191   : > { %v1209_v27 = vmul.f32 %v1841_v26, %v1202_v20 }
 0x193   : > { %v1210_v28 = vpack.c.bf16 %v1209_v27, %v1209_v27 }
 0x195   : > { %1211 = vst [vmem:[%s173_s22] sm:$0x7] %v1210_v28 }
 0x196 PF: > { %s13_s12 = sadd.s32 1, %s1848_s12  }
 0x197   : > { %p10_p5 = scmp.ge.s32.totalorder %s13_s12, 4  }
 0x199   :  { %12 = sbr.rel (!%p10_p5) target bundleno = 1 (0x1), region = 73 }

// kernel: a_call__.21
= control target key start
LH: loop header
LB: loop body
LE: loop exit
PB: predicated region body
PF: predicated region fallthrough
CT: control target
= control target key end

     0   :  { %s564_s12 = smov 0   ;;  %s566_s13 = smov 0   ;;  %s613_s0 = inlined_call_operand.vmem [shape: bf16[8,384], index: 0, kind: input, shape index: {}]   ;;  %s614_s1 = inlined_call_operand.vmem [shape: bf16[384,128], index: 1, kind: input, shape index: {}]   ;;  %s615_s2 = inlined_call_operand.vmem [shape: f32[1,128], index: 2, kind: input, shape index: {}]   ;;  %s616_s3 = inlined_call_operand.vmem [shape: bf16[8,128], index: 3, kind: output, shape index: {}]  }
   0x1   :  { %s568_s14 = smov 0  }
   0x2 LB: > { %s22_s15 = sadd.s32 1, %s535_s13  ;;  %p430_p0 = scmp.ge.s32.totalorder %s539_s14, 1  ;;  %s539_s14 = sphi %s568_s14, %s13_s14   ;;  %s535_s13 = sphi %s566_s13, %s618_s13   ;;  %s531_s12 = sphi %s564_s12, %s617_s12  }
   0x3   : > { %p23_p1 = scmp.ge.s32.totalorder %s22_s15, 3  ;;  %p165_p2 = scmp.lt.s32.totalorder %s539_s14, 4 }
   0x5   : > { %s620_s15 = smov (%p23_p1, %s22_s15), 0  ;;  %p166_p3 = pnand %p430_p0, %p165_p2 }
   0x6   : > { %p198_p4 = scmp.lt.s32.totalorder (!%p166_p3), %s531_s12, 2  ;;  %s432_s16 = sshll.u32 (!%p166_p3), %s531_s12, 4 }
   0x7   : > { %169 = sbr.rel (%p166_p3) target bundleno = 295 (0x127), region = 32  ;;  %p205_p5 = scmp.lt.s32.totalorder (!%p166_p3), %s432_s16, 47 }
   0x8   : > { %p434_p6 = scmp.ne.s32.totalorder (!%p166_p3), %s531_s12, 0 }
   0xc   : > { %s199_s17 = scalar_select %p198_p4, %s531_s12, 2 }
   0xd   : > { %s622_s16 = smov (!%p205_p5, %s432_s16), 47  ;;  %218 = sbr.rel (%p434_p6) target bundleno = 20 (0x14), region = 36 }
   0xe   : > { %s431_s18 = sshll.u32 %s199_s17, 2  ;;  %s433_s22 = sshll.u32 %s622_s16, 2 }
   0xf   : > { %s590_s21 = scalar_lea.vmem %s613_s0, %s431_s18  ;;  %s208_s25 = scalar_lea.vmem %s614_s1, %s433_s22 }
  0x12   : > { %v541_v0 = vmov 0.0  }
  0x13   : > { %219 = vst [vmem:[#allocation2] sm:$0xff] %v541_v0 }
  0x14 PF: > { %v505_v1 = vld [vmem:[%s208_s25 + $0x38] sm:$0xff]   ;;  %v542_v2 = vmov 0.0   ;;  %v506_v3 = vld [vmem:[%s208_s25 + $0x30] sm:$0xff]   ;;  %vm543_vm0 = vmmov 0   ;;  %v507_v4 = vld [vmem:[%s208_s25 + $0x28] sm:$0xff]   ;;  %p443_p7 = scmp.ne.s32.totalorder %s531_s12, 2 }
  0x15   : > { %458 = vmatprep.subr.bf16.mxu0 %v542_v2  ;;  %474 = vmatprep.mubr.msk.bf16.mxu0 %vm543_vm0, %v542_v2  ;;  %v508_v5 = vld [vmem:[%s208_s25 + $0x20] sm:$0xff]   ;;  %v509_v6 = vld [vmem:[%s208_s25 + $0x18] sm:$0xff]   ;;  %v510_v7 = vld [vmem:[%s208_s25 + $0x10] sm:$0xff]  }
  0x16   : > { %459 = vmatpush3.bf16.msra.mxu0 %v505_v1  ;;  %v511_v8 = vld [vmem:[%s208_s25 + $0x8] sm:$0xff]   ;;  %v512_v9 = vld [vmem:[%s208_s25] sm:$0xff]  }
  0x17   : > { %460 = vmatprep.subr.bf16.mxu0 %v542_v2  ;;  %v221_v10 = vld [vmem:[%s590_s21] sm:$0xf] }
  0x1a   : > { %461 = vmatpush3.bf16.msra.mxu0 %v506_v3  ;;  %v220_v11 = vld [vmem:[#allocation2] sm:$0xff] }
  0x1b   : > { %462 = vmatprep.subr.bf16.mxu0 %v542_v2 }
  0x1e   : > { %463 = vmatpush3.bf16.msra.mxu0 %v507_v4 }
  0x1f   : > { %464 = vmatprep.subr.bf16.mxu0 %v542_v2 }
  0x22   : > { %465 = vmatpush3.bf16.msra.mxu0 %v508_v5 }
  0x23   : > { %466 = vmatprep.subr.bf16.mxu0 %v542_v2 }
  0x26   : > { %467 = vmatpush3.bf16.msra.mxu0 %v509_v6 }
  0x27   : > { %468 = vmatprep.subr.bf16.mxu0 %v542_v2 }
  0x2a   : > { %469 = vmatpush3.bf16.msra.mxu0 %v510_v7 }
  0x2b   : > { %470 = vmatprep.subr.bf16.mxu0 %v542_v2 }
  0x2e   : > { %471 = vmatpush3.bf16.msra.mxu0 %v511_v8 }
  0x2f   : > { %472 = vmatprep.subr.bf16.mxu0 %v542_v2 }
  0x32   : > { %473 = vmatpush3.bf16.msra.mxu0 %v512_v9 }
  0x35   : > { %475 = vmatmul.mubr.bf16.vlgmr.msra.gmra.mxu0 %v221_v10 }
  0xf5   : > { %v320_v12 = vpop.f32.mrf.mxu0 }
  0xf6   : > { %v326_v13 = vadd.f32 %v320_v12, %v220_v11 }
  0xf7   : > { %v476_v14 = vpop.f32.mrf.mxu0  ;;  %331 = sbr.rel (%p443_p7) target bundleno = 295 (0x127), region = 40 }
  0xf8   : > { %327 = vst [vmem:[#allocation2] sm:$0xff] %v326_v13 }
  0xf9   : > { %v323_v15 = vpop.f32.mrf.mxu0 }
  0xfb   : > { %v477_v16 = vpop.f32.mrf.mxu0 }
  0xfc   : > { %v444_v18 = vld [vmem:[%s615_s2] ss:$0 sm:$0xff] }
  0xff   : > { %v332_v17 = vld [vmem:[#allocation2] sm:$0xff] }
 0x100   : > { %v340_v19 = vadd.f32 %v444_v18, %v332_v17 }
 0x102   : > { %v445_v20 = vmul.f32 -1.442695, %v340_v19 }
 0x104   : > { %513 = vpow2.f32 %v445_v20 }
 0x111   : > { %v514_v21 = vpop.eup %513 }
 0x112   : > { %v344_v22 = vadd.f32 1.0, %v514_v21 }
 0x114   : > { %515 = vrcp.f32 %v344_v22 }
 0x121   : > { %v516_v23 = vpop.eup %515 }
 0x122   : > { %v347_v24 = vmul.f32 %v516_v23, %v340_v19 }
 0x124   : > { %v348_v25 = vpack.c.bf16 %v347_v24, %v347_v24 }
 0x126   : > { %349 = vst [vmem:[%s616_s3] sm:$0xf] %v348_v25 }
 0x127 PF: > { %s13_s14 = sadd.s32 1, %s539_s14   ;;  %s617_s12 = smov %s535_s13 }
 0x128   : > { %p10_p8 = scmp.ge.s32.totalorder %s13_s14, 5   ;;  %s618_s13 = smov %s620_s15 }
 0x12a   :  { %12 = sbr.rel (!%p10_p8) target bundleno = 2 (0x2), region = 73 }

// kernel: a_call__.20
= control target key start
LH: loop header
LB: loop body
LE: loop exit
PB: predicated region body
PF: predicated region fallthrough
CT: control target
= control target key end

     0   :  { %s1930_s15 = smov 0   ;;  %s2280_s0 = inlined_call_operand.vmem [shape: bf16[2,18,128], index: 0, kind: input, shape index: {}]   ;;  %s2281_s1 = inlined_call_operand.vmem [shape: bf16[9,128,128], index: 1, kind: input, shape index: {}]   ;;  %s2282_s2 = inlined_call_operand.vmem [shape: f32[1,128], index: 2, kind: input, shape index: {}]   ;;  %s2283_s3 = inlined_call_operand.vmem [shape: bf16[2,8,128], index: 3, kind: input, shape index: {}]   ;;  %s2284_s4 = inlined_call_operand.vmem [shape: bf16[2,8,128], index: 4, kind: output, shape index: {}]  }
   0x1 LB: > { %s1321_s16 = sadd.s32 4294967295, %s1901_s15   ;;  %p1325_p0 = scmp.ge.s32.totalorder %s1901_s15, 1  ;;  %s1901_s15 = sphi %s1930_s15, %s14_s15  }
   0x2   : > { %p171_p1 = scmp.lt.s32.totalorder %s1901_s15, 3 }
   0x4   : > { %p172_p2 = pnand %p1325_p0, %p171_p1 }
   0x5   : > { %p200_p3 = scmp.lt.s32.totalorder (!%p172_p2), %s1321_s16, 1 }
   0x6   : > { %175 = sbr.rel (%p172_p2) target bundleno = 408 (0x198), region = 36 }
   0xb   : > { %v1812_v0 = vld [vmem:[%s2281_s1 + $0x78] sm:$0xff]   ;;  %v1903_v1 = vmov 0.0   ;;  %v1814_v3 = vld [vmem:[%s2281_s1 + $0x70] sm:$0xff]   ;;  %vm1904_vm0 = vmmov 0   ;;  %s2286_s16 = smov (!%p200_p3, %s1321_s16), 1  ;;  %v1816_v5 = vld [vmem:[%s2281_s1 + $0x68] sm:$0xff]  }
   0xc   : > { %1621 = vmatprep.subr.bf16.mxu0 %v1903_v1  ;;  %1641 = vmatprep.subr.bf16.mxu1 %v1903_v1  ;;  %v1813_v2 = vld [vmem:[%s2281_s1 + $0x38] sm:$0xff]   ;;  %v1815_v4 = vld [vmem:[%s2281_s1 + $0x30] sm:$0xff]   ;;  %v1817_v6 = vld [vmem:[%s2281_s1 + $0x28] sm:$0xff]   ;;  %s1801_s29 = smul.u32 12, %s2286_s16  ;;  %s1327_s27 = sshll.u32 %s2286_s16, 2 }
   0xd   : > { %1622 = vmatpush3.bf16.msra.mxu0 %v1812_v0  ;;  %1637 = vmatprep.mubr.msk.bf16.mxu0 %vm1904_vm0, %v1903_v1  ;;  %v1818_v7 = vld [vmem:[%s2281_s1 + $0x60] sm:$0xff]   ;;  %v1820_v9 = vld [vmem:[%s2281_s1 + $0x58] sm:$0xff]   ;;  %v1822_v14 = vld [vmem:[%s2281_s1 + $0x50] sm:$0xff]   ;;  %s208_s30 = scalar_lea.vmem %s2283_s3, %s1327_s27  ;;  %s212_s7 = scalar_lea.vmem %s2284_s4, %s1327_s27 }
   0xe   : > { %1642 = vmatpush3.bf16.msra.mxu1 %v1813_v2  ;;  %1623 = vmatprep.subr.bf16.mxu0 %v1903_v1  ;;  %v1819_v8 = vld [vmem:[%s2281_s1 + $0x20] sm:$0xff]   ;;  %s1980_s10 = scalar_lea.vmem %s2280_s0, %s1801_s29  ;;  %v1821_v10 = vld [vmem:[%s2281_s1 + $0x18] sm:$0xff]   ;;  %v1823_v15 = vld [vmem:[%s2281_s1 + $0x10] sm:$0xff]  }
   0xf   : > { %1643 = vmatprep.subr.bf16.mxu1 %v1903_v1  ;;  %1657 = vmatprep.mubr.msk.bf16.mxu1 %vm1904_vm0, %v1903_v1  ;;  %v214_v11 = vld [vmem:[%s1980_s10] sm:$0xf]  ;;  %v1992_v12 = vld [vmem:[%s1980_s10 + $0x4] sm:$0x1]  ;;  %v1824_v17 = vld [vmem:[%s2281_s1 + $0x48] sm:$0xff]  }
  0x10   : > { %v1345_v13 = vcombine.low %v214_v11, %v1992_v12  ;;  %v1825_v18 = vld [vmem:[%s2281_s1 + $0x8] sm:$0xff]   ;;  %v1826_v21 = vld [vmem:[%s2281_s1 + $0x40] sm:$0xff]   ;;  %v1829_v24 = vld [vmem:[%s2281_s1 + $0xb8] sm:$0xff]  }
  0x11   : > { %1624 = vmatpush3.bf16.msra.mxu0 %v1814_v3  ;;  %v1827_v22 = vld [vmem:[%s2281_s1] sm:$0xff]   ;;  %v1830_v25 = vld [vmem:[%s2281_s1 + $0xf8] sm:$0xff]   ;;  %v1831_v26 = vld [vmem:[%s2281_s1 + $0xb0] sm:$0xff]  }
  0x12   : > { %1644 = vmatpush3.bf16.msra.mxu1 %v1815_v4  ;;  %1625 = vmatprep.subr.bf16.mxu0 %v1903_v1  ;;  %v257_v16 = vshll.u32 %v1345_v13, 16  ;;  %v255_v19 = vshrl.u32 %v1345_v13, 16  ;;  %v1832_v27 = vld [vmem:[%s2281_s1 + $0xf0] sm:$0xff]   ;;  %v1833_v28 = vld [vmem:[%s2281_s1 + $0xa8] sm:$0xff]   ;;  %v1835_v30 = vld [vmem:[%s2281_s1 + $0xa0] sm:$0xff]  }
  0x13   : > { %1645 = vmatprep.subr.bf16.mxu1 %v1903_v1  ;;  %v1834_v29 = vld [vmem:[%s2281_s1 + $0xe8] sm:$0xff]   ;;  %v1836_v31 = vld [vmem:[%s2281_s1 + $0xe0] sm:$0xff]   ;;  %v1837_v32 = vld [vmem:[%s2281_s1 + $0x98] sm:$0xff]  }
  0x14   : > { %v259_v20 = vrot.slane %v257_v16, 1  ;;  %v1838_v33 = vld [vmem:[%s2281_s1 + $0xd8] sm:$0xff]   ;;  %v1839_v34 = vld [vmem:[%s2281_s1 + $0x90] sm:$0xff]   ;;  %v1841_v36 = vld [vmem:[%s2281_s1 + $0x88] sm:$0xff]  }
  0x15   : > { %1626 = vmatpush3.bf16.msra.mxu0 %v1816_v5  ;;  %v1840_v35 = vld [vmem:[%s2281_s1 + $0xd0] sm:$0xff]   ;;  %v1842_v37 = vld [vmem:[%s2281_s1 + $0xc8] sm:$0xff]   ;;  %v438_v38 = vld [vmem:[%s1980_s10] sm:$0xe] }
  0x16   : > { %1646 = vmatpush3.bf16.msra.mxu1 %v1817_v6  ;;  %1627 = vmatprep.subr.bf16.mxu0 %v1903_v1  ;;  %v260_v23 = vor.u32 %v259_v20, %v255_v19  ;;  %v550_v39 = vld [vmem:[%s1980_s10] sm:$0xc]  ;;  %v551_v40 = vld [vmem:[%s1980_s10 + $0x4] sm:$0x3]  ;;  %v1378_v41 = vcombine.low %v438_v38, %v1992_v12  ;;  %v1846_v46 = vld [vmem:[%s2281_s1 + $0x138] sm:$0xff]  }
  0x17   : > { %1647 = vmatprep.subr.bf16.mxu1 %v1903_v1  ;;  %v1843_v42 = vld [vmem:[%s2281_s1 + $0x80] sm:$0xff]   ;;  %v1403_v43 = vcombine.low %v550_v39, %v551_v40  ;;  %v1849_v48 = vld [vmem:[%s2281_s1 + $0x178] sm:$0xff]   ;;  %v1850_v49 = vld [vmem:[%s2281_s1 + $0x130] sm:$0xff]  }
  0x18   : > { %v1844_v44 = vld [vmem:[%s2281_s1 + $0xc0] sm:$0xff]   ;;  %v459_v45 = vrot.slane %v1378_v41, 1  ;;  %v1851_v50 = vld [vmem:[%s2281_s1 + $0x170] sm:$0xff]   ;;  %v1852_v51 = vld [vmem:[%s2281_s1 + $0x128] sm:$0xff]  }
  0x19   : > { %1628 = vmatpush3.bf16.msra.mxu0 %v1818_v7  ;;  %v574_v47 = vrot.slane %v1403_v43, 2  ;;  %v1853_v52 = vld [vmem:[%s2281_s1 + $0x168] sm:$0xff]   ;;  %v1854_v53 = vld [vmem:[%s2281_s1 + $0x120] sm:$0xff]   ;;  %v1856_v56 = vld [vmem:[%s2281_s1 + $0x118] sm:$0xff]  }
  0x1a   : > { %1648 = vmatpush3.bf16.msra.mxu1 %v1819_v8  ;;  %1629 = vmatprep.subr.bf16.mxu0 %v1903_v1  ;;  %v1855_v54 = vld [vmem:[%s2281_s1 + $0x160] sm:$0xff]   ;;  %v1857_v57 = vld [vmem:[%s2281_s1 + $0x158] sm:$0xff]   ;;  %v1858_v59 = vld [vmem:[%s2281_s1 + $0x110] sm:$0xff]  }
  0x1b   : > { %1649 = vmatprep.subr.bf16.mxu1 %v1903_v1  ;;  %v665_v55 = vld [vmem:[%s1980_s10 + $0x4] sm:$0x7]  ;;  %v1859_v60 = vld [vmem:[%s2281_s1 + $0x150] sm:$0xff]   ;;  %v1860_v63 = vld [vmem:[%s2281_s1 + $0x108] sm:$0xff]  }
  0x1c   : > { %v1428_v58 = vcombine.low %v550_v39, %v665_v55  ;;  %v1861_v0 = vld [vmem:[%s2281_s1 + $0x148] sm:$0xff]   ;;  %v784_v2 = vld [vmem:[%s1980_s10] sm:$0x8]  ;;  %v1867_v12 = vld [vmem:[%s2281_s1 + $0x1b0] sm:$0xff]  }
  0x1d   : > { %1630 = vmatpush3.bf16.msra.mxu0 %v1820_v9  ;;  %v1862_v5 = vld [vmem:[%s2281_s1 + $0x100] sm:$0xff]   ;;  %v1453_v6 = vcombine.low %v784_v2, %v665_v55  ;;  %v1864_v9 = vld [vmem:[%s2281_s1 + $0x1b8] sm:$0xff]   ;;  %v1868_v13 = vld [vmem:[%s2281_s1 + $0x1f0] sm:$0xff]  }
  0x1e   : > { %1650 = vmatpush3.bf16.msra.mxu1 %v1821_v10  ;;  %1631 = vmatprep.subr.bf16.mxu0 %v1903_v1  ;;  %v687_v61 = vshrl.u32 %v1428_v58, 16  ;;  %v690_v62 = vshll.u32 %v1428_v58, 16  ;;  %v1863_v7 = vld [vmem:[%s2281_s1 + $0x140] sm:$0xff]   ;;  %v1874_v19 = vld [vmem:[%s2281_s1 + $0x1d8] sm:$0xff]   ;;  %v1887_v39 = vld [vmem:[%s2281_s1 + $0x210] sm:$0xff]  }
  0x1f   : > { %1651 = vmatprep.subr.bf16.mxu1 %v1903_v1  ;;  %v805_v10 = vrot.slane %v1453_v6, 3  ;;  %v1871_v16 = vld [vmem:[%s2281_s1 + $0x1a0] sm:$0xff]   ;;  %v1886_v38 = vld [vmem:[%s2281_s1 + $0x218] sm:$0xff]   ;;  %v1888_v40 = vld [vmem:[%s2281_s1 + $0x208] sm:$0xff]  }
  0x20   : > { %v689_v3 = vrot.slane %v687_v61, 2  ;;  %v692_v4 = vrot.slane %v690_v62, 3  ;;  %v1003_v20 = vld [vmem:[%s1980_s10 + $0x4] sm:$0xf] }
  0x21   : > { %1632 = vmatpush3.bf16.msra.mxu0 %v1822_v14  ;;  %v1869_v14 = vld [vmem:[%s2281_s1 + $0x1a8] sm:$0xff]   ;;  %v1124_v41 = vld [vmem:[%s1980_s10 + $0x4] sm:$0xe] }
  0x22   : > { %1652 = vmatpush3.bf16.msra.mxu1 %v1823_v15  ;;  %1633 = vmatprep.subr.bf16.mxu0 %v1903_v1  ;;  %v693_v8 = vor.u32 %v692_v4, %v689_v3  ;;  %v1870_v15 = vld [vmem:[%s2281_s1 + $0x1e8] sm:$0xff]   ;;  %v1889_v43 = vld [vmem:[%s2281_s1 + $0x200] sm:$0xff]  }
  0x23   : > { %1653 = vmatprep.subr.bf16.mxu1 %v1903_v1 }
  0x25   : > { %1634 = vmatpush3.bf16.msra.mxu0 %v1824_v17  ;;  %v1872_v17 = vld [vmem:[%s2281_s1 + $0x1e0] sm:$0xff]  }
  0x26   : > { %1654 = vmatpush3.bf16.msra.mxu1 %v1825_v18  ;;  %1635 = vmatprep.subr.bf16.mxu0 %v1903_v1  ;;  %v1873_v18 = vld [vmem:[%s2281_s1 + $0x198] sm:$0xff]  }
  0x27   : > { %1655 = vmatprep.subr.bf16.mxu1 %v1903_v1 }
  0x29   : > { %1636 = vmatpush3.bf16.msra.mxu0 %v1826_v21  ;;  %v1004_v21 = vld [vmem:[%s1980_s10 + $0x8] sm:$0x1] }
  0x2a   : > { %1656 = vmatpush3.bf16.msra.mxu1 %v1827_v22  ;;  %1661 = vmatprep.subr.bf16.mxu0 %v1903_v1  ;;  %v1875_v22 = vld [vmem:[%s2281_s1 + $0x190] sm:$0xff]  }
  0x2b   : > { %1681 = vmatprep.subr.bf16.mxu1 %v1903_v1 }
  0x2c   : > { %1638 = vmatmul.mubr.bf16.vlgmr.msra.gmra.mxu0 %v260_v23  ;;  %v1502_v23 = vcombine.low %v1003_v20, %v1004_v21 }
  0x2d   : > { %1658 = vmatmul.mubr.bf16.vlgmr.msra.gmra.mxu1 %v214_v11  ;;  %1662 = vmatpush3.bf16.msra.mxu0 %v1829_v24  ;;  %v1866_v11 = vld [vmem:[%s2281_s1 + $0x1f8] sm:$0xff]   ;;  %v1876_v24 = vld [vmem:[%s2281_s1 + $0x1d0] sm:$0xff]  }
  0x2e   : > { %1682 = vmatpush3.bf16.msra.mxu1 %v1830_v25  ;;  %1663 = vmatprep.subr.bf16.mxu0 %v1903_v1  ;;  %v1877_v25 = vld [vmem:[%s2281_s1 + $0x188] sm:$0xff]  }
  0x2f   : > { %1683 = vmatprep.subr.bf16.mxu1 %v1903_v1  ;;  %1677 = vmatprep.mubr.msk.bf16.mxu0 %vm1904_vm0, %v1903_v1 }
  0x30   : > { %1697 = vmatprep.mubr.msk.bf16.mxu1 %vm1904_vm0, %v1903_v1 }
  0x31   : > { %1664 = vmatpush3.bf16.msra.mxu0 %v1831_v26  ;;  %v1030_v26 = vshll.u32 %v1502_v23, 16 }
  0x32   : > { %1684 = vmatpush3.bf16.msra.mxu1 %v1832_v27  ;;  %1665 = vmatprep.subr.bf16.mxu0 %v1903_v1  ;;  %v1878_v27 = vld [vmem:[%s2281_s1 + $0x1c8] sm:$0xff]  }
  0x33   : > { %1685 = vmatprep.subr.bf16.mxu1 %v1903_v1 }
  0x35   : > { %1666 = vmatpush3.bf16.msra.mxu0 %v1833_v28  ;;  %v1879_v28 = vld [vmem:[%s2281_s1 + $0x180] sm:$0xff]  }
  0x36   : > { %1686 = vmatpush3.bf16.msra.mxu1 %v1834_v29  ;;  %1667 = vmatprep.subr.bf16.mxu0 %v1903_v1  ;;  %v1028_v29 = vshrl.u32 %v1502_v23, 16 }
  0x37   : > { %1687 = vmatprep.subr.bf16.mxu1 %v1903_v1 }
  0x39   : > { %1668 = vmatpush3.bf16.msra.mxu0 %v1835_v30  ;;  %v1032_v30 = vrot.slane %v1030_v26, 1 }
  0x3a   : > { %1688 = vmatpush3.bf16.msra.mxu1 %v1836_v31  ;;  %1669 = vmatprep.subr.bf16.mxu0 %v1903_v1  ;;  %v1880_v31 = vld [vmem:[%s2281_s1 + $0x1c0] sm:$0xff]  }
  0x3b   : > { %1689 = vmatprep.subr.bf16.mxu1 %v1903_v1 }
  0x3d   : > { %1670 = vmatpush3.bf16.msra.mxu0 %v1837_v32  ;;  %v896_v32 = vld [vmem:[%s1980_s10 + $0x4] sm:$0xf] }
  0x3e   : > { %1690 = vmatpush3.bf16.msra.mxu1 %v1838_v33  ;;  %1671 = vmatprep.subr.bf16.mxu0 %v1903_v1  ;;  %v1881_v33 = vld [vmem:[%s2281_s1 + $0x238] sm:$0xff]  }
  0x3f   : > { %1691 = vmatprep.subr.bf16.mxu1 %v1903_v1 }
  0x41   : > { %1672 = vmatpush3.bf16.msra.mxu0 %v1839_v34  ;;  %v1033_v34 = vor.u32 %v1032_v30, %v1028_v29  ;;  %v1251_v30 = vld [vmem:[%s208_s30] sm:$0xf] }
  0x42   : > { %1692 = vmatpush3.bf16.msra.mxu1 %v1840_v35  ;;  %1673 = vmatprep.subr.bf16.mxu0 %v1903_v1  ;;  %v1883_v35 = vld [vmem:[%s2281_s1 + $0x230] sm:$0xff]  }
  0x43   : > { %1693 = vmatprep.subr.bf16.mxu1 %v1903_v1 }
  0x45   : > { %1674 = vmatpush3.bf16.msra.mxu0 %v1841_v36  ;;  %v1884_v36 = vld [vmem:[%s2281_s1 + $0x228] sm:$0xff]  }
  0x46   : > { %1694 = vmatpush3.bf16.msra.mxu1 %v1842_v37  ;;  %1675 = vmatprep.subr.bf16.mxu0 %v1903_v1  ;;  %v1885_v37 = vld [vmem:[%s2281_s1 + $0x220] sm:$0xff]  }
  0x47   : > { %1695 = vmatprep.subr.bf16.mxu1 %v1903_v1 }
  0x49   : > { %1676 = vmatpush3.bf16.msra.mxu0 %v1843_v42  ;;  %v1527_v42 = vcombine.low %v1124_v41, %v1004_v21  ;;  %v1536_v21 = vld [vmem:[%s2282_s2] ss:$0 sm:$0xff] }
  0x4a   : > { %1696 = vmatpush3.bf16.msra.mxu1 %v1844_v44  ;;  %1701 = vmatprep.subr.bf16.mxu0 %v1903_v1 }
  0x4b   : > { %1721 = vmatprep.subr.bf16.mxu1 %v1903_v1  ;;  %v1145_v44 = vrot.slane %v1527_v42, 1 }
  0x4c   : > { %1678 = vmatmul.mubr.bf16.vlgmr.msra.gmra.mxu0 %v459_v45 }
  0x4d   : > { %1702 = vmatpush3.bf16.msra.mxu0 %v1846_v46  ;;  %1698 = vmatmul.mubr.bf16.vlgmr.msra.gmra.mxu1 %v574_v47 }
  0x4e   : > { %1722 = vmatpush3.bf16.msra.mxu1 %v1849_v48  ;;  %1703 = vmatprep.subr.bf16.mxu0 %v1903_v1 }
  0x4f   : > { %1723 = vmatprep.subr.bf16.mxu1 %v1903_v1  ;;  %1717 = vmatprep.mubr.msk.bf16.mxu0 %vm1904_vm0, %v1903_v1 }
  0x50   : > { %1737 = vmatprep.mubr.msk.bf16.mxu1 %vm1904_vm0, %v1903_v1 }
  0x51   : > { %1704 = vmatpush3.bf16.msra.mxu0 %v1850_v49 }
  0x52   : > { %1724 = vmatpush3.bf16.msra.mxu1 %v1851_v50  ;;  %1705 = vmatprep.subr.bf16.mxu0 %v1903_v1 }
  0x53   : > { %1725 = vmatprep.subr.bf16.mxu1 %v1903_v1 }
  0x55   : > { %1706 = vmatpush3.bf16.msra.mxu0 %v1852_v51 }
  0x56   : > { %1726 = vmatpush3.bf16.msra.mxu1 %v1853_v52  ;;  %1707 = vmatprep.subr.bf16.mxu0 %v1903_v1 }
  0x57   : > { %1727 = vmatprep.subr.bf16.mxu1 %v1903_v1 }
  0x59   : > { %1708 = vmatpush3.bf16.msra.mxu0 %v1854_v53 }
  0x5a   : > { %1728 = vmatpush3.bf16.msra.mxu1 %v1855_v54  ;;  %1709 = vmatprep.subr.bf16.mxu0 %v1903_v1 }
  0x5b   : > { %1729 = vmatprep.subr.bf16.mxu1 %v1903_v1 }
  0x5d   : > { %1710 = vmatpush3.bf16.msra.mxu0 %v1856_v56 }
  0x5e   : > { %1730 = vmatpush3.bf16.msra.mxu1 %v1857_v57  ;;  %1711 = vmatprep.subr.bf16.mxu0 %v1903_v1 }
  0x5f   : > { %1731 = vmatprep.subr.bf16.mxu1 %v1903_v1 }
  0x61   : > { %1712 = vmatpush3.bf16.msra.mxu0 %v1858_v59 }
  0x62   : > { %1732 = vmatpush3.bf16.msra.mxu1 %v1859_v60  ;;  %1713 = vmatprep.subr.bf16.mxu0 %v1903_v1 }
  0x63   : > { %1733 = vmatprep.subr.bf16.mxu1 %v1903_v1 }
  0x65   : > { %1714 = vmatpush3.bf16.msra.mxu0 %v1860_v63 }
  0x66   : > { %1734 = vmatpush3.bf16.msra.mxu1 %v1861_v0  ;;  %1715 = vmatprep.subr.bf16.mxu0 %v1903_v1 }
  0x67   : > { %1735 = vmatprep.subr.bf16.mxu1 %v1903_v1 }
  0x69   : > { %1716 = vmatpush3.bf16.msra.mxu0 %v1862_v5 }
  0x6a   : > { %1736 = vmatpush3.bf16.msra.mxu1 %v1863_v7  ;;  %1741 = vmatprep.subr.bf16.mxu0 %v1903_v1 }
  0x6b   : > { %1761 = vmatprep.subr.bf16.mxu1 %v1903_v1 }
  0x6c   : > { %1718 = vmatmul.mubr.bf16.vlgmr.msra.gmra.mxu0 %v693_v8 }
  0x6d   : > { %1742 = vmatpush3.bf16.msra.mxu0 %v1864_v9  ;;  %1738 = vmatmul.mubr.bf16.vlgmr.msra.gmra.mxu1 %v805_v10 }
  0x6e   : > { %1762 = vmatpush3.bf16.msra.mxu1 %v1866_v11  ;;  %1743 = vmatprep.subr.bf16.mxu0 %v1903_v1 }
  0x6f   : > { %1763 = vmatprep.subr.bf16.mxu1 %v1903_v1  ;;  %1757 = vmatprep.mubr.msk.bf16.mxu0 %vm1904_vm0, %v1903_v1 }
  0x70   : > { %1777 = vmatprep.mubr.msk.bf16.mxu1 %vm1904_vm0, %v1903_v1 }
  0x71   : > { %1744 = vmatpush3.bf16.msra.mxu0 %v1867_v12 }
  0x72   : > { %1764 = vmatpush3.bf16.msra.mxu1 %v1868_v13  ;;  %1745 = vmatprep.subr.bf16.mxu0 %v1903_v1 }
  0x73   : > { %1765 = vmatprep.subr.bf16.mxu1 %v1903_v1 }
  0x75   : > { %1746 = vmatpush3.bf16.msra.mxu0 %v1869_v14 }
  0x76   : > { %1766 = vmatpush3.bf16.msra.mxu1 %v1870_v15  ;;  %1747 = vmatprep.subr.bf16.mxu0 %v1903_v1 }
  0x77   : > { %1767 = vmatprep.subr.bf16.mxu1 %v1903_v1 }
  0x79   : > { %1748 = vmatpush3.bf16.msra.mxu0 %v1871_v16 }
  0x7a   : > { %1768 = vmatpush3.bf16.msra.mxu1 %v1872_v17  ;;  %1749 = vmatprep.subr.bf16.mxu0 %v1903_v1 }
  0x7b   : > { %1769 = vmatprep.subr.bf16.mxu1 %v1903_v1 }
  0x7d   : > { %1750 = vmatpush3.bf16.msra.mxu0 %v1873_v18 }
  0x7e   : > { %1770 = vmatpush3.bf16.msra.mxu1 %v1874_v19  ;;  %1751 = vmatprep.subr.bf16.mxu0 %v1903_v1 }
  0x7f   : > { %1771 = vmatprep.subr.bf16.mxu1 %v1903_v1 }
  0x81   : > { %1752 = vmatpush3.bf16.msra.mxu0 %v1875_v22 }
  0x82   : > { %1772 = vmatpush3.bf16.msra.mxu1 %v1876_v24  ;;  %1753 = vmatprep.subr.bf16.mxu0 %v1903_v1 }
  0x83   : > { %1773 = vmatprep.subr.bf16.mxu1 %v1903_v1 }
  0x85   : > { %1754 = vmatpush3.bf16.msra.mxu0 %v1877_v25 }
  0x86   : > { %1774 = vmatpush3.bf16.msra.mxu1 %v1878_v27  ;;  %1755 = vmatprep.subr.bf16.mxu0 %v1903_v1 }
  0x87   : > { %1775 = vmatprep.subr.bf16.mxu1 %v1903_v1 }
  0x89   : > { %1756 = vmatpush3.bf16.msra.mxu0 %v1879_v28 }
  0x8a   : > { %1776 = vmatpush3.bf16.msra.mxu1 %v1880_v31  ;;  %1781 = vmatprep.subr.bf16.mxu0 %v1903_v1  ;;  %v1252_v31 = vunpack.c.l.bf16 %v1251_v30 }
  0x8c   : > { %1758 = vmatmul.mubr.bf16.vlgmr.msra.gmra.mxu0 %v896_v32 }
  0x8d   : > { %1782 = vmatpush3.bf16.msra.mxu0 %v1881_v33  ;;  %1778 = vmatmul.mubr.bf16.vlgmr.msra.gmra.mxu1 %v1033_v34 }
  0x8e   : > { %1783 = vmatprep.subr.bf16.mxu0 %v1903_v1  ;;  %1797 = vmatprep.mubr.msk.bf16.mxu0 %vm1904_vm0, %v1903_v1 }
  0x91   : > { %1784 = vmatpush3.bf16.msra.mxu0 %v1883_v35 }
  0x92   : > { %1785 = vmatprep.subr.bf16.mxu0 %v1903_v1 }
  0x95   : > { %1786 = vmatpush3.bf16.msra.mxu0 %v1884_v36 }
  0x96   : > { %1787 = vmatprep.subr.bf16.mxu0 %v1903_v1 }
  0x99   : > { %1788 = vmatpush3.bf16.msra.mxu0 %v1885_v37 }
  0x9a   : > { %1789 = vmatprep.subr.bf16.mxu0 %v1903_v1 }
  0x9d   : > { %1790 = vmatpush3.bf16.msra.mxu0 %v1886_v38 }
  0x9e   : > { %1791 = vmatprep.subr.bf16.mxu0 %v1903_v1 }
  0xa1   : > { %1792 = vmatpush3.bf16.msra.mxu0 %v1887_v39 }
  0xa2   : > { %1793 = vmatprep.subr.bf16.mxu0 %v1903_v1 }
  0xa5   : > { %1794 = vmatpush3.bf16.msra.mxu0 %v1888_v40 }
  0xa6   : > { %1795 = vmatprep.subr.bf16.mxu0 %v1903_v1 }
  0xa9   : > { %1796 = vmatpush3.bf16.msra.mxu0 %v1889_v43 }
  0xac   : > { %1798 = vmatmul.mubr.bf16.vlgmr.msra.gmra.mxu0 %v1145_v44 }
  0xec   : > { %v344_v45 = vpop.f32.mrf.mxu0 }
  0xed   : > { %v432_v46 = vpop.f32.mrf.mxu1 }
  0xee   : > { %v433_v47 = vadd.f32 %v432_v46, %v344_v45  ;;  %v1639_v48 = vpop.f32.mrf.mxu0 }
  0xef   : > { %v1659_v49 = vpop.f32.mrf.mxu1 }
  0xf0   : > { %v347_v50 = vpop.f32.mrf.mxu0 }
  0xf1   : > { %v435_v51 = vpop.f32.mrf.mxu1 }
  0xf2   : > { %v1640_v52 = vpop.f32.mrf.mxu0 }
  0xf3   : > { %v1660_v53 = vpop.f32.mrf.mxu1 }
 0x10c   : > { %v543_v54 = vpop.f32.mrf.mxu0 }
 0x10d   : > { %v549_v55 = vadd.f32 %v543_v54, %v433_v47  ;;  %v658_v56 = vpop.f32.mrf.mxu1 }
 0x10e   : > { %v1679_v57 = vpop.f32.mrf.mxu0 }
 0x10f   : > { %v664_v58 = vadd.f32 %v658_v56, %v549_v55  ;;  %v1699_v59 = vpop.f32.mrf.mxu1 }
 0x110   : > { %v546_v60 = vpop.f32.mrf.mxu0 }
 0x111   : > { %v661_v1 = vpop.f32.mrf.mxu1 }
 0x112   : > { %v1680_v61 = vpop.f32.mrf.mxu0 }
 0x113   : > { %v1700_v62 = vpop.f32.mrf.mxu1 }
 0x12c   : > { %v777_v63 = vpop.f32.mrf.mxu0 }
 0x12d   : > { %v889_v0 = vpop.f32.mrf.mxu1  ;;  %v783_v16 = vadd.f32 %v777_v63, %v664_v58 }
 0x12e   : > { %v1719_v2 = vpop.f32.mrf.mxu0 }
 0x12f   : > { %v1739_v3 = vpop.f32.mrf.mxu1  ;;  %v895_v17 = vadd.f32 %v889_v0, %v783_v16 }
 0x130   : > { %v780_v4 = vpop.f32.mrf.mxu0 }
 0x131   : > { %v892_v5 = vpop.f32.mrf.mxu1 }
 0x132   : > { %v1720_v6 = vpop.f32.mrf.mxu0 }
 0x133   : > { %v1740_v7 = vpop.f32.mrf.mxu1 }
 0x14c   : > { %v996_v8 = vpop.f32.mrf.mxu0 }
 0x14d   : > { %v1117_v9 = vpop.f32.mrf.mxu1  ;;  %v1002_v18 = vadd.f32 %v996_v8, %v895_v17 }
 0x14e   : > { %v1759_v10 = vpop.f32.mrf.mxu0 }
 0x14f   : > { %v1779_v11 = vpop.f32.mrf.mxu1  ;;  %v1123_v19 = vadd.f32 %v1117_v9, %v1002_v18 }
 0x150   : > { %v999_v12 = vpop.f32.mrf.mxu0 }
 0x151   : > { %v1120_v13 = vpop.f32.mrf.mxu1 }
 0x152   : > { %v1760_v14 = vpop.f32.mrf.mxu0 }
 0x153   : > { %v1780_v15 = vpop.f32.mrf.mxu1 }
 0x16c   : > { %v1229_v20 = vpop.f32.mrf.mxu0 }
 0x16d   : > { %v1235_v22 = vadd.f32 %v1229_v20, %v1123_v19 }
 0x16e   : > { %v1799_v23 = vpop.f32.mrf.mxu0 }
 0x16f   : > { %v1243_v24 = vadd.f32 %v1536_v21, %v1235_v22 }
 0x170   : > { %v1232_v25 = vpop.f32.mrf.mxu0 }
 0x171   : > { %v1537_v26 = vmul.f32 -1.442695, %v1243_v24 }
 0x172   : > { %v1800_v27 = vpop.f32.mrf.mxu0 }
 0x173   : > { %1891 = vpow2.f32 %v1537_v26 }
 0x180   : > { %v1892_v28 = vpop.eup %1891 }
 0x181   : > { %v1247_v29 = vadd.f32 1.0, %v1892_v28 }
 0x183   : > { %1893 = vrcp.f32 %v1247_v29 }
 0x190   : > { %v1894_v32 = vpop.eup %1893 }
 0x191   : > { %v1250_v33 = vmul.f32 %v1894_v32, %v1243_v24 }
 0x193   : > { %v1253_v34 = vadd.f32 %v1252_v31, %v1250_v33 }
 0x195   : > { %v1254_v35 = vpack.c.bf16 %v1253_v34, %v1253_v34 }
 0x197   : > { %1255 = vst [vmem:[%s212_s7] sm:$0xf] %v1254_v35 }
 0x198 PF: > { %s14_s15 = sadd.s32 1, %s1901_s15  }
 0x199   : > { %p11_p4 = scmp.ge.s32.totalorder %s14_s15, 4  }
 0x19b   :  { %13 = sbr.rel (!%p11_p4) target bundleno = 1 (0x1), region = 77 }

// kernel: a_call__.19
= control target key start
LH: loop header
LB: loop body
LE: loop exit
PB: predicated region body
PF: predicated region fallthrough
CT: control target
= control target key end

     0   :  { %s1865_s12 = smov 0   ;;  %s2212_s0 = inlined_call_operand.vmem [shape: bf16[2,18,128], index: 0, kind: input, shape index: {}]   ;;  %s2213_s1 = inlined_call_operand.vmem [shape: bf16[9,128,128], index: 1, kind: input, shape index: {}]   ;;  %s2214_s2 = inlined_call_operand.vmem [shape: f32[1,128], index: 2, kind: input, shape index: {}]   ;;  %s2215_s3 = inlined_call_operand.vmem [shape: bf16[2,8,128], index: 3, kind: output, shape index: {}]  }
   0x1 LB: > { %s1262_s13 = sadd.s32 4294967295, %s1841_s12   ;;  %p1266_p0 = scmp.ge.s32.totalorder %s1841_s12, 1  ;;  %s1841_s12 = sphi %s1865_s12, %s13_s12  }
   0x2   : > { %p137_p1 = scmp.lt.s32.totalorder %s1841_s12, 3 }
   0x4   : > { %p138_p2 = pnand %p1266_p0, %p137_p1 }
   0x5   : > { %p160_p3 = scmp.lt.s32.totalorder (!%p138_p2), %s1262_s13, 1 }
   0x6   : > { %141 = sbr.rel (%p138_p2) target bundleno = 406 (0x196), region = 32 }
   0xb   : > { %v1752_v0 = vld [vmem:[%s2213_s1 + $0x78] sm:$0xff]   ;;  %v1843_v1 = vmov 0.0   ;;  %v1754_v3 = vld [vmem:[%s2213_s1 + $0x70] sm:$0xff]   ;;  %vm1844_vm0 = vmmov 0   ;;  %s2217_s13 = smov (!%p160_p3, %s1262_s13), 1  ;;  %v1756_v5 = vld [vmem:[%s2213_s1 + $0x68] sm:$0xff]  }
   0xc   : > { %1561 = vmatprep.subr.bf16.mxu0 %v1843_v1  ;;  %1581 = vmatprep.subr.bf16.mxu1 %v1843_v1  ;;  %v1753_v2 = vld [vmem:[%s2213_s1 + $0x38] sm:$0xff]   ;;  %v1755_v4 = vld [vmem:[%s2213_s1 + $0x30] sm:$0xff]   ;;  %v1757_v6 = vld [vmem:[%s2213_s1 + $0x28] sm:$0xff]   ;;  %s1741_s26 = smul.u32 12, %s2217_s13  ;;  %s1268_s18 = sshll.u32 %s2217_s13, 2 }
   0xd   : > { %1562 = vmatpush3.bf16.msra.mxu0 %v1752_v0  ;;  %1577 = vmatprep.mubr.msk.bf16.mxu0 %vm1844_vm0, %v1843_v1  ;;  %v1758_v7 = vld [vmem:[%s2213_s1 + $0x60] sm:$0xff]   ;;  %v1760_v9 = vld [vmem:[%s2213_s1 + $0x58] sm:$0xff]   ;;  %v1762_v14 = vld [vmem:[%s2213_s1 + $0x50] sm:$0xff]   ;;  %s168_s21 = scalar_lea.vmem %s2215_s3, %s1268_s18 }
   0xe   : > { %1582 = vmatpush3.bf16.msra.mxu1 %v1753_v2  ;;  %1563 = vmatprep.subr.bf16.mxu0 %v1843_v1  ;;  %v1759_v8 = vld [vmem:[%s2213_s1 + $0x20] sm:$0xff]   ;;  %s1915_s6 = scalar_lea.vmem %s2212_s0, %s1741_s26  ;;  %v1761_v10 = vld [vmem:[%s2213_s1 + $0x18] sm:$0xff]   ;;  %v1763_v15 = vld [vmem:[%s2213_s1 + $0x10] sm:$0xff]  }
   0xf   : > { %1583 = vmatprep.subr.bf16.mxu1 %v1843_v1  ;;  %1597 = vmatprep.mubr.msk.bf16.mxu1 %vm1844_vm0, %v1843_v1  ;;  %v170_v11 = vld [vmem:[%s1915_s6] sm:$0xf]  ;;  %v1927_v12 = vld [vmem:[%s1915_s6 + $0x4] sm:$0x1]  ;;  %v1764_v17 = vld [vmem:[%s2213_s1 + $0x48] sm:$0xff]  }
  0x10   : > { %v1285_v13 = vcombine.low %v170_v11, %v1927_v12  ;;  %v1765_v18 = vld [vmem:[%s2213_s1 + $0x8] sm:$0xff]   ;;  %v1766_v21 = vld [vmem:[%s2213_s1 + $0x40] sm:$0xff]   ;;  %v1769_v24 = vld [vmem:[%s2213_s1 + $0xb8] sm:$0xff]  }
  0x11   : > { %1564 = vmatpush3.bf16.msra.mxu0 %v1754_v3  ;;  %v1767_v22 = vld [vmem:[%s2213_s1] sm:$0xff]   ;;  %v1770_v25 = vld [vmem:[%s2213_s1 + $0xf8] sm:$0xff]   ;;  %v1771_v26 = vld [vmem:[%s2213_s1 + $0xb0] sm:$0xff]  }
  0x12   : > { %1584 = vmatpush3.bf16.msra.mxu1 %v1755_v4  ;;  %1565 = vmatprep.subr.bf16.mxu0 %v1843_v1  ;;  %v213_v16 = vshll.u32 %v1285_v13, 16  ;;  %v211_v19 = vshrl.u32 %v1285_v13, 16  ;;  %v1772_v27 = vld [vmem:[%s2213_s1 + $0xf0] sm:$0xff]   ;;  %v1773_v28 = vld [vmem:[%s2213_s1 + $0xa8] sm:$0xff]   ;;  %v1775_v30 = vld [vmem:[%s2213_s1 + $0xa0] sm:$0xff]  }
  0x13   : > { %1585 = vmatprep.subr.bf16.mxu1 %v1843_v1  ;;  %v1774_v29 = vld [vmem:[%s2213_s1 + $0xe8] sm:$0xff]   ;;  %v1776_v31 = vld [vmem:[%s2213_s1 + $0xe0] sm:$0xff]   ;;  %v1777_v32 = vld [vmem:[%s2213_s1 + $0x98] sm:$0xff]  }
  0x14   : > { %v215_v20 = vrot.slane %v213_v16, 1  ;;  %v1778_v33 = vld [vmem:[%s2213_s1 + $0xd8] sm:$0xff]   ;;  %v1779_v34 = vld [vmem:[%s2213_s1 + $0x90] sm:$0xff]   ;;  %v1781_v36 = vld [vmem:[%s2213_s1 + $0x88] sm:$0xff]  }
  0x15   : > { %1566 = vmatpush3.bf16.msra.mxu0 %v1756_v5  ;;  %v1780_v35 = vld [vmem:[%s2213_s1 + $0xd0] sm:$0xff]   ;;  %v1782_v37 = vld [vmem:[%s2213_s1 + $0xc8] sm:$0xff]   ;;  %v394_v38 = vld [vmem:[%s1915_s6] sm:$0xe] }
  0x16   : > { %1586 = vmatpush3.bf16.msra.mxu1 %v1757_v6  ;;  %1567 = vmatprep.subr.bf16.mxu0 %v1843_v1  ;;  %v216_v23 = vor.u32 %v215_v20, %v211_v19  ;;  %v506_v39 = vld [vmem:[%s1915_s6] sm:$0xc]  ;;  %v507_v40 = vld [vmem:[%s1915_s6 + $0x4] sm:$0x3]  ;;  %v1318_v41 = vcombine.low %v394_v38, %v1927_v12  ;;  %v1786_v46 = vld [vmem:[%s2213_s1 + $0x138] sm:$0xff]  }
  0x17   : > { %1587 = vmatprep.subr.bf16.mxu1 %v1843_v1  ;;  %v1783_v42 = vld [vmem:[%s2213_s1 + $0x80] sm:$0xff]   ;;  %v1343_v43 = vcombine.low %v506_v39, %v507_v40  ;;  %v1789_v48 = vld [vmem:[%s2213_s1 + $0x178] sm:$0xff]   ;;  %v1790_v49 = vld [vmem:[%s2213_s1 + $0x130] sm:$0xff]  }
  0x18   : > { %v1784_v44 = vld [vmem:[%s2213_s1 + $0xc0] sm:$0xff]   ;;  %v415_v45 = vrot.slane %v1318_v41, 1  ;;  %v1791_v50 = vld [vmem:[%s2213_s1 + $0x170] sm:$0xff]   ;;  %v1792_v51 = vld [vmem:[%s2213_s1 + $0x128] sm:$0xff]  }
  0x19   : > { %1568 = vmatpush3.bf16.msra.mxu0 %v1758_v7  ;;  %v530_v47 = vrot.slane %v1343_v43, 2  ;;  %v1793_v52 = vld [vmem:[%s2213_s1 + $0x168] sm:$0xff]   ;;  %v1794_v53 = vld [vmem:[%s2213_s1 + $0x120] sm:$0xff]   ;;  %v1796_v56 = vld [vmem:[%s2213_s1 + $0x118] sm:$0xff]  }
  0x1a   : > { %1588 = vmatpush3.bf16.msra.mxu1 %v1759_v8  ;;  %1569 = vmatprep.subr.bf16.mxu0 %v1843_v1  ;;  %v1795_v54 = vld [vmem:[%s2213_s1 + $0x160] sm:$0xff]   ;;  %v1797_v57 = vld [vmem:[%s2213_s1 + $0x158] sm:$0xff]   ;;  %v1798_v59 = vld [vmem:[%s2213_s1 + $0x110] sm:$0xff]  }
  0x1b   : > { %1589 = vmatprep.subr.bf16.mxu1 %v1843_v1  ;;  %v621_v55 = vld [vmem:[%s1915_s6 + $0x4] sm:$0x7]  ;;  %v1799_v60 = vld [vmem:[%s2213_s1 + $0x150] sm:$0xff]   ;;  %v1800_v63 = vld [vmem:[%s2213_s1 + $0x108] sm:$0xff]  }
  0x1c   : > { %v1368_v58 = vcombine.low %v506_v39, %v621_v55  ;;  %v1801_v0 = vld [vmem:[%s2213_s1 + $0x148] sm:$0xff]   ;;  %v740_v2 = vld [vmem:[%s1915_s6] sm:$0x8]  ;;  %v1807_v12 = vld [vmem:[%s2213_s1 + $0x1b0] sm:$0xff]  }
  0x1d   : > { %1570 = vmatpush3.bf16.msra.mxu0 %v1760_v9  ;;  %v1802_v5 = vld [vmem:[%s2213_s1 + $0x100] sm:$0xff]   ;;  %v1393_v6 = vcombine.low %v740_v2, %v621_v55  ;;  %v1804_v9 = vld [vmem:[%s2213_s1 + $0x1b8] sm:$0xff]   ;;  %v1808_v13 = vld [vmem:[%s2213_s1 + $0x1f0] sm:$0xff]  }
  0x1e   : > { %1590 = vmatpush3.bf16.msra.mxu1 %v1761_v10  ;;  %1571 = vmatprep.subr.bf16.mxu0 %v1843_v1  ;;  %v643_v61 = vshrl.u32 %v1368_v58, 16  ;;  %v646_v62 = vshll.u32 %v1368_v58, 16  ;;  %v1803_v7 = vld [vmem:[%s2213_s1 + $0x140] sm:$0xff]   ;;  %v1814_v19 = vld [vmem:[%s2213_s1 + $0x1d8] sm:$0xff]   ;;  %v1827_v39 = vld [vmem:[%s2213_s1 + $0x210] sm:$0xff]  }
  0x1f   : > { %1591 = vmatprep.subr.bf16.mxu1 %v1843_v1  ;;  %v761_v10 = vrot.slane %v1393_v6, 3  ;;  %v1811_v16 = vld [vmem:[%s2213_s1 + $0x1a0] sm:$0xff]   ;;  %v1826_v38 = vld [vmem:[%s2213_s1 + $0x218] sm:$0xff]   ;;  %v1828_v40 = vld [vmem:[%s2213_s1 + $0x208] sm:$0xff]  }
  0x20   : > { %v645_v3 = vrot.slane %v643_v61, 2  ;;  %v648_v4 = vrot.slane %v646_v62, 3  ;;  %v959_v20 = vld [vmem:[%s1915_s6 + $0x4] sm:$0xf] }
  0x21   : > { %1572 = vmatpush3.bf16.msra.mxu0 %v1762_v14  ;;  %v1809_v14 = vld [vmem:[%s2213_s1 + $0x1a8] sm:$0xff]   ;;  %v1080_v41 = vld [vmem:[%s1915_s6 + $0x4] sm:$0xe] }
  0x22   : > { %1592 = vmatpush3.bf16.msra.mxu1 %v1763_v15  ;;  %1573 = vmatprep.subr.bf16.mxu0 %v1843_v1  ;;  %v649_v8 = vor.u32 %v648_v4, %v645_v3  ;;  %v1810_v15 = vld [vmem:[%s2213_s1 + $0x1e8] sm:$0xff]   ;;  %v1829_v43 = vld [vmem:[%s2213_s1 + $0x200] sm:$0xff]  }
  0x23   : > { %1593 = vmatprep.subr.bf16.mxu1 %v1843_v1 }
  0x25   : > { %1574 = vmatpush3.bf16.msra.mxu0 %v1764_v17  ;;  %v1812_v17 = vld [vmem:[%s2213_s1 + $0x1e0] sm:$0xff]  }
  0x26   : > { %1594 = vmatpush3.bf16.msra.mxu1 %v1765_v18  ;;  %1575 = vmatprep.subr.bf16.mxu0 %v1843_v1  ;;  %v1813_v18 = vld [vmem:[%s2213_s1 + $0x198] sm:$0xff]  }
  0x27   : > { %1595 = vmatprep.subr.bf16.mxu1 %v1843_v1 }
  0x29   : > { %1576 = vmatpush3.bf16.msra.mxu0 %v1766_v21  ;;  %v960_v21 = vld [vmem:[%s1915_s6 + $0x8] sm:$0x1] }
  0x2a   : > { %1596 = vmatpush3.bf16.msra.mxu1 %v1767_v22  ;;  %1601 = vmatprep.subr.bf16.mxu0 %v1843_v1  ;;  %v1815_v22 = vld [vmem:[%s2213_s1 + $0x190] sm:$0xff]  }
  0x2b   : > { %1621 = vmatprep.subr.bf16.mxu1 %v1843_v1 }
  0x2c   : > { %1578 = vmatmul.mubr.bf16.vlgmr.msra.gmra.mxu0 %v216_v23  ;;  %v1442_v23 = vcombine.low %v959_v20, %v960_v21 }
  0x2d   : > { %1598 = vmatmul.mubr.bf16.vlgmr.msra.gmra.mxu1 %v170_v11  ;;  %1602 = vmatpush3.bf16.msra.mxu0 %v1769_v24  ;;  %v1806_v11 = vld [vmem:[%s2213_s1 + $0x1f8] sm:$0xff]   ;;  %v1816_v24 = vld [vmem:[%s2213_s1 + $0x1d0] sm:$0xff]  }
  0x2e   : > { %1622 = vmatpush3.bf16.msra.mxu1 %v1770_v25  ;;  %1603 = vmatprep.subr.bf16.mxu0 %v1843_v1  ;;  %v1817_v25 = vld [vmem:[%s2213_s1 + $0x188] sm:$0xff]  }
  0x2f   : > { %1623 = vmatprep.subr.bf16.mxu1 %v1843_v1  ;;  %1617 = vmatprep.mubr.msk.bf16.mxu0 %vm1844_vm0, %v1843_v1 }
  0x30   : > { %1637 = vmatprep.mubr.msk.bf16.mxu1 %vm1844_vm0, %v1843_v1 }
  0x31   : > { %1604 = vmatpush3.bf16.msra.mxu0 %v1771_v26  ;;  %v986_v26 = vshll.u32 %v1442_v23, 16 }
  0x32   : > { %1624 = vmatpush3.bf16.msra.mxu1 %v1772_v27  ;;  %1605 = vmatprep.subr.bf16.mxu0 %v1843_v1  ;;  %v1818_v27 = vld [vmem:[%s2213_s1 + $0x1c8] sm:$0xff]  }
  0x33   : > { %1625 = vmatprep.subr.bf16.mxu1 %v1843_v1 }
  0x35   : > { %1606 = vmatpush3.bf16.msra.mxu0 %v1773_v28  ;;  %v1819_v28 = vld [vmem:[%s2213_s1 + $0x180] sm:$0xff]  }
  0x36   : > { %1626 = vmatpush3.bf16.msra.mxu1 %v1774_v29  ;;  %1607 = vmatprep.subr.bf16.mxu0 %v1843_v1  ;;  %v984_v29 = vshrl.u32 %v1442_v23, 16 }
  0x37   : > { %1627 = vmatprep.subr.bf16.mxu1 %v1843_v1 }
  0x39   : > { %1608 = vmatpush3.bf16.msra.mxu0 %v1775_v30  ;;  %v988_v30 = vrot.slane %v986_v26, 1 }
  0x3a   : > { %1628 = vmatpush3.bf16.msra.mxu1 %v1776_v31  ;;  %1609 = vmatprep.subr.bf16.mxu0 %v1843_v1  ;;  %v1820_v31 = vld [vmem:[%s2213_s1 + $0x1c0] sm:$0xff]  }
  0x3b   : > { %1629 = vmatprep.subr.bf16.mxu1 %v1843_v1 }
  0x3d   : > { %1610 = vmatpush3.bf16.msra.mxu0 %v1777_v32  ;;  %v852_v32 = vld [vmem:[%s1915_s6 + $0x4] sm:$0xf] }
  0x3e   : > { %1630 = vmatpush3.bf16.msra.mxu1 %v1778_v33  ;;  %1611 = vmatprep.subr.bf16.mxu0 %v1843_v1  ;;  %v1821_v33 = vld [vmem:[%s2213_s1 + $0x238] sm:$0xff]  }
  0x3f   : > { %1631 = vmatprep.subr.bf16.mxu1 %v1843_v1 }
  0x41   : > { %1612 = vmatpush3.bf16.msra.mxu0 %v1779_v34  ;;  %v989_v34 = vor.u32 %v988_v30, %v984_v29 }
  0x42   : > { %1632 = vmatpush3.bf16.msra.mxu1 %v1780_v35  ;;  %1613 = vmatprep.subr.bf16.mxu0 %v1843_v1  ;;  %v1823_v35 = vld [vmem:[%s2213_s1 + $0x230] sm:$0xff]  }
  0x43   : > { %1633 = vmatprep.subr.bf16.mxu1 %v1843_v1 }
  0x45   : > { %1614 = vmatpush3.bf16.msra.mxu0 %v1781_v36  ;;  %v1824_v36 = vld [vmem:[%s2213_s1 + $0x228] sm:$0xff]  }
  0x46   : > { %1634 = vmatpush3.bf16.msra.mxu1 %v1782_v37  ;;  %1615 = vmatprep.subr.bf16.mxu0 %v1843_v1  ;;  %v1825_v37 = vld [vmem:[%s2213_s1 + $0x220] sm:$0xff]  }
  0x47   : > { %1635 = vmatprep.subr.bf16.mxu1 %v1843_v1 }
  0x49   : > { %1616 = vmatpush3.bf16.msra.mxu0 %v1783_v42  ;;  %v1467_v42 = vcombine.low %v1080_v41, %v960_v21  ;;  %v1476_v21 = vld [vmem:[%s2214_s2] ss:$0 sm:$0xff] }
  0x4a   : > { %1636 = vmatpush3.bf16.msra.mxu1 %v1784_v44  ;;  %1641 = vmatprep.subr.bf16.mxu0 %v1843_v1 }
  0x4b   : > { %1661 = vmatprep.subr.bf16.mxu1 %v1843_v1  ;;  %v1101_v44 = vrot.slane %v1467_v42, 1 }
  0x4c   : > { %1618 = vmatmul.mubr.bf16.vlgmr.msra.gmra.mxu0 %v415_v45 }
  0x4d   : > { %1642 = vmatpush3.bf16.msra.mxu0 %v1786_v46  ;;  %1638 = vmatmul.mubr.bf16.vlgmr.msra.gmra.mxu1 %v530_v47 }
  0x4e   : > { %1662 = vmatpush3.bf16.msra.mxu1 %v1789_v48  ;;  %1643 = vmatprep.subr.bf16.mxu0 %v1843_v1 }
  0x4f   : > { %1663 = vmatprep.subr.bf16.mxu1 %v1843_v1  ;;  %1657 = vmatprep.mubr.msk.bf16.mxu0 %vm1844_vm0, %v1843_v1 }
  0x50   : > { %1677 = vmatprep.mubr.msk.bf16.mxu1 %vm1844_vm0, %v1843_v1 }
  0x51   : > { %1644 = vmatpush3.bf16.msra.mxu0 %v1790_v49 }
  0x52   : > { %1664 = vmatpush3.bf16.msra.mxu1 %v1791_v50  ;;  %1645 = vmatprep.subr.bf16.mxu0 %v1843_v1 }
  0x53   : > { %1665 = vmatprep.subr.bf16.mxu1 %v1843_v1 }
  0x55   : > { %1646 = vmatpush3.bf16.msra.mxu0 %v1792_v51 }
  0x56   : > { %1666 = vmatpush3.bf16.msra.mxu1 %v1793_v52  ;;  %1647 = vmatprep.subr.bf16.mxu0 %v1843_v1 }
  0x57   : > { %1667 = vmatprep.subr.bf16.mxu1 %v1843_v1 }
  0x59   : > { %1648 = vmatpush3.bf16.msra.mxu0 %v1794_v53 }
  0x5a   : > { %1668 = vmatpush3.bf16.msra.mxu1 %v1795_v54  ;;  %1649 = vmatprep.subr.bf16.mxu0 %v1843_v1 }
  0x5b   : > { %1669 = vmatprep.subr.bf16.mxu1 %v1843_v1 }
  0x5d   : > { %1650 = vmatpush3.bf16.msra.mxu0 %v1796_v56 }
  0x5e   : > { %1670 = vmatpush3.bf16.msra.mxu1 %v1797_v57  ;;  %1651 = vmatprep.subr.bf16.mxu0 %v1843_v1 }
  0x5f   : > { %1671 = vmatprep.subr.bf16.mxu1 %v1843_v1 }
  0x61   : > { %1652 = vmatpush3.bf16.msra.mxu0 %v1798_v59 }
  0x62   : > { %1672 = vmatpush3.bf16.msra.mxu1 %v1799_v60  ;;  %1653 = vmatprep.subr.bf16.mxu0 %v1843_v1 }
  0x63   : > { %1673 = vmatprep.subr.bf16.mxu1 %v1843_v1 }
  0x65   : > { %1654 = vmatpush3.bf16.msra.mxu0 %v1800_v63 }
  0x66   : > { %1674 = vmatpush3.bf16.msra.mxu1 %v1801_v0  ;;  %1655 = vmatprep.subr.bf16.mxu0 %v1843_v1 }
  0x67   : > { %1675 = vmatprep.subr.bf16.mxu1 %v1843_v1 }
  0x69   : > { %1656 = vmatpush3.bf16.msra.mxu0 %v1802_v5 }
  0x6a   : > { %1676 = vmatpush3.bf16.msra.mxu1 %v1803_v7  ;;  %1681 = vmatprep.subr.bf16.mxu0 %v1843_v1 }
  0x6b   : > { %1701 = vmatprep.subr.bf16.mxu1 %v1843_v1 }
  0x6c   : > { %1658 = vmatmul.mubr.bf16.vlgmr.msra.gmra.mxu0 %v649_v8 }
  0x6d   : > { %1682 = vmatpush3.bf16.msra.mxu0 %v1804_v9  ;;  %1678 = vmatmul.mubr.bf16.vlgmr.msra.gmra.mxu1 %v761_v10 }
  0x6e   : > { %1702 = vmatpush3.bf16.msra.mxu1 %v1806_v11  ;;  %1683 = vmatprep.subr.bf16.mxu0 %v1843_v1 }
  0x6f   : > { %1703 = vmatprep.subr.bf16.mxu1 %v1843_v1  ;;  %1697 = vmatprep.mubr.msk.bf16.mxu0 %vm1844_vm0, %v1843_v1 }
  0x70   : > { %1717 = vmatprep.mubr.msk.bf16.mxu1 %vm1844_vm0, %v1843_v1 }
  0x71   : > { %1684 = vmatpush3.bf16.msra.mxu0 %v1807_v12 }
  0x72   : > { %1704 = vmatpush3.bf16.msra.mxu1 %v1808_v13  ;;  %1685 = vmatprep.subr.bf16.mxu0 %v1843_v1 }
  0x73   : > { %1705 = vmatprep.subr.bf16.mxu1 %v1843_v1 }
  0x75   : > { %1686 = vmatpush3.bf16.msra.mxu0 %v1809_v14 }
  0x76   : > { %1706 = vmatpush3.bf16.msra.mxu1 %v1810_v15  ;;  %1687 = vmatprep.subr.bf16.mxu0 %v1843_v1 }
  0x77   : > { %1707 = vmatprep.subr.bf16.mxu1 %v1843_v1 }
  0x79   : > { %1688 = vmatpush3.bf16.msra.mxu0 %v1811_v16 }
  0x7a   : > { %1708 = vmatpush3.bf16.msra.mxu1 %v1812_v17  ;;  %1689 = vmatprep.subr.bf16.mxu0 %v1843_v1 }
  0x7b   : > { %1709 = vmatprep.subr.bf16.mxu1 %v1843_v1 }
  0x7d   : > { %1690 = vmatpush3.bf16.msra.mxu0 %v1813_v18 }
  0x7e   : > { %1710 = vmatpush3.bf16.msra.mxu1 %v1814_v19  ;;  %1691 = vmatprep.subr.bf16.mxu0 %v1843_v1 }
  0x7f   : > { %1711 = vmatprep.subr.bf16.mxu1 %v1843_v1 }
  0x81   : > { %1692 = vmatpush3.bf16.msra.mxu0 %v1815_v22 }
  0x82   : > { %1712 = vmatpush3.bf16.msra.mxu1 %v1816_v24  ;;  %1693 = vmatprep.subr.bf16.mxu0 %v1843_v1 }
  0x83   : > { %1713 = vmatprep.subr.bf16.mxu1 %v1843_v1 }
  0x85   : > { %1694 = vmatpush3.bf16.msra.mxu0 %v1817_v25 }
  0x86   : > { %1714 = vmatpush3.bf16.msra.mxu1 %v1818_v27  ;;  %1695 = vmatprep.subr.bf16.mxu0 %v1843_v1 }
  0x87   : > { %1715 = vmatprep.subr.bf16.mxu1 %v1843_v1 }
  0x89   : > { %1696 = vmatpush3.bf16.msra.mxu0 %v1819_v28 }
  0x8a   : > { %1716 = vmatpush3.bf16.msra.mxu1 %v1820_v31  ;;  %1721 = vmatprep.subr.bf16.mxu0 %v1843_v1 }
  0x8c   : > { %1698 = vmatmul.mubr.bf16.vlgmr.msra.gmra.mxu0 %v852_v32 }
  0x8d   : > { %1722 = vmatpush3.bf16.msra.mxu0 %v1821_v33  ;;  %1718 = vmatmul.mubr.bf16.vlgmr.msra.gmra.mxu1 %v989_v34 }
  0x8e   : > { %1723 = vmatprep.subr.bf16.mxu0 %v1843_v1  ;;  %1737 = vmatprep.mubr.msk.bf16.mxu0 %vm1844_vm0, %v1843_v1 }
  0x91   : > { %1724 = vmatpush3.bf16.msra.mxu0 %v1823_v35 }
  0x92   : > { %1725 = vmatprep.subr.bf16.mxu0 %v1843_v1 }
  0x95   : > { %1726 = vmatpush3.bf16.msra.mxu0 %v1824_v36 }
  0x96   : > { %1727 = vmatprep.subr.bf16.mxu0 %v1843_v1 }
  0x99   : > { %1728 = vmatpush3.bf16.msra.mxu0 %v1825_v37 }
  0x9a   : > { %1729 = vmatprep.subr.bf16.mxu0 %v1843_v1 }
  0x9d   : > { %1730 = vmatpush3.bf16.msra.mxu0 %v1826_v38 }
  0x9e   : > { %1731 = vmatprep.subr.bf16.mxu0 %v1843_v1 }
  0xa1   : > { %1732 = vmatpush3.bf16.msra.mxu0 %v1827_v39 }
  0xa2   : > { %1733 = vmatprep.subr.bf16.mxu0 %v1843_v1 }
  0xa5   : > { %1734 = vmatpush3.bf16.msra.mxu0 %v1828_v40 }
  0xa6   : > { %1735 = vmatprep.subr.bf16.mxu0 %v1843_v1 }
  0xa9   : > { %1736 = vmatpush3.bf16.msra.mxu0 %v1829_v43 }
  0xac   : > { %1738 = vmatmul.mubr.bf16.vlgmr.msra.gmra.mxu0 %v1101_v44 }
  0xec   : > { %v300_v45 = vpop.f32.mrf.mxu0 }
  0xed   : > { %v388_v46 = vpop.f32.mrf.mxu1 }
  0xee   : > { %v389_v47 = vadd.f32 %v388_v46, %v300_v45  ;;  %v1579_v48 = vpop.f32.mrf.mxu0 }
  0xef   : > { %v1599_v49 = vpop.f32.mrf.mxu1 }
  0xf0   : > { %v303_v50 = vpop.f32.mrf.mxu0 }
  0xf1   : > { %v391_v51 = vpop.f32.mrf.mxu1 }
  0xf2   : > { %v1580_v52 = vpop.f32.mrf.mxu0 }
  0xf3   : > { %v1600_v53 = vpop.f32.mrf.mxu1 }
 0x10c   : > { %v499_v54 = vpop.f32.mrf.mxu0 }
 0x10d   : > { %v505_v55 = vadd.f32 %v499_v54, %v389_v47  ;;  %v614_v56 = vpop.f32.mrf.mxu1 }
 0x10e   : > { %v1619_v57 = vpop.f32.mrf.mxu0 }
 0x10f   : > { %v620_v58 = vadd.f32 %v614_v56, %v505_v55  ;;  %v1639_v59 = vpop.f32.mrf.mxu1 }
 0x110   : > { %v502_v60 = vpop.f32.mrf.mxu0 }
 0x111   : > { %v617_v1 = vpop.f32.mrf.mxu1 }
 0x112   : > { %v1620_v61 = vpop.f32.mrf.mxu0 }
 0x113   : > { %v1640_v62 = vpop.f32.mrf.mxu1 }
 0x12c   : > { %v733_v63 = vpop.f32.mrf.mxu0 }
 0x12d   : > { %v845_v0 = vpop.f32.mrf.mxu1  ;;  %v739_v16 = vadd.f32 %v733_v63, %v620_v58 }
 0x12e   : > { %v1659_v2 = vpop.f32.mrf.mxu0 }
 0x12f   : > { %v1679_v3 = vpop.f32.mrf.mxu1  ;;  %v851_v17 = vadd.f32 %v845_v0, %v739_v16 }
 0x130   : > { %v736_v4 = vpop.f32.mrf.mxu0 }
 0x131   : > { %v848_v5 = vpop.f32.mrf.mxu1 }
 0x132   : > { %v1660_v6 = vpop.f32.mrf.mxu0 }
 0x133   : > { %v1680_v7 = vpop.f32.mrf.mxu1 }
 0x14c   : > { %v952_v8 = vpop.f32.mrf.mxu0 }
 0x14d   : > { %v1073_v9 = vpop.f32.mrf.mxu1  ;;  %v958_v18 = vadd.f32 %v952_v8, %v851_v17 }
 0x14e   : > { %v1699_v10 = vpop.f32.mrf.mxu0 }
 0x14f   : > { %v1719_v11 = vpop.f32.mrf.mxu1  ;;  %v1079_v19 = vadd.f32 %v1073_v9, %v958_v18 }
 0x150   : > { %v955_v12 = vpop.f32.mrf.mxu0 }
 0x151   : > { %v1076_v13 = vpop.f32.mrf.mxu1 }
 0x152   : > { %v1700_v14 = vpop.f32.mrf.mxu0 }
 0x153   : > { %v1720_v15 = vpop.f32.mrf.mxu1 }
 0x16c   : > { %v1185_v20 = vpop.f32.mrf.mxu0 }
 0x16d   : > { %v1191_v22 = vadd.f32 %v1185_v20, %v1079_v19 }
 0x16e   : > { %v1739_v23 = vpop.f32.mrf.mxu0 }
 0x16f   : > { %v1199_v24 = vadd.f32 %v1476_v21, %v1191_v22 }
 0x170   : > { %v1188_v25 = vpop.f32.mrf.mxu0 }
 0x171   : > { %v1477_v26 = vmul.f32 -1.442695, %v1199_v24 }
 0x172   : > { %v1740_v27 = vpop.f32.mrf.mxu0 }
 0x173   : > { %1831 = vpow2.f32 %v1477_v26 }
 0x180   : > { %v1832_v28 = vpop.eup %1831 }
 0x181   : > { %v1203_v29 = vadd.f32 1.0, %v1832_v28 }
 0x183   : > { %1833 = vrcp.f32 %v1203_v29 }
 0x190   : > { %v1834_v30 = vpop.eup %1833 }
 0x191   : > { %v1206_v31 = vmul.f32 %v1834_v30, %v1199_v24 }
 0x193   : > { %v1207_v32 = vpack.c.bf16 %v1206_v31, %v1206_v31 }
 0x195   : > { %1208 = vst [vmem:[%s168_s21] sm:$0xf] %v1207_v32 }
 0x196 PF: > { %s13_s12 = sadd.s32 1, %s1841_s12  }
 0x197   : > { %p10_p4 = scmp.ge.s32.totalorder %s13_s12, 4  }
 0x199   :  { %12 = sbr.rel (!%p10_p4) target bundleno = 1 (0x1), region = 70 }

</bundles_post_ra>
